<compile_context>
chip_gen: v7x
topology: tpu7x:2x2x1
jax: 0.10.0
libtpu: 0.0.40
codegen_flags: <defaults>
</compile_context>

<pallas_src>
import functools

import jax
import jax.numpy as jnp
import numpy as np
from jax.experimental import pallas as pl
from jax.experimental.pallas import tpu as pltpu

EPS = 1e-5
LANES = 128
_VMEM_LIMIT = 64 * 1024 * 1024


# --------------------------------------------------------------------------------------
# in-kernel helpers
# --------------------------------------------------------------------------------------
def _im2col_conv3x3(tile, w_ref, th, w, c):
    """3x3/stride-1 conv of a haloed tile as a single MXU matmul.

    tile : (th+2, w+2, c) f32, already zero-padded / halo'd.
    w_ref: (9*c, cout) im2col weight (row index = (kh*3+kw)*cin + cin).
    Returns (th*w, cout) f32.
    """
    taps = [tile[kh:kh + th, kw:kw + w, :] for kh in range(3) for kw in range(3)]
    patches = jnp.concatenate(taps, axis=-1).reshape(th * w, 9 * c)
    return jnp.dot(patches, w_ref[...], preferred_element_type=jnp.float32)


def _partial_stats(y2d):
    """Single-pass per-tile BN partials: (rows, c) -> (1, 2, c) = [sum; sum of squares]."""
    s = jnp.sum(y2d, axis=0, keepdims=True)
    ss = jnp.sum(y2d * y2d, axis=0, keepdims=True)
    return jnp.concatenate([s, ss], axis=0)[None]


# --------------------------------------------------------------------------------------
# kernel 1: conv1 (3x3, stride 1, pad 1) + partial BN1 stats
# --------------------------------------------------------------------------------------
def _conv1_kernel(xt_ref, w_ref, y_ref, st_ref):
    _, th, w, c = y_ref.shape
    y = _im2col_conv3x3(xt_ref[0], w_ref, th, w, c)
    y_ref[...] = y.reshape(1, th, w, c)
    st_ref[...] = _partial_stats(y)


# --------------------------------------------------------------------------------------
# kernel 2: bn1 (folded scale/shift) + ReLU + conv2 + partial BN2 stats
# --------------------------------------------------------------------------------------
def _bn_relu_conv2_kernel(yt_ref, w_ref, sc_ref, sh_ref, y_ref, st_ref):
    _, th, w, c = y_ref.shape
    gh = pl.program_id(1)
    h_total = th * pl.num_programs(1)

    t = yt_ref[0]                                  # (th+2, w+2, c), pre-BN conv1 output
    sc = sc_ref[...].reshape(1, 1, c)
    sh = sh_ref[...].reshape(1, 1, c)
    r = jnp.maximum(t * sc + sh, 0.0)

    # Zero the positions that correspond to the conv's zero padding: the wrapper stores
    # *pre-BN* zeros in the halo/borders, which would not map to zero after the affine.
    shape = (th + 2, w + 2, c)
    row = jax.lax.broadcasted_iota(jnp.int32, shape, 0) + gh * th   # padded-H coordinate
    col = jax.lax.broadcasted_iota(jnp.int32, shape, 1)             # padded-W coordinate
    valid = (row >= 1) & (row <= h_total) & (col >= 1) & (col <= w)
    r = jnp.where(valid, r, 0.0)

    y = _im2col_conv3x3(r, w_ref, th, w, c)
    y_ref[...] = y.reshape(1, th, w, c)
    st_ref[...] = _partial_stats(y)


# --------------------------------------------------------------------------------------
# kernel 3: bn2 (folded scale/shift) + residual add + ReLU   (pure lane-dense elementwise)
# --------------------------------------------------------------------------------------
def _bn_add_relu_kernel(y_ref, x_ref, sc_ref, sh_ref, o_ref):
    c = o_ref.shape[-1]
    sc = sc_ref[...].reshape(1, 1, 1, c)
    sh = sh_ref[...].reshape(1, 1, 1, c)
    o_ref[...] = jnp.maximum(y_ref[...] * sc + sh + x_ref[...], 0.0)


# --------------------------------------------------------------------------------------
# wrapper helpers
# --------------------------------------------------------------------------------------
def _halo_tiles(x_nhwc, th):
    """(N, H, W, C) -> (N*GH, th+2, W+2, C): zero-pad by 1 and gather H-tiles with a 1-row halo.

    Only ~2/th of the rows are duplicated (vs. a full-activation pad scratch before).
    # TODO(synk): replace this wrapper-side gather with in-kernel double-buffered halo DMA
    # (memory_space=pl.ANY + pltpu.make_async_copy) to remove the extra pass over activations.
    """
    n, h, w, c = x_nhwc.shape
    gh = h // th
    xp = jnp.pad(x_nhwc, ((0, 0), (1, 1), (1, 1), (0, 0)))
    tiles = jnp.stack([xp[:, i * th:i * th + th + 2] for i in range(gh)], axis=1)
    return tiles.reshape(n * gh, th + 2, w + 2, c)


def _finalize_bn(stats, gamma, beta, count):
    """Reduce per-tile [sum, sumsq] partials -> per-channel folded BN (scale, shift)."""
    s = jnp.sum(stats[:, 0, :], axis=0)
    ss = jnp.sum(stats[:, 1, :], axis=0)
    mean = s / count
    var = jnp.maximum(ss / count - mean * mean, 0.0)
    scale = gamma.reshape(-1) * jax.lax.rsqrt(var + EPS)
    shift = beta.reshape(-1) - mean * scale
    c = scale.shape[0]
    return scale.reshape(1, c), shift.reshape(1, c)


# --------------------------------------------------------------------------------------
# fused block
# --------------------------------------------------------------------------------------
@functools.partial(jax.jit, static_argnames=("tile_h",))
def basic_block(x_nchw, w1, w2, g1, b1, g2, b2, *, tile_h=8):
    """x_nchw: (N, C, H, W) f32; w1/w2: (9, Cin, Cout) im2col-ordered 3x3 conv weights."""
    x = jnp.transpose(x_nchw, (0, 2, 3, 1))          # NCHW -> NHWC (C on the lane axis)
    # TODO(synk): a full UPerNet should keep activations NHWC end-to-end instead of
    # transposing at every block boundary.
    n, h, w, c = x.shape
    p = w1.shape[-1]
    assert c == p, "residual path requires inplanes == planes"
    assert c % LANES == 0, "this kernel path assumes lane-dense channels (C % 128 == 0)"
    th = min(tile_h, h)
    assert h % th == 0, "H must be divisible by the H-tile size"
    gh = h // th
    grid = (n, gh)
    count = float(n * h * w)

    w1m = w1.reshape(9 * c, p)
    w2m = w2.reshape(9 * p, p)

    cparams = pltpu.CompilerParams(
        dimension_semantics=("parallel", "parallel"),
        vmem_limit_bytes=_VMEM_LIMIT)

    tile_in_spec = pl.BlockSpec((1, th + 2, w + 2, c), lambda i, j: (i * gh + j, 0, 0, 0))
    w_spec = pl.BlockSpec((9 * c, p), lambda i, j: (0, 0))
    vec_spec = pl.BlockSpec((1, p), lambda i, j: (0, 0))
    act_spec = pl.BlockSpec((1, th, w, p), lambda i, j: (i, j, 0, 0))
    st_spec = pl.BlockSpec((1, 2, p), lambda i, j: (i * gh + j, 0, 0))

    act_shape = jax.ShapeDtypeStruct((n, h, w, p), jnp.float32)
    st_shape = jax.ShapeDtypeStruct((n * gh, 2, p), jnp.float32)

    # ---- pass 1: conv1 + partial BN1 stats -------------------------------------------
    y1, st1 = pl.pallas_call(
        _conv1_kernel,
        grid=grid,
        in_specs=[tile_in_spec, w_spec],
        out_specs=(act_spec, st_spec),
        out_shape=(act_shape, st_shape),
        compiler_params=cparams,
    )(_halo_tiles(x, th), w1m)

    scale1, shift1 = _finalize_bn(st1, g1, b1, count)

    # ---- pass 2: bn1 + relu + conv2 + partial BN2 stats ------------------------------
    y2, st2 = pl.pallas_call(
        _bn_relu_conv2_kernel,
        grid=grid,
        in_specs=[tile_in_spec, w_spec, vec_spec, vec_spec],
        out_specs=(act_spec, st_spec),
        out_shape=(act_shape, st_shape),
        compiler_params=cparams,
    )(_halo_tiles(y1, th), w2m, scale1, shift1)

    scale2, shift2 = _finalize_bn(st2, g2, b2, count)

    # ---- pass 3: bn2 + residual + relu ------------------------------------------------
    out = pl.pallas_call(
        _bn_add_relu_kernel,
        grid=grid,
        in_specs=[act_spec, act_spec, vec_spec, vec_spec],
        out_specs=act_spec,
        out_shape=act_shape,
        compiler_params=cparams,
    )(y2, x, scale2, shift2)

    return jnp.transpose(out, (0, 3, 1, 2))          # NHWC -> NCHW


# --------------------------------------------------------------------------------------
# plain-JAX reference (same semantics) for correctness checking
# --------------------------------------------------------------------------------------
def ref_basic_block(x_nchw, w1, w2, g1, b1, g2, b2):
    x = jnp.transpose(x_nchw, (0, 2, 3, 1))

    def conv(h_, wmat):
        w4 = wmat.reshape(3, 3, wmat.shape[1], wmat.shape[2])   # HWIO
        return jax.lax.conv_general_dilated(
            h_, w4, (1, 1), ((1, 1), (1, 1)),
            dimension_numbers=('NHWC', 'HWIO', 'NHWC'),
            precision=jax.lax.Precision.HIGHEST)

    def bn(h_, g, b):
        m = jnp.mean(h_, axis=(0, 1, 2), keepdims=True)
        v = jnp.mean((h_ - m) ** 2, axis=(0, 1, 2), keepdims=True)
        return (h_ - m) * jax.lax.rsqrt(v + EPS) * g.reshape(1, 1, 1, -1) \
            + b.reshape(1, 1, 1, -1)

    out = jax.nn.relu(bn(conv(x, w1), g1, b1))
    out = bn(conv(out, w2), g2, b2)
    out = jax.nn.relu(out + x)
    return jnp.transpose(out, (0, 3, 1, 2))


if __name__ == "__main__":
    # Small but lane-dense shapes: batch=2, channels=128 (UPerNet fpn_dim-style), 32x32 spatial.
    N, C, H, W = 2, 128, 32, 32
    key = jax.random.PRNGKey(0)
    kx, k1, k2, kg1, kb1, kg2, kb2 = jax.random.split(key, 7)

    x = jax.random.normal(kx, (N, C, H, W), jnp.float32)

    scale = (2.0 / (9 * C)) ** 0.5
    w1 = scale * jax.random.normal(k1, (9, C, C), jnp.float32)   # (kh*kw, Cin, Cout)
    w2 = scale * jax.random.normal(k2, (9, C, C), jnp.float32)
    g1 = 1.0 + 0.1 * jax.random.normal(kg1, (1, C), jnp.float32)
    b1 = 0.1 * jax.random.normal(kb1, (1, C), jnp.float32)
    g2 = 1.0 + 0.1 * jax.random.normal(kg2, (1, C), jnp.float32)
    b2 = 0.1 * jax.random.normal(kb2, (1, C), jnp.float32)

    out = jax.block_until_ready(basic_block(x, w1, w2, g1, b1, g2, b2))
    ref = jax.block_until_ready(ref_basic_block(x, w1, w2, g1, b1, g2, b2))

    np.testing.assert_allclose(np.asarray(out), np.asarray(ref), rtol=1e-4, atol=1e-4)
    print("KERNEL_OK")
</pallas_src>

<mosaic_0001>
module attributes {stable_mosaic.version = 11 : i64} {
  func.func @_conv1_kernel(%arg0: i32, %arg1: i32, %arg2: memref<1x10x34x128xf32, #tpu.memory_space<vmem>>, %arg3: memref<1152x128xf32, #tpu.memory_space<vmem>>, %arg4: memref<1x8x32x128xf32, #tpu.memory_space<vmem>>, %arg5: memref<1x2x128xf32, #tpu.memory_space<vmem>>) attributes {dimension_semantics = [#tpu.dimension_semantics<parallel>, #tpu.dimension_semantics<parallel>], iteration_bounds = array<i64: 2, 4>, scalar_prefetch = 0 : i64, scratch_operands = 0 : i64, tpu.core_type = #tpu.core_type<tc>, window_params = [{transform_indices = @transform_0, window_bounds = array<i64: 1, 10, 34, 128>}, {pipeline_mode = #tpu.pipeline_mode<synchronous>, transform_indices = @transform_1, window_bounds = array<i64: 1152, 128>}, {transform_indices = @transform_2, window_bounds = array<i64: 1, 8, 32, 128>}, {transform_indices = @transform_3, window_bounds = array<i64: 1, 2, 128>}]} {
    %c0 = arith.constant 0 : index
    %c0_0 = arith.constant 0 : index
    %c0_1 = arith.constant 0 : index
    %c0_2 = arith.constant 0 : index
    %0 = vector.load %arg2[%c0, %c0_0, %c0_1, %c0_2] : memref<1x10x34x128xf32, #tpu.memory_space<vmem>>, vector<1x10x34x128xf32>
    %1 = vector.shape_cast %0 : vector<1x10x34x128xf32> to vector<10x34x128xf32>
    %2 = vector.extract_strided_slice %1 {offsets = [0, 0, 0], sizes = [8, 32, 128], strides = [1, 1, 1]} : vector<10x34x128xf32> to vector<8x32x128xf32>
    %3 = vector.extract_strided_slice %1 {offsets = [0, 1, 0], sizes = [8, 32, 128], strides = [1, 1, 1]} : vector<10x34x128xf32> to vector<8x32x128xf32>
    %4 = vector.extract_strided_slice %1 {offsets = [0, 2, 0], sizes = [8, 32, 128], strides = [1, 1, 1]} : vector<10x34x128xf32> to vector<8x32x128xf32>
    %5 = vector.extract_strided_slice %1 {offsets = [1, 0, 0], sizes = [8, 32, 128], strides = [1, 1, 1]} : vector<10x34x128xf32> to vector<8x32x128xf32>
    %6 = vector.extract_strided_slice %1 {offsets = [1, 1, 0], sizes = [8, 32, 128], strides = [1, 1, 1]} : vector<10x34x128xf32> to vector<8x32x128xf32>
    %7 = vector.extract_strided_slice %1 {offsets = [1, 2, 0], sizes = [8, 32, 128], strides = [1, 1, 1]} : vector<10x34x128xf32> to vector<8x32x128xf32>
    %8 = vector.extract_strided_slice %1 {offsets = [2, 0, 0], sizes = [8, 32, 128], strides = [1, 1, 1]} : vector<10x34x128xf32> to vector<8x32x128xf32>
    %9 = vector.extract_strided_slice %1 {offsets = [2, 1, 0], sizes = [8, 32, 128], strides = [1, 1, 1]} : vector<10x34x128xf32> to vector<8x32x128xf32>
    %10 = vector.extract_strided_slice %1 {offsets = [2, 2, 0], sizes = [8, 32, 128], strides = [1, 1, 1]} : vector<10x34x128xf32> to vector<8x32x128xf32>
    %11 = tpu.concatenate %2, %3, %4, %5, %6, %7, %8, %9, %10 in 2 : vector<8x32x128xf32>, vector<8x32x128xf32>, vector<8x32x128xf32>, vector<8x32x128xf32>, vector<8x32x128xf32>, vector<8x32x128xf32>, vector<8x32x128xf32>, vector<8x32x128xf32>, vector<8x32x128xf32> -> vector<8x32x1152xf32>
    %12 = vector.shape_cast %11 : vector<8x32x1152xf32> to vector<256x1152xf32>
    %c0_3 = arith.constant 0 : index
    %c0_4 = arith.constant 0 : index
    %13 = vector.load %arg3[%c0_3, %c0_4] : memref<1152x128xf32, #tpu.memory_space<vmem>>, vector<1152x128xf32>
    %cst = arith.constant dense<0.000000e+00> : vector<256x128xf32>
    %14 = tpu.matmul %12, %13, %cst {dimension_numbers = #tpu.dot_dimension_numbers<[1], [0], [0], [1], [0, 0, 1, 1], [], []>} : vector<256x1152xf32>, vector<1152x128xf32>, vector<256x128xf32> -> vector<256x128xf32>
    %15 = vector.shape_cast %14 : vector<256x128xf32> to vector<1x8x32x128xf32>
    %c0_5 = arith.constant 0 : index
    %c0_6 = arith.constant 0 : index
    %c0_7 = arith.constant 0 : index
    %c0_8 = arith.constant 0 : index
    %16 = vector.load %arg4[%c0_5, %c0_6, %c0_7, %c0_8] : memref<1x8x32x128xf32, #tpu.memory_space<vmem>>, vector<1x8x32x128xf32>
    tpu.vector_store %arg4[%c0_5, %c0_6, %c0_7, %c0_8], %15 {strides = array<i32>} : memref<1x8x32x128xf32, #tpu.memory_space<vmem>>, vector<1x8x32x128xf32>,
    %cst_9 = arith.constant dense<0.000000e+00> : vector<128xf32>
    %17 = vector.multi_reduction <add>, %14, %cst_9 [0] : vector<256x128xf32> to vector<128xf32>
    %18 = vector.shape_cast %17 : vector<128xf32> to vector<1x128xf32>
    %19 = arith.mulf %14, %14 : vector<256x128xf32>
    %cst_10 = arith.constant dense<0.000000e+00> : vector<128xf32>
    %20 = vector.multi_reduction <add>, %19, %cst_10 [0] : vector<256x128xf32> to vector<128xf32>
    %21 = vector.shape_cast %20 : vector<128xf32> to vector<1x128xf32>
    %22 = tpu.concatenate %18, %21 in 0 : vector<1x128xf32>, vector<1x128xf32> -> vector<2x128xf32>
    %23 = vector.shape_cast %22 : vector<2x128xf32> to vector<1x2x128xf32>
    %c0_11 = arith.constant 0 : index
    %c0_12 = arith.constant 0 : index
    %c0_13 = arith.constant 0 : index
    %24 = vector.load %arg5[%c0_11, %c0_12, %c0_13] : memref<1x2x128xf32, #tpu.memory_space<vmem>>, vector<1x2x128xf32>
    tpu.vector_store %arg5[%c0_11, %c0_12, %c0_13], %23 {strides = array<i32>} : memref<1x2x128xf32, #tpu.memory_space<vmem>>, vector<1x2x128xf32>,
    return
  }
  func.func @transform_0(%arg0: i32, %arg1: i32) -> (i32, i32, i32, i32) {
    %c4_i32 = arith.constant 4 : i32
    %0 = arith.muli %arg0, %c4_i32 : i32
    %1 = arith.addi %0, %arg1 : i32
    %c0_i32 = arith.constant 0 : i32
    %c0_i32_0 = arith.constant 0 : i32
    %c0_i32_1 = arith.constant 0 : i32
    %c0_i32_2 = arith.constant 0 : i32
    return %1, %c0_i32, %c0_i32_0, %c0_i32_1 : i32, i32, i32, i32
  }
  func.func @transform_1(%arg0: i32, %arg1: i32) -> (i32, i32) {
    %c0_i32 = arith.constant 0 : i32
    %c0_i32_0 = arith.constant 0 : i32
    %c0_i32_1 = arith.constant 0 : i32
    return %c0_i32, %c0_i32_0 : i32, i32
  }
  func.func @transform_2(%arg0: i32, %arg1: i32) -> (i32, i32, i32, i32) {
    %c0_i32 = arith.constant 0 : i32
    %c0_i32_0 = arith.constant 0 : i32
    %c0_i32_1 = arith.constant 0 : i32
    return %arg0, %arg1, %c0_i32, %c0_i32_0 : i32, i32, i32, i32
  }
  func.func @transform_3(%arg0: i32, %arg1: i32) -> (i32, i32, i32) {
    %c4_i32 = arith.constant 4 : i32
    %0 = arith.muli %arg0, %c4_i32 : i32
    %1 = arith.addi %0, %arg1 : i32
    %c0_i32 = arith.constant 0 : i32
    %c0_i32_0 = arith.constant 0 : i32
    %c0_i32_1 = arith.constant 0 : i32
    return %1, %c0_i32, %c0_i32_0 : i32, i32, i32
  }
}

module attributes {stable_mosaic.version = 11 : i64} {
  func.func @_bn_relu_conv2_kernel(%arg0: i32, %arg1: i32, %arg2: memref<1x10x34x128xf32, #tpu.memory_space<vmem>>, %arg3: memref<1152x128xf32, #tpu.memory_space<vmem>>, %arg4: memref<1x128xf32, #tpu.memory_space<vmem>>, %arg5: memref<1x128xf32, #tpu.memory_space<vmem>>, %arg6: memref<1x8x32x128xf32, #tpu.memory_space<vmem>>, %arg7: memref<1x2x128xf32, #tpu.memory_space<vmem>>) attributes {dimension_semantics = [#tpu.dimension_semantics<parallel>, #tpu.dimension_semantics<parallel>], iteration_bounds = array<i64: 2, 4>, scalar_prefetch = 0 : i64, scratch_operands = 0 : i64, tpu.core_type = #tpu.core_type<tc>, window_params = [{transform_indices = @transform_0, window_bounds = array<i64: 1, 10, 34, 128>}, {pipeline_mode = #tpu.pipeline_mode<synchronous>, transform_indices = @transform_1, window_bounds = array<i64: 1152, 128>}, {pipeline_mode = #tpu.pipeline_mode<synchronous>, transform_indices = @transform_2, window_bounds = array<i64: 1, 128>}, {pipeline_mode = #tpu.pipeline_mode<synchronous>, transform_indices = @transform_3, window_bounds = array<i64: 1, 128>}, {transform_indices = @transform_4, window_bounds = array<i64: 1, 8, 32, 128>}, {transform_indices = @transform_5, window_bounds = array<i64: 1, 2, 128>}]} {
    %c0 = arith.constant 0 : index
    %c0_0 = arith.constant 0 : index
    %c0_1 = arith.constant 0 : index
    %c0_2 = arith.constant 0 : index
    %0 = vector.load %arg2[%c0, %c0_0, %c0_1, %c0_2] : memref<1x10x34x128xf32, #tpu.memory_space<vmem>>, vector<1x10x34x128xf32>
    %1 = vector.shape_cast %0 : vector<1x10x34x128xf32> to vector<10x34x128xf32>
    %c0_3 = arith.constant 0 : index
    %c0_4 = arith.constant 0 : index
    %2 = vector.load %arg4[%c0_3, %c0_4] : memref<1x128xf32, #tpu.memory_space<vmem>>, vector<1x128xf32>
    %3 = vector.shape_cast %2 : vector<1x128xf32> to vector<1x1x128xf32>
    %c0_5 = arith.constant 0 : index
    %c0_6 = arith.constant 0 : index
    %4 = vector.load %arg5[%c0_5, %c0_6] : memref<1x128xf32, #tpu.memory_space<vmem>>, vector<1x128xf32>
    %5 = vector.shape_cast %4 : vector<1x128xf32> to vector<1x1x128xf32>
    %6 = vector.broadcast %3 : vector<1x1x128xf32> to vector<10x34x128xf32>
    %7 = arith.mulf %1, %6 : vector<10x34x128xf32>
    %8 = vector.broadcast %5 : vector<1x1x128xf32> to vector<10x34x128xf32>
    %9 = arith.addf %7, %8 : vector<10x34x128xf32>
    %cst = arith.constant 0.000000e+00 : f32
    %10 = vector.broadcast %cst : f32 to vector<10x34x128xf32>
    %11 = arith.maximumf %9, %10 : vector<10x34x128xf32>
    %12 = tpu.iota {dimensions = array<i32: 0>} : vector<10x34x128xi32>
    %c8_i32 = arith.constant 8 : i32
    %13 = arith.muli %arg1, %c8_i32 : i32
    %14 = vector.broadcast %13 : i32 to vector<10x34x128xi32>
    %15 = arith.addi %12, %14 : vector<10x34x128xi32>
    %16 = tpu.iota {dimensions = array<i32: 1>} : vector<10x34x128xi32>
    %c1_i32 = arith.constant 1 : i32
    %17 = vector.broadcast %c1_i32 : i32 to vector<10x34x128xi32>
    %18 = arith.cmpi sge, %15, %17 : vector<10x34x128xi32>
    %c32_i32 = arith.constant 32 : i32
    %19 = vector.broadcast %c32_i32 : i32 to vector<10x34x128xi32>
    %20 = arith.cmpi sle, %15, %19 : vector<10x34x128xi32>
    %21 = arith.andi %18, %20 : vector<10x34x128xi1>
    %c1_i32_7 = arith.constant 1 : i32
    %22 = vector.broadcast %c1_i32_7 : i32 to vector<10x34x128xi32>
    %23 = arith.cmpi sge, %16, %22 : vector<10x34x128xi32>
    %24 = arith.andi %21, %23 : vector<10x34x128xi1>
    %c32_i32_8 = arith.constant 32 : i32
    %25 = vector.broadcast %c32_i32_8 : i32 to vector<10x34x128xi32>
    %26 = arith.cmpi sle, %16, %25 : vector<10x34x128xi32>
    %27 = arith.andi %24, %26 : vector<10x34x128xi1>
    %cst_9 = arith.constant 0.000000e+00 : f32
    %28 = vector.broadcast %cst_9 : f32 to vector<10x34x128xf32>
    %29 = arith.select %27, %11, %28 : vector<10x34x128xi1>, vector<10x34x128xf32>
    %30 = vector.extract_strided_slice %29 {offsets = [0, 0, 0], sizes = [8, 32, 128], strides = [1, 1, 1]} : vector<10x34x128xf32> to vector<8x32x128xf32>
    %31 = vector.extract_strided_slice %29 {offsets = [0, 1, 0], sizes = [8, 32, 128], strides = [1, 1, 1]} : vector<10x34x128xf32> to vector<8x32x128xf32>
    %32 = vector.extract_strided_slice %29 {offsets = [0, 2, 0], sizes = [8, 32, 128], strides = [1, 1, 1]} : vector<10x34x128xf32> to vector<8x32x128xf32>
    %33 = vector.extract_strided_slice %29 {offsets = [1, 0, 0], sizes = [8, 32, 128], strides = [1, 1, 1]} : vector<10x34x128xf32> to vector<8x32x128xf32>
    %34 = vector.extract_strided_slice %29 {offsets = [1, 1, 0], sizes = [8, 32, 128], strides = [1, 1, 1]} : vector<10x34x128xf32> to vector<8x32x128xf32>
    %35 = vector.extract_strided_slice %29 {offsets = [1, 2, 0], sizes = [8, 32, 128], strides = [1, 1, 1]} : vector<10x34x128xf32> to vector<8x32x128xf32>
    %36 = vector.extract_strided_slice %29 {offsets = [2, 0, 0], sizes = [8, 32, 128], strides = [1, 1, 1]} : vector<10x34x128xf32> to vector<8x32x128xf32>
    %37 = vector.extract_strided_slice %29 {offsets = [2, 1, 0], sizes = [8, 32, 128], strides = [1, 1, 1]} : vector<10x34x128xf32> to vector<8x32x128xf32>
    %38 = vector.extract_strided_slice %29 {offsets = [2, 2, 0], sizes = [8, 32, 128], strides = [1, 1, 1]} : vector<10x34x128xf32> to vector<8x32x128xf32>
    %39 = tpu.concatenate %30, %31, %32, %33, %34, %35, %36, %37, %38 in 2 : vector<8x32x128xf32>, vector<8x32x128xf32>, vector<8x32x128xf32>, vector<8x32x128xf32>, vector<8x32x128xf32>, vector<8x32x128xf32>, vector<8x32x128xf32>, vector<8x32x128xf32>, vector<8x32x128xf32> -> vector<8x32x1152xf32>
    %40 = vector.shape_cast %39 : vector<8x32x1152xf32> to vector<256x1152xf32>
    %c0_10 = arith.constant 0 : index
    %c0_11 = arith.constant 0 : index
    %41 = vector.load %arg3[%c0_10, %c0_11] : memref<1152x128xf32, #tpu.memory_space<vmem>>, vector<1152x128xf32>
    %cst_12 = arith.constant dense<0.000000e+00> : vector<256x128xf32>
    %42 = tpu.matmul %40, %41, %cst_12 {dimension_numbers = #tpu.dot_dimension_numbers<[1], [0], [0], [1], [0, 0, 1, 1], [], []>} : vector<256x1152xf32>, vector<1152x128xf32>, vector<256x128xf32> -> vector<256x128xf32>
    %43 = vector.shape_cast %42 : vector<256x128xf32> to vector<1x8x32x128xf32>
    %c0_13 = arith.constant 0 : index
    %c0_14 = arith.constant 0 : index
    %c0_15 = arith.constant 0 : index
    %c0_16 = arith.constant 0 : index
    %44 = vector.load %arg6[%c0_13, %c0_14, %c0_15, %c0_16] : memref<1x8x32x128xf32, #tpu.memory_space<vmem>>, vector<1x8x32x128xf32>
    tpu.vector_store %arg6[%c0_13, %c0_14, %c0_15, %c0_16], %43 {strides = array<i32>} : memref<1x8x32x128xf32, #tpu.memory_space<vmem>>, vector<1x8x32x128xf32>,
    %cst_17 = arith.constant dense<0.000000e+00> : vector<128xf32>
    %45 = vector.multi_reduction <add>, %42, %cst_17 [0] : vector<256x128xf32> to vector<128xf32>
    %46 = vector.shape_cast %45 : vector<128xf32> to vector<1x128xf32>
    %47 = arith.mulf %42, %42 : vector<256x128xf32>
    %cst_18 = arith.constant dense<0.000000e+00> : vector<128xf32>
    %48 = vector.multi_reduction <add>, %47, %cst_18 [0] : vector<256x128xf32> to vector<128xf32>
    %49 = vector.shape_cast %48 : vector<128xf32> to vector<1x128xf32>
    %50 = tpu.concatenate %46, %49 in 0 : vector<1x128xf32>, vector<1x128xf32> -> vector<2x128xf32>
    %51 = vector.shape_cast %50 : vector<2x128xf32> to vector<1x2x128xf32>
    %c0_19 = arith.constant 0 : index
    %c0_20 = arith.constant 0 : index
    %c0_21 = arith.constant 0 : index
    %52 = vector.load %arg7[%c0_19, %c0_20, %c0_21] : memref<1x2x128xf32, #tpu.memory_space<vmem>>, vector<1x2x128xf32>
    tpu.vector_store %arg7[%c0_19, %c0_20, %c0_21], %51 {strides = array<i32>} : memref<1x2x128xf32, #tpu.memory_space<vmem>>, vector<1x2x128xf32>,
    return
  }
  func.func @transform_0(%arg0: i32, %arg1: i32) -> (i32, i32, i32, i32) {
    %c4_i32 = arith.constant 4 : i32
    %0 = arith.muli %arg0, %c4_i32 : i32
    %1 = arith.addi %0, %arg1 : i32
    %c0_i32 = arith.constant 0 : i32
    %c0_i32_0 = arith.constant 0 : i32
    %c0_i32_1 = arith.constant 0 : i32
    %c0_i32_2 = arith.constant 0 : i32
    return %1, %c0_i32, %c0_i32_0, %c0_i32_1 : i32, i32, i32, i32
  }
  func.func @transform_1(%arg0: i32, %arg1: i32) -> (i32, i32) {
    %c0_i32 = arith.constant 0 : i32
    %c0_i32_0 = arith.constant 0 : i32
    %c0_i32_1 = arith.constant 0 : i32
    return %c0_i32, %c0_i32_0 : i32, i32
  }
  func.func @transform_2(%arg0: i32, %arg1: i32) -> (i32, i32) {
    %c0_i32 = arith.constant 0 : i32
    %c0_i32_0 = arith.constant 0 : i32
    %c0_i32_1 = arith.constant 0 : i32
    return %c0_i32, %c0_i32_0 : i32, i32
  }
  func.func @transform_3(%arg0: i32, %arg1: i32) -> (i32, i32) {
    %c0_i32 = arith.constant 0 : i32
    %c0_i32_0 = arith.constant 0 : i32
    %c0_i32_1 = arith.constant 0 : i32
    return %c0_i32, %c0_i32_0 : i32, i32
  }
  func.func @transform_4(%arg0: i32, %arg1: i32) -> (i32, i32, i32, i32) {
    %c0_i32 = arith.constant 0 : i32
    %c0_i32_0 = arith.constant 0 : i32
    %c0_i32_1 = arith.constant 0 : i32
    return %arg0, %arg1, %c0_i32, %c0_i32_0 : i32, i32, i32, i32
  }
  func.func @transform_5(%arg0: i32, %arg1: i32) -> (i32, i32, i32) {
    %c4_i32 = arith.constant 4 : i32
    %0 = arith.muli %arg0, %c4_i32 : i32
    %1 = arith.addi %0, %arg1 : i32
    %c0_i32 = arith.constant 0 : i32
    %c0_i32_0 = arith.constant 0 : i32
    %c0_i32_1 = arith.constant 0 : i32
    return %1, %c0_i32, %c0_i32_0 : i32, i32, i32
  }
}

module attributes {stable_mosaic.version = 11 : i64} {
  func.func @_bn_add_relu_kernel(%arg0: i32, %arg1: i32, %arg2: memref<1x8x32x128xf32, #tpu.memory_space<vmem>>, %arg3: memref<1x8x32x128xf32, #tpu.memory_space<vmem>>, %arg4: memref<1x128xf32, #tpu.memory_space<vmem>>, %arg5: memref<1x128xf32, #tpu.memory_space<vmem>>, %arg6: memref<1x8x32x128xf32, #tpu.memory_space<vmem>>) attributes {dimension_semantics = [#tpu.dimension_semantics<parallel>, #tpu.dimension_semantics<parallel>], iteration_bounds = array<i64: 2, 4>, scalar_prefetch = 0 : i64, scratch_operands = 0 : i64, tpu.core_type = #tpu.core_type<tc>, window_params = [{transform_indices = @transform_0, window_bounds = array<i64: 1, 8, 32, 128>}, {transform_indices = @transform_1, window_bounds = array<i64: 1, 8, 32, 128>}, {pipeline_mode = #tpu.pipeline_mode<synchronous>, transform_indices = @transform_2, window_bounds = array<i64: 1, 128>}, {pipeline_mode = #tpu.pipeline_mode<synchronous>, transform_indices = @transform_3, window_bounds = array<i64: 1, 128>}, {transform_indices = @transform_4, window_bounds = array<i64: 1, 8, 32, 128>}]} {
    %c0 = arith.constant 0 : index
    %c0_0 = arith.constant 0 : index
    %0 = vector.load %arg4[%c0, %c0_0] : memref<1x128xf32, #tpu.memory_space<vmem>>, vector<1x128xf32>
    %1 = vector.shape_cast %0 : vector<1x128xf32> to vector<1x1x1x128xf32>
    %c0_1 = arith.constant 0 : index
    %c0_2 = arith.constant 0 : index
    %2 = vector.load %arg5[%c0_1, %c0_2] : memref<1x128xf32, #tpu.memory_space<vmem>>, vector<1x128xf32>
    %3 = vector.shape_cast %2 : vector<1x128xf32> to vector<1x1x1x128xf32>
    %c0_3 = arith.constant 0 : index
    %c0_4 = arith.constant 0 : index
    %c0_5 = arith.constant 0 : index
    %c0_6 = arith.constant 0 : index
    %4 = vector.load %arg2[%c0_3, %c0_4, %c0_5, %c0_6] : memref<1x8x32x128xf32, #tpu.memory_space<vmem>>, vector<1x8x32x128xf32>
    %5 = vector.broadcast %1 : vector<1x1x1x128xf32> to vector<1x8x32x128xf32>
    %6 = arith.mulf %4, %5 : vector<1x8x32x128xf32>
    %7 = vector.broadcast %3 : vector<1x1x1x128xf32> to vector<1x8x32x128xf32>
    %8 = arith.addf %6, %7 : vector<1x8x32x128xf32>
    %c0_7 = arith.constant 0 : index
    %c0_8 = arith.constant 0 : index
    %c0_9 = arith.constant 0 : index
    %c0_10 = arith.constant 0 : index
    %9 = vector.load %arg3[%c0_7, %c0_8, %c0_9, %c0_10] : memref<1x8x32x128xf32, #tpu.memory_space<vmem>>, vector<1x8x32x128xf32>
    %10 = arith.addf %8, %9 : vector<1x8x32x128xf32>
    %cst = arith.constant 0.000000e+00 : f32
    %11 = vector.broadcast %cst : f32 to vector<1x8x32x128xf32>
    %12 = arith.maximumf %10, %11 : vector<1x8x32x128xf32>
    %c0_11 = arith.constant 0 : index
    %c0_12 = arith.constant 0 : index
    %c0_13 = arith.constant 0 : index
    %c0_14 = arith.constant 0 : index
    %13 = vector.load %arg6[%c0_11, %c0_12, %c0_13, %c0_14] : memref<1x8x32x128xf32, #tpu.memory_space<vmem>>, vector<1x8x32x128xf32>
    tpu.vector_store %arg6[%c0_11, %c0_12, %c0_13, %c0_14], %12 {strides = array<i32>} : memref<1x8x32x128xf32, #tpu.memory_space<vmem>>, vector<1x8x32x128xf32>,
    return
  }
  func.func @transform_0(%arg0: i32, %arg1: i32) -> (i32, i32, i32, i32) {
    %c0_i32 = arith.constant 0 : i32
    %c0_i32_0 = arith.constant 0 : i32
    %c0_i32_1 = arith.constant 0 : i32
    return %arg0, %arg1, %c0_i32, %c0_i32_0 : i32, i32, i32, i32
  }
  func.func @transform_1(%arg0: i32, %arg1: i32) -> (i32, i32, i32, i32) {
    %c0_i32 = arith.constant 0 : i32
    %c0_i32_0 = arith.constant 0 : i32
    %c0_i32_1 = arith.constant 0 : i32
    return %arg0, %arg1, %c0_i32, %c0_i32_0 : i32, i32, i32, i32
  }
  func.func @transform_2(%arg0: i32, %arg1: i32) -> (i32, i32) {
    %c0_i32 = arith.constant 0 : i32
    %c0_i32_0 = arith.constant 0 : i32
    %c0_i32_1 = arith.constant 0 : i32
    return %c0_i32, %c0_i32_0 : i32, i32
  }
  func.func @transform_3(%arg0: i32, %arg1: i32) -> (i32, i32) {
    %c0_i32 = arith.constant 0 : i32
    %c0_i32_0 = arith.constant 0 : i32
    %c0_i32_1 = arith.constant 0 : i32
    return %c0_i32, %c0_i32_0 : i32, i32
  }
  func.func @transform_4(%arg0: i32, %arg1: i32) -> (i32, i32, i32, i32) {
    %c0_i32 = arith.constant 0 : i32
    %c0_i32_0 = arith.constant 0 : i32
    %c0_i32_1 = arith.constant 0 : i32
    return %arg0, %arg1, %c0_i32, %c0_i32_0 : i32, i32, i32, i32
  }
}

</mosaic_0001>

<bundles_post_ra>
// kernel: basic_block.3
= control target key start
LH: loop header
LB: loop body
LE: loop exit
PB: predicated region body
PF: predicated region fallthrough
CT: control target
= control target key end

     0   :  { %s4660_s0 = inlined_call_operand.hbm [shape: f32[8,10,34,128], index: 0, kind: input, shape index: {}]   ;;  %s4661_s1 = inlined_call_operand.hbm [shape: f32[1152,128], index: 1, kind: input, shape index: {}]   ;;  %s4662_s2 = inlined_call_operand.hbm [shape: f32[2,32,32,128], index: 2, kind: output, shape index: {0}]   ;;  %s4663_s3 = inlined_call_operand.hbm [shape: f32[8,2,128], index: 3, kind: output, shape index: {1}]  }
   0x1   :  { %4746 = sst [smem:[#allocation57_spill]] %s4661_s1 }
   0x2   :  { %4747 = sst [smem:[#allocation58_spill]] %s4662_s2 }
   0x3   :  { %4748 = sst [smem:[#allocation59_spill]] %s4663_s3 }
   0x4   :  { %9 = vsyncpa [#allocation3], 0 }
   0x5   :  { %11 = vsyncpa [#allocation3 + $0x1], 0 }
   0x6   :  { %12 = vsyncpa [#allocation6], 0 }
   0x7   :  { %13 = vsyncpa [#allocation4], 0 }
   0x8   :  { %15 = vsyncpa [#allocation4 + $0x1], 0 }
   0x9   :  { %16 = vsyncpa [#allocation9], 0 }
   0xa   :  { %18 = vsyncpa [#allocation9 + $0x1], 0  ;;  %s3113_s12 = smov 0   ;;  %s3115_s13 = smov 0  }
   0xb   :  { %s3117_s14 = smov 0   ;;  %s3119_s15 = smov 0  }
   0xc   :  { %s3121_s16 = smov 0   ;;  %s3123_s17 = smov 0  }
   0xd   :  { %s3125_s18 = smov 0   ;;  %s3127_s19 = smov 0  }
   0xe   :  { %s3129_s20 = smov 0   ;;  %s3131_s21 = smov 0  }
   0xf   :  { %s3133_s22 = smov 0  }
  0x10 LB: > { %4749 = sst [smem:[#allocation14_spill]] %s3042_s12  ;;  %s2186_s23 = sadd.s32 4294967295, %s3082_s22   ;;  %s3082_s22 = sphi %s3133_s22, %s24_s22   ;;  %s3078_s21 = sphi %s3131_s21, %s4868_s21   ;;  %s3074_s20 = sphi %s3129_s20, %s4867_s20   ;;  %s3070_s19 = sphi %s3127_s19, %s4866_s19   ;;  %s3066_s18 = sphi %s3125_s18, %s4858_s18   ;;  %s3062_s17 = sphi %s3123_s17, %s4865_s17   ;;  %s3058_s16 = sphi %s3121_s16, %s4864_s16   ;;  %s3054_s15 = sphi %s3119_s15, %s4863_s15   ;;  %s3050_s14 = sphi %s3117_s14, %s4862_s14   ;;  %s3046_s13 = sphi %s3115_s13, %s4861_s13   ;;  %s3042_s12 = sphi %s3113_s12, %s4860_s12  }
  0x11   : > { %4750 = sst [smem:[#allocation15_spill]] %s3054_s15  ;;  %s2187_s24 = sadd.s32 4294967294, %s3082_s22  }
  0x12   : > { %4751 = sst [smem:[#allocation16_spill]] %s3074_s20  ;;  %p60_p0 = scmp.ne.s32.totalorder %s3058_s16, %s3054_s15 }
  0x13   : > { %p3172_p1 = scmp.eq.s32.totalorder %s2186_s23, 0  ;;  %p106_p2 = scmp.ne.s32.totalorder %s3050_s14, %s3046_s13 }
  0x14   : > { %p3178_p3 = scmp.eq.s32.totalorder %s2186_s23, 7  ;;  %p112_p5 = scmp.ne.s32.totalorder %s3046_s13, %s3042_s12 }
  0x15   : > { %s4752_s25 = scalar_select %p3172_p1, 1, 0 }
  0x16   : > { %s4753_s26 = scalar_select %p3178_p3, 1, 0 }
  0x17   : > { %p3184_p4 = por %p3172_p1, %p60_p0  ;;  %p3192_p6 = por %p3178_p3, %p106_p2 }
  0x18   : > { %p113_p7 = scmp.eq.s32.totalorder %s2187_s24, 7  ;;  %p2192_p8 = scmp.ge.s32.totalorder %s3082_s22, 1 }
  0x19   : > { %s4754_s27 = scalar_select %p3184_p4, 1, 0 }
  0x1a   : > { %s4755_s28 = scalar_select %p3192_p6, 1, 0 }
  0x1b   : > { %p150_p9 = scmp.lt.s32.totalorder %s3082_s22, 9  ;;  %p3198_p10 = por %p113_p7, %p112_p5 }
  0x1c   : > { %4756 = sst [smem:[#allocation17_spill]] %s4755_s28  ;;  %p3202_p11 = por %p113_p7, %p60_p0 }
  0x1d   : > { %s4757_s29 = scalar_select %p3198_p10, 1, 0 }
  0x1e   : > { %s4759_s30 = scalar_select %p3202_p11, 1, 0 }
  0x1f   : > { %4758 = sst [smem:[#allocation18_spill]] %s4757_s29  ;;  %p3206_p12 = pnand %p2192_p8, %p150_p9 }
  0x20   : > { %4760 = sst [smem:[#allocation19_spill]] %s4759_s30  ;;  %s3084_s5 = smov [#allocation5]  }
  0x21   : > { %s4761_s4 = scalar_select %p3206_p12, 1, 0 }
  0x22   : > { %p2745_p13 = pneg %p3206_p12  ;;  %s162_s6 = sshll.u32 %s3084_s5, 4  ;;  %s163_s6 = int_to_ptr.vmem [resolvable:$true] %s162_s6 }
  0x23   : > { %s4763_s1 = sld [smem:[#allocation57_spill]] }
  0x24   : > { %p3214_p2 = pnand %p2745_p13, %p3172_p1 }
  0x26   : > { %p2868_p5 = pneg %p3214_p2 }
  0x29   : > { %s2866_s10 = scalar_lea.hbm %s4763_s1, 18432 }
  0x2a   : > { %p2867_p0 = scmp.ne.s32.totalorder %s4763_s1, %s2866_s10  ;;  %p2873_p9 = scmp.lt.u32.totalorder %s2866_s10, %s4763_s1 }
  0x2c   : > { %p2869_p7 = pnand %p2868_p5, %p2867_p0 }
  0x2e   : > { %p2870_p8 = pneg %p2869_p7 }
  0x30   : > { %p2875_p13 = pnand %p2873_p9, %p2870_p8 }
  0x32   : > { %2878 = shalt.err (!%p2875_p13)
}
  0x33   : > { %s2879_s30 = scalar_lea.vmem %s163_s6, 18432  ;;  %p2887_p1 = scmp.lt.s32.totalorder %s163_s6, %s163_s6 }
  0x34   : > { %p2880_p11 = scmp.ne.s32.totalorder %s163_s6, %s2879_s30  ;;  %p2888_p4 = scmp.lt.s32.totalorder %s2879_s30, %s2879_s30 }
  0x36   : > { %p2882_p10 = pnand %p2880_p11, %p2868_p5  ;;  %p2889_p12 = por %p2888_p4, %p2887_p1 }
  0x38   : > { %p2883_p6 = pneg %p2882_p10 }
  0x3a   : > { %p2890_p3 = pnand %p2889_p12, %p2883_p6 }
  0x3c   : > { %2893 = shalt.err (!%p2890_p3)
}
  0x3d   : > { %s4671_s8 = smov 128   ;;  %s4672_s9 = smov 8  }
  0x3e   : > { %2748 = dma.hbm_to_vmem [thread:$0]  (!%p3214_p2), %s4763_s1, 18432, %s163_s6, [#allocation6], %s4671_s8, %s4671_s8, %s4672_s9  }
  0x3f   : > { %s33_s11 = sadd.s32 1, %s3074_s20  ;;  %s36_s23 = sadd.s32 1, %s3078_s21 }
  0x40   : > { %p34_p1 = scmp.ge.s32.totalorder %s33_s11, 4  ;;  %s2188_s24 = sshll.u32 %s3078_s21, 2 }
  0x41   : > { %s47_s5 = sadd.s32 1, %s3062_s17  ;;  %s41_s7 = sadd.s32 %s3074_s20, %s2188_s24 }
  0x42   : > { %s4870_s11 = smov (%p34_p1, %s33_s11), 0  ;;  %s4872_s23 = smov (!%p34_p1, %s36_s23), %s3078_s21 }
  0x43   : > { %p54_p3 = scmp.ne.s32.totalorder %s3062_s17, %s3058_s16  ;;  %p38_p4 = scmp.ge.s32.totalorder %s4872_s23, 2 }
  0x44   : > { %p55_p6 = scmp.eq.s32.totalorder %s3082_s22, 0  ;;  %s92_s6 = ssub.s32 %s3074_s20, %s4870_s11 }
  0x45   : > { %s96_s30 = sadd.s32 1, %s3050_s14  ;;  %s4874_s23 = smov (%p38_p4, %s4872_s23), 0 }
  0x46   : > { %4764 = sst [smem:[#allocation20_spill]] %s4874_s23  ;;  %p3253_p10 = por %p55_p6, %p54_p3 }
  0x47   : > { %p4766_p11 = scmp.ne.s32.totalorder %s4753_s26, 0  ;;  %s2189_s8 = sshll.u32 %s4874_s23, 2 }
  0x48   : > { %s91_s9 = ssub.s32 %s3078_s21, %s4874_s23  ;;  %s43_s1 = sadd.s32 %s2189_s8, %s4870_s11 }
  0x49   : > { %p3259_p12 = por %p4766_p11, %p54_p3  ;;  %s93_s15 = sor.u32 %s92_s6, %s91_s9 }
  0x4a   : > { %s44_s20 = ssub.s32 %s41_s7, %s43_s1  ;;  %p94_p2 = scmp.eq.s32.totalorder %s93_s15, 0 }
  0x4b   : > { %s4767_s24 = scalar_select %p3259_p12, 1, 0 }
  0x4c   : > { %p45_p0 = scmp.eq.s32.totalorder %s44_s20, 0  ;;  %p2761_p5 = scmp.lt.s32.totalorder %s3082_s22, 8 }
  0x4d   : > { %4768 = sst [smem:[#allocation21_spill]] %s4767_s24  ;;  %s176_s3 = sand.u32 1, %s3062_s17  }
  0x4e   : > { %s3269_s29 = scalar_select %p94_p2, %s3050_s14, %s96_s30  }
  0x4f   : > { %s3272_s12 = scalar_select %p45_p0, %s3062_s17, %s47_s5  }
  0x50   : > { %s2733_s2 = smul.u32 6400, %s41_s7  ;;  %p3277_p7 = pnand %p2761_p5, %p3253_p10 }
  0x51   : > { %s2732_s26 = smul.u32 400, %s176_s3  ;;  %s3288_s8 = scalar_lea.sflag [#allocation3], %s176_s3 }
  0x52   : > { %s3284_s1 = scalar_lea.hbm %s4660_s0, %s2733_s2  ;;  %p2896_p9 = pneg %p3277_p7 }
  0x53   : > { %s180_s15 = scalar_lea.vmem [#allocation2], %s2732_s26  ;;  %s2894_s9 = scalar_lea.hbm %s3284_s1, 6400 }
  0x54   : > { %s189_s20 = sshll.u32 %s180_s15, 4  ;;  %p2895_p8 = scmp.ne.s32.totalorder %s3284_s1, %s2894_s9  ;;  %s3286_s20 = int_to_ptr.vmem [resolvable:$true] %s189_s20 }
  0x55   : > { %s2899_s5 = scalar_lea.hbm %s4660_s0, 51200  ;;  %p2900_p3 = scmp.lt.u32.totalorder %s3284_s1, %s4660_s0 }
  0x56   : > { %p2897_p13 = pnand %p2896_p9, %p2895_p8  ;;  %p2901_p4 = scmp.lt.u32.totalorder %s2899_s5, %s2894_s9 }
  0x57   : > { %p2903_p10 = scmp.lt.u32.totalorder %s2894_s9, %s3284_s1 }
  0x58   : > { %p2898_p1 = pneg %p2897_p13  ;;  %p2902_p6 = por %p2901_p4, %p2900_p3 }
  0x5a   : > { %p2904_p11 = por %p2903_p10, %p2902_p6 }
  0x5c   : > { %p2905_p2 = pnand %p2904_p11, %p2898_p1 }
  0x5e   : > { %2908 = shalt.err (!%p2905_p2)
}
  0x5f   : > { %s2909_s3 = scalar_lea.vmem %s3286_s20, 6400  ;;  %s3087_s30 = smov [#allocation2]  }
  0x60   : > { %p2910_p0 = scmp.ne.s32.totalorder %s3286_s20, %s2909_s3  ;;  %s2914_s10 = sshll.u32 %s3087_s30, 4  ;;  %s2915_s10 = int_to_ptr.vmem [resolvable:$false] %s2914_s10 }
  0x61   : > { %s2916_s24 = scalar_lea.vmem %s2915_s10, 12800  ;;  %p2917_p13 = scmp.lt.s32.totalorder %s3286_s20, %s2915_s10 }
  0x62   : > { %p2912_p5 = pnand %p2910_p0, %p2896_p9  ;;  %p2918_p3 = scmp.lt.s32.totalorder %s2916_s24, %s2909_s3 }
  0x64   : > { %p2913_p8 = pneg %p2912_p5  ;;  %p2919_p4 = por %p2918_p3, %p2917_p13 }
  0x66   : > { %p2920_p6 = pnand %p2919_p4, %p2913_p8 }
  0x68   : > { %2923 = shalt.err (!%p2920_p6)
}
  0x69   : > { %s4770_s26 = smov 8   ;;  %s4771_s15 = smov 128  }
  0x6a   : > { %2752 = dma.hbm_to_vmem [thread:$0]  (!%p3277_p7), %s3284_s1, 6400, %s3286_s20, %s3288_s8, %s4771_s15, %s4771_s15, %s4770_s26  }
  0x6b   : > { %p4772_p9 = scmp.ne.s32.totalorder %s4761_s4, 0 }
  0x6d   : > { %201 = sbr.rel (%p4772_p9) target bundleno = 781 (0x30d), region = 28 }
  0x74   : > { %s3322_s9 = sand.u32 1, %s3058_s16   ;;  %p4773_p1 = scmp.ne.s32.totalorder %s4754_s27, 0 }
  0x75   : > { %s2734_s2 = smul.u32 400, %s3322_s9  ;;  %s204_s23 = scalar_lea.sflag [#allocation3], %s3322_s9 }
  0x77   : > { %s3326_s5 = scalar_lea.vmem [#allocation2], %s2734_s2 }
  0x78   : > { %3025 = dma.done.wait (%p4773_p1), %s204_s23, 6400  }
  0x79   : > { %3027 = vsyncadd (%p4773_p1), %s204_s23, 4294960896  ;;  %p4774_p7 = scmp.ne.s32.totalorder %s4752_s25, 0 }
  0x7b   : > { %3029 = dma.done.wait (%p4774_p7), [#allocation6], 18432  }
  0x7c   : > { %3031 = vsyncadd (%p4774_p7), [#allocation6], 4294948864  ;;  %v4684_v0 = vmov 0.0|0.0   ;;  %v606_v1 = vld [vmem:[#allocation5] sm:$0xff]  ;;  %v607_v2 = vld [vmem:[#allocation5 + $0x8] sm:$0xff]  ;;  %vm334_vm0 = vcmask 1046528  }
  0x7d   : > { %2340 = vmatprep.subr.bf16.mxu1 %v4684_v0  ;;  %2388 = vmatprep.subr.bf16.mxu0 %v4684_v0  ;;  %v638_v3 = vld [vmem:[#allocation5 + $0x100] sm:$0xff]  ;;  %v2341_v4 = vpack.c.bf16 %v607_v2, %v606_v1  ;;  %v639_v5 = vld [vmem:[#allocation5 + $0x108] sm:$0xff]  ;;  %v608_v6 = vld [vmem:[#allocation5 + $0x10] sm:$0xff]  ;;  %vm439_vm1 = vcmask 1045504   ;;  %s229_s25 = sand.u32 1, %s3046_s13   ;;  %s2211_s4 = sshll.u32 %s3066_s18, 5 }
  0x7e   : > { %v609_v7 = vld [vmem:[#allocation5 + $0x18] sm:$0xff]  ;;  %v2389_v8 = vpack.c.bf16 %v639_v5, %v638_v3  ;;  %v640_v9 = vld [vmem:[#allocation5 + $0x110] sm:$0xff]  ;;  %v610_v13 = vld [vmem:[#allocation5 + $0x20] sm:$0xff]  ;;  %s2199_s27 = sshll.u32 %s229_s25, 8  ;;  %s2205_s1 = sshll.u32 %s3070_s19, 7 }
  0x7f   : > { %v641_v10 = vld [vmem:[#allocation5 + $0x118] sm:$0xff]  ;;  %2342 = vmatpush1.bf16.msra.mxu1 %v2341_v4  ;;  %v2344_v11 = vpack.c.bf16 %v609_v7, %v608_v6  ;;  %v611_v14 = vld [vmem:[#allocation5 + $0x28] sm:$0xff]  ;;  %v642_v15 = vld [vmem:[#allocation5 + $0x120] sm:$0xff]  ;;  %s4326_s28 = scalar_lea.vmem [#allocation7], %s2199_s27  ;;  %s2035_s20 = sadd.s32 %s2211_s4, %s2205_s1 }
  0x80   : > { %2390 = vmatpush1.bf16.msra.mxu0 %v2389_v8  ;;  %2343 = vmatprep.subr.bf16.mxu1 %v4684_v0  ;;  %v2392_v12 = vpack.c.bf16 %v641_v10, %v640_v9  ;;  %v643_v16 = vld [vmem:[#allocation5 + $0x128] sm:$0xff]  ;;  %v2347_v17 = vpack.c.bf16 %v611_v14, %v610_v13  ;;  %v612_v19 = vld [vmem:[#allocation5 + $0x30] sm:$0xff]  ;;  %v613_v20 = vld [vmem:[#allocation5 + $0x38] sm:$0xff]  ;;  %s2038_s8 = sshll.u32 %s4326_s28, 4  ;;  %s2206_s7 = sshll.u32 %s2035_s20, 7  ;;  %s4479_s8 = int_to_ptr.vmem [resolvable:$true] %s2038_s8 }
  0x81   : > { %2391 = vmatprep.subr.bf16.mxu0 %v4684_v0  ;;  %v2395_v18 = vpack.c.bf16 %v643_v16, %v642_v15  ;;  %v644_v21 = vld [vmem:[#allocation5 + $0x130] sm:$0xff]  ;;  %v645_v22 = vld [vmem:[#allocation5 + $0x138] sm:$0xff]  ;;  %v2350_v23 = vpack.c.bf16 %v613_v20, %v612_v19  ;;  %v614_v25 = vld [vmem:[#allocation5 + $0x40] sm:$0xff]  ;;  %s4846_s6 = sld [smem:[#allocation17_spill]]  ;;  %s4847_s10 = sld [smem:[#allocation58_spill]] }
  0x82   : > { %v2398_v24 = vpack.c.bf16 %v645_v22, %v644_v21  ;;  %v615_v26 = vld [vmem:[#allocation5 + $0x48] sm:$0xff]  ;;  %v646_v27 = vld [vmem:[#allocation5 + $0x140] sm:$0xff]  ;;  %v616_v31 = vld [vmem:[#allocation5 + $0x50] sm:$0xff]  ;;  %s4492_s26 = scalar_lea.sflag [#allocation4], %s229_s25  ;;  %s2924_s15 = scalar_lea.vmem %s4479_s8, 4096 }
  0x83   : > { %2345 = vmatpush1.bf16.msra.mxu1 %v2344_v11  ;;  %v647_v28 = vld [vmem:[#allocation5 + $0x148] sm:$0xff]  ;;  %v2353_v29 = vpack.c.bf16 %v615_v26, %v614_v25  ;;  %v617_v32 = vld [vmem:[#allocation5 + $0x58] sm:$0xff]  ;;  %v648_v33 = vld [vmem:[#allocation5 + $0x150] sm:$0xff]  ;;  %p2925_p10 = scmp.ne.s32.totalorder %s4479_s8, %s2924_s15  ;;  %s3089_s2 = smov [#allocation7]  }
  0x84   : > { %2393 = vmatpush1.bf16.msra.mxu0 %v2392_v12  ;;  %2346 = vmatprep.subr.bf16.mxu1 %v4684_v0  ;;  %v2401_v30 = vpack.c.bf16 %v647_v28, %v646_v27  ;;  %v649_v34 = vld [vmem:[#allocation5 + $0x158] sm:$0xff]  ;;  %v2356_v35 = vpack.c.bf16 %v617_v32, %v616_v31  ;;  %v618_v37 = vld [vmem:[#allocation5 + $0x60] sm:$0xff]  ;;  %v619_v38 = vld [vmem:[#allocation5 + $0x68] sm:$0xff]  ;;  %s2928_s23 = sshll.u32 %s3089_s2, 4  ;;  %s2929_s23 = int_to_ptr.vmem [resolvable:$false] %s2928_s23 }
  0x85   : > { %2394 = vmatprep.subr.bf16.mxu0 %v4684_v0  ;;  %v2404_v36 = vpack.c.bf16 %v649_v34, %v648_v33  ;;  %v650_v39 = vld [vmem:[#allocation5 + $0x160] sm:$0xff]  ;;  %v651_v40 = vld [vmem:[#allocation5 + $0x168] sm:$0xff]  ;;  %v2359_v46 = vpack.c.bf16 %v619_v38, %v618_v37  ;;  %v620_v48 = vld [vmem:[#allocation5 + $0x70] sm:$0xff]  ;;  %p2931_p5 = scmp.lt.s32.totalorder %s4479_s8, %s2929_s23 }
  0x86   : > { %v3349_v41 = vld [vmem:[%s3326_s5] sm:$0xff]  ;;  %v3352_v42 = vld [vmem:[%s3326_s5 + $0x8] sm:$0xff]  ;;  %v2407_v47 = vpack.c.bf16 %v651_v40, %v650_v39  ;;  %v3382_v38 = vld [vmem:[%s3326_s5 + $0x10] sm:$0xff] }
  0x87   : > { %2348 = vmatpush1.bf16.msra.mxu1 %v2347_v17  ;;  %v335_v43 = vrot.slane %v3349_v41, 1  ;;  %v336_v44 = vrot.slane %v3352_v42, 1  ;;  %v3357_v45 = vld [vmem:[%s3326_s5 + $0x28] sm:$0xff]  ;;  %v652_v51 = vld [vmem:[#allocation5 + $0x170] sm:$0xff]  ;;  %v622_v55 = vld [vmem:[#allocation5 + $0x80] sm:$0xff]  ;;  %s4487_s24 = scalar_lea.hbm %s4847_s10, %s2206_s7  ;;  %p4848_p11 = scmp.ne.s32.totalorder %s4846_s6, 0 }
  0x88   : > { %2396 = vmatpush1.bf16.msra.mxu0 %v2395_v18  ;;  %2349 = vmatprep.subr.bf16.mxu1 %v4684_v0  ;;  %v621_v49 = vld [vmem:[#allocation5 + $0x78] sm:$0xff]  ;;  %v623_v56 = vld [vmem:[#allocation5 + $0x88] sm:$0xff]  ;;  %v654_v57 = vld [vmem:[#allocation5 + $0x180] sm:$0xff] }
  0x89   : > { %2397 = vmatprep.subr.bf16.mxu0 %v4684_v0  ;;  %1039 = vmatprep.mubr.f32.mxu0 %v3357_v45  ;;  %v337_v50 = vsel %vm334_vm0, %v335_v43, %v336_v44  ;;  %v653_v52 = vld [vmem:[#allocation5 + $0x178] sm:$0xff]  ;;  %v2362_v53 = vpack.c.bf16 %v621_v49, %v620_v48  ;;  %v655_v58 = vld [vmem:[#allocation5 + $0x188] sm:$0xff]  ;;  %v2365_v59 = vpack.c.bf16 %v623_v56, %v622_v55  ;;  %v624_v61 = vld [vmem:[#allocation5 + $0x90] sm:$0xff]  ;;  %v440_v43 = vrot.slane %v3349_v41, 2  ;;  %p2926_p2 = pnand %p2925_p10, %p4848_p11 }
  0x8a   : > { %814 = vmatprep.mubr.f32.mxu1 %v337_v50  ;;  %v2410_v54 = vpack.c.bf16 %v653_v52, %v652_v51  ;;  %v2413_v60 = vpack.c.bf16 %v655_v58, %v654_v57  ;;  %v625_v62 = vld [vmem:[#allocation5 + $0x98] sm:$0xff]  ;;  %v656_v63 = vld [vmem:[#allocation5 + $0x190] sm:$0xff]  ;;  %v626_v4 = vld [vmem:[#allocation5 + $0xa0] sm:$0xff]  ;;  %v338_v49 = vrot.slane %v3382_v38, 1  ;;  %v443_v57 = vrot.slane %v3382_v38, 2 }
  0x8b   : > { %2351 = vmatpush1.bf16.msra.mxu1 %v2350_v23  ;;  %v657_v1 = vld [vmem:[#allocation5 + $0x198] sm:$0xff]  ;;  %v2368_v2 = vpack.c.bf16 %v625_v62, %v624_v61  ;;  %v627_v5 = vld [vmem:[#allocation5 + $0xa8] sm:$0xff]  ;;  %v658_v6 = vld [vmem:[#allocation5 + $0x1a0] sm:$0xff]  ;;  %p2927_p0 = pneg %p2926_p2 }
  0x8c   : > { %2399 = vmatpush1.bf16.msra.mxu0 %v2398_v24  ;;  %2352 = vmatprep.subr.bf16.mxu1 %v4684_v0  ;;  %v2416_v3 = vpack.c.bf16 %v657_v1, %v656_v63  ;;  %v659_v7 = vld [vmem:[#allocation5 + $0x1a8] sm:$0xff]  ;;  %v2371_v8 = vpack.c.bf16 %v627_v5, %v626_v4  ;;  %v628_v10 = vld [vmem:[#allocation5 + $0xb0] sm:$0xff]  ;;  %v629_v11 = vld [vmem:[#allocation5 + $0xb8] sm:$0xff]  ;;  %v339_v55 = vsel %vm334_vm0, %v336_v44, %v338_v49 }
  0x8d   : > { %2400 = vmatprep.subr.bf16.mxu0 %v4684_v0  ;;  %v2419_v9 = vpack.c.bf16 %v659_v7, %v658_v6  ;;  %v660_v12 = vld [vmem:[#allocation5 + $0x1b0] sm:$0xff]  ;;  %v661_v13 = vld [vmem:[#allocation5 + $0x1b8] sm:$0xff]  ;;  %v2374_v14 = vpack.c.bf16 %v629_v11, %v628_v10  ;;  %v630_v16 = vld [vmem:[#allocation5 + $0xc0] sm:$0xff]  ;;  %v344_v11 = vrot.slane %v3357_v45, 1 }
  0x8e   : > { %v2422_v15 = vpack.c.bf16 %v661_v13, %v660_v12  ;;  %v631_v17 = vld [vmem:[#allocation5 + $0xc8] sm:$0xff]  ;;  %v662_v18 = vld [vmem:[#allocation5 + $0x1c0] sm:$0xff]  ;;  %v632_v22 = vld [vmem:[#allocation5 + $0xd0] sm:$0xff] }
  0x8f   : > { %2354 = vmatpush1.bf16.msra.mxu1 %v2353_v29  ;;  %v663_v19 = vld [vmem:[#allocation5 + $0x1c8] sm:$0xff]  ;;  %v2377_v20 = vpack.c.bf16 %v631_v17, %v630_v16  ;;  %v633_v23 = vld [vmem:[#allocation5 + $0xd8] sm:$0xff]  ;;  %v664_v24 = vld [vmem:[#allocation5 + $0x1d0] sm:$0xff] }
  0x90   : > { %2402 = vmatpush1.bf16.msra.mxu0 %v2401_v30  ;;  %2355 = vmatprep.subr.bf16.mxu1 %v4684_v0  ;;  %v2425_v21 = vpack.c.bf16 %v663_v19, %v662_v18  ;;  %v665_v25 = vld [vmem:[#allocation5 + $0x1d8] sm:$0xff]  ;;  %v2380_v26 = vpack.c.bf16 %v633_v23, %v632_v22  ;;  %v634_v28 = vld [vmem:[#allocation5 + $0xe0] sm:$0xff]  ;;  %v635_v29 = vld [vmem:[#allocation5 + $0xe8] sm:$0xff]  ;;  %v449_v23 = vrot.slane %v3357_v45, 2 }
  0x91   : > { %2403 = vmatprep.subr.bf16.mxu0 %v4684_v0  ;;  %v2428_v27 = vpack.c.bf16 %v665_v25, %v664_v24  ;;  %v666_v30 = vld [vmem:[#allocation5 + $0x1e0] sm:$0xff]  ;;  %v667_v31 = vld [vmem:[#allocation5 + $0x1e8] sm:$0xff]  ;;  %v2383_v32 = vpack.c.bf16 %v635_v29, %v634_v28  ;;  %v636_v34 = vld [vmem:[#allocation5 + $0xf0] sm:$0xff] }
  0x92   : > { %v2431_v33 = vpack.c.bf16 %v667_v31, %v666_v30  ;;  %v669_v37 = vld [vmem:[#allocation5 + $0x1f8] sm:$0xff]  ;;  %v671_v48 = vld [vmem:[#allocation5 + $0x208] sm:$0xff]  ;;  %v702_v51 = vld [vmem:[#allocation5 + $0x300] sm:$0xff] }
  0x93   : > { %2357 = vmatpush1.bf16.msra.mxu1 %v2356_v35  ;;  %v637_v35 = vld [vmem:[#allocation5 + $0xf8] sm:$0xff]  ;;  %v703_v52 = vld [vmem:[#allocation5 + $0x308] sm:$0xff]  ;;  %v3397_v56 = vld [vmem:[%s3326_s5 + $0x30] sm:$0xff] }
  0x94   : > { %2405 = vmatpush1.bf16.msra.mxu0 %v2404_v36  ;;  %2358 = vmatprep.subr.bf16.mxu1 %v4684_v0  ;;  %v668_v36 = vld [vmem:[#allocation5 + $0x1f0] sm:$0xff]  ;;  %v2386_v39 = vpack.c.bf16 %v637_v35, %v636_v34  ;;  %v3390_v50 = vld [vmem:[%s3326_s5 + $0x18] sm:$0xff]  ;;  %v3404_v62 = vpack.c.bf16 %v703_v52, %v702_v51  ;;  %v345_v12 = vrot.slane %v3397_v56, 1  ;;  %v450_v25 = vrot.slane %v3397_v56, 2  ;;  %v678_v29 = vld [vmem:[#allocation5 + $0x240] sm:$0xff] }
  0x95   : > { %2406 = vmatprep.subr.bf16.mxu0 %v4684_v0  ;;  %v2434_v40 = vpack.c.bf16 %v669_v37, %v668_v36  ;;  %v340_v58 = vrot.slane %v3390_v50, 1  ;;  %v248_v61 = vld [vmem:[%s3326_s5 + $0x20] sm:$0x3]  ;;  %v705_v44 = vld [vmem:[#allocation5 + $0x318] sm:$0xff]  ;;  %v445_v1 = vrot.slane %v3390_v50, 2  ;;  %v675_v7 = vld [vmem:[#allocation5 + $0x228] sm:$0xff] }
  0x96   : > { %v704_v63 = vld [vmem:[#allocation5 + $0x310] sm:$0xff]  ;;  %v342_v5 = vrot.slane %v248_v61, 1  ;;  %v3412_v6 = vld [vmem:[%s3326_s5 + $0x38] sm:$0xff]  ;;  %v3435_v22 = vsel %vm334_vm0, %v344_v11, %v345_v12  ;;  %v3455_v35 = vsel %vm439_vm1, %v449_v23, %v450_v25 }
  0x97   : > { %2360 = vmatpush1.bf16.msra.mxu1 %v2359_v46  ;;  %v441_v46 = vrot.slane %v3352_v42, 2  ;;  %v707_v10 = vld [vmem:[#allocation5 + $0x328] sm:$0xff]  ;;  %v446_v13 = vsel %vm439_vm1, %v443_v57, %v445_v1  ;;  %v676_v17 = vld [vmem:[#allocation5 + $0x230] sm:$0xff]  ;;  %v677_v18 = vld [vmem:[#allocation5 + $0x238] sm:$0xff]  ;;  %v452_v34 = vrot.slane %v3412_v6, 2 }
  0x98   : > { %2408 = vmatpush1.bf16.msra.mxu0 %v2407_v47  ;;  %2361 = vmatprep.subr.bf16.mxu1 %v4684_v0  ;;  %v670_v47 = vld [vmem:[#allocation5 + $0x200] sm:$0xff]  ;;  %v679_v30 = vld [vmem:[#allocation5 + $0x248] sm:$0xff] }
  0x99   : > { %2409 = vmatprep.subr.bf16.mxu0 %v4684_v0  ;;  %v3443_v28 = vld [vmem:[%s3326_s5 + $0x50] sm:$0xff]  ;;  %v3461_v37 = vld [vmem:[%s3326_s5 + $0x58] sm:$0xff]  ;;  %v3476_v51 = vsel %vm439_vm1, %v450_v25, %v452_v34 }
  0x9a   : > { %v459_v11 = vrot.slane %v3461_v37, 2 }
  0x9b   : > { %2363 = vmatpush1.bf16.msra.mxu1 %v2362_v53  ;;  %v2437_v53 = vpack.c.bf16 %v671_v48, %v670_v47  ;;  %v712_v48 = vld [vmem:[#allocation5 + $0x350] sm:$0xff] }
  0x9c   : > { %2411 = vmatpush1.bf16.msra.mxu0 %v2410_v54  ;;  %2364 = vmatprep.subr.bf16.mxu1 %v4684_v0  ;;  %v442_v54 = vsel %vm439_vm1, %v440_v43, %v441_v46  ;;  %v680_v43 = vld [vmem:[#allocation5 + $0x250] sm:$0xff] }
  0x9d   : > { %2412 = vmatprep.subr.bf16.mxu0 %v4684_v0 }
  0x9f   : > { %2366 = vmatpush1.bf16.msra.mxu1 %v2365_v59  ;;  %v672_v59 = vld [vmem:[#allocation5 + $0x210] sm:$0xff] }
  0xa0   : > { %2414 = vmatpush1.bf16.msra.mxu0 %v2413_v60  ;;  %2367 = vmatprep.subr.bf16.mxu1 %v4684_v0  ;;  %v673_v60 = vld [vmem:[#allocation5 + $0x218] sm:$0xff] }
  0xa1   : > { %2415 = vmatprep.subr.bf16.mxu0 %v4684_v0  ;;  %v2440_v4 = vpack.c.bf16 %v673_v60, %v672_v59  ;;  %v714_v59 = vld [vmem:[#allocation5 + $0x360] sm:$0xff]  ;;  %v715_v60 = vld [vmem:[#allocation5 + $0x368] sm:$0xff] }
  0xa3   : > { %2369 = vmatpush1.bf16.msra.mxu1 %v2368_v2  ;;  %v444_v2 = vsel %vm439_vm1, %v441_v46, %v443_v57  ;;  %v681_v46 = vld [vmem:[#allocation5 + $0x258] sm:$0xff]  ;;  %v683_v57 = vld [vmem:[#allocation5 + $0x268] sm:$0xff] }
  0xa4   : > { %2417 = vmatpush1.bf16.msra.mxu0 %v2416_v3  ;;  %2370 = vmatprep.subr.bf16.mxu1 %v4684_v0  ;;  %v341_v3 = vsel %vm334_vm0, %v338_v49, %v340_v58  ;;  %v713_v49 = vld [vmem:[#allocation5 + $0x358] sm:$0xff] }
  0xa5   : > { %2418 = vmatprep.subr.bf16.mxu0 %v4684_v0 }
  0xa7   : > { %2372 = vmatpush1.bf16.msra.mxu1 %v2371_v8  ;;  %v3416_v8 = vpack.c.bf16 %v705_v44, %v704_v63 }
  0xa8   : > { %2420 = vmatpush1.bf16.msra.mxu0 %v2419_v9  ;;  %2373 = vmatprep.subr.bf16.mxu1 %v4684_v0  ;;  %v706_v9 = vld [vmem:[#allocation5 + $0x320] sm:$0xff] }
  0xa9   : > { %2421 = vmatprep.subr.bf16.mxu0 %v4684_v0  ;;  %v3430_v19 = vpack.c.bf16 %v707_v10, %v706_v9  ;;  %v717_v9 = vld [vmem:[#allocation5 + $0x378] sm:$0xff]  ;;  %v458_v10 = vrot.slane %v3443_v28, 2 }
  0xab   : > { %2375 = vmatpush1.bf16.msra.mxu1 %v2374_v14  ;;  %v343_v14 = vsel %vm334_vm0, %v340_v58, %v342_v5  ;;  %v3486_v58 = vpack.c.bf16 %v713_v49, %v712_v48  ;;  %v685_v5 = vld [vmem:[#allocation5 + $0x278] sm:$0xff]  ;;  %v690_v49 = vld [vmem:[#allocation5 + $0x2a0] sm:$0xff] }
  0xac   : > { %2423 = vmatpush1.bf16.msra.mxu0 %v2422_v15  ;;  %2376 = vmatprep.subr.bf16.mxu1 %v4684_v0  ;;  %v447_v15 = vrot.slane %v248_v61, 2  ;;  %v3563_v48 = vld [vmem:[%s3326_s5 + $0x88] sm:$0xff] }
  0xad   : > { %2424 = vmatprep.subr.bf16.mxu0 %v4684_v0 }
  0xae   : > { %v448_v24 = vsel %vm439_vm1, %v445_v1, %v447_v15  ;;  %v353_v1 = vrot.slane %v3443_v28, 1  ;;  %v3523_v15 = vld [vmem:[%s3326_s5 + $0x78] sm:$0xff] }
  0xaf   : > { %2378 = vmatpush1.bf16.msra.mxu1 %v2377_v20  ;;  %v708_v20 = vld [vmem:[#allocation5 + $0x330] sm:$0xff] }
  0xb0   : > { %2426 = vmatpush1.bf16.msra.mxu0 %v2425_v21  ;;  %2379 = vmatprep.subr.bf16.mxu1 %v4684_v0  ;;  %v709_v21 = vld [vmem:[#allocation5 + $0x338] sm:$0xff] }
  0xb1   : > { %2427 = vmatprep.subr.bf16.mxu0 %v4684_v0  ;;  %v3447_v31 = vpack.c.bf16 %v709_v21, %v708_v20  ;;  %v718_v20 = vld [vmem:[#allocation5 + $0x380] sm:$0xff]  ;;  %v719_v21 = vld [vmem:[#allocation5 + $0x388] sm:$0xff] }
  0xb3   : > { %2381 = vmatpush1.bf16.msra.mxu1 %v2380_v26  ;;  %v347_v26 = vrot.slane %v3412_v6, 1 }
  0xb4   : > { %2429 = vmatpush1.bf16.msra.mxu0 %v2428_v27  ;;  %2382 = vmatprep.subr.bf16.mxu1 %v4684_v0  ;;  %v2446_v27 = vpack.c.bf16 %v677_v18, %v676_v17  ;;  %v687_v17 = vld [vmem:[#allocation5 + $0x288] sm:$0xff] }
  0xb5   : > { %2430 = vmatprep.subr.bf16.mxu0 %v4684_v0  ;;  %v3458_v36 = vsel %vm334_vm0, %v345_v12, %v347_v26 }
  0xb7   : > { %2384 = vmatpush1.bf16.msra.mxu1 %v2383_v32  ;;  %v710_v32 = vld [vmem:[#allocation5 + $0x340] sm:$0xff] }
  0xb8   : > { %2432 = vmatpush1.bf16.msra.mxu0 %v2431_v33  ;;  %2385 = vmatprep.subr.bf16.mxu1 %v4684_v0  ;;  %v711_v33 = vld [vmem:[#allocation5 + $0x348] sm:$0xff] }
  0xb9   : > { %2433 = vmatprep.subr.bf16.mxu0 %v4684_v0  ;;  %v3467_v47 = vpack.c.bf16 %v711_v33, %v710_v32  ;;  %v689_v32 = vld [vmem:[#allocation5 + $0x298] sm:$0xff]  ;;  %v3548_v33 = vpack.c.bf16 %v719_v21, %v718_v20  ;;  %v694_v20 = vld [vmem:[#allocation5 + $0x2c0] sm:$0xff]  ;;  %v695_v21 = vld [vmem:[#allocation5 + $0x2c8] sm:$0xff] }
  0xbb   : > { %2387 = vmatpush1.bf16.msra.mxu1 %v2386_v39  ;;  %v2449_v39 = vpack.c.bf16 %v679_v30, %v678_v29  ;;  %v258_v29 = vld [vmem:[%s3326_s5 + $0x70] sm:$0x3]  ;;  %4775 = vst [vmem:[#allocation22_spill] sm:$0xff] %v3548_v33 }
  0xbc   : > { %2435 = vmatpush1.bf16.msra.mxu0 %v2434_v40  ;;  %2564 = vmatprep.subr.bf16.mxu1 %v4684_v0  ;;  %v253_v40 = vld [vmem:[%s3326_s5 + $0x48] sm:$0x3]  ;;  %v688_v30 = vld [vmem:[#allocation5 + $0x290] sm:$0xff] }
  0xbd   : > { %2436 = vmatprep.subr.bf16.mxu0 %v4684_v0  ;;  %v456_v63 = vrot.slane %v253_v40, 2 }
  0xbe   : > { %815 = vmatmul.mubr.f32.vlgmr.msra.gmra.mrb[0].mxu1 %v3349_v41  ;;  %v674_v41 = vld [vmem:[#allocation5 + $0x220] sm:$0xff] }
  0xbf   : > { %1040 = vmatmul.mubr.f32.vlgmr.msra.gmra.mrb[0].mxu0 %v442_v54  ;;  %819 = vmatprep.mubr.f32.mxu1 %v339_v55  ;;  %v2443_v16 = vpack.c.bf16 %v675_v7, %v674_v41  ;;  %v3482_v54 = vld [vmem:[%s3326_s5 + $0x60] sm:$0xff]  ;;  %v3506_v41 = vpack.c.bf16 %v715_v60, %v714_v59  ;;  %v465_v59 = vrot.slane %v258_v29, 2 }
  0xc0   : > { %2438 = vmatpush1.bf16.msra.mxu0 %v2437_v53  ;;  %1044 = vmatprep.mubr.f32.mxu0 %v3397_v56  ;;  %v351_v53 = vrot.slane %v253_v40, 1  ;;  %v682_v55 = vld [vmem:[#allocation5 + $0x260] sm:$0xff]  ;;  %v716_v7 = vld [vmem:[#allocation5 + $0x370] sm:$0xff]  ;;  %v461_v23 = vrot.slane %v3482_v54, 2 }
  0xc1   : > { %2439 = vmatprep.subr.bf16.mxu0 %v4684_v0  ;;  %2580 = vmatpush1.bf16.msra.mxu1 %v3404_v62  ;;  %v3527_v18 = vpack.c.bf16 %v717_v9, %v716_v7  ;;  %v724_v7 = vld [vmem:[#allocation5 + $0x3b0] sm:$0xff]  ;;  %v725_v9 = vld [vmem:[#allocation5 + $0x3b8] sm:$0xff] }
  0xc2   : > { %820 = vmatmul.mubr.f32.gmra.mrb[2].mxu1 %v3352_v42  ;;  %2565 = vmatprep.subr.bf16.mxu1 %v4684_v0  ;;  %v3426_v42 = vld [vmem:[%s3326_s5 + $0x40] sm:$0xff]  ;;  %v3557_v40 = vsel %vm439_vm1, %v459_v11, %v461_v23 }
  0xc3   : > { %1045 = vmatmul.mubr.f32.gmra.mrb[2].mxu0 %v444_v2  ;;  %824 = vmatprep.mubr.f32.mxu1 %v341_v3  ;;  %v2455_v2 = vpack.c.bf16 %v683_v57, %v682_v55  ;;  %v3502_v3 = vld [vmem:[%s3326_s5 + $0x68] sm:$0xff] }
  0xc4   : > { %1049 = vmatprep.mubr.f32.mxu0 %v3412_v6  ;;  %2441 = vmatpush1.bf16.msra.mxu0 %v2440_v4  ;;  %v684_v4 = vld [vmem:[#allocation5 + $0x270] sm:$0xff]  ;;  %v723_v55 = vld [vmem:[#allocation5 + $0x3a8] sm:$0xff] }
  0xc5   : > { %2442 = vmatprep.subr.bf16.mxu0 %v4684_v0  ;;  %2581 = vmatpush1.bf16.msra.mxu1 %v3416_v8 }
  0xc6   : > { %825 = vmatmul.mubr.f32.gmra.mrb[4].mxu1 %v3382_v38  ;;  %2566 = vmatprep.subr.bf16.mxu1 %v4684_v0  ;;  %v349_v38 = vrot.slane %v3426_v42, 1 }
  0xc7   : > { %1050 = vmatmul.mubr.f32.gmra.mrb[4].mxu0 %v446_v13  ;;  %829 = vmatprep.mubr.f32.mxu1 %v343_v14  ;;  %v2458_v14 = vpack.c.bf16 %v685_v5, %v684_v4  ;;  %v693_v4 = vld [vmem:[#allocation5 + $0x2b8] sm:$0xff] }
  0xc8   : > { %1054 = vmatprep.mubr.f32.mxu0 %v3426_v42  ;;  %2444 = vmatpush1.bf16.msra.mxu0 %v2443_v16  ;;  %v3479_v52 = vsel %vm334_vm0, %v347_v26, %v349_v38  ;;  %v3497_v44 = vsel %vm334_vm0, %v349_v38, %v351_v53  ;;  %v686_v16 = vld [vmem:[#allocation5 + $0x280] sm:$0xff]  ;;  %v721_v38 = vld [vmem:[#allocation5 + $0x398] sm:$0xff] }
  0xc9   : > { %2445 = vmatprep.subr.bf16.mxu0 %v4684_v0  ;;  %2582 = vmatpush1.bf16.msra.mxu1 %v3430_v19  ;;  %v3542_v26 = vld [vmem:[%s3326_s5 + $0x80] sm:$0xff] }
  0xca   : > { %830 = vmatmul.mubr.f32.gmra.mrb[6].mxu1 %v3390_v50  ;;  %2567 = vmatprep.subr.bf16.mxu1 %v4684_v0  ;;  %v454_v50 = vrot.slane %v3426_v42, 2 }
  0xcb   : > { %1055 = vmatmul.mubr.f32.gmra.mrb[6].mxu0 %v448_v24  ;;  %834 = vmatprep.mubr.f32.mxu1 %v3435_v22  ;;  %v3536_v24 = vsel %vm439_vm1, %v458_v10, %v459_v11  ;;  %v467_v10 = vrot.slane %v3523_v15, 2  ;;  %v468_v11 = vrot.slane %v3542_v26, 2 }
  0xcc   : > { %1059 = vmatprep.mubr.f32.mxu0 %v3443_v28  ;;  %2447 = vmatpush1.bf16.msra.mxu0 %v2446_v27  ;;  %v3493_v61 = vsel %vm439_vm1, %v452_v34, %v454_v50  ;;  %v3516_v12 = vsel %vm439_vm1, %v454_v50, %v456_v63  ;;  %v2461_v27 = vpack.c.bf16 %v687_v17, %v686_v16  ;;  %v720_v34 = vld [vmem:[#allocation5 + $0x390] sm:$0xff]  ;;  %v691_v50 = vld [vmem:[#allocation5 + $0x2a8] sm:$0xff]  ;;  %v362_v63 = vrot.slane %v3523_v15, 1 }
  0xcd   : > { %2448 = vmatprep.subr.bf16.mxu0 %v4684_v0  ;;  %2583 = vmatpush1.bf16.msra.mxu1 %v3447_v31  ;;  %v3567_v53 = vpack.c.bf16 %v721_v38, %v720_v34  ;;  %v3604_v17 = vld [vmem:[%s3326_s5 + $0xa0] sm:$0xff]  ;;  %v2473_v38 = vpack.c.bf16 %v695_v21, %v694_v20 }
  0xce   : > { %835 = vmatmul.mubr.f32.gmra.mrb[8].mxu1 %v3357_v45  ;;  %2568 = vmatprep.subr.bf16.mxu1 %v4684_v0  ;;  %v2452_v45 = vpack.c.bf16 %v681_v46, %v680_v43  ;;  %v360_v46 = vrot.slane %v258_v29, 1  ;;  %v3615_v29 = vsel %vm439_vm1, %v467_v10, %v468_v11  ;;  %v731_v10 = vld [vmem:[#allocation5 + $0x3e8] sm:$0xff]  ;;  %v371_v20 = vrot.slane %v3604_v17, 1 }
  0xcf   : > { %1060 = vmatmul.mubr.f32.gmra.mrb[8].mxu0 %v3455_v35  ;;  %839 = vmatprep.mubr.f32.mxu1 %v3458_v36  ;;  %4776 = vst [vmem:[#allocation23_spill] sm:$0xff] %v3567_v53 }
  0xd0   : > { %1064 = vmatprep.mubr.f32.mxu0 %v3461_v37  ;;  %2450 = vmatpush1.bf16.msra.mxu0 %v2449_v39  ;;  %v463_v39 = vrot.slane %v3502_v3, 2 }
  0xd1   : > { %2451 = vmatprep.subr.bf16.mxu0 %v4684_v0  ;;  %2584 = vmatpush1.bf16.msra.mxu1 %v3467_v47 }
  0xd2   : > { %840 = vmatmul.mubr.f32.gmra.mrb[10].mxu1 %v3397_v56  ;;  %2569 = vmatprep.subr.bf16.mxu1 %v4684_v0  ;;  %v354_v56 = vrot.slane %v3461_v37, 1  ;;  %v3574_v57 = vsel %vm439_vm1, %v461_v23, %v463_v39  ;;  %v3608_v23 = vpack.c.bf16 %v725_v9, %v724_v7  ;;  %v730_v9 = vld [vmem:[#allocation5 + $0x3e0] sm:$0xff] }
  0xd3   : > { %1065 = vmatmul.mubr.f32.gmra.mrb[10].mxu0 %v3476_v51  ;;  %844 = vmatprep.mubr.f32.mxu1 %v3479_v52 }
  0xd4   : > { %1069 = vmatprep.mubr.f32.mxu0 %v3482_v54  ;;  %2453 = vmatpush1.bf16.msra.mxu0 %v2452_v45  ;;  %v3519_v13 = vsel %vm334_vm0, %v353_v1, %v354_v56  ;;  %v722_v45 = vld [vmem:[#allocation5 + $0x3a0] sm:$0xff]  ;;  %v2467_v1 = vpack.c.bf16 %v691_v50, %v690_v49  ;;  %4778 = vst [vmem:[#allocation25_spill] sm:$0xff] %v3608_v23  ;;  %v728_v50 = vld [vmem:[#allocation5 + $0x3d0] sm:$0xff] }
  0xd5   : > { %2454 = vmatprep.subr.bf16.mxu0 %v4684_v0  ;;  %2585 = vmatpush1.bf16.msra.mxu1 %v3486_v58  ;;  %v3587_v5 = vpack.c.bf16 %v723_v55, %v722_v45  ;;  %v729_v45 = vld [vmem:[#allocation5 + $0x3d8] sm:$0xff] }
  0xd6   : > { %845 = vmatmul.mubr.f32.gmra.mrb[12].mxu1 %v3412_v6  ;;  %2570 = vmatprep.subr.bf16.mxu1 %v4684_v0  ;;  %v356_v6 = vrot.slane %v3482_v54, 1  ;;  %v3648_v7 = vpack.c.bf16 %v729_v45, %v728_v50  ;;  %v734_v50 = vld [vmem:[#allocation5 + $0x400] sm:$0xff]  ;;  %v735_v45 = vld [vmem:[#allocation5 + $0x408] sm:$0xff] }
  0xd7   : > { %1070 = vmatmul.mubr.f32.gmra.mrb[12].mxu0 %v3493_v61  ;;  %849 = vmatprep.mubr.f32.mxu1 %v3497_v44  ;;  %4777 = vst [vmem:[#allocation24_spill] sm:$0xff] %v3587_v5 }
  0xd8   : > { %1074 = vmatprep.mubr.f32.mxu0 %v3502_v3  ;;  %2456 = vmatpush1.bf16.msra.mxu0 %v2455_v2  ;;  %v3539_v25 = vsel %vm334_vm0, %v354_v56, %v356_v6  ;;  %v3583_v56 = vld [vmem:[%s3326_s5 + $0x90] sm:$0xff]  ;;  %4783 = vst [vmem:[#allocation30_spill] sm:$0xff] %v3648_v7 }
  0xd9   : > { %2457 = vmatprep.subr.bf16.mxu0 %v4684_v0  ;;  %2586 = vmatpush1.bf16.msra.mxu1 %v3506_v41  ;;  %v692_v2 = vld [vmem:[#allocation5 + $0x2b0] sm:$0xff]  ;;  %v367_v34 = vrot.slane %v3583_v56, 1  ;;  %v472_v55 = vrot.slane %v3583_v56, 2 }
  0xda   : > { %850 = vmatmul.mubr.f32.gmra.mrb[14].mxu1 %v3426_v42  ;;  %2571 = vmatprep.subr.bf16.mxu1 %v4684_v0  ;;  %v358_v42 = vrot.slane %v3502_v3, 1  ;;  %v2470_v16 = vpack.c.bf16 %v693_v4, %v692_v2  ;;  %v698_v2 = vld [vmem:[#allocation5 + $0x2e0] sm:$0xff]  ;;  %v699_v4 = vld [vmem:[#allocation5 + $0x2e8] sm:$0xff] }
  0xdb   : > { %1075 = vmatmul.mubr.f32.gmra.mrb[14].mxu0 %v3516_v12  ;;  %854 = vmatprep.mubr.f32.mxu1 %v3519_v13  ;;  %v2479_v21 = vpack.c.bf16 %v699_v4, %v698_v2  ;;  %v3685_v4 = vld [vmem:[%s3326_s5 + $0xc8] sm:$0xff] }
  0xdc   : > { %1079 = vmatprep.mubr.f32.mxu0 %v3523_v15  ;;  %2459 = vmatpush1.bf16.msra.mxu0 %v2458_v14  ;;  %v3560_v43 = vsel %vm334_vm0, %v356_v6, %v358_v42  ;;  %v3578_v60 = vsel %vm334_vm0, %v358_v42, %v360_v46  ;;  %v3597_v6 = vsel %vm439_vm1, %v463_v39, %v465_v59  ;;  %v726_v42 = vld [vmem:[#allocation5 + $0x3c0] sm:$0xff]  ;;  %v263_v39 = vld [vmem:[%s3326_s5 + $0x98] sm:$0x3]  ;;  %v696_v46 = vld [vmem:[#allocation5 + $0x2d0] sm:$0xff] }
  0xdd   : > { %2460 = vmatprep.subr.bf16.mxu0 %v4684_v0  ;;  %2587 = vmatpush1.bf16.msra.mxu1 %v3527_v18 }
  0xde   : > { %855 = vmatmul.mubr.f32.gmra.mrb[16].mxu1 %v3443_v28  ;;  %2572 = vmatprep.subr.bf16.mxu1 %v4684_v0  ;;  %v2464_v28 = vpack.c.bf16 %v689_v32, %v688_v30  ;;  %v3622_v32 = vld [vmem:[%s3326_s5 + $0xa8] sm:$0xff] }
  0xdf   : > { %1080 = vmatmul.mubr.f32.gmra.mrb[16].mxu0 %v3536_v24  ;;  %859 = vmatprep.mubr.f32.mxu1 %v3539_v25 }
  0xe0   : > { %1084 = vmatprep.mubr.f32.mxu0 %v3542_v26  ;;  %2462 = vmatpush1.bf16.msra.mxu0 %v2461_v27  ;;  %v727_v27 = vld [vmem:[#allocation5 + $0x3c8] sm:$0xff] }
  0xe1   : > { %2463 = vmatprep.subr.bf16.mxu0 %v4684_v0  ;;  %2588 = vmatpush1.bf16.msra.mxu1 %v3548_v33  ;;  %v3629_v49 = vpack.c.bf16 %v727_v27, %v726_v42  ;;  %v3664_v42 = vld [vmem:[%s3326_s5 + $0xb8] sm:$0xff]  ;;  %v700_v27 = vld [vmem:[#allocation5 + $0x2f0] sm:$0xff] }
  0xe2   : > { %860 = vmatmul.mubr.f32.gmra.mrb[18].mxu1 %v3461_v37  ;;  %2573 = vmatprep.subr.bf16.mxu1 %v4684_v0  ;;  %v363_v37 = vrot.slane %v3542_v26, 1 }
  0xe3   : > { %1085 = vmatmul.mubr.f32.gmra.mrb[18].mxu0 %v3557_v40  ;;  %864 = vmatprep.mubr.f32.mxu1 %v3560_v43  ;;  %4780 = vst [vmem:[#allocation27_spill] sm:$0xff] %v3629_v49 }
  0xe4   : > { %1089 = vmatprep.mubr.f32.mxu0 %v3563_v48  ;;  %2465 = vmatpush1.bf16.msra.mxu0 %v2464_v28  ;;  %v3600_v14 = vsel %vm334_vm0, %v362_v63, %v363_v37  ;;  %v697_v28 = vld [vmem:[#allocation5 + $0x2d8] sm:$0xff] }
  0xe5   : > { %2466 = vmatprep.subr.bf16.mxu0 %v4684_v0  ;;  %2589 = vmatpush1.bf16.msra.mxu1 %v3567_v53  ;;  %v278_v53 = vld [vmem:[%s3326_s5 + $0x110] sm:$0x3] }
  0xe6   : > { %865 = vmatmul.mubr.f32.gmra.mrb[20].mxu1 %v3482_v54  ;;  %2574 = vmatprep.subr.bf16.mxu1 %v4684_v0  ;;  %v365_v54 = vrot.slane %v3563_v48, 1 }
  0xe7   : > { %1090 = vmatmul.mubr.f32.gmra.mrb[20].mxu0 %v3574_v57  ;;  %869 = vmatprep.mubr.f32.mxu1 %v3578_v60 }
  0xe8   : > { %1094 = vmatprep.mubr.f32.mxu0 %v3583_v56  ;;  %2468 = vmatpush1.bf16.msra.mxu0 %v2467_v1  ;;  %v3619_v30 = vsel %vm334_vm0, %v363_v37, %v365_v54  ;;  %v3641_v63 = vsel %vm334_vm0, %v365_v54, %v367_v34  ;;  %v369_v37 = vrot.slane %v263_v39, 1  ;;  %v3644_v1 = vld [vmem:[%s3326_s5 + $0xb0] sm:$0xff]  ;;  %v474_v54 = vrot.slane %v263_v39, 2  ;;  %v733_v39 = vld [vmem:[#allocation5 + $0x3f8] sm:$0xff] }
  0xe9   : > { %2469 = vmatprep.subr.bf16.mxu0 %v4684_v0  ;;  %2590 = vmatpush1.bf16.msra.mxu1 %v3587_v5  ;;  %4779 = vst [vmem:[#allocation26_spill] sm:$0xff] %v3619_v30  ;;  %4782 = vst [vmem:[#allocation29_spill] sm:$0xff] %v3641_v63  ;;  %v3801_v5 = vld [vmem:[%s3326_s5 + $0x108] sm:$0xff] }
  0xea   : > { %870 = vmatmul.mubr.f32.gmra.mrb[22].mxu1 %v3502_v3  ;;  %2575 = vmatprep.subr.bf16.mxu1 %v4684_v0  ;;  %v470_v3 = vrot.slane %v3563_v48, 2  ;;  %4797 = vst [vmem:[#allocation44_spill] sm:$0xff] %v3801_v5 }
  0xeb   : > { %1095 = vmatmul.mubr.f32.gmra.mrb[22].mxu0 %v3597_v6  ;;  %874 = vmatprep.mubr.f32.mxu1 %v3600_v14 }
  0xec   : > { %1099 = vmatprep.mubr.f32.mxu0 %v3604_v17  ;;  %2471 = vmatpush1.bf16.msra.mxu0 %v2470_v16  ;;  %v3638_v59 = vsel %vm439_vm1, %v468_v11, %v470_v3  ;;  %v3655_v11 = vsel %vm439_vm1, %v470_v3, %v472_v55  ;;  %v3659_v16 = vsel %vm334_vm0, %v367_v34, %v369_v37  ;;  %v701_v3 = vld [vmem:[#allocation5 + $0x2f8] sm:$0xff]  ;;  %v732_v34 = vld [vmem:[#allocation5 + $0x3f0] sm:$0xff]  ;;  %v477_v37 = vrot.slane %v3622_v32, 2 }
  0xed   : > { %2472 = vmatprep.subr.bf16.mxu0 %v4684_v0  ;;  %2591 = vmatpush1.bf16.msra.mxu1 %v3608_v23  ;;  %4781 = vst [vmem:[#allocation28_spill] sm:$0xff] %v3638_v59  ;;  %4784 = vst [vmem:[#allocation31_spill] sm:$0xff] %v3655_v11  ;;  %v2482_v2 = vpack.c.bf16 %v701_v3, %v700_v27  ;;  %v268_v27 = vld [vmem:[%s3326_s5 + $0xc0] sm:$0x3] }
  0xee   : > { %875 = vmatmul.mubr.f32.gmra.mrb[24].mxu1 %v3523_v15  ;;  %2576 = vmatprep.subr.bf16.mxu1 %v4684_v0  ;;  %v2476_v15 = vpack.c.bf16 %v697_v28, %v696_v46  ;;  %4785 = vst [vmem:[#allocation32_spill] sm:$0xff] %v3659_v16  ;;  %v3675_v46 = vsel %vm439_vm1, %v472_v55, %v474_v54  ;;  %v476_v28 = vrot.slane %v3604_v17, 2  ;;  %v3786_v23 = vld [vmem:[%s3326_s5 + $0x100] sm:$0xff] }
  0xef   : > { %1100 = vmatmul.mubr.f32.gmra.mrb[24].mxu0 %v3615_v29  ;;  %879 = vmatprep.mubr.f32.mxu1 %v3619_v30  ;;  %4787 = vst [vmem:[#allocation34_spill] sm:$0xff] %v3675_v46  ;;  %v3689_v55 = vpack.c.bf16 %v733_v39, %v732_v34  ;;  %v378_v39 = vrot.slane %v268_v27, 1  ;;  %4795 = vst [vmem:[#allocation42_spill] sm:$0xff] %v3786_v23  ;;  %v3847_v30 = vld [vmem:[%s3326_s5 + $0x128] sm:$0xff] }
  0xf0   : > { %1104 = vmatprep.mubr.f32.mxu0 %v3622_v32  ;;  %2474 = vmatpush1.bf16.msra.mxu0 %v2473_v38  ;;  %v3668_v38 = vpack.c.bf16 %v731_v10, %v730_v9  ;;  %v3693_v9 = vpack.c.bf16 %v735_v45, %v734_v50  ;;  %v3699_v10 = vsel %vm439_vm1, %v476_v28, %v477_v37  ;;  %v3725_v28 = vld [vmem:[%s3326_s5 + $0xd8] sm:$0xff] }
  0xf1   : > { %2475 = vmatprep.subr.bf16.mxu0 %v4684_v0  ;;  %2592 = vmatpush1.bf16.msra.mxu1 %v3629_v49  ;;  %4788 = vst [vmem:[#allocation35_spill] sm:$0xff] %v3689_v55  ;;  %4789 = vst [vmem:[#allocation36_spill] sm:$0xff] %v3699_v10  ;;  %v273_v49 = vld [vmem:[%s3326_s5 + $0xe8] sm:$0x3] }
  0xf2   : > { %880 = vmatmul.mubr.f32.gmra.mrb[26].mxu1 %v3542_v26  ;;  %2577 = vmatprep.subr.bf16.mxu1 %v4684_v0  ;;  %v372_v26 = vrot.slane %v3622_v32, 1  ;;  %4786 = vst [vmem:[#allocation33_spill] sm:$0xff] %v3668_v38 }
  0xf3   : > { %1105 = vmatmul.mubr.f32.gmra.mrb[26].mxu0 %v3638_v59  ;;  %884 = vmatprep.mubr.f32.mxu1 %v3641_v63  ;;  %v3832_v63 = vld [vmem:[%s3326_s5 + $0x120] sm:$0xff] }
  0xf4   : > { %1109 = vmatprep.mubr.f32.mxu0 %v3644_v1  ;;  %2477 = vmatpush1.bf16.msra.mxu0 %v2476_v15  ;;  %v374_v15 = vrot.slane %v3644_v1, 1  ;;  %v399_v59 = vrot.slane %v3832_v63, 1 }
  0xf5   : > { %2478 = vmatprep.subr.bf16.mxu0 %v4684_v0  ;;  %2593 = vmatpush1.bf16.msra.mxu1 %v3648_v7 }
  0xf6   : > { %885 = vmatmul.mubr.f32.gmra.mrb[28].mxu1 %v3563_v48  ;;  %2578 = vmatprep.subr.bf16.mxu1 %v4684_v0  ;;  %v3680_v48 = vsel %vm334_vm0, %v371_v20, %v372_v26  ;;  %v3702_v54 = vsel %vm334_vm0, %v372_v26, %v374_v15  ;;  %v479_v20 = vrot.slane %v3644_v1, 2  ;;  %v481_v26 = vrot.slane %v3664_v42, 2 }
  0xf7   : > { %1110 = vmatmul.mubr.f32.gmra.mrb[28].mxu0 %v3655_v11  ;;  %889 = vmatprep.mubr.f32.mxu1 %v3659_v16  ;;  %v396_v11 = vrot.slane %v278_v53, 1 }
  0xf8   : > { %1114 = vmatprep.mubr.f32.mxu0 %v3664_v42  ;;  %2480 = vmatpush1.bf16.msra.mxu0 %v2479_v21  ;;  %v3707_v21 = vld [vmem:[%s3326_s5 + $0xd0] sm:$0xff]  ;;  %v3719_v3 = vsel %vm439_vm1, %v477_v37, %v479_v20  ;;  %v3731_v50 = vsel %vm439_vm1, %v479_v20, %v481_v26  ;;  %v483_v37 = vrot.slane %v268_v27, 2  ;;  %v485_v20 = vrot.slane %v3685_v4, 2 }
  0xf9   : > { %2481 = vmatprep.subr.bf16.mxu0 %v4684_v0  ;;  %2594 = vmatpush1.bf16.msra.mxu1 %v3668_v38  ;;  %4790 = vst [vmem:[#allocation37_spill] sm:$0xff] %v3719_v3  ;;  %4791 = vst [vmem:[#allocation38_spill] sm:$0xff] %v3731_v50  ;;  %v3756_v38 = vld [vmem:[%s3326_s5 + $0xf0] sm:$0xff] }
  0xfa   : > { %890 = vmatmul.mubr.f32.gmra.mrb[30].mxu1 %v3583_v56  ;;  %2579 = vmatprep.subr.bf16.mxu1 %v4684_v0  ;;  %v376_v56 = vrot.slane %v3664_v42, 1 }
  0xfb   : > { %1115 = vmatmul.mubr.f32.gmra.mrb[30].mxu0 %v3675_v46  ;;  %894 = vmatprep.mubr.f32.mxu1 %v3680_v48  ;;  %v3817_v46 = vld [vmem:[%s3326_s5 + $0x118] sm:$0xff] }
  0xfc   : > { %1119 = vmatprep.mubr.f32.mxu0 %v3685_v4  ;;  %2483 = vmatpush1.bf16.msra.mxu0 %v2482_v2  ;;  %v3722_v34 = vsel %vm334_vm0, %v374_v15, %v376_v56  ;;  %v3735_v45 = vsel %vm334_vm0, %v376_v56, %v378_v39  ;;  %v380_v15 = vrot.slane %v3685_v4, 1  ;;  %v381_v2 = vrot.slane %v3707_v21, 1 }
  0xfd   : > { %2595 = vmatpush1.bf16.msra.mxu1 %v3689_v55  ;;  %2484 = vmatprep.subr.bf16.mxu0 %v4684_v0  ;;  %v3740_v0 = vld [vmem:[%s3326_s5 + $0xe0] sm:$0xff]  ;;  %v3748_v56 = vsel %vm439_vm1, %v481_v26, %v483_v37  ;;  %v486_v39 = vrot.slane %v3707_v21, 2  ;;  %v383_v55 = vrot.slane %v3725_v28, 1  ;;  %v398_v33 = vrot.slane %v3817_v46, 1 }
  0xfe   : > { %895 = vmatmul.mubr.f32.gmra.mrb[32].mxu1 %v3604_v17  ;;  %2533 = vmatprep.subr.bf16.mxu1 %v3693_v9  ;;  %4792 = vst [vmem:[#allocation39_spill] sm:$0xff] %v3748_v56  ;;  %v3751_v27 = vsel %vm334_vm0, %v380_v15, %v381_v2  ;;  %v488_v15 = vrot.slane %v3725_v28, 2  ;;  %v385_v7 = vrot.slane %v3740_v0, 1 }
  0xff   : > { %1120 = vmatmul.mubr.f32.gmra.mrb[32].mxu0 %v3699_v10  ;;  %899 = vmatprep.mubr.f32.mxu1 %v3702_v54  ;;  %v3763_v26 = vsel %vm439_vm1, %v485_v20, %v486_v39  ;;  %v3766_v37 = vsel %vm334_vm0, %v381_v2, %v383_v55  ;;  %v389_v10 = vrot.slane %v3756_v38, 1 }
 0x100   : > { %1124 = vmatprep.mubr.f32.mxu0 %v3707_v21  ;;  %4793 = vst [vmem:[#allocation40_spill] sm:$0xff] %v3763_v26  ;;  %v3779_v20 = vsel %vm439_vm1, %v486_v39, %v488_v15  ;;  %v3782_v2 = vsel %vm334_vm0, %v383_v55, %v385_v7 }
 0x101   : > { %4794 = vst [vmem:[#allocation41_spill] sm:$0xff] %v3779_v20 }
 0x102   : > { %900 = vmatmul.mubr.f32.gmra.mrb[34].mxu1 %v3622_v32 }
 0x103   : > { %1125 = vmatmul.mubr.f32.gmra.mrb[34].mxu0 %v3719_v3  ;;  %904 = vmatprep.mubr.f32.mxu1 %v3722_v34  ;;  %v387_v3 = vrot.slane %v273_v49, 1 }
 0x104   : > { %1129 = vmatprep.mubr.f32.mxu0 %v3725_v28 }
 0x105   : > { %v3796_v55 = vsel %vm334_vm0, %v385_v7, %v387_v3  ;;  %v494_v3 = vrot.slane %v3756_v38, 2 }
 0x106   : > { %905 = vmatmul.mubr.f32.gmra.mrb[36].mxu1 %v3644_v1 }
 0x107   : > { %1130 = vmatmul.mubr.f32.gmra.mrb[36].mxu0 %v3731_v50  ;;  %909 = vmatprep.mubr.f32.mxu1 %v3735_v45  ;;  %v3771_v50 = vld [vmem:[%s3326_s5 + $0xf8] sm:$0xff] }
 0x108   : > { %1134 = vmatprep.mubr.f32.mxu0 %v3740_v0  ;;  %v390_v16 = vrot.slane %v3771_v50, 1 }
 0x10a   : > { %910 = vmatmul.mubr.f32.gmra.mrb[38].mxu1 %v3664_v42  ;;  %v3811_v7 = vsel %vm334_vm0, %v389_v10, %v390_v16 }
 0x10b   : > { %1135 = vmatmul.mubr.f32.gmra.mrb[38].mxu0 %v3748_v56  ;;  %914 = vmatprep.mubr.f32.mxu1 %v3751_v27  ;;  %v490_v56 = vrot.slane %v3740_v0, 2 }
 0x10c   : > { %1139 = vmatprep.mubr.f32.mxu0 %v3756_v38 }
 0x10d   : > { %v3793_v39 = vsel %vm439_vm1, %v488_v15, %v490_v56  ;;  %v495_v15 = vrot.slane %v3771_v50, 2 }
 0x10e   : > { %915 = vmatmul.mubr.f32.gmra.mrb[40].mxu1 %v3685_v4  ;;  %4796 = vst [vmem:[#allocation43_spill] sm:$0xff] %v3793_v39 }
 0x10f   : > { %1140 = vmatmul.mubr.f32.gmra.mrb[40].mxu0 %v3763_v26  ;;  %919 = vmatprep.mubr.f32.mxu1 %v3766_v37  ;;  %v492_v26 = vrot.slane %v273_v49, 2  ;;  %v3824_v10 = vsel %vm439_vm1, %v494_v3, %v495_v15  ;;  %v499_v3 = vrot.slane %v3801_v5, 2 }
 0x110   : > { %1144 = vmatprep.mubr.f32.mxu0 %v3771_v50  ;;  %4799 = vst [vmem:[#allocation46_spill] sm:$0xff] %v3824_v10 }
 0x111   : > { %v3807_v49 = vsel %vm439_vm1, %v490_v56, %v492_v26  ;;  %v497_v26 = vrot.slane %v3786_v23, 2 }
 0x112   : > { %920 = vmatmul.mubr.f32.gmra.mrb[42].mxu1 %v3707_v21  ;;  %4798 = vst [vmem:[#allocation45_spill] sm:$0xff] %v3807_v49 }
 0x113   : > { %1145 = vmatmul.mubr.f32.gmra.mrb[42].mxu0 %v3779_v20  ;;  %924 = vmatprep.mubr.f32.mxu1 %v3782_v2  ;;  %v392_v20 = vrot.slane %v3786_v23, 1 }
 0x114   : > { %1149 = vmatprep.mubr.f32.mxu0 %v3786_v23 }
 0x115   : > { %v3827_v56 = vsel %vm334_vm0, %v390_v16, %v392_v20  ;;  %v3841_v16 = vsel %vm439_vm1, %v495_v15, %v497_v26 }
 0x116   : > { %925 = vmatmul.mubr.f32.gmra.mrb[44].mxu1 %v3725_v28  ;;  %4800 = vst [vmem:[#allocation47_spill] sm:$0xff] %v3827_v56  ;;  %4801 = vst [vmem:[#allocation48_spill] sm:$0xff] %v3841_v16 }
 0x117   : > { %1150 = vmatmul.mubr.f32.gmra.mrb[44].mxu0 %v3793_v39  ;;  %929 = vmatprep.mubr.f32.mxu1 %v3796_v55  ;;  %v394_v39 = vrot.slane %v3801_v5, 1 }
 0x118   : > { %1154 = vmatprep.mubr.f32.mxu0 %v3801_v5 }
 0x119   : > { %v3857_v15 = vsel %vm334_vm0, %v394_v39, %v396_v11  ;;  %v3873_v11 = vsel %vm334_vm0, %v398_v33, %v399_v59 }
 0x11a   : > { %930 = vmatmul.mubr.f32.gmra.mrb[46].mxu1 %v3740_v0  ;;  %4803 = vst [vmem:[#allocation50_spill] sm:$0xff] %v3857_v15  ;;  %4805 = vst [vmem:[#allocation52_spill] sm:$0xff] %v3873_v11 }
 0x11b   : > { %1155 = vmatmul.mubr.f32.gmra.mrb[46].mxu0 %v3807_v49  ;;  %934 = vmatprep.mubr.f32.mxu1 %v3811_v7  ;;  %v3844_v49 = vsel %vm334_vm0, %v392_v20, %v394_v39  ;;  %v501_v20 = vrot.slane %v278_v53, 2  ;;  %v504_v39 = vrot.slane %v3832_v63, 2 }
 0x11c   : > { %1159 = vmatprep.mubr.f32.mxu0 %v3817_v46 }
 0x11d   : > { %v3870_v53 = vsel %vm439_vm1, %v499_v3, %v501_v20  ;;  %v506_v20 = vrot.slane %v3847_v30, 2 }
 0x11e   : > { %935 = vmatmul.mubr.f32.gmra.mrb[48].mxu1 %v3756_v38  ;;  %4804 = vst [vmem:[#allocation51_spill] sm:$0xff] %v3870_v53 }
 0x11f   : > { %1160 = vmatmul.mubr.f32.gmra.mrb[48].mxu0 %v3824_v10  ;;  %939 = vmatprep.mubr.f32.mxu1 %v3827_v56  ;;  %v3853_v10 = vsel %vm439_vm1, %v497_v26, %v499_v3  ;;  %v3862_v56 = vld [vmem:[%s3326_s5 + $0x130] sm:$0xff]  ;;  %v503_v26 = vrot.slane %v3817_v46, 2 }
 0x120   : > { %1164 = vmatprep.mubr.f32.mxu0 %v3832_v63  ;;  %4802 = vst [vmem:[#allocation49_spill] sm:$0xff] %v3853_v10 }
 0x121   : > { %v3885_v3 = vsel %vm439_vm1, %v503_v26, %v504_v39  ;;  %v3901_v26 = vsel %vm439_vm1, %v504_v39, %v506_v20 }
 0x122   : > { %940 = vmatmul.mubr.f32.gmra.mrb[50].mxu1 %v3771_v50  ;;  %4807 = vst [vmem:[#allocation54_spill] sm:$0xff] %v3885_v3  ;;  %4809 = vst [vmem:[#allocation56_spill] sm:$0xff] %v3901_v26 }
 0x123   : > { %1165 = vmatmul.mubr.f32.gmra.mrb[50].mxu0 %v3841_v16  ;;  %944 = vmatprep.mubr.f32.mxu1 %v3844_v49  ;;  %v401_v16 = vrot.slane %v3847_v30, 1 }
 0x124   : > { %1169 = vmatprep.mubr.f32.mxu0 %v3847_v30 }
 0x125   : > { %v3888_v33 = vsel %vm334_vm0, %v399_v59, %v401_v16 }
 0x126   : > { %945 = vmatmul.mubr.f32.gmra.mrb[52].mxu1 %v3786_v23  ;;  %v3878_v23 = vld [vmem:[%s3326_s5 + $0x140] sm:$0xff] }
 0x127   : > { %1170 = vmatmul.mubr.f32.gmra.mrb[52].mxu0 %v3853_v10  ;;  %949 = vmatprep.mubr.f32.mxu1 %v3857_v15  ;;  %4806 = vst [vmem:[#allocation53_spill] sm:$0xff] %v3878_v23  ;;  %v403_v10 = vrot.slane %v3862_v56, 1  ;;  %v3893_v15 = vld [vmem:[%s3326_s5 + $0x148] sm:$0xff] }
 0x128   : > { %1174 = vmatprep.mubr.f32.mxu0 %v3862_v56  ;;  %4808 = vst [vmem:[#allocation55_spill] sm:$0xff] %v3893_v15 }
 0x129   : > { %v3904_v59 = vsel %vm334_vm0, %v401_v16, %v403_v10 }
 0x12a   : > { %950 = vmatmul.mubr.f32.gmra.mrb[54].mxu1 %v3801_v5  ;;  %v283_v5 = vld [vmem:[%s3326_s5 + $0x138] sm:$0x3] }
 0x12b   : > { %1175 = vmatmul.mubr.f32.gmra.mrb[54].mxu0 %v3870_v53  ;;  %954 = vmatprep.mubr.f32.mxu1 %v3873_v11  ;;  %v508_v53 = vrot.slane %v3862_v56, 2  ;;  %v3908_v11 = vld [vmem:[%s3326_s5 + $0x150] sm:$0xff]  ;;  %v510_v16 = vrot.slane %v283_v5, 2 }
 0x12c   : > { %1179 = vmatprep.mubr.f32.mxu0 %v3878_v23  ;;  %v405_v23 = vrot.slane %v283_v5, 1  ;;  %v736_v5 = vld [vmem:[#allocation5 + $0x410] sm:$0xff] }
 0x12e   : > { %955 = vmatmul.mubr.f32.gmra.mrb[56].mxu1 %v3817_v46  ;;  %v3918_v39 = vsel %vm334_vm0, %v403_v10, %v405_v23  ;;  %v737_v23 = vld [vmem:[#allocation5 + $0x418] sm:$0xff] }
 0x12f   : > { %1180 = vmatmul.mubr.f32.gmra.mrb[56].mxu0 %v3885_v3  ;;  %959 = vmatprep.mubr.f32.mxu1 %v3888_v33  ;;  %v3915_v3 = vsel %vm439_vm1, %v506_v20, %v508_v53  ;;  %v2536_v10 = vpack.c.bf16 %v737_v23, %v736_v5  ;;  %v738_v20 = vld [vmem:[#allocation5 + $0x420] sm:$0xff]  ;;  %v4821_v5 = vld [vmem:[#allocation24_spill] sm:$0xff] }
 0x130   : > { %1184 = vmatprep.mubr.f32.mxu0 %v3893_v15  ;;  %v3921_v15 = vld [vmem:[%s3326_s5 + $0x158] sm:$0xff] }
 0x131   : > { %v4823_v23 = vld [vmem:[#allocation32_spill] sm:$0xff] }
 0x132   : > { %960 = vmatmul.mubr.f32.gmra.mrb[58].mxu1 %v3832_v63 }
 0x133   : > { %1185 = vmatmul.mubr.f32.gmra.mrb[58].mxu0 %v3901_v26  ;;  %964 = vmatprep.mubr.f32.mxu1 %v3904_v59  ;;  %v3928_v26 = vsel %vm439_vm1, %v508_v53, %v510_v16  ;;  %v739_v53 = vld [vmem:[#allocation5 + $0x428] sm:$0xff]  ;;  %v4810_v16 = vmov 0.0|0.0  }
 0x134   : > { %1189 = vmatprep.mubr.f32.mxu0 %v3908_v11 }
 0x136   : > { %965 = vmatmul.mubr.f32.gmra.mrb[60].mxu1 %v3847_v30 }
 0x137   : > { %1190 = vmatmul.mubr.f32.gmra.mrb[60].mxu0 %v3915_v3  ;;  %969 = vmatprep.mubr.f32.mxu1 %v3918_v39 }
 0x138   : > { %1194 = vmatprep.mubr.f32.mxu0 %v3921_v15 }
 0x13a   : > { %970 = vmatmul.mubr.f32.gmra.mrb[62].mxu1 %v3862_v56 }
 0x13b   : > { %1195 = vmatmul.mubr.f32.gmra.mrb[62].mxu0 %v3928_v26  ;;  %1529 = vmatprep.mubr.f32.mxu1 %v3680_v48 }
 0x13c   : > { %1264 = vmatprep.mubr.f32.mxu0 %v3455_v35  ;;  %v2540_v35 = vpack.c.bf16 %v739_v53, %v738_v20  ;;  %v4825_v20 = vld [vmem:[#allocation36_spill] sm:$0xff]  ;;  %v4826_v53 = vld [vmem:[#allocation25_spill] sm:$0xff] }
 0x13e   : > { %1530 = vmatmul.mubr.f32.vlgmr.msra.gmra.mrb[64].mxu1 %v3604_v17  ;;  %v741_v17 = vld [vmem:[#allocation5 + $0x438] sm:$0xff] }
 0x13f   : > { %1265 = vmatmul.mubr.f32.vlgmr.msra.gmra.mrb[0].mxu0 %v3435_v22  ;;  %1534 = vmatprep.mubr.f32.mxu1 %v3702_v54  ;;  %v740_v22 = vld [vmem:[#allocation5 + $0x430] sm:$0xff] }
 0x140   : > { %2486 = vmatpush1.bf16.msra.mxu0 %v3404_v62  ;;  %1269 = vmatprep.mubr.f32.mxu0 %v3476_v51  ;;  %v2544_v62 = vpack.c.bf16 %v741_v17, %v740_v22  ;;  %v743_v51 = vld [vmem:[#allocation5 + $0x448] sm:$0xff] }
 0x141   : > { %2487 = vmatprep.subr.bf16.mxu0 %v4810_v16  ;;  %2535 = vmatpush3.bf16.msra.mxu1 %v3693_v9  ;;  %v4818_v9 = vld [vmem:[#allocation29_spill] sm:$0xff]  ;;  %v4828_v22 = vld [vmem:[#allocation27_spill] sm:$0xff]  ;;  %v4829_v17 = vld [vmem:[#allocation38_spill] sm:$0xff] }
 0x142   : > { %1535 = vmatmul.mubr.f32.gmra.mrb[66].mxu1 %v3622_v32  ;;  %2537 = vmatprep.subr.bf16.mxu1 %v2536_v10  ;;  %v748_v32 = vld [vmem:[#allocation5 + $0x470] sm:$0xff] }
 0x143   : > { %1270 = vmatmul.mubr.f32.gmra.mrb[2].mxu0 %v3458_v36  ;;  %1539 = vmatprep.mubr.f32.mxu1 %v3722_v34  ;;  %v742_v36 = vld [vmem:[#allocation5 + $0x440] sm:$0xff] }
 0x144   : > { %1274 = vmatprep.mubr.f32.mxu0 %v3493_v61  ;;  %2489 = vmatpush1.bf16.msra.mxu0 %v3416_v8  ;;  %v2548_v8 = vpack.c.bf16 %v743_v51, %v742_v36  ;;  %v745_v61 = vld [vmem:[#allocation5 + $0x458] sm:$0xff]  ;;  %v4831_v36 = vld [vmem:[#allocation55_spill] sm:$0xff]  ;;  %v4832_v51 = vld [vmem:[#allocation30_spill] sm:$0xff] }
 0x145   : > { %2490 = vmatprep.subr.bf16.mxu0 %v4810_v16  ;;  %2539 = vmatpush3.bf16.msra.mxu1 %v2536_v10  ;;  %v4824_v10 = vld [vmem:[#allocation52_spill] sm:$0xff] }
 0x146   : > { %1540 = vmatmul.mubr.f32.gmra.mrb[68].mxu1 %v3644_v1  ;;  %2541 = vmatprep.subr.bf16.mxu1 %v2540_v35  ;;  %v749_v1 = vld [vmem:[#allocation5 + $0x478] sm:$0xff] }
 0x147   : > { %1275 = vmatmul.mubr.f32.gmra.mrb[4].mxu0 %v3479_v52  ;;  %1544 = vmatprep.mubr.f32.mxu1 %v3735_v45  ;;  %v744_v52 = vld [vmem:[#allocation5 + $0x450] sm:$0xff] }
 0x148   : > { %1279 = vmatprep.mubr.f32.mxu0 %v3516_v12  ;;  %2492 = vmatpush1.bf16.msra.mxu0 %v3430_v19  ;;  %v2552_v19 = vpack.c.bf16 %v745_v61, %v744_v52  ;;  %v747_v12 = vld [vmem:[#allocation5 + $0x468] sm:$0xff]  ;;  %v4834_v52 = vld [vmem:[#allocation33_spill] sm:$0xff]  ;;  %v554_v61 = vrot.slane %v3921_v15, 1 }
 0x149   : > { %2493 = vmatprep.subr.bf16.mxu0 %v4810_v16  ;;  %2543 = vmatpush3.bf16.msra.mxu1 %v2540_v35  ;;  %v4827_v35 = vld [vmem:[#allocation37_spill] sm:$0xff] }
 0x14a   : > { %1545 = vmatmul.mubr.f32.gmra.mrb[70].mxu1 %v3664_v42  ;;  %2545 = vmatprep.subr.bf16.mxu1 %v2544_v62  ;;  %v4814_v42 = vld [vmem:[#allocation26_spill] sm:$0xff] }
 0x14b   : > { %1280 = vmatmul.mubr.f32.gmra.mrb[6].mxu0 %v3497_v44  ;;  %1549 = vmatprep.mubr.f32.mxu1 %v3751_v27  ;;  %v746_v44 = vld [vmem:[#allocation5 + $0x460] sm:$0xff] }
 0x14c   : > { %1284 = vmatprep.mubr.f32.mxu0 %v3536_v24  ;;  %2495 = vmatpush1.bf16.msra.mxu0 %v3447_v31  ;;  %v2556_v31 = vpack.c.bf16 %v747_v12, %v746_v44  ;;  %v4041_v44 = vld [vmem:[%s3326_s5 + $0x160] sm:$0x3]  ;;  %v4052_v12 = vld [vmem:[%s3326_s5 + $0x168] sm:$0xff] }
 0x14d   : > { %2496 = vmatprep.subr.bf16.mxu0 %v4810_v16  ;;  %2547 = vmatpush3.bf16.msra.mxu1 %v2544_v62  ;;  %v4830_v62 = vld [vmem:[#allocation53_spill] sm:$0xff] }
 0x14e   : > { %1550 = vmatmul.mubr.f32.gmra.mrb[72].mxu1 %v3685_v4  ;;  %2549 = vmatprep.subr.bf16.mxu1 %v2548_v8  ;;  %v4816_v4 = vld [vmem:[#allocation23_spill] sm:$0xff] }
 0x14f   : > { %1285 = vmatmul.mubr.f32.gmra.mrb[8].mxu0 %v3519_v13  ;;  %1554 = vmatprep.mubr.f32.mxu1 %v3766_v37 }
 0x150   : > { %1289 = vmatprep.mubr.f32.mxu0 %v3557_v40  ;;  %2498 = vmatpush1.bf16.msra.mxu0 %v3467_v47  ;;  %v2560_v47 = vpack.c.bf16 %v749_v1, %v748_v32  ;;  %v580_v1 = vrot.slane %v4052_v12, 1 }
 0x151   : > { %2499 = vmatprep.subr.bf16.mxu0 %v4810_v16  ;;  %2551 = vmatpush3.bf16.msra.mxu1 %v2548_v8  ;;  %v552_v8 = vrot.slane %v3908_v11, 1 }
 0x152   : > { %1555 = vmatmul.mubr.f32.gmra.mrb[74].mxu1 %v3707_v21  ;;  %2553 = vmatprep.subr.bf16.mxu1 %v2552_v19  ;;  %v4819_v21 = vld [vmem:[#allocation50_spill] sm:$0xff] }
 0x153   : > { %1290 = vmatmul.mubr.f32.gmra.mrb[10].mxu0 %v3539_v25  ;;  %1559 = vmatprep.mubr.f32.mxu1 %v3782_v2 }
 0x154   : > { %1294 = vmatprep.mubr.f32.mxu0 %v3574_v57  ;;  %2501 = vmatpush1.bf16.msra.mxu0 %v3486_v58  ;;  %v4811_v58 = vld [vmem:[#allocation47_spill] sm:$0xff] }
 0x155   : > { %2502 = vmatprep.subr.bf16.mxu0 %v4810_v16  ;;  %2555 = vmatpush3.bf16.msra.mxu1 %v2552_v19  ;;  %v4836_v19 = vld [vmem:[#allocation35_spill] sm:$0xff] }
 0x156   : > { %1560 = vmatmul.mubr.f32.gmra.mrb[76].mxu1 %v3725_v28  ;;  %2557 = vmatprep.subr.bf16.mxu1 %v2556_v31  ;;  %v4820_v28 = vld [vmem:[#allocation34_spill] sm:$0xff] }
 0x157   : > { %1295 = vmatmul.mubr.f32.gmra.mrb[12].mxu0 %v3560_v43  ;;  %1564 = vmatprep.mubr.f32.mxu1 %v3796_v55 }
 0x158   : > { %1299 = vmatprep.mubr.f32.mxu0 %v3597_v6  ;;  %2504 = vmatpush1.bf16.msra.mxu0 %v3506_v41  ;;  %v4812_v41 = vld [vmem:[#allocation28_spill] sm:$0xff] }
 0x159   : > { %2505 = vmatprep.subr.bf16.mxu0 %v4810_v16  ;;  %2559 = vmatpush3.bf16.msra.mxu1 %v2556_v31  ;;  %v4055_v31 = vld [vmem:[%s3326_s5 + $0x170] sm:$0xff] }
 0x15a   : > { %1565 = vmatmul.mubr.f32.gmra.mrb[78].mxu1 %v3740_v0  ;;  %2561 = vmatprep.subr.bf16.mxu1 %v2560_v47  ;;  %v4813_v0 = vld [vmem:[#allocation22_spill] sm:$0xff] }
 0x15b   : > { %1300 = vmatmul.mubr.f32.gmra.mrb[14].mxu0 %v3578_v60  ;;  %1569 = vmatprep.mubr.f32.mxu1 %v3811_v7 }
 0x15c   : > { %1304 = vmatprep.mubr.f32.mxu0 %v3615_v29  ;;  %2507 = vmatpush1.bf16.msra.mxu0 %v3527_v18  ;;  %v4815_v18 = vld [vmem:[#allocation31_spill] sm:$0xff] }
 0x15d   : > { %2508 = vmatprep.subr.bf16.mxu0 %v4810_v16  ;;  %2563 = vmatpush3.bf16.msra.mxu1 %v2560_v47  ;;  %v581_v47 = vrot.slane %v4055_v31, 1 }
 0x15e   : > { %1570 = vmatmul.mubr.f32.gmra.mrb[80].mxu1 %v3756_v38  ;;  %v4817_v38 = vld [vmem:[#allocation42_spill] sm:$0xff] }
 0x15f   : > { %1305 = vmatmul.mubr.f32.gmra.mrb[16].mxu0 %v3600_v14  ;;  %1574 = vmatprep.mubr.f32.mxu1 %v4811_v58 }
 0x160   : > { %1309 = vmatprep.mubr.f32.mxu0 %v4812_v41  ;;  %2510 = vmatpush1.bf16.msra.mxu0 %v4813_v0  ;;  %v4067_v0 = vld [vmem:[%s3326_s5 + $0x178] sm:$0xff] }
 0x161   : > { %2511 = vmatprep.subr.bf16.mxu0 %v4810_v16 }
 0x162   : > { %1575 = vmatmul.mubr.f32.gmra.mrb[82].mxu1 %v3771_v50  ;;  %v4822_v50 = vld [vmem:[#allocation44_spill] sm:$0xff] }
 0x163   : > { %1310 = vmatmul.mubr.f32.gmra.mrb[18].mxu0 %v4814_v42  ;;  %1579 = vmatprep.mubr.f32.mxu1 %v3844_v49 }
 0x164   : > { %1314 = vmatprep.mubr.f32.mxu0 %v4815_v18  ;;  %2513 = vmatpush1.bf16.msra.mxu0 %v4816_v4  ;;  %v582_v4 = vsel %vm334_vm0, %v580_v1, %v581_v47 }
 0x165   : > { %2514 = vmatprep.subr.bf16.mxu0 %v4810_v16 }
 0x166   : > { %1580 = vmatmul.mubr.f32.gmra.mrb[84].mxu1 %v4817_v38  ;;  %v583_v38 = vrot.slane %v4067_v0, 1 }
 0x167   : > { %1315 = vmatmul.mubr.f32.gmra.mrb[20].mxu0 %v4818_v9  ;;  %1584 = vmatprep.mubr.f32.mxu1 %v4819_v21 }
 0x168   : > { %1319 = vmatprep.mubr.f32.mxu0 %v4820_v28  ;;  %2516 = vmatpush1.bf16.msra.mxu0 %v4821_v5  ;;  %v4076_v5 = vld [vmem:[%s3326_s5 + $0x180] sm:$0xff] }
 0x169   : > { %2517 = vmatprep.subr.bf16.mxu0 %v4810_v16 }
 0x16a   : > { %1585 = vmatmul.mubr.f32.gmra.mrb[86].mxu1 %v4822_v50  ;;  %v4840_v50 = vld [vmem:[#allocation46_spill] sm:$0xff] }
 0x16b   : > { %1320 = vmatmul.mubr.f32.gmra.mrb[22].mxu0 %v4823_v23  ;;  %1589 = vmatprep.mubr.f32.mxu1 %v4824_v10 }
 0x16c   : > { %1324 = vmatprep.mubr.f32.mxu0 %v4825_v20  ;;  %2519 = vmatpush1.bf16.msra.mxu0 %v4826_v53  ;;  %v584_v53 = vsel %vm334_vm0, %v581_v47, %v583_v38  ;;  %v4844_v47 = vld [vmem:[#allocation54_spill] sm:$0xff] }
 0x16d   : > { %2520 = vmatprep.subr.bf16.mxu0 %v4810_v16 }
 0x16e   : > { %1590 = vmatmul.mubr.f32.gmra.mrb[88].mxu1 %v3817_v46  ;;  %v549_v46 = vrot.slane %v4830_v62, 1 }
 0x16f   : > { %1325 = vmatmul.mubr.f32.gmra.mrb[24].mxu0 %v3680_v48  ;;  %1594 = vmatprep.mubr.f32.mxu1 %v3888_v33  ;;  %v550_v48 = vrot.slane %v4831_v36, 1 }
 0x170   : > { %1329 = vmatprep.mubr.f32.mxu0 %v4827_v35  ;;  %2522 = vmatpush1.bf16.msra.mxu0 %v4828_v22  ;;  %v4084_v22 = vld [vmem:[%s3326_s5 + $0x188] sm:$0x3] }
 0x171   : > { %2523 = vmatprep.subr.bf16.mxu0 %v4810_v16 }
 0x172   : > { %1595 = vmatmul.mubr.f32.gmra.mrb[90].mxu1 %v3832_v63  ;;  %v4833_v63 = vld [vmem:[#allocation39_spill] sm:$0xff] }
 0x173   : > { %1330 = vmatmul.mubr.f32.gmra.mrb[26].mxu0 %v3702_v54  ;;  %1599 = vmatprep.mubr.f32.mxu1 %v3904_v59  ;;  %v4026_v54 = vsel %vm334_vm0, %v549_v46, %v550_v48  ;;  %v4841_v46 = vld [vmem:[#allocation48_spill] sm:$0xff] }
 0x174   : > { %1334 = vmatprep.mubr.f32.mxu0 %v4829_v17  ;;  %2525 = vmatpush1.bf16.msra.mxu0 %v4832_v51 }
 0x175   : > { %2526 = vmatprep.subr.bf16.mxu0 %v4810_v16 }
 0x176   : > { %1600 = vmatmul.mubr.f32.gmra.mrb[92].mxu1 %v3847_v30  ;;  %v4835_v30 = vld [vmem:[#allocation40_spill] sm:$0xff] }
 0x177   : > { %1335 = vmatmul.mubr.f32.gmra.mrb[28].mxu0 %v3722_v34  ;;  %1604 = vmatprep.mubr.f32.mxu1 %v3918_v39  ;;  %v4036_v34 = vsel %vm334_vm0, %v550_v48, %v552_v8 }
 0x178   : > { %1339 = vmatprep.mubr.f32.mxu0 %v4833_v63  ;;  %2528 = vmatpush1.bf16.msra.mxu0 %v4834_v52  ;;  %v4842_v52 = vld [vmem:[#allocation49_spill] sm:$0xff] }
 0x179   : > { %2529 = vmatprep.subr.bf16.mxu0 %v4810_v16  ;;  %v556_v16 = vrot.slane %v4041_v44, 1 }
 0x17a   : > { %1605 = vmatmul.mubr.f32.gmra.mrb[94].mxu1 %v3862_v56  ;;  %v4048_v56 = vsel %vm334_vm0, %v552_v8, %v554_v61 }
 0x17b   : > { %1340 = vmatmul.mubr.f32.gmra.mrb[30].mxu0 %v3735_v45  ;;  %1609 = vmatprep.mubr.f32.mxu1 %v4026_v54  ;;  %v4837_v45 = vld [vmem:[#allocation41_spill] sm:$0xff]  ;;  %v4062_v32 = vsel %vm334_vm0, %v554_v61, %v556_v16  ;;  %v4843_v16 = vld [vmem:[#allocation51_spill] sm:$0xff] }
 0x17c   : > { %1344 = vmatprep.mubr.f32.mxu0 %v4835_v30  ;;  %2531 = vmatpush1.bf16.msra.mxu0 %v4836_v19 }
 0x17e   : > { %1610 = vmatmul.mubr.f32.gmra.mrb[96].mxu1 %v4830_v62 }
 0x17f   : > { %1345 = vmatmul.mubr.f32.gmra.mrb[32].mxu0 %v3751_v27  ;;  %1614 = vmatprep.mubr.f32.mxu1 %v4036_v34  ;;  %v4838_v27 = vld [vmem:[#allocation43_spill] sm:$0xff] }
 0x180   : > { %1349 = vmatprep.mubr.f32.mxu0 %v4837_v45 }
 0x182   : > { %1615 = vmatmul.mubr.f32.gmra.mrb[98].mxu1 %v4831_v36 }
 0x183   : > { %1350 = vmatmul.mubr.f32.gmra.mrb[34].mxu0 %v3766_v37  ;;  %1619 = vmatprep.mubr.f32.mxu1 %v4048_v56  ;;  %v4839_v37 = vld [vmem:[#allocation45_spill] sm:$0xff] }
 0x184   : > { %1354 = vmatprep.mubr.f32.mxu0 %v4838_v27 }
 0x186   : > { %1620 = vmatmul.mubr.f32.gmra.mrb[100].mxu1 %v3908_v11 }
 0x187   : > { %1355 = vmatmul.mubr.f32.gmra.mrb[36].mxu0 %v3782_v2  ;;  %1624 = vmatprep.mubr.f32.mxu1 %v4062_v32  ;;  %v585_v2 = vrot.slane %v4076_v5, 1 }
 0x188   : > { %1359 = vmatprep.mubr.f32.mxu0 %v4839_v37 }
 0x189   : > { %v586_v48 = vsel %vm334_vm0, %v583_v38, %v585_v2 }
 0x18a   : > { %1625 = vmatmul.mubr.f32.gmra.mrb[102].mxu1 %v3921_v15 }
 0x18b   : > { %1360 = vmatmul.mubr.f32.gmra.mrb[38].mxu0 %v3796_v55  ;;  %1629 = vmatprep.mubr.f32.mxu1 %v582_v4  ;;  %v587_v55 = vrot.slane %v4084_v22, 1 }
 0x18c   : > { %1364 = vmatprep.mubr.f32.mxu0 %v4840_v50 }
 0x18d   : > { %v588_v61 = vsel %vm334_vm0, %v585_v2, %v587_v55  ;;  %v2861_v2 = vld [vmem:[%s3326_s5 + $0x68] sm:$0xff] }
 0x18e   : > { %1630 = vmatmul.mubr.f32.gmra.mrb[104].mxu1 %v4052_v12 }
 0x18f   : > { %1365 = vmatmul.mubr.f32.gmra.mrb[40].mxu0 %v3811_v7  ;;  %1634 = vmatprep.mubr.f32.mxu1 %v584_v53 }
 0x190   : > { %1369 = vmatprep.mubr.f32.mxu0 %v4841_v46 }
 0x191   : > { %v4091_v51 = vpop.f32.mrb[0].mxu1 }
 0x192   : > { %1635 = vmatmul.mubr.f32.gmra.mrb[106].mxu1 %v4055_v31  ;;  %v818_v8 = vpop.f32.mrb[1].mxu1 }
 0x193   : > { %1370 = vmatmul.mubr.f32.gmra.mrb[42].mxu0 %v4811_v58  ;;  %1639 = vmatprep.mubr.f32.mxu1 %v586_v48 }
 0x194   : > { %1374 = vmatprep.mubr.f32.mxu0 %v4842_v52 }
 0x195   : > { %v4097_v7 = vpop.f32.mrb[2].mxu1 }
 0x196   : > { %1640 = vmatmul.mubr.f32.gmra.mrb[108].mxu1 %v4067_v0  ;;  %v823_v19 = vpop.f32.mrb[3].mxu1 }
 0x197   : > { %1375 = vmatmul.mubr.f32.gmra.mrb[44].mxu0 %v3844_v49  ;;  %1644 = vmatprep.mubr.f32.mxu1 %v588_v61  ;;  %v4845_v49 = vld [vmem:[#allocation56_spill] sm:$0xff]  ;;  %v600_v61 = vrot.slane %v4084_v22, 2 }
 0x198   : > { %1379 = vmatprep.mubr.f32.mxu0 %v4843_v16  ;;  %v2864_v19 = vld [vmem:[%s3326_s5 + $0x88] sm:$0xff]  ;;  %v2865_v22 = vld [vmem:[%s3326_s5 + $0x90] sm:$0xff] }
 0x199   : > { %v4102_v1 = vpop.f32.mrb[4].mxu1 }
 0x19a   : > { %1645 = vmatmul.mubr.f32.gmra.mrb[110].mxu1 %v4076_v5  ;;  %v828_v58 = vpop.f32.mrb[5].mxu1 }
 0x19b   : > { %1380 = vmatmul.mubr.f32.gmra.mrb[46].mxu0 %v4819_v21  ;;  %2292 = vmatprep.mubr.f32.mxu1 %v3536_v24  ;;  %v562_v24 = vrot.slane %v4830_v62, 2 }
 0x19c   : > { %1384 = vmatprep.mubr.f32.mxu0 %v4844_v47 }
 0x19d   : > { %v4108_v4 = vpop.f32.mrb[6].mxu1 }
 0x19e   : > { %2293 = vmatmul.mubr.f32.vlgmr.msra.gmra.mrb[112].mxu1 %v3557_v40  ;;  %v833_v38 = vpop.f32.mrb[7].mxu1  ;;  %v563_v40 = vrot.slane %v4831_v36, 2 }
 0x19f   : > { %1385 = vmatmul.mubr.f32.gmra.mrb[48].mxu0 %v4824_v10  ;;  %2295 = vmatprep.mubr.f32.mxu1 %v3574_v57 }
 0x1a0   : > { %1389 = vmatprep.mubr.f32.mxu0 %v4845_v49 }
 0x1a1   : > { %v4114_v53 = vpop.f32.mrb[8].mxu1 }
 0x1a2   : > { %2296 = vmatmul.mubr.f32.gmra.mrb[114].mxu1 %v3597_v6  ;;  %v838_v21 = vpop.f32.mrb[9].mxu1  ;;  %v564_v6 = vsel %vm439_vm1, %v562_v24, %v563_v40 }
 0x1a3   : > { %1390 = vmatmul.mubr.f32.gmra.mrb[50].mxu0 %v3888_v33  ;;  %2298 = vmatprep.mubr.f32.mxu1 %v3615_v29  ;;  %v565_v29 = vrot.slane %v3908_v11, 2 }
 0x1a4   : > { %1394 = vmatprep.mubr.f32.mxu0 %v3915_v3 }
 0x1a5   : > { %v4122_v10 = vpop.f32.mrb[10].mxu1 }
 0x1a6   : > { %2299 = vmatmul.mubr.f32.gmra.mrb[116].mxu1 %v4812_v41  ;;  %v843_v57 = vpop.f32.mrb[11].mxu1  ;;  %v567_v41 = vrot.slane %v3921_v15, 2 }
 0x1a7   : > { %1395 = vmatmul.mubr.f32.gmra.mrb[52].mxu0 %v3904_v59  ;;  %2301 = vmatprep.mubr.f32.mxu1 %v4815_v18  ;;  %v566_v59 = vsel %vm439_vm1, %v563_v40, %v565_v29 }
 0x1a8   : > { %1399 = vmatprep.mubr.f32.mxu0 %v3928_v26  ;;  %v568_v11 = vsel %vm439_vm1, %v565_v29, %v567_v41 }
 0x1a9   : > { %v4130_v33 = vpop.f32.mrb[12].mxu1 }
 0x1aa   : > { %2302 = vmatmul.mubr.f32.gmra.mrb[118].mxu1 %v4820_v28  ;;  %v848_v62 = vpop.f32.mrb[13].mxu1 }
 0x1ab   : > { %1400 = vmatmul.mubr.f32.gmra.mrb[54].mxu0 %v3918_v39  ;;  %2304 = vmatprep.mubr.f32.mxu1 %v4825_v20  ;;  %v569_v39 = vrot.slane %v4041_v44, 2  ;;  %v2858_v44 = vld [vmem:[%s3326_s5 + $0x50] sm:$0xff] }
 0x1ac   : > { %1404 = vmatprep.mubr.f32.mxu0 %v564_v6 }
 0x1ad   : > { %v4137_v18 = vpop.f32.mrb[14].mxu1  ;;  %v570_v15 = vsel %vm439_vm1, %v567_v41, %v569_v39 }
 0x1ae   : > { %2305 = vmatmul.mubr.f32.gmra.mrb[120].mxu1 %v4827_v35  ;;  %v853_v36 = vpop.f32.mrb[15].mxu1 }
 0x1af   : > { %1405 = vmatmul.mubr.f32.gmra.mrb[56].mxu0 %v4026_v54  ;;  %2307 = vmatprep.mubr.f32.mxu1 %v4829_v17 }
 0x1b0   : > { %1409 = vmatprep.mubr.f32.mxu0 %v566_v59 }
 0x1b1   : > { %v4144_v28 = vpop.f32.mrb[16].mxu1 }
 0x1b2   : > { %2308 = vmatmul.mubr.f32.gmra.mrb[122].mxu1 %v4833_v63  ;;  %v858_v20 = vpop.f32.mrb[17].mxu1 }
 0x1b3   : > { %1410 = vmatmul.mubr.f32.gmra.mrb[58].mxu0 %v4036_v34  ;;  %2310 = vmatprep.mubr.f32.mxu1 %v4835_v30 }
 0x1b4   : > { %1414 = vmatprep.mubr.f32.mxu0 %v568_v11 }
 0x1b5   : > { %v4150_v35 = vpop.f32.mrb[18].mxu1 }
 0x1b6   : > { %2311 = vmatmul.mubr.f32.gmra.mrb[124].mxu1 %v4837_v45  ;;  %v863_v17 = vpop.f32.mrb[19].mxu1 }
 0x1b7   : > { %1415 = vmatmul.mubr.f32.gmra.mrb[60].mxu0 %v4048_v56  ;;  %2313 = vmatprep.mubr.f32.mxu1 %v4838_v27  ;;  %v2859_v27 = vld [vmem:[%s3326_s5 + $0x58] sm:$0xff] }
 0x1b8   : > { %1419 = vmatprep.mubr.f32.mxu0 %v570_v15 }
 0x1b9   : > { %v4155_v63 = vpop.f32.mrb[20].mxu1 }
 0x1ba   : > { %2314 = vmatmul.mubr.f32.gmra.mrb[126].mxu1 %v4839_v37  ;;  %v868_v54 = vpop.f32.mrb[21].mxu1  ;;  %v2860_v37 = vld [vmem:[%s3326_s5 + $0x60] sm:$0xff] }
 0x1bb   : > { %1420 = vmatmul.mubr.f32.gmra.mrb[62].mxu0 %v4062_v32  ;;  %2316 = vmatprep.mubr.f32.mxu1 %v4840_v50 }
 0x1bc   : > { %1489 = vmatprep.mubr.f32.mxu0 %v3519_v13 }
 0x1bd   : > { %v4161_v30 = vpop.f32.mrb[22].mxu1 }
 0x1be   : > { %2317 = vmatmul.mubr.f32.gmra.mrb[128].mxu1 %v4841_v46  ;;  %v873_v34 = vpop.f32.mrb[23].mxu1  ;;  %v594_v46 = vrot.slane %v4055_v31, 2  ;;  %v2863_v31 = vld [vmem:[%s3326_s5 + $0x80] sm:$0xff] }
 0x1bf   : > { %1490 = vmatmul.mubr.f32.vlgmr.msra.gmra.mrb[0].mxu0 %v2858_v44  ;;  %2319 = vmatprep.mubr.f32.mxu1 %v4842_v52 }
 0x1c0   : > { %1494 = vmatprep.mubr.f32.mxu0 %v3539_v25 }
 0x1c1   : > { %v4167_v45 = vpop.f32.mrb[24].mxu1 }
 0x1c2   : > { %2320 = vmatmul.mubr.f32.gmra.mrb[130].mxu1 %v4843_v16  ;;  %v878_v56 = vpop.f32.mrb[25].mxu1 }
 0x1c3   : > { %1495 = vmatmul.mubr.f32.gmra.mrb[2].mxu0 %v2859_v27  ;;  %2322 = vmatprep.mubr.f32.mxu1 %v4844_v47 }
 0x1c4   : > { %1499 = vmatprep.mubr.f32.mxu0 %v3560_v43  ;;  %v593_v43 = vrot.slane %v4052_v12, 2 }
 0x1c5   : > { %v4173_v13 = vpop.f32.mrb[26].mxu1 }
 0x1c6   : > { %2323 = vmatmul.mubr.f32.gmra.mrb[132].mxu1 %v4845_v49  ;;  %v883_v32 = vpop.f32.mrb[27].mxu1  ;;  %v595_v55 = vsel %vm439_vm1, %v593_v43, %v594_v46 }
 0x1c7   : > { %1500 = vmatmul.mubr.f32.gmra.mrb[4].mxu0 %v2860_v37  ;;  %2325 = vmatprep.mubr.f32.mxu1 %v3915_v3 }
 0x1c8   : > { %1504 = vmatprep.mubr.f32.mxu0 %v3578_v60  ;;  %v2862_v60 = vld [vmem:[%s3326_s5 + $0x78] sm:$0xff]  ;;  %s2930_s5 = scalar_lea.vmem %s2929_s23, 8192 }
 0x1c9   : > { %v4179_v25 = vpop.f32.mrb[28].mxu1  ;;  %p2932_p8 = scmp.lt.s32.totalorder %s2930_s5, %s2924_s15 }
 0x1ca   : > { %2326 = vmatmul.mubr.f32.gmra.mrb[134].mxu1 %v3928_v26  ;;  %v888_v50 = vpop.f32.mrb[29].mxu1  ;;  %v596_v26 = vrot.slane %v4067_v0, 2 }
 0x1cb   : > { %1505 = vmatmul.mubr.f32.gmra.mrb[6].mxu0 %v2861_v2  ;;  %2328 = vmatprep.mubr.f32.mxu1 %v564_v6  ;;  %p2933_p13 = por %p2932_p8, %p2931_p5 }
 0x1cc   : > { %1509 = vmatprep.mubr.f32.mxu0 %v3600_v14  ;;  %v598_v14 = vrot.slane %v4076_v5, 2  ;;  %v597_v52 = vsel %vm439_vm1, %v594_v46, %v596_v26 }
 0x1cd   : > { %v4186_v48 = vpop.f32.mrb[30].mxu1  ;;  %p2934_p3 = pnand %p2933_p13, %p2927_p0 }
 0x1ce   : > { %2329 = vmatmul.mubr.f32.gmra.mrb[136].mxu1 %v566_v59  ;;  %v893_v3 = vpop.f32.mrb[31].mxu1  ;;  %v601_v16 = vsel %vm439_vm1, %v598_v14, %v600_v61 }
 0x1cf   : > { %1510 = vmatmul.mubr.f32.gmra.mrb[8].mxu0 %v2862_v60  ;;  %2331 = vmatprep.mubr.f32.mxu1 %v568_v11 }
 0x1d0   : > { %1514 = vmatprep.mubr.f32.mxu0 %v4814_v42  ;;  %v599_v42 = vsel %vm439_vm1, %v596_v26, %v598_v14 }
 0x1d1   : > { %v4193_v8 = vpop.f32.mrb[32].mxu1 }
 0x1d2   : > { %2332 = vmatmul.mubr.f32.gmra.mrb[138].mxu1 %v570_v15  ;;  %v898_v12 = vpop.f32.mrb[33].mxu1 }
 0x1d3   : > { %1515 = vmatmul.mubr.f32.gmra.mrb[10].mxu0 %v2863_v31  ;;  %2334 = vmatprep.mubr.f32.mxu1 %v595_v55 }
 0x1d4   : > { %1519 = vmatprep.mubr.f32.mxu0 %v4818_v9 }
 0x1d5   : > { %v4200_v0 = vpop.f32.mrb[34].mxu1 }
 0x1d6   : > { %2335 = vmatmul.mubr.f32.gmra.mrb[140].mxu1 %v597_v52  ;;  %v903_v5 = vpop.f32.mrb[35].mxu1 }
 0x1d7   : > { %1520 = vmatmul.mubr.f32.gmra.mrb[12].mxu0 %v2864_v19  ;;  %2337 = vmatprep.mubr.f32.mxu1 %v599_v42 }
 0x1d8   : > { %1524 = vmatprep.mubr.f32.mxu0 %v4823_v23 }
 0x1d9   : > { %v4205_v58 = vpop.f32.mrb[36].mxu1 }
 0x1da   : > { %2338 = vmatmul.mubr.f32.gmra.mrb[142].mxu1 %v601_v16  ;;  %v908_v47 = vpop.f32.mrb[37].mxu1 }
 0x1db   : > { %1525 = vmatmul.mubr.f32.gmra.mrb[14].mxu0 %v2865_v22 }
 0x1dd   : > { %v4208_v9 = vpop.f32.mrb[38].mxu1 }
 0x1de   : > { %v913_v38 = vpop.f32.mrb[39].mxu1 }
 0x1e1   : > { %v4210_v49 = vpop.f32.mrb[40].mxu1 }
 0x1e2   : > { %v918_v21 = vpop.f32.mrb[41].mxu1 }
 0x1e5   : > { %v4212_v24 = vpop.f32.mrb[42].mxu1 }
 0x1e6   : > { %v923_v40 = vpop.f32.mrb[43].mxu1 }
 0x1e9   : > { %v4214_v57 = vpop.f32.mrb[44].mxu1 }
 0x1ea   : > { %v928_v6 = vpop.f32.mrb[45].mxu1 }
 0x1ed   : > { %v4216_v29 = vpop.f32.mrb[46].mxu1 }
 0x1ee   : > { %v933_v23 = vpop.f32.mrb[47].mxu1 }
 0x1f1   : > { %v4218_v62 = vpop.f32.mrb[48].mxu1 }
 0x1f2   : > { %v938_v59 = vpop.f32.mrb[49].mxu1 }
 0x1f5   : > { %v4220_v41 = vpop.f32.mrb[50].mxu1 }
 0x1f6   : > { %v943_v36 = vpop.f32.mrb[51].mxu1 }
 0x1f9   : > { %v4222_v11 = vpop.f32.mrb[52].mxu1 }
 0x1fa   : > { %v948_v39 = vpop.f32.mrb[53].mxu1 }
 0x1fd   : > { %v4224_v20 = vpop.f32.mrb[54].mxu1 }
 0x1fe   : > { %v953_v15 = vpop.f32.mrb[55].mxu1 }
 0x201   : > { %v4226_v17 = vpop.f32.mrb[56].mxu1 }
 0x202   : > { %v958_v54 = vpop.f32.mrb[57].mxu1 }
 0x205   : > { %v4228_v34 = vpop.f32.mrb[58].mxu1 }
 0x206   : > { %v963_v44 = vpop.f32.mrb[59].mxu1 }
 0x209   : > { %v4230_v56 = vpop.f32.mrb[60].mxu1 }
 0x20a   : > { %v968_v27 = vpop.f32.mrb[61].mxu1 }
 0x20d   : > { %v4232_v32 = vpop.f32.mrb[62].mxu1 }
 0x20e   : > { %v973_v37 = vpop.f32.mrb[63].mxu1 }
 0x211   : > { %v1531_v50 = vpop.f32.mrb[64].mxu1 }
 0x212   : > { %v1533_v2 = vpop.f32.mrb[65].mxu1 }
 0x215   : > { %v1536_v43 = vpop.f32.mrb[66].mxu1 }
 0x216   : > { %v1538_v46 = vpop.f32.mrb[67].mxu1 }
 0x219   : > { %v1541_v3 = vpop.f32.mrb[68].mxu1 }
 0x21a   : > { %v1543_v60 = vpop.f32.mrb[69].mxu1 }
 0x21d   : > { %v1546_v26 = vpop.f32.mrb[70].mxu1 }
 0x21e   : > { %v1548_v55 = vpop.f32.mrb[71].mxu1 }
 0x221   : > { %v1551_v14 = vpop.f32.mrb[72].mxu1 }
 0x222   : > { %v1553_v12 = vpop.f32.mrb[73].mxu1 }
 0x225   : > { %v1556_v31 = vpop.f32.mrb[74].mxu1 }
 0x226   : > { %v1558_v52 = vpop.f32.mrb[75].mxu1 }
 0x229   : > { %v1561_v61 = vpop.f32.mrb[76].mxu1 }
 0x22a   : > { %v1563_v42 = vpop.f32.mrb[77].mxu1 }
 0x22d   : > { %v1566_v5 = vpop.f32.mrb[78].mxu1 }
 0x22e   : > { %v1568_v19 = vpop.f32.mrb[79].mxu1 }
 0x231   : > { %v1571_v16 = vpop.f32.mrb[80].mxu1 }
 0x232   : > { %v1306_v47 = vpop.f32.mrb[16].mxu0  ;;  %v1573_v22 = vpop.f32.mrb[81].mxu1 }
 0x233   : > { %v2604_v38 = vadd.f32 %v1306_v47, %v4144_v28  ;;  %v1308_v21 = vpop.f32.mrb[17].mxu0 }
 0x235   : > { %v4235_v40 = vadd.f32 %v2604_v38, %v1531_v50  ;;  %v1576_v6 = vpop.f32.mrb[82].mxu1 }
 0x236   : > { %v1311_v23 = vpop.f32.mrb[18].mxu0  ;;  %v1578_v59 = vpop.f32.mrb[83].mxu1 }
 0x237   : > { %v2606_v36 = vadd.f32 %v1311_v23, %v4150_v35  ;;  %v1313_v39 = vpop.f32.mrb[19].mxu0 }
 0x239   : > { %v4238_v15 = vadd.f32 %v2606_v36, %v1536_v43  ;;  %v1581_v54 = vpop.f32.mrb[84].mxu1 }
 0x23a   : > { %v1316_v44 = vpop.f32.mrb[20].mxu0  ;;  %v1583_v27 = vpop.f32.mrb[85].mxu1 }
 0x23b   : > { %v2608_v37 = vadd.f32 %v1316_v44, %v4155_v63  ;;  %v1318_v2 = vpop.f32.mrb[21].mxu0 }
 0x23d   : > { %v4241_v46 = vadd.f32 %v2608_v37, %v1541_v3  ;;  %v1586_v28 = vpop.f32.mrb[86].mxu1 }
 0x23e   : > { %v1321_v60 = vpop.f32.mrb[22].mxu0  ;;  %v1588_v50 = vpop.f32.mrb[87].mxu1 }
 0x23f   : > { %v2610_v55 = vadd.f32 %v1321_v60, %v4161_v30  ;;  %v1323_v12 = vpop.f32.mrb[23].mxu0 }
 0x241   : > { %v4244_v52 = vadd.f32 %v2610_v55, %v1546_v26  ;;  %v1591_v35 = vpop.f32.mrb[88].mxu1 }
 0x242   : > { %v1326_v42 = vpop.f32.mrb[24].mxu0  ;;  %v1593_v43 = vpop.f32.mrb[89].mxu1 }
 0x243   : > { %v2612_v19 = vadd.f32 %v1326_v42, %v4167_v45  ;;  %v1328_v47 = vpop.f32.mrb[25].mxu0 }
 0x245   : > { %v4247_v22 = vadd.f32 %v2612_v19, %v1551_v14  ;;  %v1596_v63 = vpop.f32.mrb[90].mxu1 }
 0x246   : > { %v1331_v38 = vpop.f32.mrb[26].mxu0  ;;  %v1598_v3 = vpop.f32.mrb[91].mxu1 }
 0x247   : > { %v2614_v21 = vadd.f32 %v1331_v38, %v4173_v13  ;;  %v1333_v23 = vpop.f32.mrb[27].mxu0 }
 0x249   : > { %v4250_v59 = vadd.f32 %v2614_v21, %v1556_v31  ;;  %v1601_v30 = vpop.f32.mrb[92].mxu1 }
 0x24a   : > { %v1336_v36 = vpop.f32.mrb[28].mxu0  ;;  %v1603_v26 = vpop.f32.mrb[93].mxu1 }
 0x24b   : > { %v2616_v39 = vadd.f32 %v1336_v36, %v4179_v25  ;;  %v1338_v44 = vpop.f32.mrb[29].mxu0 }
 0x24d   : > { %v4253_v27 = vadd.f32 %v2616_v39, %v1561_v61  ;;  %v1606_v45 = vpop.f32.mrb[94].mxu1 }
 0x24e   : > { %v1341_v37 = vpop.f32.mrb[30].mxu0  ;;  %v1608_v14 = vpop.f32.mrb[95].mxu1 }
 0x24f   : > { %v2618_v2 = vadd.f32 %v1341_v37, %v4186_v48  ;;  %v1343_v60 = vpop.f32.mrb[31].mxu0 }
 0x251   : > { %v4256_v50 = vadd.f32 %v2618_v2, %v1566_v5  ;;  %v1611_v13 = vpop.f32.mrb[96].mxu1 }
 0x252   : > { %v1346_v55 = vpop.f32.mrb[32].mxu0  ;;  %v1613_v31 = vpop.f32.mrb[97].mxu1 }
 0x253   : > { %v2620_v12 = vadd.f32 %v1346_v55, %v4193_v8  ;;  %v1348_v42 = vpop.f32.mrb[33].mxu0 }
 0x255   : > { %v4259_v43 = vadd.f32 %v2620_v12, %v1571_v16  ;;  %v1616_v25 = vpop.f32.mrb[98].mxu1 }
 0x256   : > { %v1351_v19 = vpop.f32.mrb[34].mxu0  ;;  %v1618_v61 = vpop.f32.mrb[99].mxu1 }
 0x257   : > { %v2622_v47 = vadd.f32 %v1351_v19, %v4200_v0  ;;  %v1353_v38 = vpop.f32.mrb[35].mxu0 }
 0x259   : > { %v4262_v3 = vadd.f32 %v2622_v47, %v1576_v6  ;;  %v1621_v48 = vpop.f32.mrb[100].mxu1 }
 0x25a   : > { %v1356_v21 = vpop.f32.mrb[36].mxu0  ;;  %v1623_v5 = vpop.f32.mrb[101].mxu1 }
 0x25b   : > { %v2624_v23 = vadd.f32 %v1356_v21, %v4205_v58  ;;  %v1358_v36 = vpop.f32.mrb[37].mxu0 }
 0x25d   : > { %v4265_v26 = vadd.f32 %v2624_v23, %v1581_v54  ;;  %v1626_v8 = vpop.f32.mrb[102].mxu1 }
 0x25e   : > { %v1361_v39 = vpop.f32.mrb[38].mxu0  ;;  %v1628_v16 = vpop.f32.mrb[103].mxu1 }
 0x25f   : > { %v2626_v44 = vadd.f32 %v1361_v39, %v4208_v9  ;;  %v1363_v37 = vpop.f32.mrb[39].mxu0 }
 0x261   : > { %v4268_v14 = vadd.f32 %v2626_v44, %v1586_v28  ;;  %v1631_v0 = vpop.f32.mrb[104].mxu1 }
 0x262   : > { %v1366_v2 = vpop.f32.mrb[40].mxu0  ;;  %v1633_v6 = vpop.f32.mrb[105].mxu1 }
 0x263   : > { %v2628_v60 = vadd.f32 %v1366_v2, %v4210_v49  ;;  %v1368_v55 = vpop.f32.mrb[41].mxu0 }
 0x265   : > { %v4271_v31 = vadd.f32 %v2628_v60, %v1591_v35  ;;  %v4273_v58 = vpop.f32.mrb[106].mxu1 }
 0x266   : > { %v1371_v54 = vpop.f32.mrb[42].mxu0  ;;  %v1638_v12 = vpop.f32.mrb[107].mxu1 }
 0x267   : > { %v2630_v42 = vadd.f32 %v1371_v54, %v4212_v24  ;;  %v1373_v19 = vpop.f32.mrb[43].mxu0 }
 0x269   : > { %v4276_v61 = vpop.f32.mrb[108].mxu1  ;;  %v4278_v9 = vadd.f32 %v2630_v42, %v1596_v63 }
 0x26a   : > { %v1376_v28 = vpop.f32.mrb[44].mxu0  ;;  %v1643_v47 = vpop.f32.mrb[109].mxu1 }
 0x26b   : > { %v2632_v38 = vadd.f32 %v1376_v28, %v4214_v57  ;;  %v1378_v21 = vpop.f32.mrb[45].mxu0 }
 0x26d   : > { %v4281_v49 = vpop.f32.mrb[110].mxu1  ;;  %v4283_v35 = vadd.f32 %v2632_v38, %v1601_v30 }
 0x26e   : > { %v1381_v5 = vpop.f32.mrb[46].mxu0  ;;  %v1648_v23 = vpop.f32.mrb[111].mxu1 }
 0x26f   : > { %v2634_v36 = vadd.f32 %v1381_v5, %v4216_v29  ;;  %v1383_v39 = vpop.f32.mrb[47].mxu0 }
 0x271   : > { %v4286_v24 = vpop.f32.mrb[112].mxu1  ;;  %v4288_v16 = vadd.f32 %v2634_v36, %v1606_v45 }
 0x272   : > { %v1386_v63 = vpop.f32.mrb[48].mxu0  ;;  %v4290_v44 = vpop.f32.mrb[113].mxu1 }
 0x273   : > { %v2636_v57 = vadd.f32 %v1386_v63, %v4218_v62  ;;  %v1388_v37 = vpop.f32.mrb[49].mxu0 }
 0x275   : > { %v4293_v2 = vpop.f32.mrb[114].mxu1  ;;  %v4295_v30 = vadd.f32 %v2636_v57, %v1611_v13 }
 0x276   : > { %v1391_v6 = vpop.f32.mrb[50].mxu0  ;;  %v4297_v60 = vpop.f32.mrb[115].mxu1 }
 0x277   : > { %v2638_v29 = vadd.f32 %v1391_v6, %v4220_v41  ;;  %v1393_v55 = vpop.f32.mrb[51].mxu0 }
 0x279   : > { %v4300_v45 = vpop.f32.mrb[116].mxu1  ;;  %v4302_v54 = vadd.f32 %v2638_v29, %v1616_v25 }
 0x27a   : > { %v1396_v12 = vpop.f32.mrb[52].mxu0  ;;  %v4304_v42 = vpop.f32.mrb[117].mxu1 }
 0x27b   : > { %v2640_v62 = vadd.f32 %v1396_v12, %v4222_v11  ;;  %v1398_v19 = vpop.f32.mrb[53].mxu0 }
 0x27d   : > { %v4308_v13 = vpop.f32.mrb[118].mxu1  ;;  %v4310_v28 = vadd.f32 %v2640_v62, %v1621_v48 }
 0x27e   : > { %v1401_v47 = vpop.f32.mrb[54].mxu0  ;;  %v4312_v38 = vpop.f32.mrb[119].mxu1 }
 0x27f   : > { %v2642_v41 = vadd.f32 %v1401_v47, %v4224_v20  ;;  %v1403_v25 = vpop.f32.mrb[55].mxu0 }
 0x281   : > { %v2306_v21 = vpop.f32.mrb[120].mxu1  ;;  %v4317_v5 = vadd.f32 %v2642_v41, %v1626_v8 }
 0x282   : > { %v1406_v23 = vpop.f32.mrb[56].mxu0  ;;  %v4320_v11 = vadd.f32 %v4238_v15, %v2306_v21  ;;  %v1756_v36 = vpop.f32.mrb[121].mxu1 }
 0x283   : > { %v2644_v39 = vadd.f32 %v1406_v23, %v4226_v17  ;;  %v1408_v48 = vpop.f32.mrb[57].mxu0  ;;  %v4324_v63 = vadd.f32 %v4235_v40, %v1756_v36 }
 0x284   : > { %1884 = vst [vmem:[%s4326_s28 + $0x48] sm:$0xff] %v4320_v11 }
 0x285   : > { %1883 = vst [vmem:[%s4326_s28 + $0x40] sm:$0xff] %v4324_v63  ;;  %v2309_v20 = vpop.f32.mrb[122].mxu1  ;;  %v4332_v15 = vadd.f32 %v2644_v39, %v1631_v0 }
 0x286   : > { %v1411_v8 = vpop.f32.mrb[58].mxu0  ;;  %v4335_v17 = vadd.f32 %v4244_v52, %v2309_v20  ;;  %v1766_v40 = vpop.f32.mrb[123].mxu1 }
 0x287   : > { %v2646_v57 = vadd.f32 %v1411_v8, %v4228_v34  ;;  %v1413_v37 = vpop.f32.mrb[59].mxu0  ;;  %v4339_v6 = vadd.f32 %v4241_v46, %v1766_v40 }
 0x288   : > { %1886 = vst [vmem:[%s4326_s28 + $0x58] sm:$0xff] %v4335_v17 }
 0x289   : > { %1885 = vst [vmem:[%s4326_s28 + $0x50] sm:$0xff] %v4339_v6  ;;  %v2312_v29 = vpop.f32.mrb[124].mxu1  ;;  %v4346_v0 = vadd.f32 %v2646_v57, %v4273_v58 }
 0x28a   : > { %v1416_v55 = vpop.f32.mrb[60].mxu0  ;;  %v4349_v52 = vadd.f32 %v4250_v59, %v2312_v29  ;;  %v1776_v12 = vpop.f32.mrb[125].mxu1 }
 0x28b   : > { %v2648_v34 = vadd.f32 %v1416_v55, %v4230_v56  ;;  %v1418_v62 = vpop.f32.mrb[61].mxu0  ;;  %v4353_v46 = vadd.f32 %v4247_v22, %v1776_v12 }
 0x28c   : > { %1888 = vst [vmem:[%s4326_s28 + $0x68] sm:$0xff] %v4349_v52 }
 0x28d   : > { %1887 = vst [vmem:[%s4326_s28 + $0x60] sm:$0xff] %v4353_v46  ;;  %v2315_v19 = vpop.f32.mrb[126].mxu1  ;;  %v4360_v58 = vadd.f32 %v2648_v34, %v4276_v61 }
 0x28e   : > { %v1421_v47 = vpop.f32.mrb[62].mxu0  ;;  %v4363_v59 = vadd.f32 %v4256_v50, %v2315_v19  ;;  %v1786_v41 = vpop.f32.mrb[127].mxu1 }
 0x28f   : > { %v2650_v56 = vadd.f32 %v1421_v47, %v4232_v32  ;;  %v1423_v25 = vpop.f32.mrb[63].mxu0  ;;  %v4367_v22 = vadd.f32 %v4253_v27, %v1786_v41 }
 0x290   : > { %1890 = vst [vmem:[%s4326_s28 + $0x78] sm:$0xff] %v4363_v59 }
 0x291   : > { %1889 = vst [vmem:[%s4326_s28 + $0x70] sm:$0xff] %v4367_v22  ;;  %v2318_v61 = vpop.f32.mrb[128].mxu1  ;;  %v4374_v21 = vadd.f32 %v2650_v56, %v4281_v49 }
 0x292   : > { %v1491_v23 = vpop.f32.mrb[0].mxu0  ;;  %v4377_v50 = vadd.f32 %v4262_v3, %v2318_v61  ;;  %v1796_v36 = vpop.f32.mrb[129].mxu1 }
 0x293   : > { %v2596_v32 = vadd.f32 %v1491_v23, %v4091_v51  ;;  %v1493_v27 = vpop.f32.mrb[1].mxu0  ;;  %v4381_v39 = vadd.f32 %v4259_v43, %v1796_v36 }
 0x294   : > { %1892 = vst [vmem:[%s4326_s28 + $0x88] sm:$0xff] %v4377_v50 }
 0x295   : > { %v1717_v48 = vadd.f32 %v2596_v32, %v4290_v44  ;;  %1891 = vst [vmem:[%s4326_s28 + $0x80] sm:$0xff] %v4381_v39  ;;  %v2321_v49 = vpop.f32.mrb[130].mxu1 }
 0x296   : > { %v1496_v20 = vpop.f32.mrb[2].mxu0  ;;  %v4389_v3 = vadd.f32 %v4268_v14, %v2321_v49  ;;  %v1806_v8 = vpop.f32.mrb[131].mxu1 }
 0x297   : > { %1875 = vst [vmem:[%s4326_s28] sm:$0xff] %v1717_v48  ;;  %v2597_v51 = vadd.f32 %v1496_v20, %v4097_v7  ;;  %v1498_v40 = vpop.f32.mrb[3].mxu0  ;;  %v4394_v43 = vadd.f32 %v4265_v26, %v1806_v8  ;;  %v1944_v37 = vmul.f32 %v1717_v48, %v1717_v48 }
 0x298   : > { %1894 = vst [vmem:[%s4326_s28 + $0x98] sm:$0xff] %v4389_v3 }
 0x299   : > { %v1722_v44 = vadd.f32 %v2597_v51, %v4286_v24  ;;  %1893 = vst [vmem:[%s4326_s28 + $0x90] sm:$0xff] %v4394_v43  ;;  %v2324_v57 = vpop.f32.mrb[132].mxu1 }
 0x29a   : > { %v1501_v14 = vpop.f32.mrb[4].mxu0  ;;  %v4402_v29 = vadd.f32 %v4278_v9, %v2324_v57  ;;  %v1816_v7 = vpop.f32.mrb[133].mxu1 }
 0x29b   : > { %1876 = vst [vmem:[%s4326_s28 + $0x8] sm:$0xff] %v1722_v44  ;;  %v1907_v55 = vadd.f32 %v1722_v44, %v1717_v48  ;;  %v1945_v12 = vmul.f32 %v1722_v44, %v1722_v44  ;;  %v2598_v26 = vadd.f32 %v1501_v14, %v4102_v1  ;;  %v1503_v34 = vpop.f32.mrb[5].mxu0  ;;  %v4407_v24 = vadd.f32 %v4271_v31, %v1816_v7 }
 0x29c   : > { %1896 = vst [vmem:[%s4326_s28 + $0xa8] sm:$0xff] %v4402_v29 }
 0x29d   : > { %v1976_v62 = vadd.f32 %v1945_v12, %v1944_v37  ;;  %v1727_v19 = vadd.f32 %v2598_v26, %v4297_v60  ;;  %1895 = vst [vmem:[%s4326_s28 + $0xa0] sm:$0xff] %v4407_v24  ;;  %v2327_v9 = vpop.f32.mrb[134].mxu1 }
 0x29e   : > { %v1506_v47 = vpop.f32.mrb[6].mxu0  ;;  %v4415_v41 = vadd.f32 %v4288_v16, %v2327_v9  ;;  %v1826_v1 = vpop.f32.mrb[135].mxu1 }
 0x29f   : > { %1877 = vst [vmem:[%s4326_s28 + $0x10] sm:$0xff] %v1727_v19  ;;  %v1908_v56 = vadd.f32 %v1907_v55, %v1727_v19  ;;  %v1946_v25 = vmul.f32 %v1727_v19, %v1727_v19  ;;  %v2599_v31 = vadd.f32 %v1506_v47, %v4108_v4  ;;  %v1508_v61 = vpop.f32.mrb[7].mxu0  ;;  %v4420_v23 = vadd.f32 %v4283_v35, %v1826_v1 }
 0x2a0   : > { %1898 = vst [vmem:[%s4326_s28 + $0xb8] sm:$0xff] %v4415_v41 }
 0x2a1   : > { %v1977_v60 = vadd.f32 %v1976_v62, %v1946_v25  ;;  %v1732_v36 = vadd.f32 %v2599_v31, %v4293_v2  ;;  %1897 = vst [vmem:[%s4326_s28 + $0xb0] sm:$0xff] %v4420_v23  ;;  %v2330_v16 = vpop.f32.mrb[136].mxu1 }
 0x2a2   : > { %v1511_v32 = vpop.f32.mrb[8].mxu0  ;;  %v4428_v27 = vadd.f32 %v4302_v54, %v2330_v16  ;;  %v1836_v4 = vpop.f32.mrb[137].mxu1 }
 0x2a3   : > { %1878 = vst [vmem:[%s4326_s28 + $0x18] sm:$0xff] %v1732_v36  ;;  %v1909_v48 = vadd.f32 %v1908_v56, %v1732_v36  ;;  %v1947_v49 = vmul.f32 %v1732_v36, %v1732_v36  ;;  %v2600_v35 = vadd.f32 %v1511_v32, %v4114_v53  ;;  %v1513_v20 = vpop.f32.mrb[9].mxu0  ;;  %v4433_v8 = vadd.f32 %v4295_v30, %v1836_v4 }
 0x2a4   : > { %1900 = vst [vmem:[%s4326_s28 + $0xc8] sm:$0xff] %v4428_v27 }
 0x2a5   : > { %v1978_v2 = vadd.f32 %v1977_v60, %v1947_v49  ;;  %v1737_v54 = vadd.f32 %v2600_v35, %v4304_v42  ;;  %1899 = vst [vmem:[%s4326_s28 + $0xc0] sm:$0xff] %v4433_v8  ;;  %v2333_v51 = vpop.f32.mrb[138].mxu1 }
 0x2a6   : > { %v1516_v40 = vpop.f32.mrb[10].mxu0  ;;  %v4441_v44 = vadd.f32 %v4317_v5, %v2333_v51  ;;  %v1846_v53 = vpop.f32.mrb[139].mxu1 }
 0x2a7   : > { %1879 = vst [vmem:[%s4326_s28 + $0x20] sm:$0xff] %v1737_v54  ;;  %v1910_v30 = vadd.f32 %v1909_v48, %v1737_v54  ;;  %v1948_v57 = vmul.f32 %v1737_v54, %v1737_v54  ;;  %v2601_v37 = vadd.f32 %v1516_v40, %v4122_v10  ;;  %v1518_v14 = vpop.f32.mrb[11].mxu0  ;;  %v4446_v7 = vadd.f32 %v4310_v28, %v1846_v53 }
 0x2a8   : > { %1902 = vst [vmem:[%s4326_s28 + $0xd8] sm:$0xff] %v4441_v44 }
 0x2a9   : > { %v1979_v42 = vadd.f32 %v1978_v2, %v1948_v57  ;;  %v1742_v5 = vadd.f32 %v2601_v37, %v4300_v45  ;;  %1901 = vst [vmem:[%s4326_s28 + $0xd0] sm:$0xff] %v4446_v7  ;;  %v2336_v55 = vpop.f32.mrb[140].mxu1 }
 0x2aa   : > { %v1521_v12 = vpop.f32.mrb[12].mxu0  ;;  %v4456_v10 = vadd.f32 %v4346_v0, %v2336_v55  ;;  %v1856_v26 = vpop.f32.mrb[141].mxu1 }
 0x2ab   : > { %1880 = vst [vmem:[%s4326_s28 + $0x28] sm:$0xff] %v1742_v5  ;;  %v1911_v28 = vadd.f32 %v1910_v30, %v1742_v5  ;;  %v1949_v34 = vmul.f32 %v1742_v5, %v1742_v5  ;;  %v2602_v62 = vadd.f32 %v1521_v12, %v4130_v33  ;;  %v1523_v19 = vpop.f32.mrb[13].mxu0  ;;  %v4461_v9 = vadd.f32 %v4332_v15, %v1856_v26 }
 0x2ac   : > { %1904 = vst [vmem:[%s4326_s28 + $0xe8] sm:$0xff] %v4456_v10 }
 0x2ad   : > { %v1980_v45 = vadd.f32 %v1979_v42, %v1949_v34  ;;  %v1747_v47 = vadd.f32 %v2602_v62, %v4312_v38  ;;  %1903 = vst [vmem:[%s4326_s28 + $0xe0] sm:$0xff] %v4461_v9  ;;  %v2339_v0 = vpop.f32.mrb[142].mxu1 }
 0x2ae   : > { %v1526_v1 = vpop.f32.mrb[14].mxu0  ;;  %v4470_v33 = vadd.f32 %v4374_v21, %v2339_v0  ;;  %v1866_v56 = vpop.f32.mrb[143].mxu1 }
 0x2af   : > { %1881 = vst [vmem:[%s4326_s28 + $0x30] sm:$0xff] %v1747_v47  ;;  %v1912_v15 = vadd.f32 %v1911_v28, %v1747_v47  ;;  %v1950_v25 = vmul.f32 %v1747_v47, %v1747_v47  ;;  %v2603_v31 = vadd.f32 %v1526_v1, %v4137_v18  ;;  %v1528_v38 = vpop.f32.mrb[15].mxu0  ;;  %v4475_v61 = vadd.f32 %v4360_v58, %v1866_v56 }
 0x2b0   : > { %1906 = vst [vmem:[%s4326_s28 + $0xf8] sm:$0xff] %v4470_v33 }
 0x2b1   : > { %v1981_v21 = vadd.f32 %v1980_v45, %v1950_v25  ;;  %v1752_v60 = vadd.f32 %v2603_v31, %v4308_v13  ;;  %1905 = vst [vmem:[%s4326_s28 + $0xf0] sm:$0xff] %v4475_v61 }
 0x2b3   : > { %1882 = vst [vmem:[%s4326_s28 + $0x38] sm:$0xff] %v1752_v60  ;;  %v1913_v18 = vadd.f32 %v1912_v15, %v1752_v60  ;;  %v1951_v58 = vmul.f32 %v1752_v60, %v1752_v60 }
 0x2b4   : > { %2937 = shalt.err (!%p2934_p3)
}
 0x2b5   : > { %s2938_s25 = scalar_lea.hbm %s4487_s24, 4096  ;;  %s2942_s4 = scalar_lea.hbm %s4847_s10, 32768 }
 0x2b6   : > { %p2939_p4 = scmp.ne.s32.totalorder %s4487_s24, %s2938_s25  ;;  %p2943_p1 = scmp.lt.u32.totalorder %s4487_s24, %s4847_s10 }
 0x2b7   : > { %p2944_p7 = scmp.lt.u32.totalorder %s2942_s4, %s2938_s25  ;;  %p2946_p2 = scmp.lt.u32.totalorder %s2938_s25, %s4487_s24 }
 0x2b8   : > { %p2940_p6 = pnand %p2939_p4, %p4848_p11 }
 0x2b9   : > { %p2945_p10 = por %p2944_p7, %p2943_p1 }
 0x2ba   : > { %p2941_p9 = pneg %p2940_p6 }
 0x2bb   : > { %p2947_p0 = por %p2946_p2, %p2945_p10 }
 0x2bd   : > { %p2948_p5 = pnand %p2947_p0, %p2941_p9 }
 0x2bf   : > { %2951 = shalt.err (!%p2948_p5)
}
 0x2c0   : > { %s3090_s7 = smov 128   ;;  %s3091_s3 = smov 8   ;;  %v1952_v13 = vmul.f32 %v4324_v63, %v4324_v63  ;;  %v1914_v36 = vadd.f32 %v1913_v18, %v4324_v63  ;;  %v1982_v16 = vadd.f32 %v1981_v21, %v1951_v58  ;;  %v1953_v32 = vmul.f32 %v4320_v11, %v4320_v11 }
 0x2c1   : > { %2741 = dma.vmem_to_hbm [thread:$0]  (%p4848_p11), %s4479_s8, 4096, %s4487_s24, %s4492_s26, %s3090_s7, %s3090_s7, %s3091_s3   ;;  %v1954_v49 = vmul.f32 %v4339_v6, %v4339_v6  ;;  %v1955_v2 = vmul.f32 %v4335_v17, %v4335_v17  ;;  %v1956_v63 = vmul.f32 %v4353_v46, %v4353_v46  ;;  %vm2013_vm2 = vcmask 1040384  }
 0x2c2   : > { %v1915_v4 = vadd.f32 %v1914_v36, %v4320_v11  ;;  %v1983_v48 = vadd.f32 %v1982_v16, %v1952_v13  ;;  %v1957_v11 = vmul.f32 %v4349_v52, %v4349_v52  ;;  %s2200_s8 = sshll.u32 %s3322_s9, 1  ;;  %s2207_s6 = sshll.u32 %s3070_s19, 2 }
 0x2c3   : > { %s2049_s30 = sadd.s32 %s3066_s18, %s2207_s6  ;;  %s238_s15 = scalar_lea.vmem [#allocation8], %s2200_s8 }
 0x2c4   : > { %v1916_v35 = vadd.f32 %v1915_v4, %v4339_v6  ;;  %v1984_v20 = vadd.f32 %v1983_v48, %v1953_v32  ;;  %v1958_v6 = vmul.f32 %v4367_v22, %v4367_v22  ;;  %s2208_s26 = sshll.u32 %s2049_s30, 5  ;;  %s2056_s2 = sshll.u32 %s238_s15, 4  ;;  %s4596_s2 = int_to_ptr.vmem [resolvable:$true] %s2056_s2 }
 0x2c5   : > { %s4850_s25 = sld [smem:[#allocation59_spill]]  ;;  %s2022_s18 = scalar_lea.sflag [#allocation9], %s3322_s9 }
 0x2c6   : > { %v1917_v54 = vadd.f32 %v1916_v35, %v4335_v17  ;;  %v1985_v51 = vadd.f32 %v1984_v20, %v1954_v49  ;;  %v1959_v17 = vmul.f32 %v4363_v59, %v4363_v59  ;;  %s2952_s19 = scalar_lea.vmem %s4596_s2, 32  ;;  %s3092_s28 = smov [#allocation8]  }
 0x2c7   : > { %p2953_p11 = scmp.ne.s32.totalorder %s4596_s2, %s2952_s19  ;;  %s2956_s4 = sshll.u32 %s3092_s28, 4  ;;  %s2957_s4 = int_to_ptr.vmem [resolvable:$false] %s2956_s4 }
 0x2c8   : > { %v1918_v40 = vadd.f32 %v1917_v54, %v4353_v46  ;;  %v1986_v53 = vadd.f32 %v1985_v51, %v1955_v2  ;;  %v1960_v46 = vmul.f32 %v4381_v39, %v4381_v39  ;;  %v1975_v2 = vmul.f32 %v4470_v33, %v4470_v33  ;;  %s2958_s1 = scalar_lea.vmem %s2957_s4, 64  ;;  %p2959_p3 = scmp.lt.s32.totalorder %s4596_s2, %s2957_s4 }
 0x2c9   : > { %p2954_p8 = pnand %p2953_p11, %p3259_p12  ;;  %p2960_p4 = scmp.lt.s32.totalorder %s2958_s1, %s2952_s19 }
 0x2ca   : > { %v1919_v30 = vadd.f32 %v1918_v40, %v4349_v52  ;;  %v1987_v57 = vadd.f32 %v1986_v53, %v1956_v63  ;;  %v1961_v52 = vmul.f32 %v4377_v50, %v4377_v50 }
 0x2cb   : > { %s4594_s27 = scalar_lea.hbm %s4850_s25, %s2208_s26  ;;  %p2955_p13 = pneg %p2954_p8 }
 0x2cc   : > { %v1920_v37 = vadd.f32 %v1919_v30, %v4367_v22  ;;  %v1988_v14 = vadd.f32 %v1987_v57, %v1957_v11  ;;  %v1962_v22 = vmul.f32 %v4394_v43, %v4394_v43  ;;  %p2961_p6 = por %p2960_p4, %p2959_p3 }
 0x2ce   : > { %v1921_v42 = vadd.f32 %v1920_v37, %v4363_v59  ;;  %v1989_v5 = vadd.f32 %v1988_v14, %v1958_v6  ;;  %v1963_v59 = vmul.f32 %v4389_v3, %v4389_v3  ;;  %p2962_p9 = pnand %p2961_p6, %p2955_p13 }
 0x2d0   : > { %v1922_v55 = vadd.f32 %v1921_v42, %v4381_v39  ;;  %v1990_v12 = vadd.f32 %v1989_v5, %v1959_v17  ;;  %v1964_v39 = vmul.f32 %v4407_v24, %v4407_v24 }
 0x2d2   : > { %v1923_v26 = vadd.f32 %v1922_v55, %v4377_v50  ;;  %v1991_v28 = vadd.f32 %v1990_v12, %v1960_v46  ;;  %v1965_v50 = vmul.f32 %v4402_v29, %v4402_v29 }
 0x2d4   : > { %v1992_v34 = vadd.f32 %v1991_v28, %v1961_v52  ;;  %v1924_v62 = vadd.f32 %v1923_v26, %v4394_v43  ;;  %v1966_v43 = vmul.f32 %v4420_v23, %v4420_v23 }
 0x2d6   : > { %v1925_v19 = vadd.f32 %v1924_v62, %v4389_v3  ;;  %v1993_v45 = vadd.f32 %v1992_v34, %v1962_v22  ;;  %v1967_v3 = vmul.f32 %v4415_v41, %v4415_v41 }
 0x2d8   : > { %v1926_v47 = vadd.f32 %v1925_v19, %v4407_v24  ;;  %v1994_v0 = vadd.f32 %v1993_v45, %v1963_v59  ;;  %v1968_v24 = vmul.f32 %v4433_v8, %v4433_v8 }
 0x2da   : > { %v1927_v1 = vadd.f32 %v1926_v47, %v4402_v29  ;;  %v1995_v56 = vadd.f32 %v1994_v0, %v1964_v39  ;;  %v1969_v29 = vmul.f32 %v4428_v27, %v4428_v27 }
 0x2dc   : > { %v1928_v15 = vadd.f32 %v1927_v1, %v4420_v23  ;;  %v1996_v25 = vadd.f32 %v1995_v56, %v1965_v50  ;;  %v1970_v23 = vmul.f32 %v4446_v7, %v4446_v7 }
 0x2de   : > { %v1929_v31 = vadd.f32 %v1928_v15, %v4415_v41  ;;  %v1997_v38 = vadd.f32 %v1996_v25, %v1966_v43  ;;  %v1971_v41 = vmul.f32 %v4441_v44, %v4441_v44 }
 0x2e0   : > { %v1930_v21 = vadd.f32 %v1929_v31, %v4433_v8  ;;  %v1998_v60 = vadd.f32 %v1997_v38, %v1967_v3  ;;  %v1972_v8 = vmul.f32 %v4461_v9, %v4461_v9 }
 0x2e2   : > { %v1931_v18 = vadd.f32 %v1930_v21, %v4428_v27  ;;  %v1999_v58 = vadd.f32 %v1998_v60, %v1968_v24  ;;  %v1973_v27 = vmul.f32 %v4456_v10, %v4456_v10 }
 0x2e4   : > { %v1932_v13 = vadd.f32 %v1931_v18, %v4446_v7  ;;  %v2000_v36 = vadd.f32 %v1999_v58, %v1969_v29 }
 0x2e6   : > { %v1933_v16 = vadd.f32 %v1932_v13, %v4441_v44  ;;  %v2001_v32 = vadd.f32 %v2000_v36, %v1970_v23  ;;  %v1974_v44 = vmul.f32 %v4475_v61, %v4475_v61 }
 0x2e8   : > { %v1934_v4 = vadd.f32 %v1933_v16, %v4461_v9  ;;  %v2002_v48 = vadd.f32 %v2001_v32, %v1971_v41 }
 0x2ea   : > { %v1935_v7 = vadd.f32 %v1934_v4, %v4456_v10  ;;  %v2003_v49 = vadd.f32 %v2002_v48, %v1972_v8 }
 0x2ec   : > { %v1936_v35 = vadd.f32 %v1935_v7, %v4475_v61  ;;  %v2004_v20 = vadd.f32 %v2003_v49, %v1973_v27 }
 0x2ee   : > { %v1937_v9 = vadd.f32 %v1936_v35, %v4470_v33  ;;  %v2005_v54 = vadd.f32 %v2004_v20, %v1974_v44 }
 0x2f0   : > { %v1938_v51 = vrot.slane %v1937_v9, 4  ;;  %v2006_v63 = vadd.f32 %v2005_v54, %v1975_v2 }
 0x2f2   : > { %v1939_v40 = vadd.f32 %v1938_v51, %v1937_v9  ;;  %v2007_v53 = vrot.slane %v2006_v63, 4 }
 0x2f4   : > { %v1940_v11 = vrot.slane %v1939_v40, 2  ;;  %v2008_v10 = vadd.f32 %v2007_v53, %v2006_v63 }
 0x2f6   : > { %v1941_v30 = vadd.f32 %v1940_v11, %v1939_v40  ;;  %v2009_v57 = vrot.slane %v2008_v10, 2 }
 0x2f8   : > { %v1942_v61 = vrot.slane %v1941_v30, 1  ;;  %v2010_v6 = vadd.f32 %v2009_v57, %v2008_v10 }
 0x2fa   : > { %v2011_v37 = vrot.slane %v2010_v6, 1  ;;  %v1943_v33 = vadd.f32 %v1942_v61, %v1941_v30 }
 0x2fc   : > { %v2012_v14 = vadd.f32 %v2011_v37, %v2010_v6 }
 0x2fe   : > { %v2014_v17 = vsel %vm2013_vm2, %v1943_v33, %v2012_v14 }
 0x2ff   : > { %2015 = vst [vmem:[%s238_s15] sm:$0x3] %v2014_v17 }
 0x300   : > { %2965 = shalt.err (!%p2962_p9)
}
 0x301   : > { %s2966_s9 = scalar_lea.hbm %s4594_s27, 32  ;;  %s2970_s3 = scalar_lea.hbm %s4850_s25, 256 }
 0x302   : > { %p2967_p1 = scmp.ne.s32.totalorder %s4594_s27, %s2966_s9  ;;  %p2971_p2 = scmp.lt.u32.totalorder %s4594_s27, %s4850_s25 }
 0x303   : > { %p2972_p0 = scmp.lt.u32.totalorder %s2970_s3, %s2966_s9  ;;  %p2974_p11 = scmp.lt.u32.totalorder %s2966_s9, %s4594_s27 }
 0x304   : > { %p2968_p7 = pnand %p2967_p1, %p3259_p12 }
 0x305   : > { %p2973_p5 = por %p2972_p0, %p2971_p2 }
 0x306   : > { %p2969_p10 = pneg %p2968_p7 }
 0x307   : > { %p2975_p8 = por %p2974_p11, %p2973_p5 }
 0x309   : > { %p2976_p13 = pnand %p2975_p8, %p2969_p10 }
 0x30b   : > { %2979 = shalt.err (!%p2976_p13)
}
 0x30c   : > { %2742 = dma.vmem_to_hbm [thread:$0]  (%p3259_p12), %s4596_s2, 32, %s4594_s27, %s2022_s18  }
 0x30d PF: > { %s4851_s30 = sld [smem:[#allocation14_spill]]  ;;  %s4852_s26 = sld [smem:[#allocation18_spill]] }
 0x30e   : > { %p2763_p3 = scmp.ge.s32.totalorder %s3082_s22, 2 }
 0x313   : > { %s2068_s15 = sand.u32 1, %s4851_s30   ;;  %p4853_p4 = scmp.ne.s32.totalorder %s4852_s26, 0 }
 0x314   : > { %s2069_s23 = scalar_lea.sflag [#allocation4], %s2068_s15 }
 0x315   : > { %p2754_p6 = pnand %p2763_p3, %p4853_p4 }
 0x317   : > { %3033 = dma.done.wait (!%p2754_p6), %s2069_s23, 4096  }
 0x318   : > { %3035 = vsyncadd (!%p2754_p6), %s2069_s23, 4294963200  ;;  %s4854_s5 = sld [smem:[#allocation15_spill]]  ;;  %s4855_s19 = sld [smem:[#allocation19_spill]] }
 0x31e   : > { %s2077_s28 = sand.u32 1, %s4854_s5   ;;  %p4856_p9 = scmp.ne.s32.totalorder %s4855_s19, 0 }
 0x31f   : > { %s2078_s24 = scalar_lea.sflag [#allocation9], %s2077_s28 }
 0x320   : > { %p2757_p1 = pnand %p2763_p3, %p4856_p9 }
 0x322   : > { %3037 = dma.done.wait (!%p2757_p1), %s2078_s24, 32  }
 0x323   : > { %3039 = vsyncadd (!%p2757_p1), %s2078_s24, 4294967264  ;;  %s24_s22 = sadd.s32 1, %s3082_s22   ;;  %s4857_s2 = smov %s3272_s12 }
 0x324   : > { %p21_p12 = scmp.ge.s32.totalorder %s24_s22, 10   ;;  %s4858_s18 = sld [smem:[#allocation16_spill]] }
 0x325   : > { %s4859_s27 = sld [smem:[#allocation20_spill]]  ;;  %s4860_s12 = smov %s3046_s13 }
 0x326   : > { %s4861_s13 = smov %s3050_s14  ;;  %s4862_s14 = smov %s3269_s29 }
 0x327   : > { %s4863_s15 = smov %s3058_s16  ;;  %s4864_s16 = smov %s3062_s17 }
 0x328   : > { %s4865_s17 = smov %s4857_s2  ;;  %s4866_s19 = smov %s3078_s21 }
 0x329   : > { %s4867_s20 = smov %s4870_s11  ;;  %23 = sbr.rel (!%p21_p12) target bundleno = 16 (0x10), region = 94 }
 0x32b   : > { %s4868_s21 = smov %s4859_s27 }
 0x330   :  { %2083 = vsyncpa [#allocation3], 1 }
 0x331   :  { %2085 = vsyncpa [#allocation3 + $0x1], 1 }
 0x332   :  { %2086 = vsyncpa [#allocation6], 1 }
 0x333   :  { %2087 = vsyncpa [#allocation4], 1 }
 0x334   :  { %2089 = vsyncpa [#allocation4 + $0x1], 1 }
 0x335   :  { %2090 = vsyncpa [#allocation9], 1 }
 0x336   :  { %2092 = vsyncpa [#allocation9 + $0x1], 1 }

// kernel: basic_block.4
= control target key start
LH: loop header
LB: loop body
LE: loop exit
PB: predicated region body
PF: predicated region fallthrough
CT: control target
= control target key end

     0   :  { %s6065_s0 = inlined_call_operand.hbm [shape: f32[8,10,34,128], index: 0, kind: input, shape index: {}]   ;;  %s6066_s1 = inlined_call_operand.hbm [shape: f32[1152,128], index: 1, kind: input, shape index: {}]   ;;  %s6067_s2 = inlined_call_operand.hbm [shape: f32[1,128], index: 2, kind: input, shape index: {}]   ;;  %s6068_s3 = inlined_call_operand.hbm [shape: f32[1,128], index: 3, kind: input, shape index: {}]   ;;  %s6069_s4 = inlined_call_operand.hbm [shape: f32[2,32,32,128], index: 4, kind: output, shape index: {0}]   ;;  %s6070_s5 = inlined_call_operand.hbm [shape: f32[8,2,128], index: 5, kind: output, shape index: {1}]  }
   0x1   :  { %6200 = sst [smem:[#allocation91_spill]] %s6066_s1 }
   0x2   :  { %6201 = sst [smem:[#allocation92_spill]] %s6067_s2 }
   0x3   :  { %6202 = sst [smem:[#allocation93_spill]] %s6068_s3 }
   0x4   :  { %6203 = sst [smem:[#allocation94_spill]] %s6069_s4 }
   0x5   :  { %6204 = sst [smem:[#allocation95_spill]] %s6070_s5 }
   0x6   :  { %11 = vsyncpa [#allocation3], 0 }
   0x7   :  { %13 = vsyncpa [#allocation3 + $0x1], 0 }
   0x8   :  { %14 = vsyncpa [#allocation6], 0 }
   0x9   :  { %15 = vsyncpa [#allocation9], 0 }
   0xa   :  { %16 = vsyncpa [#allocation4], 0 }
   0xb   :  { %18 = vsyncpa [#allocation4 + $0x1], 0 }
   0xc   :  { %19 = vsyncpa [#allocation12], 0 }
   0xd   :  { %21 = vsyncpa [#allocation12 + $0x1], 0  ;;  %s3771_s18 = smov 0   ;;  %s3773_s19 = smov 0  }
   0xe   :  { %s3775_s20 = smov 0   ;;  %s3777_s21 = smov 0  }
   0xf   :  { %s3779_s22 = smov 0   ;;  %s3781_s23 = smov 0  }
  0x10   :  { %s3783_s24 = smov 0   ;;  %s3785_s25 = smov 0  }
  0x11   :  { %s3787_s26 = smov 0   ;;  %s3789_s27 = smov 0  }
  0x12   :  { %s3791_s28 = smov 0  }
  0x13 LB: > { %6205 = sst [smem:[#allocation18_spill]] %s3688_s18  ;;  %s2655_s29 = sadd.s32 4294967295, %s3728_s28   ;;  %s3728_s28 = sphi %s3791_s28, %s27_s28   ;;  %s3724_s27 = sphi %s3789_s27, %s6476_s27   ;;  %s3720_s26 = sphi %s3787_s26, %s6475_s26   ;;  %s3716_s25 = sphi %s3785_s25, %s6474_s25   ;;  %s3712_s24 = sphi %s3783_s24, %s6473_s24   ;;  %s3708_s23 = sphi %s3781_s23, %s6472_s23   ;;  %s3704_s22 = sphi %s3779_s22, %s6471_s22   ;;  %s3700_s21 = sphi %s3777_s21, %s6470_s21   ;;  %s3696_s20 = sphi %s3775_s20, %s6469_s20   ;;  %s3692_s19 = sphi %s3773_s19, %s6468_s19   ;;  %s3688_s18 = sphi %s3771_s18, %s6467_s18  }
  0x14   : > { %6206 = sst [smem:[#allocation19_spill]] %s3692_s19  ;;  %s2656_s30 = sadd.s32 4294967294, %s3728_s28  }
  0x15   : > { %6207 = sst [smem:[#allocation20_spill]] %s3700_s21  ;;  %p63_p0 = scmp.ne.s32.totalorder %s3704_s22, %s3700_s21 }
  0x16   : > { %6208 = sst [smem:[#allocation21_spill]] %s3712_s24  ;;  %p3830_p1 = scmp.eq.s32.totalorder %s2655_s29, 0 }
  0x17   : > { %6209 = sst [smem:[#allocation22_spill]] %s3716_s25  ;;  %p151_p2 = scmp.ne.s32.totalorder %s3696_s20, %s3692_s19 }
  0x18   : > { %s6210_s6 = scalar_select %p3830_p1, 1, 0 }
  0x19   : > { %p3836_p3 = scmp.eq.s32.totalorder %s2655_s29, 7  ;;  %p3842_p4 = por %p3830_p1, %p63_p0 }
  0x1a   : > { %p157_p5 = scmp.ne.s32.totalorder %s3692_s19, %s3688_s18  ;;  %p158_p7 = scmp.eq.s32.totalorder %s2656_s30, 7 }
  0x1b   : > { %s6211_s7 = scalar_select %p3836_p3, 1, 0 }
  0x1c   : > { %s6212_s8 = scalar_select %p3842_p4, 1, 0 }
  0x1d   : > { %p3850_p6 = por %p3836_p3, %p151_p2  ;;  %p2661_p8 = scmp.ge.s32.totalorder %s3728_s28, 1 }
  0x1e   : > { %p195_p9 = scmp.lt.s32.totalorder %s3728_s28, 9  ;;  %p3856_p10 = por %p158_p7, %p157_p5 }
  0x1f   : > { %s6213_s9 = scalar_select %p3850_p6, 1, 0 }
  0x20   : > { %s6215_s10 = scalar_select %p3856_p10, 1, 0 }
  0x21   : > { %6214 = sst [smem:[#allocation23_spill]] %s6213_s9  ;;  %p3860_p11 = por %p158_p7, %p63_p0 }
  0x22   : > { %6216 = sst [smem:[#allocation24_spill]] %s6215_s10  ;;  %p3864_p12 = pnand %p2661_p8, %p195_p9 }
  0x23   : > { %s6217_s11 = scalar_select %p3860_p11, 1, 0 }
  0x24   : > { %s6219_s12 = scalar_select %p3864_p12, 1, 0 }
  0x25   : > { %6218 = sst [smem:[#allocation25_spill]] %s6217_s11  ;;  %p3325_p13 = pneg %p3864_p12 }
  0x26   : > { %s3730_s13 = smov [#allocation5]   ;;  %s3731_s16 = smov [#allocation7]  }
  0x27   : > { %s207_s14 = sshll.u32 %s3730_s13, 4  ;;  %p3872_p2 = pnand %p3325_p13, %p3830_p1  ;;  %s208_s14 = int_to_ptr.vmem [resolvable:$true] %s207_s14 }
  0x28   : > { %s221_s17 = sshll.u32 %s3731_s16, 4  ;;  %s6221_s1 = sld [smem:[#allocation91_spill]]  ;;  %s222_s17 = int_to_ptr.vmem [resolvable:$true] %s221_s17 }
  0x29   : > { %p3884_p5 = pneg %p3872_p2 }
  0x2e   : > { %s3452_s11 = scalar_lea.hbm %s6221_s1, 18432 }
  0x2f   : > { %p3453_p0 = scmp.ne.s32.totalorder %s6221_s1, %s3452_s11  ;;  %p3459_p9 = scmp.lt.u32.totalorder %s3452_s11, %s6221_s1 }
  0x31   : > { %p3455_p7 = pnand %p3884_p5, %p3453_p0 }
  0x33   : > { %p3456_p8 = pneg %p3455_p7 }
  0x35   : > { %p3461_p13 = pnand %p3459_p9, %p3456_p8 }
  0x37   : > { %3464 = shalt.err (!%p3461_p13)
}
  0x38   : > { %s3465_s16 = scalar_lea.vmem %s208_s14, 18432  ;;  %p3473_p1 = scmp.lt.s32.totalorder %s208_s14, %s208_s14 }
  0x39   : > { %p3466_p11 = scmp.ne.s32.totalorder %s208_s14, %s3465_s16  ;;  %p3474_p4 = scmp.lt.s32.totalorder %s3465_s16, %s3465_s16 }
  0x3b   : > { %p3468_p10 = pnand %p3466_p11, %p3884_p5  ;;  %p3475_p12 = por %p3474_p4, %p3473_p1 }
  0x3d   : > { %p3469_p6 = pneg %p3468_p10 }
  0x3f   : > { %p3476_p3 = pnand %p3475_p12, %p3469_p6 }
  0x41   : > { %3479 = shalt.err (!%p3476_p3)
}
  0x42   : > { %s6089_s21 = smov 128   ;;  %s6090_s10 = smov 8  }
  0x43   : > { %3328 = dma.hbm_to_vmem [thread:$0]  (!%p3872_p2), %s6221_s1, 18432, %s208_s14, [#allocation6], %s6089_s21, %s6089_s21, %s6090_s10  }
  0x44   : > { %s3734_s11 = smov [#allocation8]   ;;  %s6223_s2 = sld [smem:[#allocation92_spill]] }
  0x45   : > { %s232_s29 = sshll.u32 %s3734_s11, 4  ;;  %s233_s29 = int_to_ptr.vmem [resolvable:$true] %s232_s29 }
  0x4a   : > { %s3480_s4 = scalar_lea.hbm %s6223_s2, 16 }
  0x4b   : > { %p3481_p1 = scmp.ne.s32.totalorder %s6223_s2, %s3480_s4  ;;  %p3487_p6 = scmp.lt.u32.totalorder %s3480_s4, %s6223_s2 }
  0x4d   : > { %p3483_p3 = pnand %p3481_p1, %p3884_p5 }
  0x4f   : > { %p3484_p4 = pneg %p3483_p3 }
  0x51   : > { %p3489_p10 = pnand %p3487_p6, %p3484_p4 }
  0x53   : > { %3492 = shalt.err (!%p3489_p10)
}
  0x54   : > { %s3493_s14 = scalar_lea.vmem %s222_s17, 16  ;;  %s3500_s5 = scalar_lea.vmem %s222_s17, 32 }
  0x55   : > { %p3494_p11 = scmp.ne.s32.totalorder %s222_s17, %s3493_s14  ;;  %p3501_p7 = scmp.lt.s32.totalorder %s222_s17, %s222_s17 }
  0x56   : > { %p3502_p8 = scmp.lt.s32.totalorder %s3500_s5, %s3493_s14 }
  0x57   : > { %p3496_p12 = pnand %p3494_p11, %p3884_p5 }
  0x58   : > { %p3503_p9 = por %p3502_p8, %p3501_p7 }
  0x59   : > { %p3497_p0 = pneg %p3496_p12 }
  0x5b   : > { %p3504_p13 = pnand %p3503_p9, %p3497_p0 }
  0x5d   : > { %3507 = shalt.err (!%p3504_p13)
}
  0x5e   : > { %3331 = dma.hbm_to_vmem [thread:$0]  (!%p3872_p2), %s6223_s2, 16, %s222_s17, [#allocation6]  }
  0x5f   : > { %s6224_s3 = sld [smem:[#allocation93_spill]] }
  0x65   : > { %s3508_s24 = scalar_lea.hbm %s6224_s3, 16 }
  0x66   : > { %p3509_p1 = scmp.ne.s32.totalorder %s6224_s3, %s3508_s24  ;;  %p3515_p6 = scmp.lt.u32.totalorder %s3508_s24, %s6224_s3 }
  0x68   : > { %p3511_p3 = pnand %p3509_p1, %p3884_p5 }
  0x6a   : > { %p3512_p4 = pneg %p3511_p3 }
  0x6c   : > { %p3517_p10 = pnand %p3515_p6, %p3512_p4 }
  0x6e   : > { %3520 = shalt.err (!%p3517_p10)
}
  0x6f   : > { %s3521_s14 = scalar_lea.vmem %s233_s29, 16  ;;  %s3528_s17 = scalar_lea.vmem %s233_s29, 32 }
  0x70   : > { %p3522_p11 = scmp.ne.s32.totalorder %s233_s29, %s3521_s14  ;;  %p3529_p7 = scmp.lt.s32.totalorder %s233_s29, %s233_s29 }
  0x71   : > { %p3530_p8 = scmp.lt.s32.totalorder %s3528_s17, %s3521_s14 }
  0x72   : > { %p3524_p12 = pnand %p3522_p11, %p3884_p5 }
  0x73   : > { %p3531_p9 = por %p3530_p8, %p3529_p7 }
  0x74   : > { %p3525_p0 = pneg %p3524_p12 }
  0x76   : > { %p3532_p13 = pnand %p3531_p9, %p3525_p0 }
  0x78   : > { %3535 = shalt.err (!%p3532_p13)
}
  0x79   : > { %3334 = dma.hbm_to_vmem [thread:$0]  (!%p3872_p2), %s6224_s3, 16, %s233_s29, [#allocation9]  }
  0x7a   : > { %s36_s13 = sadd.s32 1, %s3720_s26  ;;  %s39_s15 = sadd.s32 1, %s3724_s27 }
  0x7b   : > { %p37_p5 = scmp.ge.s32.totalorder %s36_s13, 4  ;;  %s2657_s9 = sshll.u32 %s3724_s27, 2 }
  0x7c   : > { %s50_s4 = sadd.s32 1, %s3708_s23  ;;  %s44_s19 = sadd.s32 %s3720_s26, %s2657_s9 }
  0x7d   : > { %s6478_s13 = smov (%p37_p5, %s36_s13), 0  ;;  %s6480_s15 = smov (!%p37_p5, %s39_s15), %s3724_s27 }
  0x7e   : > { %p57_p1 = scmp.ne.s32.totalorder %s3708_s23, %s3704_s22  ;;  %p41_p3 = scmp.ge.s32.totalorder %s6480_s15, 2 }
  0x7f   : > { %p58_p4 = scmp.eq.s32.totalorder %s3728_s28, 0  ;;  %s137_s29 = ssub.s32 %s3720_s26, %s6478_s13 }
  0x80   : > { %s141_s24 = sadd.s32 1, %s3696_s20  ;;  %s6482_s15 = smov (%p41_p3, %s6480_s15), 0 }
  0x81   : > { %p3955_p2 = por %p58_p4, %p57_p1  ;;  %p6226_p6 = scmp.ne.s32.totalorder %s6211_s7, 0 }
  0x82   : > { %s2658_s30 = sshll.u32 %s6482_s15, 2  ;;  %s136_s16 = ssub.s32 %s3724_s27, %s6482_s15 }
  0x83   : > { %p3961_p10 = por %p6226_p6, %p57_p1  ;;  %s46_s14 = sadd.s32 %s2658_s30, %s6478_s13 }
  0x84   : > { %s138_s17 = sor.u32 %s137_s29, %s136_s16  ;;  %s47_s5 = ssub.s32 %s44_s19, %s46_s14 }
  0x85   : > { %p139_p11 = scmp.eq.s32.totalorder %s138_s17, 0  ;;  %p48_p12 = scmp.eq.s32.totalorder %s47_s5, 0 }
  0x86   : > { %p3349_p0 = scmp.lt.s32.totalorder %s3728_s28, 8  ;;  %s243_s21 = sand.u32 1, %s3708_s23  }
  0x87   : > { %s3971_s25 = scalar_select %p139_p11, %s3696_s20, %s141_s24  }
  0x88   : > { %s3974_s9 = scalar_select %p48_p12, %s3708_s23, %s50_s4  }
  0x89   : > { %s3305_s10 = smul.u32 6400, %s44_s19  ;;  %p3979_p7 = pnand %p3349_p0, %p3955_p2 }
  0x8a   : > { %s3304_s7 = smul.u32 400, %s243_s21  ;;  %s3990_s19 = scalar_lea.sflag [#allocation3], %s243_s21 }
  0x8b   : > { %s3986_s29 = scalar_lea.hbm %s6065_s0, %s3305_s10  ;;  %p3538_p9 = pneg %p3979_p7 }
  0x8c   : > { %s247_s4 = scalar_lea.vmem [#allocation2], %s3304_s7  ;;  %s3536_s18 = scalar_lea.hbm %s3986_s29, 6400 }
  0x8d   : > { %s256_s24 = sshll.u32 %s247_s4, 4  ;;  %p3537_p8 = scmp.ne.s32.totalorder %s3986_s29, %s3536_s18  ;;  %s3988_s24 = int_to_ptr.vmem [resolvable:$true] %s256_s24 }
  0x8e   : > { %s3541_s10 = scalar_lea.hbm %s6065_s0, 51200  ;;  %p3542_p1 = scmp.lt.u32.totalorder %s3986_s29, %s6065_s0 }
  0x8f   : > { %p3539_p13 = pnand %p3538_p9, %p3537_p8  ;;  %p3543_p3 = scmp.lt.u32.totalorder %s3541_s10, %s3536_s18 }
  0x90   : > { %p3545_p2 = scmp.lt.u32.totalorder %s3536_s18, %s3986_s29 }
  0x91   : > { %p3540_p5 = pneg %p3539_p13  ;;  %p3544_p4 = por %p3543_p3, %p3542_p1 }
  0x93   : > { %p3546_p6 = por %p3545_p2, %p3544_p4 }
  0x95   : > { %p3547_p11 = pnand %p3546_p6, %p3540_p5 }
  0x97   : > { %3550 = shalt.err (!%p3547_p11)
}
  0x98   : > { %s3551_s21 = scalar_lea.vmem %s3988_s24, 6400  ;;  %s3735_s14 = smov [#allocation2]  }
  0x99   : > { %p3552_p12 = scmp.ne.s32.totalorder %s3988_s24, %s3551_s21  ;;  %s3556_s17 = sshll.u32 %s3735_s14, 4  ;;  %s3557_s17 = int_to_ptr.vmem [resolvable:$false] %s3556_s17 }
  0x9a   : > { %s3558_s5 = scalar_lea.vmem %s3557_s17, 12800  ;;  %p3559_p13 = scmp.lt.s32.totalorder %s3988_s24, %s3557_s17 }
  0x9b   : > { %p3554_p0 = pnand %p3552_p12, %p3538_p9  ;;  %p3560_p1 = scmp.lt.s32.totalorder %s3558_s5, %s3551_s21 }
  0x9d   : > { %p3555_p8 = pneg %p3554_p0  ;;  %p3561_p3 = por %p3560_p1, %p3559_p13 }
  0x9f   : > { %p3562_p4 = pnand %p3561_p3, %p3555_p8 }
  0xa1   : > { %3565 = shalt.err (!%p3562_p4)
}
  0xa2   : > { %s6229_s7 = smov 8   ;;  %s6230_s4 = smov 128  }
  0xa3   : > { %3338 = dma.hbm_to_vmem [thread:$0]  (!%p3979_p7), %s3986_s29, 6400, %s3988_s24, %s3990_s19, %s6230_s4, %s6230_s4, %s6229_s7  }
  0xa4   : > { %p6231_p9 = scmp.ne.s32.totalorder %s6219_s12, 0 }
  0xa6   : > { %268 = sbr.rel (%p6231_p9) target bundleno = 840 (0x348), region = 36 }
  0xad   : > { %s4024_s18 = sand.u32 1, %s3704_s22   ;;  %p6232_p5 = scmp.ne.s32.totalorder %s6212_s8, 0 }
  0xae   : > { %s3306_s2 = smul.u32 400, %s4024_s18  ;;  %s271_s3 = scalar_lea.sflag [#allocation3], %s4024_s18 }
  0xb0   : > { %s4028_s10 = scalar_lea.vmem [#allocation2], %s3306_s2 }
  0xb1   : > { %3667 = dma.done.wait (%p6232_p5), %s271_s3, 6400  }
  0xb2   : > { %3669 = vsyncadd (%p6232_p5), %s271_s3, 4294960896  ;;  %p6233_p7 = scmp.ne.s32.totalorder %s6210_s6, 0 }
  0xb4   : > { %3671 = dma.done.wait (%p6233_p7), [#allocation6], 18448  }
  0xb5   : > { %3673 = vsyncadd (%p6233_p7), [#allocation6], 4294948848 }
  0xb6   : > { %3675 = dma.done.wait (%p6233_p7), [#allocation9], 16  }
  0xb7   : > { %3677 = vsyncadd (%p6233_p7), [#allocation9], 4294967280  ;;  %v6092_v0 = vmov 0.0|0.0   ;;  %v1056_v1 = vld [vmem:[#allocation5] sm:$0xff]  ;;  %v1057_v2 = vld [vmem:[#allocation5 + $0x8] sm:$0xff]  ;;  %s6234_s1 = sld [smem:[#allocation21_spill]]  ;;  %v548_v30 = vlaneseq }
  0xb8   : > { %2912 = vmatprep.subr.bf16.mxu1 %v6092_v0  ;;  %2960 = vmatprep.subr.bf16.mxu0 %v6092_v0  ;;  %v1088_v3 = vld [vmem:[#allocation5 + $0x100] sm:$0xff]  ;;  %v2913_v4 = vpack.c.bf16 %v1057_v2, %v1056_v1  ;;  %v1089_v5 = vld [vmem:[#allocation5 + $0x108] sm:$0xff]  ;;  %v1058_v6 = vld [vmem:[#allocation5 + $0x10] sm:$0xff]  ;;  %vm6169_vm9 = vcmask 1046528   ;;  %vm6188_vm11 = vcmask 1045504   ;;  %s6455_s8 = sld [smem:[#allocation19_spill]] }
  0xb9   : > { %v1059_v7 = vld [vmem:[#allocation5 + $0x18] sm:$0xff]  ;;  %v2961_v8 = vpack.c.bf16 %v1089_v5, %v1088_v3  ;;  %v1090_v9 = vld [vmem:[#allocation5 + $0x110] sm:$0xff]  ;;  %v1060_v13 = vld [vmem:[#allocation5 + $0x20] sm:$0xff]  ;;  %v4058_v38 = vshrl.u32 %v548_v30, 7  ;;  %s6456_s19 = sld [smem:[#allocation22_spill]]  ;;  %s6457_s5 = sld [smem:[#allocation23_spill]] }
  0xba   : > { %v1091_v10 = vld [vmem:[#allocation5 + $0x118] sm:$0xff]  ;;  %2914 = vmatpush1.bf16.msra.mxu1 %v2913_v4  ;;  %v2916_v11 = vpack.c.bf16 %v1059_v7, %v1058_v6  ;;  %v1061_v14 = vld [vmem:[#allocation5 + $0x28] sm:$0xff]  ;;  %v1092_v15 = vld [vmem:[#allocation5 + $0x120] sm:$0xff]  ;;  %s6458_s2 = sld [smem:[#allocation94_spill]] }
  0xbb   : > { %2962 = vmatpush1.bf16.msra.mxu0 %v2961_v8  ;;  %2915 = vmatprep.subr.bf16.mxu1 %v6092_v0  ;;  %v2964_v12 = vpack.c.bf16 %v1091_v10, %v1090_v9  ;;  %v1093_v16 = vld [vmem:[#allocation5 + $0x128] sm:$0xff]  ;;  %v2919_v17 = vpack.c.bf16 %v1061_v14, %v1060_v13  ;;  %v1062_v19 = vld [vmem:[#allocation5 + $0x30] sm:$0xff]  ;;  %v1063_v20 = vld [vmem:[#allocation5 + $0x38] sm:$0xff]  ;;  %6236 = vst [vmem:[#allocation27_spill] sm:$0xff] %v4058_v38  ;;  %vm6170_vm5 = vcmp.ge.s32.totalorder %v4058_v38, 1 }
  0xbc   : > { %2963 = vmatprep.subr.bf16.mxu0 %v6092_v0  ;;  %v2967_v18 = vpack.c.bf16 %v1093_v16, %v1092_v15  ;;  %v1094_v21 = vld [vmem:[#allocation5 + $0x130] sm:$0xff]  ;;  %v1095_v22 = vld [vmem:[#allocation5 + $0x138] sm:$0xff]  ;;  %v2922_v23 = vpack.c.bf16 %v1063_v20, %v1062_v19  ;;  %v1064_v25 = vld [vmem:[#allocation5 + $0x40] sm:$0xff] }
  0xbd   : > { %s2676_s6 = sshll.u32 %s6234_s1, 3  ;;  %v2970_v24 = vpack.c.bf16 %v1095_v22, %v1094_v21  ;;  %v1065_v26 = vld [vmem:[#allocation5 + $0x48] sm:$0xff]  ;;  %v1096_v27 = vld [vmem:[#allocation5 + $0x140] sm:$0xff]  ;;  %v1066_v33 = vld [vmem:[#allocation5 + $0x50] sm:$0xff]  ;;  %s2783_s30 = sshll.u32 %s6234_s1, 5 }
  0xbe   : > { %2917 = vmatpush1.bf16.msra.mxu1 %v2916_v11  ;;  %v1097_v28 = vld [vmem:[#allocation5 + $0x148] sm:$0xff]  ;;  %v4051_v29 = vstv %s2676_s6  ;;  %v2925_v31 = vpack.c.bf16 %v1065_v26, %v1064_v25  ;;  %v1067_v34 = vld [vmem:[#allocation5 + $0x58] sm:$0xff]  ;;  %v1098_v36 = vld [vmem:[#allocation5 + $0x150] sm:$0xff]  ;;  %s308_s12 = sand.u32 1, %s6455_s8  }
  0xbf   : > { %2965 = vmatpush1.bf16.msra.mxu0 %v2964_v12  ;;  %2918 = vmatprep.subr.bf16.mxu1 %v6092_v0  ;;  %6235 = vst [vmem:[#allocation26_spill] sm:$0xff] %v4051_v29  ;;  %v2973_v32 = vpack.c.bf16 %v1097_v28, %v1096_v27  ;;  %vm554_vm0 = vcmp.ge.s32.totalorder %v4051_v29, 1  ;;  %vm564_vm1 = vcmp.le.s32.totalorder %v4051_v29, 32  ;;  %v539_v35 = vadd.s32 1, %v4051_v29  ;;  %v1099_v37 = vld [vmem:[#allocation5 + $0x158] sm:$0xff]  ;;  %v1068_v42 = vld [vmem:[#allocation5 + $0x60] sm:$0xff] }
  0xc0   : > { %2966 = vmatprep.subr.bf16.mxu0 %v6092_v0  ;;  %v2928_v39 = vpack.c.bf16 %v1067_v34, %v1066_v33  ;;  %vm4060_vm2 = vmand %vm554_vm0, %vm564_vm1  ;;  %v2976_v41 = vpack.c.bf16 %v1099_v37, %v1098_v36  ;;  %v1069_v43 = vld [vmem:[#allocation5 + $0x68] sm:$0xff]  ;;  %v1100_v44 = vld [vmem:[#allocation5 + $0x160] sm:$0xff]  ;;  %s2672_s29 = sshll.u32 %s308_s12, 8  ;;  %s2777_s16 = sshll.u32 %s6456_s19, 7 }
  0xc1   : > { %vm555_vm3 = vcmp.ge.s32.totalorder %v539_v35, 1  ;;  %vm565_vm4 = vcmp.le.s32.totalorder %v539_v35, 32  ;;  %v1101_v45 = vld [vmem:[#allocation5 + $0x168] sm:$0xff]  ;;  %v323_v46 = vld [vmem:[%s4028_s10] sm:$0xff]  ;;  %v2931_v51 = vpack.c.bf16 %v1069_v43, %v1068_v42  ;;  %v1071_v58 = vld [vmem:[#allocation5 + $0x78] sm:$0xff]  ;;  %s5731_s24 = scalar_lea.vmem [#allocation10], %s2672_s29  ;;  %s2485_s21 = sadd.s32 %s2783_s30, %s2777_s16 }
  0xc2   : > { %2920 = vmatpush1.bf16.msra.mxu1 %v2919_v17  ;;  %v324_v47 = vld [vmem:[%s4028_s10 + $0x8] sm:$0xff]  ;;  %v4068_v48 = vld [vmem:[#allocation7] ss:$0 sm:$0xff]  ;;  %v4070_v49 = vld [vmem:[#allocation8] ss:$0 sm:$0xff]  ;;  %v2979_v56 = vpack.c.bf16 %v1101_v45, %v1100_v44  ;;  %s2488_s14 = sshll.u32 %s5731_s24, 4  ;;  %s5884_s14 = int_to_ptr.vmem [resolvable:$true] %s2488_s14 }
  0xc3   : > { %2968 = vmatpush1.bf16.msra.mxu0 %v2967_v18  ;;  %2921 = vmatprep.subr.bf16.mxu1 %v6092_v0  ;;  %v328_v50 = vld [vmem:[%s4028_s10 + $0x28] sm:$0xff]  ;;  %v381_v52 = vmul.f32 %v4068_v48, %v323_v46  ;;  %v382_v53 = vmul.f32 %v4068_v48, %v324_v47  ;;  %vm4078_vm6 = vmand %vm555_vm3, %vm565_vm4  ;;  %v1070_v57 = vld [vmem:[#allocation5 + $0x70] sm:$0xff]  ;;  %s2778_s17 = sshll.u32 %s2485_s21, 7  ;;  %s3566_s6 = scalar_lea.vmem %s5884_s14, 4096 }
  0xc4   : > { %2969 = vmatprep.subr.bf16.mxu0 %v6092_v0  ;;  %v386_v54 = vmul.f32 %v4068_v48, %v328_v50  ;;  %v1102_v59 = vld [vmem:[#allocation5 + $0x170] sm:$0xff]  ;;  %v1103_v60 = vld [vmem:[#allocation5 + $0x178] sm:$0xff]  ;;  %vm4094_vm7 = vmand %vm4060_vm2, %vm6170_vm5  ;;  %v2934_v3 = vpack.c.bf16 %v1071_v58, %v1070_v57  ;;  %s5892_s3 = scalar_lea.hbm %s6458_s2, %s2778_s17  ;;  %p3567_p2 = scmp.ne.s32.totalorder %s5884_s14, %s3566_s6 }
  0xc5   : > { %v4085_v61 = vadd.f32 %v4070_v49, %v381_v52  ;;  %v4088_v62 = vadd.f32 %v4070_v49, %v382_v53  ;;  %vm4103_vm8 = vmand %vm4078_vm6, %vm6170_vm5  ;;  %v2982_v7 = vpack.c.bf16 %v1103_v60, %v1102_v59  ;;  %v1072_v8 = vld [vmem:[#allocation5 + $0x80] sm:$0xff]  ;;  %v1073_v9 = vld [vmem:[#allocation5 + $0x88] sm:$0xff]  ;;  %p6459_p6 = scmp.ne.s32.totalorder %s6457_s5, 0  ;;  %s3737_s29 = smov [#allocation10]  }
  0xc6   : > { %2923 = vmatpush1.bf16.msra.mxu1 %v2922_v23  ;;  %v442_v1 = vadd.f32 %v4070_v49, %v386_v54  ;;  %v1104_v10 = vld [vmem:[#allocation5 + $0x180] sm:$0xff]  ;;  %v1105_v11 = vld [vmem:[#allocation5 + $0x188] sm:$0xff]  ;;  %v2937_v16 = vpack.c.bf16 %v1073_v9, %v1072_v8  ;;  %v1074_v18 = vld [vmem:[#allocation5 + $0x90] sm:$0xff]  ;;  %s3570_s30 = sshll.u32 %s3737_s29, 4  ;;  %s3571_s30 = int_to_ptr.vmem [resolvable:$false] %s3570_s30 }
  0xc7   : > { %2971 = vmatpush1.bf16.msra.mxu0 %v2970_v24  ;;  %2924 = vmatprep.subr.bf16.mxu1 %v6092_v0  ;;  %v487_v4 = vmax.f32 %v4085_v61, 0.0  ;;  %v488_v5 = vmax.f32 %v4088_v62, 0.0  ;;  %v2985_v17 = vpack.c.bf16 %v1105_v11, %v1104_v10  ;;  %v1075_v19 = vld [vmem:[#allocation5 + $0x98] sm:$0xff]  ;;  %v1106_v21 = vld [vmem:[#allocation5 + $0x190] sm:$0xff]  ;;  %v1076_v25 = vld [vmem:[#allocation5 + $0xa0] sm:$0xff]  ;;  %p3568_p11 = pnand %p3567_p2, %p6459_p6  ;;  %s3572_s16 = scalar_lea.vmem %s3571_s30, 8192 }
  0xc8   : > { %2972 = vmatprep.subr.bf16.mxu0 %v6092_v0  ;;  %v4109_v6 = vmax.f32 %v442_v1, 0.0  ;;  %v1107_v22 = vld [vmem:[#allocation5 + $0x198] sm:$0xff]  ;;  %v2940_v23 = vpack.c.bf16 %v1075_v19, %v1074_v18  ;;  %v1077_v26 = vld [vmem:[#allocation5 + $0xa8] sm:$0xff]  ;;  %v1108_v27 = vld [vmem:[#allocation5 + $0x1a0] sm:$0xff]  ;;  %v4161_v18 = vadd.s32 32, %v4058_v38  ;;  %p3573_p0 = scmp.lt.s32.totalorder %s5884_s14, %s3571_s30  ;;  %p3574_p8 = scmp.lt.s32.totalorder %s3572_s16, %s3566_s6 }
  0xc9   : > { %v4117_v12 = vsel %vm4094_vm7, %v487_v4, 0.0  ;;  %v4123_v13 = vsel %vm4060_vm2, %v488_v5, 0.0  ;;  %v2988_v24 = vpack.c.bf16 %v1107_v22, %v1106_v21  ;;  %v1109_v28 = vld [vmem:[#allocation5 + $0x1a8] sm:$0xff]  ;;  %v2943_v30 = vpack.c.bf16 %v1077_v26, %v1076_v25  ;;  %v1079_v33 = vld [vmem:[#allocation5 + $0xb8] sm:$0xff]  ;;  %v1110_v34 = vld [vmem:[#allocation5 + $0x1b0] sm:$0xff]  ;;  %p3569_p12 = pneg %p3568_p11 }
  0xca   : > { %2926 = vmatpush1.bf16.msra.mxu1 %v2925_v31  ;;  %2709 = vmatprep.mubr.msk.f32.mxu0 %vm4103_vm8, %v4109_v6  ;;  %v785_v14 = vrot.slane %v4117_v12, 1  ;;  %v786_v15 = vrot.slane %v4123_v13, 1  ;;  %v2991_v31 = vpack.c.bf16 %v1109_v28, %v1108_v27  ;;  %v1111_v35 = vld [vmem:[#allocation5 + $0x1b8] sm:$0xff]  ;;  %v325_v36 = vld [vmem:[%s4028_s10 + $0x10] sm:$0xff]  ;;  %v1081_v42 = vld [vmem:[#allocation5 + $0xc8] sm:$0xff]  ;;  %6245 = vst [vmem:[#allocation28_spill] sm:$0xff] %v4161_v18  ;;  %p3575_p13 = por %p3574_p8, %p3573_p0 }
  0xcb   : > { %2974 = vmatpush1.bf16.msra.mxu0 %v2973_v32  ;;  %2927 = vmatprep.subr.bf16.mxu1 %v6092_v0  ;;  %v1078_v32 = vld [vmem:[#allocation5 + $0xb0] sm:$0xff]  ;;  %v1112_v43 = vld [vmem:[#allocation5 + $0x1c0] sm:$0xff]  ;;  %v1113_v44 = vld [vmem:[#allocation5 + $0x1c8] sm:$0xff]  ;;  %v383_v45 = vmul.f32 %v4068_v48, %v325_v36  ;;  %vm6161_vm10 = vcmp.le.s32.totalorder %v4161_v18, 32 }
  0xcc   : > { %2975 = vmatprep.subr.bf16.mxu0 %v6092_v0  ;;  %v787_v20 = vsel %vm6169_vm9, %v785_v14, %v786_v15  ;;  %v2946_v37 = vpack.c.bf16 %v1079_v33, %v1078_v32  ;;  %v326_v46 = vld [vmem:[%s4028_s10 + $0x18] sm:$0xff]  ;;  %v2997_v50 = vpack.c.bf16 %v1113_v44, %v1112_v43  ;;  %v1114_v53 = vld [vmem:[#allocation5 + $0x1d0] sm:$0xff]  ;;  %v1084_v1 = vld [vmem:[#allocation5 + $0xe0] sm:$0xff]  ;;  %v890_v33 = vrot.slane %v4117_v12, 2  ;;  %p3576_p1 = pnand %p3575_p13, %p3569_p12 }
  0xcd   : > { %1264 = vmatprep.mubr.f32.mxu1 %v787_v20  ;;  %v1083_v52 = vld [vmem:[#allocation5 + $0xd8] sm:$0xff]  ;;  %v384_v57 = vmul.f32 %v4068_v48, %v326_v46  ;;  %v327_v58 = vld [vmem:[%s4028_s10 + $0x20] sm:$0x3]  ;;  %v1117_v9 = vld [vmem:[#allocation5 + $0x1e8] sm:$0xff] }
  0xce   : > { %2929 = vmatpush1.bf16.msra.mxu1 %v2928_v39  ;;  %v2994_v39 = vpack.c.bf16 %v1111_v35, %v1110_v34  ;;  %v1115_v54 = vld [vmem:[#allocation5 + $0x1d8] sm:$0xff]  ;;  %v1116_v8 = vld [vmem:[#allocation5 + $0x1e0] sm:$0xff]  ;;  %v385_v14 = vmul.f32 %v4068_v48, %v327_v58  ;;  %v1086_v20 = vld [vmem:[#allocation5 + $0xf0] sm:$0xff]  ;;  %v891_v34 = vrot.slane %v4123_v13, 2  ;;  %v4219_v13 = vsel %vm4103_vm8, %v4109_v6, 0.0 }
  0xcf   : > { %2977 = vmatpush1.bf16.msra.mxu0 %v2976_v41  ;;  %2930 = vmatprep.subr.bf16.mxu1 %v6092_v0  ;;  %v1080_v41 = vld [vmem:[#allocation5 + $0xc0] sm:$0xff]  ;;  %v3000_v60 = vpack.c.bf16 %v1115_v54, %v1114_v53  ;;  %v4156_v11 = vadd.f32 %v4070_v49, %v384_v57  ;;  %v3003_v19 = vpack.c.bf16 %v1117_v9, %v1116_v8  ;;  %v1087_v21 = vld [vmem:[#allocation5 + $0xf8] sm:$0xff]  ;;  %v1121_v36 = vld [vmem:[#allocation5 + $0x208] sm:$0xff] }
  0xd0   : > { %2978 = vmatprep.subr.bf16.mxu0 %v6092_v0  ;;  %v2949_v47 = vpack.c.bf16 %v1081_v42, %v1080_v41  ;;  %v330_v22 = vld [vmem:[%s4028_s10 + $0x38] sm:$0xff]  ;;  %v441_v27 = vadd.f32 %v4070_v49, %v385_v14  ;;  %v2958_v28 = vpack.c.bf16 %v1087_v21, %v1086_v20  ;;  %v1120_v35 = vld [vmem:[#allocation5 + $0x200] sm:$0xff]  ;;  %vm4193_vm12 = vmand %vm4060_vm2, %vm6161_vm10  ;;  %v892_v53 = vsel %vm6188_vm11, %v890_v33, %v891_v34 }
  0xd1   : > { %v490_v26 = vmax.f32 %v4156_v11, 0.0  ;;  %v331_v42 = vld [vmem:[%s4028_s10 + $0x40] sm:$0xff]  ;;  %v1153_v44 = vld [vmem:[#allocation5 + $0x308] sm:$0xff]  ;;  %v1155_v9 = vld [vmem:[#allocation5 + $0x318] sm:$0xff] }
  0xd2   : > { %2932 = vmatpush1.bf16.msra.mxu1 %v2931_v51  ;;  %v1082_v51 = vld [vmem:[#allocation5 + $0xd0] sm:$0xff]  ;;  %v491_v41 = vmax.f32 %v441_v27, 0.0  ;;  %v1152_v43 = vld [vmem:[#allocation5 + $0x300] sm:$0xff]  ;;  %v389_v58 = vmul.f32 %v4068_v48, %v331_v42  ;;  %v1125_v63 = vld [vmem:[#allocation5 + $0x228] sm:$0xff]  ;;  %v794_v27 = vrot.slane %v4219_v13, 1 }
  0xd3   : > { %2980 = vmatpush1.bf16.msra.mxu0 %v2979_v56  ;;  %2933 = vmatprep.subr.bf16.mxu1 %v6092_v0  ;;  %v4147_v56 = vadd.f32 %v4070_v49, %v383_v45  ;;  %v2952_v59 = vpack.c.bf16 %v1083_v52, %v1082_v51  ;;  %v3009_v45 = vpack.c.bf16 %v1121_v36, %v1120_v35  ;;  %v1122_v51 = vld [vmem:[#allocation5 + $0x210] sm:$0xff]  ;;  %v1123_v52 = vld [vmem:[#allocation5 + $0x218] sm:$0xff]  ;;  %vm4329_vm1 = vmand %vm4078_vm6, %vm6161_vm10 }
  0xd4   : > { %2981 = vmatprep.subr.bf16.mxu0 %v6092_v0  ;;  %v1154_v8 = vld [vmem:[#allocation5 + $0x310] sm:$0xff]  ;;  %v445_v21 = vadd.f32 %v4070_v49, %v389_v58  ;;  %v1127_v42 = vld [vmem:[#allocation5 + $0x238] sm:$0xff] }
  0xd5   : > { %v489_v10 = vmax.f32 %v4147_v56, 0.0 }
  0xd6   : > { %2935 = vmatpush1.bf16.msra.mxu1 %v2934_v3  ;;  %v1085_v3 = vld [vmem:[#allocation5 + $0xe8] sm:$0xff]  ;;  %v4263_v35 = vmax.f32 %v445_v21, 0.0 }
  0xd7   : > { %2983 = vmatpush1.bf16.msra.mxu0 %v2982_v7  ;;  %2936 = vmatprep.subr.bf16.mxu1 %v6092_v0  ;;  %v329_v7 = vld [vmem:[%s4028_s10 + $0x30] sm:$0xff]  ;;  %v4170_v25 = vsel %vm4060_vm2, %v489_v10, 0.0 }
  0xd8   : > { %2984 = vmatprep.subr.bf16.mxu0 %v6092_v0 }
  0xda   : > { %2938 = vmatpush1.bf16.msra.mxu1 %v2937_v16  ;;  %v2955_v16 = vpack.c.bf16 %v1085_v3, %v1084_v1  ;;  %v4214_v1 = vpack.c.bf16 %v1153_v44, %v1152_v43  ;;  %v540_v3 = vadd.s32 2, %v4051_v29  ;;  %v899_v44 = vrot.slane %v4219_v13, 2 }
  0xdb   : > { %2986 = vmatpush1.bf16.msra.mxu0 %v2985_v17  ;;  %2939 = vmatprep.subr.bf16.mxu1 %v6092_v0  ;;  %v387_v17 = vmul.f32 %v4068_v48, %v329_v7  ;;  %v332_v7 = vld [vmem:[%s4028_s10 + $0x48] sm:$0x3]  ;;  %v6252_v13 = vmov 0 }
  0xdc   : > { %2987 = vmatprep.subr.bf16.mxu0 %v6092_v0  ;;  %vm556_vm13 = vcmp.ge.s32.totalorder %v540_v3, 1  ;;  %vm566_vm14 = vcmp.le.s32.totalorder %v540_v3, 32  ;;  %v1128_v3 = vld [vmem:[#allocation5 + $0x240] sm:$0xff] }
  0xdd   : > { %vm4284_vm15 = vmand %vm556_vm13, %vm566_vm14 }
  0xde   : > { %2941 = vmatpush1.bf16.msra.mxu1 %v2940_v23  ;;  %v1118_v23 = vld [vmem:[#allocation5 + $0x1f0] sm:$0xff]  ;;  %vm4312_vm0 = vmand %vm4284_vm15, %vm6170_vm5 }
  0xdf   : > { %2989 = vmatpush1.bf16.msra.mxu0 %v2988_v24  ;;  %2942 = vmatprep.subr.bf16.mxu1 %v6092_v0  ;;  %v1119_v24 = vld [vmem:[#allocation5 + $0x1f8] sm:$0xff]  ;;  %v6253_v13 = vsel %vm4312_vm0, 4294967295, %v6252_v13 }
  0xe0   : > { %2990 = vmatprep.subr.bf16.mxu0 %v6092_v0  ;;  %v3006_v32 = vpack.c.bf16 %v1119_v24, %v1118_v23  ;;  %v334_v23 = vld [vmem:[%s4028_s10 + $0x58] sm:$0xff]  ;;  %v390_v24 = vmul.f32 %v4068_v48, %v332_v7  ;;  %6254 = vst [vmem:[#allocation31_spill] sm:$0xff] %v6253_v13  ;;  %v1142_v13 = vld [vmem:[#allocation5 + $0x2b0] sm:$0xff] }
  0xe1   : > { %v392_v62 = vmul.f32 %v4068_v48, %v334_v23  ;;  %v1129_v7 = vld [vmem:[#allocation5 + $0x248] sm:$0xff]  ;;  %v1130_v23 = vld [vmem:[#allocation5 + $0x250] sm:$0xff] }
  0xe2   : > { %2944 = vmatpush1.bf16.msra.mxu1 %v2943_v30  ;;  %v443_v30 = vadd.f32 %v4070_v49, %v387_v17  ;;  %v446_v12 = vadd.f32 %v4070_v49, %v390_v24  ;;  %v3021_v21 = vpack.c.bf16 %v1129_v7, %v1128_v3  ;;  %v1131_v24 = vld [vmem:[#allocation5 + $0x258] sm:$0xff] }
  0xe3   : > { %2992 = vmatpush1.bf16.msra.mxu0 %v2991_v31  ;;  %2945 = vmatprep.subr.bf16.mxu1 %v6092_v0  ;;  %v388_v31 = vmul.f32 %v4068_v48, %v330_v22 }
  0xe4   : > { %2993 = vmatprep.subr.bf16.mxu0 %v6092_v0  ;;  %v4197_v46 = vmax.f32 %v443_v30, 0.0  ;;  %v1156_v30 = vld [vmem:[#allocation5 + $0x320] sm:$0xff] }
  0xe6   : > { %2947 = vmatpush1.bf16.msra.mxu1 %v2946_v37  ;;  %v788_v37 = vrot.slane %v4170_v25, 1  ;;  %v4241_v22 = vsel %vm4078_vm6, %v4197_v46, 0.0 }
  0xe7   : > { %2995 = vmatpush1.bf16.msra.mxu0 %v2994_v39  ;;  %2948 = vmatprep.subr.bf16.mxu1 %v6092_v0  ;;  %v4186_v39 = vsel %vm4060_vm2, %v490_v26, 0.0  ;;  %v795_v33 = vrot.slane %v4241_v22, 1 }
  0xe8   : > { %2996 = vmatprep.subr.bf16.mxu0 %v6092_v0  ;;  %v789_v54 = vsel %vm6169_vm9, %v786_v15, %v788_v37  ;;  %v790_v57 = vrot.slane %v4186_v39, 1  ;;  %v3012_v15 = vpack.c.bf16 %v1123_v52, %v1122_v51  ;;  %v895_v17 = vrot.slane %v4186_v39, 2  ;;  %v335_v39 = vld [vmem:[%s4028_s10 + $0x60] sm:$0xff]  ;;  %v1159_v51 = vld [vmem:[#allocation5 + $0x338] sm:$0xff] }
  0xe9   : > { %v4291_v56 = vsel %vm6169_vm9, %v794_v27, %v795_v33  ;;  %v393_v58 = vmul.f32 %v4068_v48, %v335_v39 }
  0xea   : > { %2950 = vmatpush1.bf16.msra.mxu1 %v2949_v47  ;;  %v893_v47 = vrot.slane %v4170_v25, 2  ;;  %v4247_v25 = vpack.c.bf16 %v1155_v9, %v1154_v8 }
  0xeb   : > { %2998 = vmatpush1.bf16.msra.mxu0 %v2997_v50  ;;  %2951 = vmatprep.subr.bf16.mxu1 %v6092_v0  ;;  %v444_v50 = vadd.f32 %v4070_v49, %v388_v31  ;;  %v1157_v31 = vld [vmem:[#allocation5 + $0x328] sm:$0xff] }
  0xec   : > { %2999 = vmatprep.subr.bf16.mxu0 %v6092_v0  ;;  %v894_v14 = vsel %vm6188_vm11, %v891_v34, %v893_v47  ;;  %v4275_v43 = vpack.c.bf16 %v1157_v31, %v1156_v30  ;;  %v541_v31 = vadd.s32 3, %v4051_v29 }
  0xee   : > { %2953 = vmatpush1.bf16.msra.mxu1 %v2952_v59  ;;  %v333_v59 = vld [vmem:[%s4028_s10 + $0x50] sm:$0xff]  ;;  %vm567_vm3 = vcmp.le.s32.totalorder %v541_v31, 32 }
  0xef   : > { %3001 = vmatpush1.bf16.msra.mxu0 %v3000_v60  ;;  %2954 = vmatprep.subr.bf16.mxu1 %v6092_v0  ;;  %v4212_v60 = vsel %vm4193_vm12, %v491_v41, 0.0  ;;  %v391_v61 = vmul.f32 %v4068_v48, %v333_v59  ;;  %v1126_v41 = vld [vmem:[#allocation5 + $0x230] sm:$0xff] }
  0xf0   : > { %3002 = vmatprep.subr.bf16.mxu0 %v6092_v0  ;;  %v792_v20 = vrot.slane %v4212_v60, 1  ;;  %v897_v36 = vrot.slane %v4212_v60, 2  ;;  %v3018_v59 = vpack.c.bf16 %v1127_v42, %v1126_v41  ;;  %v336_v60 = vld [vmem:[%s4028_s10 + $0x68] sm:$0xff]  ;;  %v339_v41 = vld [vmem:[%s4028_s10 + $0x80] sm:$0xff]  ;;  %v3024_v42 = vpack.c.bf16 %v1131_v24, %v1130_v23 }
  0xf1   : > { %v447_v34 = vadd.f32 %v4070_v49, %v391_v61  ;;  %v1161_v61 = vld [vmem:[#allocation5 + $0x348] sm:$0xff] }
  0xf2   : > { %2956 = vmatpush1.bf16.msra.mxu1 %v2955_v16  ;;  %v4228_v16 = vmax.f32 %v444_v50, 0.0  ;;  %v1158_v50 = vld [vmem:[#allocation5 + $0x330] sm:$0xff] }
  0xf3   : > { %3004 = vmatpush1.bf16.msra.mxu0 %v3003_v19  ;;  %2957 = vmatprep.subr.bf16.mxu1 %v6092_v0  ;;  %v1124_v19 = vld [vmem:[#allocation5 + $0x220] sm:$0xff]  ;;  %v4293_v52 = vmax.f32 %v447_v34, 0.0  ;;  %v4318_v8 = vpack.c.bf16 %v1159_v51, %v1158_v50  ;;  %v1163_v34 = vld [vmem:[#allocation5 + $0x358] sm:$0xff] }
  0xf4   : > { %3005 = vmatprep.subr.bf16.mxu0 %v6092_v0 }
  0xf5   : > { %6251 = vst [vmem:[#allocation30_spill] sm:$0xff] %v4293_v52 }
  0xf6   : > { %2959 = vmatpush1.bf16.msra.mxu1 %v2958_v28  ;;  %v3015_v28 = vpack.c.bf16 %v1125_v63, %v1124_v19 }
  0xf7   : > { %3007 = vmatpush1.bf16.msra.mxu0 %v3006_v32  ;;  %3136 = vmatprep.subr.bf16.mxu1 %v6092_v0  ;;  %v896_v32 = vsel %vm6188_vm11, %v893_v47, %v895_v17  ;;  %v900_v47 = vrot.slane %v4241_v22, 2 }
  0xf8   : > { %3008 = vmatprep.subr.bf16.mxu0 %v6092_v0 }
  0xf9   : > { %2677 = vmatmul.mubr.msk.f32.vlgmr.msra.gmra.mrb[0].mxu1 %vm4094_vm7, %v487_v4  ;;  %v791_v4 = vsel %vm6169_vm9, %v788_v37, %v790_v57  ;;  %v4269_v37 = vsel %vm4078_vm6, %v4228_v16, 0.0  ;;  %v4336_v40 = vsel %vm6188_vm11, %v899_v44, %v900_v47  ;;  %v1132_v44 = vld [vmem:[#allocation5 + $0x260] sm:$0xff] }
  0xfa   : > { %1490 = vmatmul.mubr.f32.vlgmr.msra.gmra.mrb[0].mxu0 %v892_v53  ;;  %1269 = vmatprep.mubr.f32.mxu1 %v789_v54  ;;  %v448_v53 = vadd.f32 %v4070_v49, %v392_v62  ;;  %v898_v54 = vsel %vm6188_vm11, %v895_v17, %v897_v36  ;;  %v902_v9 = vrot.slane %v4269_v37, 2  ;;  %v1160_v17 = vld [vmem:[#allocation5 + $0x340] sm:$0xff]  ;;  %v4377_v62 = vsel %vm4312_vm0, %v4293_v52, 0.0 }
  0xfb   : > { %3010 = vmatpush1.bf16.msra.mxu0 %v3009_v45  ;;  %2710 = vmatprep.mubr.msk.f32.mxu0 %vm4078_vm6, %v4197_v46  ;;  %v6248_v45 = vmov 0  ;;  %v4356_v27 = vpack.c.bf16 %v1161_v61, %v1160_v17  ;;  %v1134_v61 = vld [vmem:[#allocation5 + $0x270] sm:$0xff] }
  0xfc   : > { %3011 = vmatprep.subr.bf16.mxu0 %v6092_v0  ;;  %3152 = vmatpush1.bf16.msra.mxu1 %v4214_v1  ;;  %v6249_v45 = vsel %vm4284_vm15, 4294967295, %v6248_v45  ;;  %v4346_v63 = vmax.f32 %v448_v53, 0.0  ;;  %v1164_v53 = vld [vmem:[#allocation5 + $0x360] sm:$0xff] }
  0xfd   : > { %2678 = vmatmul.mubr.msk.f32.gmra.mrb[2].mxu1 %vm4060_vm2, %v488_v5  ;;  %3137 = vmatprep.subr.bf16.mxu1 %v6092_v0  ;;  %v793_v5 = vsel %vm6169_vm9, %v790_v57, %v792_v20  ;;  %6250 = vst [vmem:[#allocation29_spill] sm:$0xff] %v6249_v45  ;;  %v4304_v57 = vsel %vm4078_vm6, %v4263_v35, 0.0  ;;  %v338_v20 = vld [vmem:[%s4028_s10 + $0x78] sm:$0xff]  ;;  %6258 = vst [vmem:[#allocation33_spill] sm:$0xff] %v4356_v27 }
  0xfe   : > { %1495 = vmatmul.mubr.f32.gmra.mrb[2].mxu0 %v894_v14  ;;  %1274 = vmatprep.mubr.f32.mxu1 %v791_v4  ;;  %v799_v11 = vrot.slane %v4304_v57, 1  ;;  %6257 = vst [vmem:[#allocation32_spill] sm:$0xff] %v4346_v63  ;;  %v449_v4 = vadd.f32 %v4070_v49, %v393_v58  ;;  %v904_v30 = vrot.slane %v4304_v57, 2  ;;  %v4389_v39 = vsel %vm4284_vm15, %v4346_v63, 0.0  ;;  %v340_v14 = vld [vmem:[%s4028_s10 + $0x88] sm:$0xff] }
  0xff   : > { %2711 = vmatprep.mubr.msk.f32.mxu0 %vm4078_vm6, %v4228_v16  ;;  %3013 = vmatpush1.bf16.msra.mxu0 %v3012_v15  ;;  %v496_v15 = vmax.f32 %v446_v12, 0.0 }
 0x100   : > { %3014 = vmatprep.subr.bf16.mxu0 %v6092_v0  ;;  %3153 = vmatpush1.bf16.msra.mxu1 %v4247_v25  ;;  %v4383_v36 = vmax.f32 %v449_v4, 0.0  ;;  %v4403_v51 = vsel %vm6188_vm11, %v902_v9, %v904_v30  ;;  %v6263_v4 = vmov 0 }
 0x101   : > { %2679 = vmatmul.mubr.msk.f32.gmra.mrb[4].mxu1 %vm4060_vm2, %v489_v10  ;;  %3138 = vmatprep.subr.bf16.mxu1 %v6092_v0  ;;  %v797_v10 = vrot.slane %v4269_v37, 1  ;;  %v4352_v22 = vsel %vm4329_vm1, %v496_v15, 0.0 }
 0x102   : > { %1500 = vmatmul.mubr.f32.gmra.mrb[4].mxu0 %v896_v32  ;;  %1279 = vmatprep.mubr.f32.mxu1 %v793_v5  ;;  %v337_v32 = vld [vmem:[%s4028_s10 + $0x70] sm:$0x3]  ;;  %v396_v5 = vmul.f32 %v4068_v48, %v338_v20  ;;  %6259 = vst [vmem:[#allocation34_spill] sm:$0xff] %v4383_v36  ;;  %v801_v37 = vrot.slane %v4352_v22, 1  ;;  %v906_v3 = vrot.slane %v4352_v22, 2  ;;  %v4424_v7 = vsel %vm4284_vm15, %v4383_v36, 0.0 }
 0x103   : > { %2712 = vmatprep.mubr.msk.f32.mxu0 %vm4078_vm6, %v4263_v35  ;;  %3016 = vmatpush1.bf16.msra.mxu0 %v3015_v28  ;;  %v4344_v19 = vsel %vm6169_vm9, %v795_v33, %v797_v10  ;;  %v4362_v28 = vsel %vm6188_vm11, %v900_v47, %v902_v9  ;;  %v1162_v33 = vld [vmem:[#allocation5 + $0x350] sm:$0xff]  ;;  %v4371_v2 = vsel %vm6169_vm9, %v797_v10, %v799_v11  ;;  %v1133_v47 = vld [vmem:[#allocation5 + $0x268] sm:$0xff]  ;;  %v803_v10 = vrot.slane %v4377_v62, 1  ;;  %v1167_v22 = vld [vmem:[#allocation5 + $0x378] sm:$0xff] }
 0x104   : > { %3017 = vmatprep.subr.bf16.mxu0 %v6092_v0  ;;  %3154 = vmatpush1.bf16.msra.mxu1 %v4275_v43  ;;  %v395_v12 = vmul.f32 %v4068_v48, %v337_v32  ;;  %v4395_v50 = vpack.c.bf16 %v1163_v34, %v1162_v33  ;;  %v4418_v15 = vsel %vm6169_vm9, %v799_v11, %v801_v37  ;;  %v908_v20 = vrot.slane %v4377_v62, 2  ;;  %v1136_v37 = vld [vmem:[#allocation5 + $0x280] sm:$0xff] }
 0x105   : > { %2680 = vmatmul.mubr.msk.f32.gmra.mrb[6].mxu1 %vm4060_vm2, %v490_v26  ;;  %3139 = vmatprep.subr.bf16.mxu1 %v6092_v0  ;;  %v394_v26 = vmul.f32 %v4068_v48, %v336_v60  ;;  %vm557_vm2 = vcmp.ge.s32.totalorder %v541_v31, 1  ;;  %v397_v60 = vmul.f32 %v4068_v48, %v339_v41  ;;  %v3027_v9 = vpack.c.bf16 %v1133_v47, %v1132_v44  ;;  %v1168_v44 = vld [vmem:[#allocation5 + $0x380] sm:$0xff]  ;;  %v1169_v47 = vld [vmem:[#allocation5 + $0x388] sm:$0xff] }
 0x106   : > { %1505 = vmatmul.mubr.f32.gmra.mrb[6].mxu0 %v898_v54  ;;  %1284 = vmatprep.mubr.f32.mxu1 %v4291_v56  ;;  %6260 = vst [vmem:[#allocation35_spill] sm:$0xff] %v4395_v50  ;;  %v1165_v54 = vld [vmem:[#allocation5 + $0x368] sm:$0xff]  ;;  %v451_v17 = vadd.f32 %v4070_v49, %v395_v12  ;;  %vm4437_vm4 = vmand %vm557_vm2, %vm567_vm3  ;;  %v806_v24 = vrot.slane %v4424_v7, 1  ;;  %v4457_v32 = vsel %vm6188_vm11, %v904_v30, %v906_v3 }
 0x107   : > { %2713 = vmatprep.mubr.msk.f32.mxu0 %vm4312_vm0, %v4293_v52  ;;  %3019 = vmatpush1.bf16.msra.mxu0 %v3018_v59  ;;  %v452_v59 = vadd.f32 %v4070_v49, %v396_v5  ;;  %v4430_v11 = vpack.c.bf16 %v1165_v54, %v1164_v53  ;;  %v6264_v4 = vsel %vm4437_vm4, 4294967295, %v6263_v4  ;;  %v453_v31 = vadd.f32 %v4070_v49, %v397_v60  ;;  %vm4467_vm7 = vmand %vm4437_vm4, %vm6170_vm5  ;;  %v343_v60 = vld [vmem:[%s4028_s10 + $0xa0] sm:$0xff] }
 0x108   : > { %3020 = vmatprep.subr.bf16.mxu0 %v6092_v0  ;;  %3155 = vmatpush1.bf16.msra.mxu1 %v4318_v8  ;;  %6265 = vst [vmem:[#allocation38_spill] sm:$0xff] %v6264_v4  ;;  %v398_v34 = vmul.f32 %v4068_v48, %v340_v14  ;;  %v6267_v5 = vmov 0  ;;  %v501_v30 = vmax.f32 %v451_v17, 0.0  ;;  %v4516_v14 = vpack.c.bf16 %v1169_v47, %v1168_v44  ;;  %v1140_v47 = vld [vmem:[#allocation5 + $0x2a0] sm:$0xff]  ;;  %vm4648_vm1 = vmand %vm4437_vm4, %vm6161_vm10 }
 0x109   : > { %2681 = vmatmul.mubr.msk.f32.gmra.mrb[8].mxu1 %vm4103_vm8, %v4109_v6  ;;  %3140 = vmatprep.subr.bf16.mxu1 %v6092_v0  ;;  %v450_v6 = vadd.f32 %v4070_v49, %v394_v26  ;;  %v1135_v26 = vld [vmem:[#allocation5 + $0x278] sm:$0xff]  ;;  %6262 = vst [vmem:[#allocation37_spill] sm:$0xff] %v4430_v11  ;;  %v4459_v33 = vmax.f32 %v452_v59, 0.0  ;;  %v6268_v5 = vsel %vm4467_vm7, 4294967295, %v6267_v5  ;;  %vm4488_vm8 = vmand %vm4284_vm15, %vm6161_vm10  ;;  %v4505_v53 = vmax.f32 %v453_v31, 0.0 }
 0x10a   : > { %1510 = vmatmul.mubr.f32.gmra.mrb[8].mxu0 %v4336_v40  ;;  %1289 = vmatprep.mubr.f32.mxu1 %v4344_v19  ;;  %v3030_v62 = vpack.c.bf16 %v1135_v26, %v1134_v61  ;;  %6269 = vst [vmem:[#allocation40_spill] sm:$0xff] %v6268_v5  ;;  %v454_v59 = vadd.f32 %v4070_v49, %v398_v34  ;;  %6275 = vst [vmem:[#allocation44_spill] sm:$0xff] %v4516_v14  ;;  %v542_v26 = vadd.s32 4, %v4051_v29 }
 0x10b   : > { %2714 = vmatprep.mubr.msk.f32.mxu0 %vm4284_vm15, %v4346_v63  ;;  %3022 = vmatpush1.bf16.msra.mxu0 %v3021_v21  ;;  %v4409_v58 = vmax.f32 %v450_v6, 0.0  ;;  %v1166_v21 = vld [vmem:[#allocation5 + $0x370] sm:$0xff]  ;;  %6266 = vst [vmem:[#allocation39_spill] sm:$0xff] %v4459_v33  ;;  %6274 = vst [vmem:[#allocation43_spill] sm:$0xff] %v4505_v53  ;;  %v4539_v34 = vsel %vm4437_vm4, %v4505_v53, 0.0 }
 0x10c   : > { %3023 = vmatprep.subr.bf16.mxu0 %v6092_v0  ;;  %3156 = vmatpush1.bf16.msra.mxu1 %v4356_v27  ;;  %v341_v6 = vld [vmem:[%s4028_s10 + $0x90] sm:$0xff]  ;;  %v4478_v41 = vpack.c.bf16 %v1167_v22, %v1166_v21  ;;  %v1171_v22 = vld [vmem:[#allocation5 + $0x398] sm:$0xff]  ;;  %vm568_vm12 = vcmp.le.s32.totalorder %v542_v26, 32 }
 0x10d   : > { %2682 = vmatmul.mubr.msk.f32.gmra.mrb[10].mxu1 %vm4078_vm6, %v4197_v46  ;;  %3141 = vmatprep.subr.bf16.mxu1 %v6092_v0  ;;  %6261 = vst [vmem:[#allocation36_spill] sm:$0xff] %v4409_v58  ;;  %v804_v46 = vrot.slane %v4389_v39, 1  ;;  %v4474_v57 = vsel %vm4284_vm15, %v4409_v58, 0.0  ;;  %v1170_v21 = vld [vmem:[#allocation5 + $0x390] sm:$0xff] }
 0x10e   : > { %1515 = vmatmul.mubr.f32.gmra.mrb[10].mxu0 %v4362_v28  ;;  %1294 = vmatprep.mubr.f32.mxu1 %v4371_v2  ;;  %6270 = vst [vmem:[#allocation41_spill] sm:$0xff] %v4478_v41  ;;  %v808_v54 = vrot.slane %v4474_v57, 1  ;;  %v6091_v61 = vrot.slane %v4474_v57, 2 }
 0x10f   : > { %2715 = vmatprep.mubr.msk.f32.mxu0 %vm4284_vm15, %v4383_v36  ;;  %3025 = vmatpush1.bf16.msra.mxu0 %v3024_v42  ;;  %v4446_v23 = vsel %vm6169_vm9, %v803_v10, %v804_v46  ;;  %v911_v42 = vrot.slane %v4424_v7, 2  ;;  %v399_v10 = vmul.f32 %v4068_v48, %v341_v6  ;;  %v1138_v7 = vld [vmem:[#allocation5 + $0x290] sm:$0xff]  ;;  %v401_v6 = vmul.f32 %v4068_v48, %v343_v60 }
 0x110   : > { %3026 = vmatprep.subr.bf16.mxu0 %v6092_v0  ;;  %3157 = vmatpush1.bf16.msra.mxu1 %v4395_v50  ;;  %v4555_v60 = vpack.c.bf16 %v1171_v22, %v1170_v21  ;;  %v357_v50 = vld [vmem:[%s4028_s10 + $0x110] sm:$0x3] }
 0x111   : > { %2683 = vmatmul.mubr.msk.f32.gmra.mrb[12].mxu1 %vm4078_vm6, %v4228_v16  ;;  %3142 = vmatprep.subr.bf16.mxu1 %v6092_v0  ;;  %v909_v16 = vrot.slane %v4389_v39, 2  ;;  %v1137_v39 = vld [vmem:[#allocation5 + $0x288] sm:$0xff]  ;;  %v455_v31 = vadd.f32 %v4070_v49, %v399_v10 }
 0x112   : > { %1520 = vmatmul.mubr.f32.gmra.mrb[12].mxu0 %v4403_v51  ;;  %1299 = vmatprep.mubr.f32.mxu1 %v4418_v15  ;;  %v3033_v3 = vpack.c.bf16 %v1137_v39, %v1136_v37  ;;  %v344_v39 = vld [vmem:[%s4028_s10 + $0xa8] sm:$0xff]  ;;  %6279 = vst [vmem:[#allocation48_spill] sm:$0xff] %v4555_v60 }
 0x113   : > { %2716 = vmatprep.mubr.msk.f32.mxu0 %vm4284_vm15, %v4409_v58  ;;  %3028 = vmatpush1.bf16.msra.mxu0 %v3027_v9  ;;  %v4496_v55 = vsel %vm6188_vm11, %v908_v20, %v909_v16  ;;  %v1139_v9 = vld [vmem:[#allocation5 + $0x298] sm:$0xff]  ;;  %v4522_v17 = vsel %vm6188_vm11, %v909_v16, %v911_v42  ;;  %v4534_v16 = vsel %vm4467_vm7, %v4459_v33, 0.0  ;;  %v1141_v10 = vld [vmem:[#allocation5 + $0x2a8] sm:$0xff]  ;;  %v402_v21 = vmul.f32 %v4068_v48, %v344_v39 }
 0x114   : > { %3029 = vmatprep.subr.bf16.mxu0 %v6092_v0  ;;  %3158 = vmatpush1.bf16.msra.mxu1 %v4430_v11  ;;  %6276 = vst [vmem:[#allocation45_spill] sm:$0xff] %v4522_v17  ;;  %v342_v20 = vld [vmem:[%s4028_s10 + $0x98] sm:$0x3]  ;;  %v3036_v12 = vpack.c.bf16 %v1139_v9, %v1138_v7  ;;  %v4569_v9 = vmax.f32 %v455_v31, 0.0  ;;  %v6283_v39 = vmov 0.0|0.0  }
 0x115   : > { %2684 = vmatmul.mubr.msk.f32.gmra.mrb[14].mxu1 %vm4078_vm6, %v4263_v35  ;;  %3143 = vmatprep.subr.bf16.mxu1 %v6092_v0  ;;  %v4499_v35 = vsel %vm6169_vm9, %v804_v46, %v806_v24  ;;  %v4512_v46 = vsel %vm4488_vm8, %v501_v30, 0.0  ;;  %v4548_v30 = vmax.f32 %v454_v59, 0.0  ;;  %v400_v44 = vmul.f32 %v4068_v48, %v342_v20  ;;  %v1173_v7 = vld [vmem:[#allocation5 + $0x3a8] sm:$0xff] }
 0x116   : > { %1525 = vmatmul.mubr.f32.gmra.mrb[14].mxu0 %v4457_v32  ;;  %1304 = vmatprep.mubr.f32.mxu1 %v4446_v23  ;;  %6273 = vst [vmem:[#allocation42_spill] sm:$0xff] %v4499_v35  ;;  %v810_v37 = vrot.slane %v4512_v46, 1  ;;  %v812_v59 = vrot.slane %v4534_v16, 1  ;;  %vm558_vm6 = vcmp.ge.s32.totalorder %v542_v26, 1  ;;  %6281 = vst [vmem:[#allocation50_spill] sm:$0xff] %v4569_v9  ;;  %v813_v20 = vrot.slane %v4539_v34, 1 }
 0x117   : > { %2717 = vmatprep.mubr.msk.f32.mxu0 %vm4467_vm7, %v4459_v33  ;;  %3031 = vmatpush1.bf16.msra.mxu0 %v3030_v62  ;;  %v4546_v62 = vsel %vm6169_vm9, %v806_v24, %v808_v54  ;;  %6278 = vst [vmem:[#allocation47_spill] sm:$0xff] %v4548_v30  ;;  %v4563_v24 = vsel %vm6188_vm11, %v911_v42, %v6091_v61  ;;  %v915_v61 = vrot.slane %v4512_v46, 2  ;;  %v4584_v31 = vsel %vm4437_vm4, %v4548_v30, 0.0  ;;  %vm4597_vm13 = vmand %vm558_vm6, %vm568_vm12  ;;  %v6361_v46 = vld [vmem:[#allocation33_spill] sm:$0xff] }
 0x118   : > { %3032 = vmatprep.subr.bf16.mxu0 %v6092_v0  ;;  %3159 = vmatpush1.bf16.msra.mxu1 %v4478_v41  ;;  %6277 = vst [vmem:[#allocation46_spill] sm:$0xff] %v4546_v62  ;;  %6280 = vst [vmem:[#allocation49_spill] sm:$0xff] %v4563_v24  ;;  %v457_v42 = vadd.f32 %v4070_v49, %v401_v6  ;;  %v4578_v22 = vsel %vm6169_vm9, %v808_v54, %v810_v37  ;;  %v917_v37 = vrot.slane %v4534_v16, 2  ;;  %v1147_v41 = vld [vmem:[#allocation5 + $0x2d8] sm:$0xff] }
 0x119   : > { %2685 = vmatmul.mubr.msk.f32.gmra.mrb[16].mxu1 %vm4312_vm0, %v4293_v52  ;;  %3144 = vmatprep.subr.bf16.mxu1 %v6092_v0  ;;  %6282 = vst [vmem:[#allocation51_spill] sm:$0xff] %v4578_v22  ;;  %v456_v6 = vadd.f32 %v4070_v49, %v400_v44  ;;  %v1143_v52 = vld [vmem:[#allocation5 + $0x2b8] sm:$0xff]  ;;  %v1174_v44 = vld [vmem:[#allocation5 + $0x3b0] sm:$0xff]  ;;  %v6288_v16 = vrot.slane %v4474_v57, 2  ;;  %vm4632_vm14 = vmand %vm4597_vm13, %vm6170_vm5 }
 0x11a   : > { %1530 = vmatmul.mubr.f32.gmra.mrb[16].mxu0 %v4496_v55  ;;  %1309 = vmatprep.mubr.f32.mxu1 %v4499_v35  ;;  %v4609_v26 = vmax.f32 %v457_v42, 0.0  ;;  %vm668_vm12 = vmand %vm4597_vm13, %vm6161_vm10 }
 0x11b   : > { %2718 = vmatprep.mubr.msk.f32.mxu0 %vm4437_vm4, %v4505_v53  ;;  %3034 = vmatpush1.bf16.msra.mxu0 %v3033_v3  ;;  %v1172_v3 = vld [vmem:[#allocation5 + $0x3a0] sm:$0xff]  ;;  %v506_v57 = vmax.f32 %v456_v6, 0.0 }
 0x11c   : > { %3035 = vmatprep.subr.bf16.mxu0 %v6092_v0  ;;  %3160 = vmatpush1.bf16.msra.mxu1 %v4516_v14  ;;  %v4590_v54 = vpack.c.bf16 %v1173_v7, %v1172_v3  ;;  %v815_v3 = vrot.slane %v4584_v31, 1  ;;  %v458_v7 = vadd.f32 %v4070_v49, %v402_v21 }
 0x11d   : > { %2686 = vmatmul.mubr.msk.f32.gmra.mrb[18].mxu1 %vm4284_vm15, %v4346_v63  ;;  %3145 = vmatprep.subr.bf16.mxu1 %v6092_v0  ;;  %v3039_v0 = vpack.c.bf16 %v1141_v10, %v1140_v47  ;;  %v345_v63 = vld [vmem:[%s4028_s10 + $0xb0] sm:$0xff]  ;;  %v1175_v47 = vld [vmem:[#allocation5 + $0x3b8] sm:$0xff]  ;;  %v4607_v10 = vsel %vm6169_vm9, %v812_v59, %v813_v20  ;;  %v4624_v59 = vsel %vm4437_vm4, %v4569_v9, 0.0 }
 0x11e   : > { %1535 = vmatmul.mubr.f32.gmra.mrb[18].mxu0 %v4522_v17  ;;  %1314 = vmatprep.mubr.f32.mxu1 %v4546_v62  ;;  %6284 = vst [vmem:[#allocation52_spill] sm:$0xff] %v4590_v54  ;;  %6287 = vst [vmem:[#allocation53_spill] sm:$0xff] %v4607_v10  ;;  %v403_v42 = vmul.f32 %v4068_v48, %v345_v63  ;;  %v4638_v14 = vpack.c.bf16 %v1175_v47, %v1174_v44  ;;  %v1177_v63 = vld [vmem:[#allocation5 + $0x3c8] sm:$0xff]  ;;  %v361_v17 = vld [vmem:[%s4028_s10 + $0x130] sm:$0xff] }
 0x11f   : > { %2719 = vmatprep.mubr.msk.f32.mxu0 %vm4437_vm4, %v4548_v30  ;;  %3037 = vmatpush1.bf16.msra.mxu0 %v3036_v12  ;;  %v918_v12 = vrot.slane %v4539_v34, 2  ;;  %v4619_v34 = vsel %vm6188_vm11, %v6288_v16, %v915_v61  ;;  %v1144_v61 = vld [vmem:[#allocation5 + $0x2c0] sm:$0xff]  ;;  %v1145_v16 = vld [vmem:[#allocation5 + $0x2c8] sm:$0xff]  ;;  %v4664_v47 = vsel %vm6169_vm9, %v813_v20, %v815_v3 }
 0x120   : > { %3038 = vmatprep.subr.bf16.mxu0 %v6283_v39  ;;  %3161 = vmatpush1.bf16.msra.mxu1 %v4555_v60  ;;  %6289 = vst [vmem:[#allocation54_spill] sm:$0xff] %v4619_v34  ;;  %v3042_v60 = vpack.c.bf16 %v1143_v52, %v1142_v13  ;;  %6292 = vst [vmem:[#allocation55_spill] sm:$0xff] %v4638_v14  ;;  %v1176_v13 = vld [vmem:[#allocation5 + $0x3c0] sm:$0xff]  ;;  %v459_v45 = vadd.f32 %v4070_v49, %v403_v42  ;;  %v543_v42 = vadd.s32 5, %v4051_v29 }
 0x121   : > { %2687 = vmatmul.mubr.msk.f32.gmra.mrb[20].mxu1 %vm4284_vm15, %v4383_v36  ;;  %3146 = vmatprep.subr.bf16.mxu1 %v6283_v39  ;;  %v346_v36 = vld [vmem:[%s4028_s10 + $0xb8] sm:$0xff]  ;;  %v4656_v6 = vsel %vm6188_vm11, %v917_v37, %v918_v12  ;;  %6296 = vst [vmem:[#allocation57_spill] sm:$0xff] %v4664_v47  ;;  %v3045_v37 = vpack.c.bf16 %v1145_v16, %v1144_v61  ;;  %v1178_v61 = vld [vmem:[#allocation5 + $0x3d0] sm:$0xff] }
 0x122   : > { %1540 = vmatmul.mubr.f32.gmra.mrb[20].mxu0 %v4563_v24  ;;  %1319 = vmatprep.mubr.f32.mxu1 %v4578_v22  ;;  %6295 = vst [vmem:[#allocation56_spill] sm:$0xff] %v4656_v6  ;;  %v404_v44 = vmul.f32 %v4068_v48, %v346_v36  ;;  %v1146_v36 = vld [vmem:[#allocation5 + $0x2d0] sm:$0xff]  ;;  %v4676_v20 = vpack.c.bf16 %v1177_v63, %v1176_v13  ;;  %v1179_v16 = vld [vmem:[#allocation5 + $0x3d8] sm:$0xff]  ;;  %v4697_v13 = vsel %vm4632_vm14, %v4609_v26, 0.0  ;;  %vm559_vm2 = vcmp.ge.s32.totalorder %v543_v42, 1 }
 0x123   : > { %2720 = vmatprep.mubr.msk.f32.mxu0 %vm4437_vm4, %v4569_v9  ;;  %3040 = vmatpush1.bf16.msra.mxu0 %v3039_v0  ;;  %v920_v0 = vrot.slane %v4584_v31, 2  ;;  %v817_v31 = vrot.slane %v4624_v59, 1  ;;  %vm569_vm3 = vcmp.le.s32.totalorder %v543_v42, 32  ;;  %v1151_v22 = vld [vmem:[#allocation5 + $0x2f8] sm:$0xff]  ;;  %v359_v24 = vld [vmem:[%s4028_s10 + $0x120] sm:$0xff] }
 0x124   : > { %3041 = vmatprep.subr.bf16.mxu0 %v6283_v39  ;;  %3162 = vmatpush1.bf16.msra.mxu1 %v4590_v54  ;;  %v348_v54 = vld [vmem:[%s4028_s10 + $0xc8] sm:$0xff]  ;;  %6297 = vst [vmem:[#allocation58_spill] sm:$0xff] %v4676_v20  ;;  %vm4761_vm8 = vmand %vm559_vm2, %vm569_vm3 }
 0x125   : > { %2688 = vmatmul.mubr.msk.f32.gmra.mrb[22].mxu1 %vm4284_vm15, %v4409_v58  ;;  %3147 = vmatprep.subr.bf16.mxu1 %v6283_v39  ;;  %v4666_v58 = vmax.f32 %v458_v7, 0.0  ;;  %v4682_v7 = vsel %vm6188_vm11, %v918_v12, %v920_v0  ;;  %v4691_v52 = vsel %vm6169_vm9, %v815_v3, %v817_v31  ;;  %v460_v12 = vadd.f32 %v4070_v49, %v404_v44  ;;  %v349_v49 = vld [vmem:[%s4028_s10 + $0xd0] sm:$0xff]  ;;  %vm4795_vm6 = vmand %vm4761_vm8, %vm6170_vm5 }
 0x126   : > { %1545 = vmatmul.mubr.f32.gmra.mrb[22].mxu0 %v4619_v34  ;;  %1324 = vmatprep.mubr.f32.mxu1 %v4607_v10  ;;  %v4672_v10 = vsel %vm4648_vm1, %v506_v57, 0.0  ;;  %6298 = vst [vmem:[#allocation59_spill] sm:$0xff] %v4682_v7  ;;  %v347_v57 = vld [vmem:[%s4028_s10 + $0xc0] sm:$0x3]  ;;  %6299 = vst [vmem:[#allocation60_spill] sm:$0xff] %v4691_v52  ;;  %v406_v63 = vmul.f32 %v4068_v48, %v348_v54  ;;  %v3048_v44 = vpack.c.bf16 %v1147_v41, %v1146_v36 }
 0x127   : > { %2721 = vmatprep.mubr.msk.f32.mxu0 %vm4632_vm14, %v4609_v26  ;;  %3043 = vmatpush1.bf16.msra.mxu0 %v3042_v60  ;;  %v4703_v60 = vmax.f32 %v459_v45, 0.0  ;;  %v819_v5 = vrot.slane %v4672_v10, 1  ;;  %v4709_v3 = vsel %vm4597_vm13, %v4666_v58, 0.0  ;;  %v1148_v54 = vld [vmem:[#allocation5 + $0x2e0] sm:$0xff]  ;;  %v4715_v45 = vpack.c.bf16 %v1179_v16, %v1178_v61 }
 0x128   : > { %3044 = vmatprep.subr.bf16.mxu0 %v6283_v39  ;;  %3163 = vmatpush1.bf16.msra.mxu1 %v4638_v14  ;;  %v1149_v14 = vld [vmem:[#allocation5 + $0x2e8] sm:$0xff]  ;;  %v821_v41 = vrot.slane %v4697_v13, 1  ;;  %v4729_v36 = vmax.f32 %v460_v12, 0.0  ;;  %v4732_v61 = vld [vmem:[#allocation8] ss:$0 sm:$0xff]  ;;  %v924_v12 = vrot.slane %v4672_v10, 2 }
 0x129   : > { %2689 = vmatmul.mubr.msk.f32.gmra.mrb[24].mxu1 %vm4467_vm7, %v4459_v33  ;;  %3148 = vmatprep.subr.bf16.mxu1 %v6283_v39  ;;  %v405_v33 = vmul.f32 %v4068_v48, %v347_v57  ;;  %6300 = vst [vmem:[#allocation61_spill] sm:$0xff] %v4715_v45  ;;  %v1180_v48 = vld [vmem:[#allocation5 + $0x3e0] sm:$0xff]  ;;  %v822_v57 = vrot.slane %v4709_v3, 1  ;;  %vm6354_vm7 = vcmask 1046528  }
 0x12a   : > { %1550 = vmatmul.mubr.f32.gmra.mrb[24].mxu0 %v4656_v6  ;;  %1329 = vmatprep.mubr.f32.mxu1 %v4664_v47  ;;  %v6301_v47 = vrot.slane %v4624_v59, 2  ;;  %v351_v34 = vld [vmem:[%s4028_s10 + $0xe0] sm:$0xff] }
 0x12b   : > { %2722 = vmatprep.mubr.msk.f32.mxu0 %vm4597_vm13, %v4666_v58  ;;  %3046 = vmatpush1.bf16.msra.mxu0 %v3045_v37  ;;  %v1181_v37 = vld [vmem:[#allocation5 + $0x3e8] sm:$0xff] }
 0x12c   : > { %3047 = vmatprep.subr.bf16.mxu0 %v6283_v39  ;;  %3164 = vmatpush1.bf16.msra.mxu1 %v4676_v20  ;;  %v4723_v6 = vsel %vm6188_vm11, %v920_v0, %v6301_v47  ;;  %v462_v0 = vadd.f32 %v4732_v61, %v406_v63  ;;  %v4735_v47 = vld [vmem:[#allocation7] ss:$0 sm:$0xff]  ;;  %v4748_v20 = vsel %vm4597_vm13, %v4703_v60, 0.0  ;;  %v3051_v63 = vpack.c.bf16 %v1149_v14, %v1148_v54 }
 0x12d   : > { %2690 = vmatmul.mubr.msk.f32.gmra.mrb[26].mxu1 %vm4437_vm4, %v4505_v53  ;;  %6302 = vst [vmem:[#allocation62_spill] sm:$0xff] %v4723_v6  ;;  %3149 = vmatprep.subr.bf16.mxu1 %v6283_v39  ;;  %v407_v16 = vmul.f32 %v4735_v47, %v349_v49  ;;  %v4742_v53 = vsel %vm6169_vm9, %v817_v31, %v819_v5  ;;  %v1150_v49 = vld [vmem:[#allocation5 + $0x2f0] sm:$0xff]  ;;  %v927_v14 = vrot.slane %v4709_v3, 2  ;;  %v824_v42 = vrot.slane %v4748_v20, 1  ;;  %v1184_v3 = vld [vmem:[#allocation5 + $0x400] sm:$0xff] }
 0x12e   : > { %1555 = vmatmul.mubr.f32.gmra.mrb[26].mxu0 %v4682_v7  ;;  %1334 = vmatprep.mubr.f32.mxu1 %v4691_v52  ;;  %6303 = vst [vmem:[#allocation63_spill] sm:$0xff] %v4742_v53  ;;  %v350_v52 = vld [vmem:[%s4028_s10 + $0xd8] sm:$0xff]  ;;  %v461_v7 = vadd.f32 %v4732_v61, %v405_v33  ;;  %v4754_v5 = vpack.c.bf16 %v1181_v37, %v1180_v48  ;;  %v926_v33 = vrot.slane %v4697_v13, 2  ;;  %v1182_v31 = vld [vmem:[#allocation5 + $0x3f0] sm:$0xff]  ;;  %v4778_v13 = vsel %vm4597_vm13, %v4729_v36, 0.0 }
 0x12f   : > { %2723 = vmatprep.mubr.msk.f32.mxu0 %vm4597_vm13, %v4703_v60  ;;  %3049 = vmatpush1.bf16.msra.mxu0 %v3048_v44  ;;  %v1183_v44 = vld [vmem:[#allocation5 + $0x3f8] sm:$0xff]  ;;  %v4771_v54 = vsel %vm6169_vm9, %v821_v41, %v822_v57  ;;  %v463_v48 = vadd.f32 %v4732_v61, %v407_v16  ;;  %v1185_v37 = vld [vmem:[#allocation5 + $0x408] sm:$0xff]  ;;  %v408_v16 = vmul.f32 %v4735_v47, %v350_v52  ;;  %v826_v52 = vrot.slane %v4778_v13, 1 }
 0x130   : > { %3050 = vmatprep.subr.bf16.mxu0 %v6283_v39  ;;  %3165 = vmatpush1.bf16.msra.mxu1 %v4715_v45  ;;  %6304 = vst [vmem:[#allocation64_spill] sm:$0xff] %v4754_v5  ;;  %v4788_v45 = vmax.f32 %v462_v0, 0.0  ;;  %v511_v11 = vmax.f32 %v461_v7, 0.0  ;;  %v4818_v7 = vsel %vm6188_vm11, %v926_v33, %v927_v14  ;;  %v544_v33 = vadd.s32 6, %v4051_v29 }
 0x131   : > { %2691 = vmatmul.mubr.msk.f32.gmra.mrb[28].mxu1 %vm4437_vm4, %v4548_v30  ;;  %3150 = vmatprep.subr.bf16.mxu1 %v6283_v39  ;;  %v6307_v30 = vrot.slane %v4624_v59, 2  ;;  %v4813_v59 = vpack.c.bf16 %v1185_v37, %v1184_v3  ;;  %6312 = vst [vmem:[#allocation67_spill] sm:$0xff] %v4818_v7  ;;  %v4827_v0 = vmax.f32 %v463_v48, 0.0 }
 0x132   : > { %1560 = vmatmul.mubr.f32.gmra.mrb[28].mxu0 %v4723_v6  ;;  %1339 = vmatprep.mubr.f32.mxu1 %v4742_v53  ;;  %v3054_v53 = vpack.c.bf16 %v1151_v22, %v1150_v49  ;;  %v929_v22 = vrot.slane %v4748_v20, 2  ;;  %v4825_v20 = vsel %vm6169_vm9, %v822_v57, %v824_v42  ;;  %v353_v49 = vld [vmem:[%s4028_s10 + $0xf0] sm:$0xff]  ;;  %vm560_vm1 = vcmp.ge.s32.totalorder %v544_v33, 1  ;;  %v6363_v6 = vld [vmem:[#allocation42_spill] sm:$0xff] }
 0x133   : > { %2724 = vmatprep.mubr.msk.f32.mxu0 %vm4597_vm13, %v4729_v36  ;;  %v4786_v41 = vsel %vm6188_vm11, %v6307_v30, %v924_v12  ;;  %3052 = vmatpush1.bf16.msra.mxu0 %v3051_v63  ;;  %v4802_v30 = vpack.c.bf16 %v1183_v44, %v1182_v31  ;;  %6313 = vst [vmem:[#allocation68_spill] sm:$0xff] %v4827_v0  ;;  %v718_v31 = vsel %vm668_vm12, %v511_v11, 0.0  ;;  %v352_v44 = vld [vmem:[%s4028_s10 + $0xe8] sm:$0x3]  ;;  %vm570_vm2 = vcmp.le.s32.totalorder %v544_v33, 32 }
 0x134   : > { %6308 = vst [vmem:[#allocation65_spill] sm:$0xff] %v4786_v41  ;;  %3053 = vmatprep.subr.bf16.mxu0 %v6283_v39  ;;  %3166 = vmatpush1.bf16.msra.mxu1 %v4754_v5  ;;  %v464_v12 = vadd.f32 %v4732_v61, %v408_v16  ;;  %v409_v63 = vmul.f32 %v4735_v47, %v351_v34  ;;  %v719_v34 = vsel %vm4795_vm6, %v4788_v45, 0.0  ;;  %v828_v3 = vrot.slane %v718_v31, 1  ;;  %vm4892_vm3 = vmand %vm560_vm1, %vm570_vm2 }
 0x135   : > { %6311 = vst [vmem:[#allocation66_spill] sm:$0xff] %v4802_v30  ;;  %2692 = vmatmul.mubr.msk.f32.gmra.mrb[30].mxu1 %vm4437_vm4, %v4569_v9  ;;  %3151 = vmatprep.subr.bf16.mxu1 %v6283_v39  ;;  %v4838_v57 = vsel %vm6188_vm11, %v927_v14, %v929_v22  ;;  %v4846_v11 = vsel %vm6169_vm9, %v824_v42, %v826_v52  ;;  %v720_v42 = vsel %vm4761_vm8, %v4827_v0, 0.0  ;;  %vm4915_vm12 = vmand %vm4892_vm3, %vm6170_vm5  ;;  %vm6347_vm4 = vcmask 1045504  }
 0x136   : > { %1565 = vmatmul.mubr.f32.gmra.mrb[30].mxu0 %v4786_v41  ;;  %1344 = vmatprep.mubr.f32.mxu1 %v4771_v54  ;;  %6314 = vst [vmem:[#allocation69_spill] sm:$0xff] %v4838_v57  ;;  %v411_v14 = vmul.f32 %v4735_v47, %v353_v49  ;;  %v4856_v48 = vmax.f32 %v464_v12, 0.0  ;;  %v465_v37 = vadd.f32 %v4732_v61, %v409_v63  ;;  %v830_v63 = vrot.slane %v719_v34, 1  ;;  %vm673_vm1 = vmand %vm4761_vm8, %vm6161_vm10 }
 0x137   : > { %2725 = vmatprep.mubr.msk.f32.mxu0 %vm4795_vm6, %v4788_v45  ;;  %3055 = vmatpush1.bf16.msra.mxu0 %v3054_v53  ;;  %v931_v53 = vrot.slane %v4778_v13, 2  ;;  %v354_v13 = vld [vmem:[%s4028_s10 + $0xf8] sm:$0xff]  ;;  %v410_v16 = vmul.f32 %v4735_v47, %v352_v44  ;;  %v831_v49 = vrot.slane %v720_v42, 1  ;;  %v4877_v44 = vsel %vm6169_vm9, %v826_v52, %v828_v3 }
 0x138   : > { %3167 = vmatpush1.bf16.msra.mxu1 %v4802_v30  ;;  %3056 = vmatprep.subr.bf16.mxu0 %v6283_v39  ;;  %6315 = vst [vmem:[#allocation70_spill] sm:$0xff] %v4856_v48  ;;  %v467_v9 = vadd.f32 %v4732_v61, %v411_v14  ;;  %v4879_v4 = vmax.f32 %v465_v37, 0.0  ;;  %v933_v30 = vrot.slane %v718_v31, 2  ;;  %v412_v5 = vmul.f32 %v4735_v47, %v354_v13 }
 0x139   : > { %2693 = vmatmul.mubr.msk.f32.gmra.mrb[32].mxu1 %vm4632_vm14, %v4609_v26  ;;  %3105 = vmatprep.subr.bf16.mxu1 %v4813_v59  ;;  %v4870_v12 = vsel %vm6188_vm11, %v929_v22, %v931_v53  ;;  %v721_v22 = vsel %vm4761_vm8, %v4856_v48, 0.0  ;;  %v4899_v31 = vsel %vm6169_vm9, %v830_v63, %v831_v49  ;;  %v935_v14 = vrot.slane %v719_v34, 2 }
 0x13a   : > { %1570 = vmatmul.mubr.f32.gmra.mrb[32].mxu0 %v4818_v7  ;;  %1349 = vmatprep.mubr.f32.mxu1 %v4825_v20  ;;  %6316 = vst [vmem:[#allocation71_spill] sm:$0xff] %v4870_v12  ;;  %6317 = vst [vmem:[#allocation72_spill] sm:$0xff] %v4879_v4  ;;  %v466_v7 = vadd.f32 %v4732_v61, %v410_v16  ;;  %v936_v3 = vrot.slane %v720_v42, 2  ;;  %v4906_v33 = vsel %vm6188_vm11, %v931_v53, %v933_v30  ;;  %v6322_v34 = vmov 0  ;;  %v356_v53 = vld [vmem:[%s4028_s10 + $0x108] sm:$0xff] }
 0x13b   : > { %2726 = vmatprep.mubr.msk.f32.mxu0 %vm4761_vm8, %v4827_v0  ;;  %6320 = vst [vmem:[#allocation73_spill] sm:$0xff] %v4906_v33  ;;  %v4908_v13 = vmax.f32 %v467_v9, 0.0  ;;  %v833_v16 = vrot.slane %v721_v22, 1  ;;  %v6323_v34 = vsel %vm4915_vm12, 4294967295, %v6322_v34  ;;  %v938_v9 = vrot.slane %v721_v22, 2 }
 0x13c   : > { %6324 = vst [vmem:[#allocation75_spill] sm:$0xff] %v6323_v34  ;;  %v516_v30 = vmax.f32 %v466_v7, 0.0  ;;  %v414_v41 = vmul.f32 %v4735_v47, %v356_v53  ;;  %v545_v53 = vadd.s32 7, %v4051_v29  ;;  %v364_v34 = vld [vmem:[%s4028_s10 + $0x148] sm:$0xff] }
 0x13d   : > { %2694 = vmatmul.mubr.msk.f32.gmra.mrb[34].mxu1 %vm4597_vm13, %v4666_v58  ;;  %6321 = vst [vmem:[#allocation74_spill] sm:$0xff] %v4908_v13  ;;  %v4940_v42 = vsel %vm6169_vm9, %v831_v49, %v833_v16  ;;  %v724_v49 = vsel %vm4915_vm12, %v4908_v13, 0.0  ;;  %v6395_v52 = vld [vmem:[#allocation69_spill] sm:$0xff] }
 0x13e   : > { %1575 = vmatmul.mubr.f32.gmra.mrb[34].mxu0 %v4838_v57  ;;  %1354 = vmatprep.mubr.f32.mxu1 %v4846_v11  ;;  %v355_v57 = vld [vmem:[%s4028_s10 + $0x100] sm:$0xff]  ;;  %v723_v62 = vsel %vm673_vm1, %v516_v30, 0.0  ;;  %vm561_vm2 = vcmp.ge.s32.totalorder %v545_v53, 1  ;;  %vm571_vm1 = vcmp.le.s32.totalorder %v545_v53, 32 }
 0x13f   : > { %2727 = vmatprep.mubr.msk.f32.mxu0 %vm4761_vm8, %v4856_v48  ;;  %v413_v37 = vmul.f32 %v4735_v47, %v355_v57  ;;  %v722_v57 = vsel %vm4761_vm8, %v4879_v4, 0.0  ;;  %vm5003_vm10 = vmand %vm561_vm2, %vm571_vm1  ;;  %vm6338_vm1 = vcmp.le.s32.totalorder %v4161_v18, 32 }
 0x140   : > { %v835_v22 = vrot.slane %v722_v57, 1  ;;  %vm5028_vm2 = vmand %vm5003_vm10, %vm6170_vm5  ;;  %vm6340_vm5 = vcmask 1046528  }
 0x141   : > { %2695 = vmatmul.mubr.msk.f32.gmra.mrb[36].mxu1 %vm4597_vm13, %v4703_v60  ;;  %v469_v7 = vadd.f32 %v4732_v61, %v413_v37  ;;  %v940_v37 = vrot.slane %v722_v57, 2  ;;  %v837_v57 = vrot.slane %v723_v62, 1 }
 0x142   : > { %1580 = vmatmul.mubr.f32.gmra.mrb[36].mxu0 %v4870_v12  ;;  %1359 = vmatprep.mubr.f32.mxu1 %v4877_v44  ;;  %v468_v12 = vadd.f32 %v4732_v61, %v412_v5  ;;  %v4933_v5 = vsel %vm6188_vm11, %v935_v14, %v936_v3  ;;  %v4950_v14 = vsel %vm6188_vm11, %v936_v3, %v938_v9 }
 0x143   : > { %2728 = vmatprep.mubr.msk.f32.mxu0 %vm4761_vm8, %v4879_v4  ;;  %6325 = vst [vmem:[#allocation76_spill] sm:$0xff] %v4933_v5  ;;  %6327 = vst [vmem:[#allocation78_spill] sm:$0xff] %v4950_v14  ;;  %v4966_v3 = vsel %vm6169_vm9, %v833_v16, %v835_v22  ;;  %v4980_v35 = vsel %vm6188_vm11, %v938_v9, %v940_v37  ;;  %v839_v16 = vrot.slane %v724_v49, 1 }
 0x144   : > { %v4942_v63 = vmax.f32 %v468_v12, 0.0  ;;  %v4955_v12 = vmax.f32 %v469_v7, 0.0  ;;  %6329 = vst [vmem:[#allocation80_spill] sm:$0xff] %v4966_v3  ;;  %6330 = vst [vmem:[#allocation81_spill] sm:$0xff] %v4980_v35 }
 0x145   : > { %2696 = vmatmul.mubr.msk.f32.gmra.mrb[38].mxu1 %vm4597_vm13, %v4729_v36 }
 0x146   : > { %1585 = vmatmul.mubr.f32.gmra.mrb[38].mxu0 %v4906_v33  ;;  %1364 = vmatprep.mubr.f32.mxu1 %v4899_v31  ;;  %6326 = vst [vmem:[#allocation77_spill] sm:$0xff] %v4942_v63  ;;  %v358_v33 = vld [vmem:[%s4028_s10 + $0x118] sm:$0xff]  ;;  %6328 = vst [vmem:[#allocation79_spill] sm:$0xff] %v4955_v12  ;;  %v4972_v7 = vsel %vm4892_vm3, %v4942_v63, 0.0 }
 0x147   : > { %2729 = vmatprep.mubr.msk.f32.mxu0 %vm4915_vm12, %v4908_v13  ;;  %v416_v30 = vmul.f32 %v4735_v47, %v358_v33  ;;  %v415_v33 = vmul.f32 %v4735_v47, %v357_v50  ;;  %v4990_v50 = vsel %vm6169_vm9, %v835_v22, %v837_v57  ;;  %v945_v57 = vrot.slane %v4972_v7, 2  ;;  %v6409_v22 = vld [vmem:[#allocation66_spill] sm:$0xff] }
 0x148   : > { %6331 = vst [vmem:[#allocation82_spill] sm:$0xff] %v4990_v50 }
 0x149   : > { %2697 = vmatmul.mubr.msk.f32.gmra.mrb[40].mxu1 %vm4795_vm6, %v4788_v45  ;;  %v472_v27 = vadd.f32 %v4732_v61, %v416_v30  ;;  %v360_v30 = vld [vmem:[%s4028_s10 + $0x128] sm:$0xff]  ;;  %v471_v53 = vadd.f32 %v4732_v61, %v415_v33 }
 0x14a   : > { %1590 = vmatmul.mubr.f32.gmra.mrb[40].mxu0 %v4933_v5  ;;  %1369 = vmatprep.mubr.f32.mxu1 %v4940_v42  ;;  %v470_v5 = vadd.f32 %v4732_v61, %v414_v41  ;;  %v840_v41 = vrot.slane %v4972_v7, 1  ;;  %v419_v7 = vmul.f32 %v4735_v47, %v361_v17 }
 0x14b   : > { %2730 = vmatprep.mubr.msk.f32.mxu0 %vm4892_vm3, %v4942_v63 }
 0x14c   : > { %v4992_v9 = vmax.f32 %v470_v5, 0.0  ;;  %v944_v5 = vrot.slane %v724_v49, 2 }
 0x14d   : > { %2698 = vmatmul.mubr.msk.f32.gmra.mrb[42].mxu1 %vm4761_vm8, %v4827_v0  ;;  %v942_v0 = vrot.slane %v723_v62, 2  ;;  %v5010_v62 = vsel %vm6169_vm9, %v839_v16, %v840_v41  ;;  %vm678_vm9 = vmand %vm4892_vm3, %vm6338_vm1 }
 0x14e   : > { %1595 = vmatmul.mubr.f32.gmra.mrb[42].mxu0 %v4950_v14  ;;  %1374 = vmatprep.mubr.f32.mxu1 %v4966_v3  ;;  %v417_v14 = vmul.f32 %v4735_v47, %v359_v24  ;;  %v726_v3 = vsel %vm4892_vm3, %v4955_v12, 0.0  ;;  %6334 = vst [vmem:[#allocation83_spill] sm:$0xff] %v5010_v62  ;;  %v5012_v24 = vmax.f32 %v472_v27, 0.0  ;;  %v368_v27 = vld [vmem:[%s4028_s10 + $0x168] sm:$0xff] }
 0x14f   : > { %2731 = vmatprep.mubr.msk.f32.mxu0 %vm4892_vm3, %v4955_v12  ;;  %v5019_v33 = vsel %vm6188_vm11, %v940_v37, %v942_v0  ;;  %v727_v0 = vsel %vm4892_vm3, %v4992_v9, 0.0  ;;  %v521_v37 = vmax.f32 %v471_v53, 0.0  ;;  %v947_v49 = vrot.slane %v726_v3, 2 }
 0x150   : > { %6335 = vst [vmem:[#allocation84_spill] sm:$0xff] %v5019_v33  ;;  %v844_v53 = vrot.slane %v727_v0, 1  ;;  %v949_v17 = vrot.slane %v727_v0, 2 }
 0x151   : > { %2699 = vmatmul.mubr.msk.f32.gmra.mrb[44].mxu1 %vm4761_vm8, %v4856_v48  ;;  %v842_v48 = vrot.slane %v726_v3, 1  ;;  %v729_v3 = vsel %vm5028_vm2, %v5012_v24, 0.0  ;;  %v5077_v0 = vsel %vm6188_vm11, %v945_v57, %v947_v49 }
 0x152   : > { %1600 = vmatmul.mubr.f32.gmra.mrb[44].mxu0 %v4980_v35  ;;  %1379 = vmatprep.mubr.f32.mxu1 %v4990_v50  ;;  %v473_v35 = vadd.f32 %v4732_v61, %v417_v14  ;;  %v418_v50 = vmul.f32 %v4735_v47, %v360_v30  ;;  %v5045_v14 = vsel %vm6188_vm11, %v944_v5, %v945_v57  ;;  %v362_v5 = vld [vmem:[%s4028_s10 + $0x138] sm:$0x3] }
 0x153   : > { %2732 = vmatprep.mubr.msk.f32.mxu0 %vm4892_vm3, %v4992_v9  ;;  %6339 = vst [vmem:[#allocation85_spill] sm:$0xff] %v5045_v14  ;;  %v5052_v16 = vsel %vm6340_vm5, %v840_v41, %v842_v48  ;;  %6342 = vst [vmem:[#allocation87_spill] sm:$0xff] %v5077_v0 }
 0x154   : > { %6341 = vst [vmem:[#allocation86_spill] sm:$0xff] %v5052_v16  ;;  %v5054_v30 = vmax.f32 %v473_v35, 0.0  ;;  %v475_v35 = vadd.f32 %v4732_v61, %v419_v7 }
 0x155   : > { %2700 = vmatmul.mubr.msk.f32.gmra.mrb[46].mxu1 %vm4761_vm8, %v4879_v4  ;;  %v363_v4 = vld [vmem:[%s4028_s10 + $0x140] sm:$0xff] }
 0x156   : > { %1605 = vmatmul.mubr.f32.gmra.mrb[46].mxu0 %v5019_v33  ;;  %1384 = vmatprep.mubr.f32.mxu1 %v5010_v62  ;;  %v474_v33 = vadd.f32 %v4732_v61, %v418_v50  ;;  %v728_v62 = vsel %vm678_vm9, %v521_v37, 0.0  ;;  %v730_v41 = vsel %vm5003_vm10, %v5054_v30, 0.0  ;;  %v421_v50 = vmul.f32 %v4735_v47, %v363_v4 }
 0x157   : > { %2733 = vmatprep.mubr.msk.f32.mxu0 %vm5028_vm2, %v5012_v24  ;;  %v546_v37 = vadd.s32 8, %v4051_v29  ;;  %v846_v7 = vrot.slane %v728_v62, 1  ;;  %v5090_v4 = vsel %vm6188_vm11, %v947_v49, %v949_v17  ;;  %v848_v29 = vrot.slane %v729_v3, 1 }
 0x158   : > { %6344 = vst [vmem:[#allocation89_spill] sm:$0xff] %v5090_v4  ;;  %v849_v57 = vrot.slane %v730_v41, 1  ;;  %v951_v49 = vrot.slane %v728_v62, 2 }
 0x159   : > { %2701 = vmatmul.mubr.msk.f32.gmra.mrb[48].mxu1 %vm4915_vm12, %v4908_v13  ;;  %v420_v13 = vmul.f32 %v4735_v47, %v362_v5  ;;  %vm562_vm9 = vcmp.ge.s32.totalorder %v546_v37, 1  ;;  %vm572_vm1 = vcmp.le.s32.totalorder %v546_v37, 32  ;;  %v5101_v5 = vsel %vm6340_vm5, %v844_v53, %v846_v7 }
 0x15a   : > { %1610 = vmatmul.mubr.f32.gmra.mrb[48].mxu0 %v5045_v14  ;;  %1389 = vmatprep.mubr.f32.mxu1 %v5052_v16  ;;  %v5080_v14 = vsel %vm6340_vm5, %v842_v48, %v844_v53  ;;  %v5082_v16 = vmax.f32 %v474_v33, 0.0  ;;  %v5094_v48 = vmax.f32 %v475_v35, 0.0  ;;  %v477_v33 = vadd.f32 %v4732_v61, %v421_v50  ;;  %v365_v35 = vld [vmem:[%s4028_s10 + $0x150] sm:$0xff]  ;;  %vm5112_vm11 = vmand %vm562_vm9, %vm572_vm1 }
 0x15b   : > { %2734 = vmatprep.mubr.msk.f32.mxu0 %vm5003_vm10, %v5054_v30  ;;  %6343 = vst [vmem:[#allocation88_spill] sm:$0xff] %v5080_v14  ;;  %v5119_v62 = vsel %vm6340_vm5, %v848_v29, %v849_v57  ;;  %v954_v53 = vrot.slane %v730_v41, 2  ;;  %vm6349_vm9 = vcmp.ge.s32.totalorder %v4058_v38, 1  ;;  %v366_v41 = vld [vmem:[%s4028_s10 + $0x158] sm:$0xff]  ;;  %v6423_v50 = vld [vmem:[#allocation87_spill] sm:$0xff] }
 0x15c   : > { %v5127_v7 = vmax.f32 %v477_v33, 0.0  ;;  %vm5135_vm1 = vmand %vm5112_vm11, %vm6349_vm9  ;;  %vm6353_vm9 = vcmask 1045504   ;;  %v6380_v10 = vld [vmem:[#allocation86_spill] sm:$0xff] }
 0x15d   : > { %2702 = vmatmul.mubr.msk.f32.gmra.mrb[50].mxu1 %vm4892_vm3, %v4942_v63  ;;  %v476_v63 = vadd.f32 %v4732_v61, %v420_v13  ;;  %v5125_v13 = vsel %vm6347_vm4, %v949_v17, %v951_v49  ;;  %vm6352_vm4 = vcmp.le.s32.totalorder %v4161_v18, 32 }
 0x15e   : > { %1615 = vmatmul.mubr.f32.gmra.mrb[50].mxu0 %v5077_v0  ;;  %1394 = vmatprep.mubr.f32.mxu1 %v5080_v14  ;;  %v731_v0 = vsel %vm5003_vm10, %v5082_v16, 0.0  ;;  %v422_v14 = vmul.f32 %v4735_v47, %v364_v34  ;;  %v953_v34 = vrot.slane %v729_v3, 2  ;;  %6348 = vst [vmem:[#allocation90_spill] sm:$0xff] %v5125_v13  ;;  %v732_v3 = vsel %vm5003_vm10, %v5094_v48, 0.0  ;;  %vm683_vm5 = vmand %vm5003_vm10, %vm6352_vm4 }
 0x15f   : > { %2735 = vmatprep.mubr.msk.f32.mxu0 %vm5003_vm10, %v5082_v16  ;;  %v851_v37 = vrot.slane %v731_v0, 1  ;;  %v526_v17 = vmax.f32 %v476_v63, 0.0  ;;  %v956_v63 = vrot.slane %v731_v0, 2  ;;  %vm6356_vm4 = vcmask 1046528  }
 0x161   : > { %2703 = vmatmul.mubr.msk.f32.gmra.mrb[52].mxu1 %vm4892_vm3, %v4955_v12  ;;  %v478_v12 = vadd.f32 %v4732_v61, %v422_v14  ;;  %v5153_v14 = vsel %vm6353_vm9, %v953_v34, %v954_v53  ;;  %v5156_v33 = vsel %vm6354_vm7, %v849_v57, %v851_v37  ;;  %v733_v18 = vsel %vm683_vm5, %v526_v17, 0.0  ;;  %vm6355_vm7 = vmmov %vm6353_vm9 }
 0x162   : > { %1620 = vmatmul.mubr.f32.gmra.mrb[52].mxu0 %v5090_v4  ;;  %1399 = vmatprep.mubr.f32.mxu1 %v5101_v5  ;;  %v423_v4 = vmul.f32 %v4735_v47, %v365_v35  ;;  %v853_v35 = vrot.slane %v732_v3, 1  ;;  %v5171_v0 = vsel %vm6355_vm7, %v954_v53, %v956_v63  ;;  %v958_v57 = vrot.slane %v732_v3, 2  ;;  %vm6357_vm5 = vmmov %vm6355_vm7 }
 0x163   : > { %2736 = vmatprep.mubr.msk.f32.mxu0 %vm5003_vm10, %v5094_v48  ;;  %v5161_v49 = vmax.f32 %v478_v12, 0.0  ;;  %v855_v34 = vrot.slane %v733_v18, 1  ;;  %vm6358_vm9 = vmmov %vm6356_vm4 }
 0x164   : > { %v479_v38 = vadd.f32 %v4732_v61, %v423_v4  ;;  %v5177_v12 = vsel %vm6356_vm4, %v851_v37, %v853_v35  ;;  %v5191_v53 = vsel %vm6357_vm5, %v956_v63, %v958_v57  ;;  %vm6359_vm7 = vmmov %vm6357_vm5 }
 0x165   : > { %2704 = vmatmul.mubr.msk.f32.gmra.mrb[54].mxu1 %vm4892_vm3, %v4992_v9 }
 0x166   : > { %1625 = vmatmul.mubr.f32.gmra.mrb[54].mxu0 %v5125_v13  ;;  %1404 = vmatprep.mubr.f32.mxu1 %v5119_v62  ;;  %v424_v13 = vmul.f32 %v4735_v47, %v366_v41  ;;  %v5179_v4 = vmax.f32 %v479_v38, 0.0  ;;  %v5194_v38 = vsel %vm6358_vm9, %v853_v35, %v855_v34  ;;  %v1187_v41 = vld [vmem:[#allocation5 + $0x418] sm:$0xff]  ;;  %v1188_v35 = vld [vmem:[#allocation5 + $0x420] sm:$0xff]  ;;  %v6366_v34 = vld [vmem:[#allocation35_spill] sm:$0xff] }
 0x167   : > { %2737 = vmatprep.mubr.msk.f32.mxu0 %vm5135_vm1, %v5127_v7 }
 0x168   : > { %v480_v17 = vadd.f32 %v4732_v61, %v424_v13  ;;  %v960_v13 = vrot.slane %v733_v18, 2  ;;  %v1186_v18 = vld [vmem:[#allocation5 + $0x410] sm:$0xff] }
 0x169   : > { %2705 = vmatmul.mubr.msk.f32.gmra.mrb[56].mxu1 %vm5028_vm2, %v5012_v24  ;;  %v3108_v63 = vpack.c.bf16 %v1187_v41, %v1186_v18  ;;  %v6368_v18 = vld [vmem:[#allocation46_spill] sm:$0xff] }
 0x16a   : > { %1630 = vmatmul.mubr.f32.gmra.mrb[56].mxu0 %v5153_v14  ;;  %1409 = vmatprep.mubr.f32.mxu1 %v5156_v33  ;;  %v5196_v37 = vmax.f32 %v480_v17, 0.0  ;;  %v5207_v3 = vsel %vm6359_vm7, %v958_v57, %v960_v13  ;;  %v1189_v57 = vld [vmem:[#allocation5 + $0x428] sm:$0xff] }
 0x16b   : > { %2738 = vmatprep.mubr.msk.f32.mxu0 %vm5112_vm11, %v5161_v49  ;;  %v6367_v17 = vld [vmem:[#allocation70_spill] sm:$0xff] }
 0x16c   : > { %v6369_v41 = vld [vmem:[#allocation82_spill] sm:$0xff] }
 0x16d   : > { %2706 = vmatmul.mubr.msk.f32.gmra.mrb[58].mxu1 %vm5003_vm10, %v5054_v30 }
 0x16e   : > { %1635 = vmatmul.mubr.f32.gmra.mrb[58].mxu0 %v5171_v0  ;;  %1414 = vmatprep.mubr.f32.mxu1 %v5177_v12 }
 0x16f   : > { %2739 = vmatprep.mubr.msk.f32.mxu0 %vm5112_vm11, %v5179_v4 }
 0x171   : > { %2707 = vmatmul.mubr.msk.f32.gmra.mrb[60].mxu1 %vm5003_vm10, %v5082_v16 }
 0x172   : > { %1640 = vmatmul.mubr.f32.gmra.mrb[60].mxu0 %v5191_v53  ;;  %1419 = vmatprep.mubr.f32.mxu1 %v5194_v38 }
 0x173   : > { %2740 = vmatprep.mubr.msk.f32.mxu0 %vm5112_vm11, %v5196_v37 }
 0x175   : > { %2708 = vmatmul.mubr.msk.f32.gmra.mrb[62].mxu1 %vm5003_vm10, %v5094_v48 }
 0x176   : > { %1645 = vmatmul.mubr.f32.gmra.mrb[62].mxu0 %v5207_v3  ;;  %1979 = vmatprep.mubr.f32.mxu1 %v4771_v54 }
 0x177   : > { %1714 = vmatprep.mubr.f32.mxu0 %v4336_v40  ;;  %v3112_v40 = vpack.c.bf16 %v1189_v57, %v1188_v35  ;;  %v6371_v35 = vld [vmem:[#allocation37_spill] sm:$0xff]  ;;  %v6372_v57 = vld [vmem:[#allocation72_spill] sm:$0xff] }
 0x179   : > { %2749 = vmatmul.mubr.msk.f32.vlgmr.msra.gmra.mrb[64].mxu1 %vm4632_vm14, %v4609_v26  ;;  %v1191_v26 = vld [vmem:[#allocation5 + $0x438] sm:$0xff] }
 0x17a   : > { %1715 = vmatmul.mubr.f32.vlgmr.msra.gmra.mrb[0].mxu0 %v4291_v56  ;;  %1984 = vmatprep.mubr.f32.mxu1 %v4825_v20  ;;  %v1190_v56 = vld [vmem:[#allocation5 + $0x430] sm:$0xff] }
 0x17b   : > { %3058 = vmatpush1.bf16.msra.mxu0 %v4214_v1  ;;  %1719 = vmatprep.mubr.f32.mxu0 %v4362_v28  ;;  %v3116_v1 = vpack.c.bf16 %v1191_v26, %v1190_v56  ;;  %v1193_v28 = vld [vmem:[#allocation5 + $0x448] sm:$0xff]  ;;  %v6374_v56 = vld [vmem:[#allocation83_spill] sm:$0xff]  ;;  %v6375_v26 = vld [vmem:[#allocation56_spill] sm:$0xff] }
 0x17c   : > { %3059 = vmatprep.subr.bf16.mxu0 %v6283_v39  ;;  %3107 = vmatpush3.bf16.msra.mxu1 %v4813_v59  ;;  %v6365_v59 = vld [vmem:[#allocation49_spill] sm:$0xff] }
 0x17d   : > { %2750 = vmatmul.mubr.msk.f32.gmra.mrb[66].mxu1 %vm4597_vm13, %v4666_v58  ;;  %3109 = vmatprep.subr.bf16.mxu1 %v3108_v63  ;;  %v1196_v58 = vld [vmem:[#allocation5 + $0x460] sm:$0xff] }
 0x17e   : > { %1720 = vmatmul.mubr.f32.gmra.mrb[2].mxu0 %v4344_v19  ;;  %1989 = vmatprep.mubr.f32.mxu1 %v4846_v11  ;;  %v1192_v19 = vld [vmem:[#allocation5 + $0x440] sm:$0xff] }
 0x17f   : > { %1724 = vmatprep.mubr.f32.mxu0 %v4403_v51  ;;  %3061 = vmatpush1.bf16.msra.mxu0 %v4247_v25  ;;  %v3120_v25 = vpack.c.bf16 %v1193_v28, %v1192_v19  ;;  %v1195_v51 = vld [vmem:[#allocation5 + $0x458] sm:$0xff]  ;;  %v6377_v19 = vld [vmem:[#allocation74_spill] sm:$0xff] }
 0x180   : > { %3062 = vmatprep.subr.bf16.mxu0 %v6283_v39  ;;  %3111 = vmatpush3.bf16.msra.mxu1 %v3108_v63  ;;  %v6370_v63 = vld [vmem:[#allocation54_spill] sm:$0xff] }
 0x181   : > { %2751 = vmatmul.mubr.msk.f32.gmra.mrb[68].mxu1 %vm4597_vm13, %v4703_v60  ;;  %3113 = vmatprep.subr.bf16.mxu1 %v3112_v40  ;;  %v6364_v60 = vld [vmem:[#allocation80_spill] sm:$0xff]  ;;  %v6397_v28 = vld [vmem:[#allocation26_spill] sm:$0xff] }
 0x182   : > { %1725 = vmatmul.mubr.f32.gmra.mrb[4].mxu0 %v4371_v2  ;;  %1994 = vmatprep.mubr.f32.mxu1 %v4877_v44  ;;  %v1194_v2 = vld [vmem:[#allocation5 + $0x450] sm:$0xff] }
 0x183   : > { %1729 = vmatprep.mubr.f32.mxu0 %v4457_v32  ;;  %3064 = vmatpush1.bf16.msra.mxu0 %v4275_v43  ;;  %v3124_v43 = vpack.c.bf16 %v1195_v51, %v1194_v2  ;;  %v6360_v32 = vld [vmem:[#allocation45_spill] sm:$0xff]  ;;  %v6381_v2 = vld [vmem:[#allocation59_spill] sm:$0xff]  ;;  %v6382_v51 = vld [vmem:[#allocation44_spill] sm:$0xff] }
 0x184   : > { %3065 = vmatprep.subr.bf16.mxu0 %v6283_v39  ;;  %3115 = vmatpush3.bf16.msra.mxu1 %v3112_v40  ;;  %v6373_v40 = vld [vmem:[#allocation51_spill] sm:$0xff] }
 0x185   : > { %2752 = vmatmul.mubr.msk.f32.gmra.mrb[70].mxu1 %vm4597_vm13, %v4729_v36  ;;  %3117 = vmatprep.subr.bf16.mxu1 %v3116_v1  ;;  %v1199_v36 = vld [vmem:[#allocation5 + $0x478] sm:$0xff] }
 0x186   : > { %1730 = vmatmul.mubr.f32.gmra.mrb[6].mxu0 %v4418_v15  ;;  %1999 = vmatprep.mubr.f32.mxu1 %v4899_v31  ;;  %v1197_v15 = vld [vmem:[#allocation5 + $0x468] sm:$0xff] }
 0x187   : > { %1734 = vmatprep.mubr.f32.mxu0 %v4496_v55  ;;  %3067 = vmatpush1.bf16.msra.mxu0 %v4318_v8  ;;  %v6362_v8 = vld [vmem:[#allocation68_spill] sm:$0xff]  ;;  %v3128_v21 = vpack.c.bf16 %v1197_v15, %v1196_v58  ;;  %v6384_v58 = vld [vmem:[#allocation57_spill] sm:$0xff] }
 0x188   : > { %3068 = vmatprep.subr.bf16.mxu0 %v6283_v39  ;;  %3119 = vmatpush3.bf16.msra.mxu1 %v3116_v1  ;;  %v6376_v1 = vld [vmem:[#allocation41_spill] sm:$0xff]  ;;  %v6385_v15 = vld [vmem:[#allocation88_spill] sm:$0xff] }
 0x189   : > { %2753 = vmatmul.mubr.msk.f32.gmra.mrb[72].mxu1 %vm4795_vm6, %v4788_v45  ;;  %3121 = vmatprep.subr.bf16.mxu1 %v3120_v25  ;;  %v1198_v45 = vld [vmem:[#allocation5 + $0x470] sm:$0xff] }
 0x18a   : > { %1735 = vmatmul.mubr.f32.gmra.mrb[8].mxu0 %v4446_v23  ;;  %2004 = vmatprep.mubr.f32.mxu1 %v4940_v42  ;;  %v3132_v13 = vpack.c.bf16 %v1199_v36, %v1198_v45  ;;  %v6389_v45 = vld [vmem:[#allocation60_spill] sm:$0xff]  ;;  %v6390_v36 = vld [vmem:[#allocation65_spill] sm:$0xff] }
 0x18b   : > { %1739 = vmatprep.mubr.f32.mxu0 %v6360_v32  ;;  %3070 = vmatpush1.bf16.msra.mxu0 %v6361_v46  ;;  %v6386_v46 = vld [vmem:[#allocation62_spill] sm:$0xff] }
 0x18c   : > { %3071 = vmatprep.subr.bf16.mxu0 %v6283_v39  ;;  %3123 = vmatpush3.bf16.msra.mxu1 %v3120_v25  ;;  %v6379_v25 = vld [vmem:[#allocation53_spill] sm:$0xff] }
 0x18d   : > { %2754 = vmatmul.mubr.msk.f32.gmra.mrb[74].mxu1 %vm4761_vm8, %v6362_v8  ;;  %3125 = vmatprep.subr.bf16.mxu1 %v3124_v43  ;;  %v6387_v8 = vld [vmem:[#allocation48_spill] sm:$0xff] }
 0x18e   : > { %1740 = vmatmul.mubr.f32.gmra.mrb[10].mxu0 %v6363_v6  ;;  %2009 = vmatprep.mubr.f32.mxu1 %v6364_v60 }
 0x18f   : > { %1744 = vmatprep.mubr.f32.mxu0 %v6365_v59  ;;  %3073 = vmatpush1.bf16.msra.mxu0 %v6366_v34  ;;  %v6391_v34 = vld [vmem:[#allocation52_spill] sm:$0xff] }
 0x190   : > { %3074 = vmatprep.subr.bf16.mxu0 %v6283_v39  ;;  %3127 = vmatpush3.bf16.msra.mxu1 %v3124_v43  ;;  %v6383_v43 = vld [vmem:[#allocation77_spill] sm:$0xff] }
 0x191   : > { %2755 = vmatmul.mubr.msk.f32.gmra.mrb[76].mxu1 %vm4761_vm8, %v6367_v17  ;;  %3129 = vmatprep.subr.bf16.mxu1 %v3128_v21  ;;  %v6392_v17 = vld [vmem:[#allocation63_spill] sm:$0xff] }
 0x192   : > { %1745 = vmatmul.mubr.f32.gmra.mrb[12].mxu0 %v6368_v18  ;;  %2014 = vmatprep.mubr.f32.mxu1 %v6369_v41 }
 0x193   : > { %1749 = vmatprep.mubr.f32.mxu0 %v6370_v63  ;;  %3076 = vmatpush1.bf16.msra.mxu0 %v6371_v35  ;;  %v6394_v35 = vld [vmem:[#allocation55_spill] sm:$0xff] }
 0x194   : > { %3077 = vmatprep.subr.bf16.mxu0 %v6283_v39  ;;  %3131 = vmatpush3.bf16.msra.mxu1 %v3128_v21  ;;  %v6388_v21 = vld [vmem:[#allocation79_spill] sm:$0xff] }
 0x195   : > { %2756 = vmatmul.mubr.msk.f32.gmra.mrb[78].mxu1 %vm4761_vm8, %v6372_v57  ;;  %3133 = vmatprep.subr.bf16.mxu1 %v3132_v13  ;;  %v367_v57 = vld [vmem:[%s4028_s10 + $0x160] sm:$0x3]  ;;  %vm6401_vm8 = vmmov %vm6356_vm4 }
 0x196   : > { %1750 = vmatmul.mubr.f32.gmra.mrb[14].mxu0 %v6373_v40  ;;  %2019 = vmatprep.mubr.f32.mxu1 %v6374_v56 }
 0x197   : > { %1754 = vmatprep.mubr.f32.mxu0 %v6375_v26  ;;  %3079 = vmatpush1.bf16.msra.mxu0 %v6376_v1  ;;  %v5323_v1 = vsel %vm5135_vm1, %v5127_v7, 0.0 }
 0x198   : > { %3080 = vmatprep.subr.bf16.mxu0 %v6283_v39  ;;  %3135 = vmatpush3.bf16.msra.mxu1 %v3132_v13  ;;  %v6393_v13 = vld [vmem:[#allocation67_spill] sm:$0xff] }
 0x199   : > { %2757 = vmatmul.mubr.msk.f32.gmra.mrb[80].mxu1 %vm4915_vm12, %v6377_v19  ;;  %v5328_v19 = vsel %vm5112_vm11, %v5161_v49, 0.0 }
 0x19a   : > { %1755 = vmatmul.mubr.f32.gmra.mrb[16].mxu0 %v6379_v25  ;;  %2024 = vmatprep.mubr.f32.mxu1 %v6380_v10 }
 0x19b   : > { %1759 = vmatprep.mubr.f32.mxu0 %v6381_v2  ;;  %3082 = vmatpush1.bf16.msra.mxu0 %v6382_v51  ;;  %v547_v51 = vadd.s32 9, %v6397_v28 }
 0x19c   : > { %3083 = vmatprep.subr.bf16.mxu0 %v6283_v39 }
 0x19d   : > { %2758 = vmatmul.mubr.msk.f32.gmra.mrb[82].mxu1 %vm4892_vm3, %v6383_v43  ;;  %v6398_v43 = vld [vmem:[#allocation71_spill] sm:$0xff]  ;;  %vm563_vm13 = vcmp.ge.s32.totalorder %v547_v51, 1  ;;  %vm573_vm14 = vcmp.le.s32.totalorder %v547_v51, 32 }
 0x19e   : > { %1760 = vmatmul.mubr.f32.gmra.mrb[18].mxu0 %v6384_v58  ;;  %2029 = vmatprep.mubr.f32.mxu1 %v6385_v15  ;;  %vm5383_vm12 = vmand %vm563_vm13, %vm573_vm14  ;;  %v6410_v58 = vld [vmem:[#allocation27_spill] sm:$0xff] }
 0x19f   : > { %1764 = vmatprep.mubr.f32.mxu0 %v6386_v46  ;;  %3085 = vmatpush1.bf16.msra.mxu0 %v6387_v8  ;;  %v999_v8 = vrot.slane %v5323_v1, 1 }
 0x1a0   : > { %3086 = vmatprep.subr.bf16.mxu0 %v6283_v39 }
 0x1a1   : > { %2759 = vmatmul.mubr.msk.f32.gmra.mrb[84].mxu1 %vm4892_vm3, %v6388_v21  ;;  %v1000_v21 = vrot.slane %v5328_v19, 1 }
 0x1a2   : > { %1765 = vmatmul.mubr.f32.gmra.mrb[20].mxu0 %v6389_v45  ;;  %2034 = vmatprep.mubr.f32.mxu1 %v5101_v5 }
 0x1a3   : > { %1769 = vmatprep.mubr.f32.mxu0 %v6390_v36  ;;  %3088 = vmatpush1.bf16.msra.mxu0 %v6391_v34  ;;  %v426_v34 = vmul.f32 %v4735_v47, %v368_v27  ;;  %v6400_v27 = vld [vmem:[#allocation73_spill] sm:$0xff] }
 0x1a4   : > { %3089 = vmatprep.subr.bf16.mxu0 %v6283_v39 }
 0x1a5   : > { %2760 = vmatmul.mubr.msk.f32.gmra.mrb[86].mxu1 %vm4892_vm3, %v4992_v9  ;;  %v6396_v9 = vld [vmem:[#allocation58_spill] sm:$0xff]  ;;  %v482_v28 = vadd.f32 %v4732_v61, %v426_v34 }
 0x1a6   : > { %1770 = vmatmul.mubr.f32.gmra.mrb[22].mxu0 %v6392_v17  ;;  %2039 = vmatprep.mubr.f32.mxu1 %v5119_v62  ;;  %v6403_v17 = vld [vmem:[#allocation28_spill] sm:$0xff] }
 0x1a7   : > { %1774 = vmatprep.mubr.f32.mxu0 %v6393_v13  ;;  %3091 = vmatpush1.bf16.msra.mxu0 %v6394_v35  ;;  %v6399_v35 = vld [vmem:[#allocation61_spill] sm:$0xff]  ;;  %vm6404_vm6 = vcmp.le.s32.totalorder %v6403_v17, 32 }
 0x1a8   : > { %3092 = vmatprep.subr.bf16.mxu0 %v6283_v39  ;;  %vm688_vm3 = vmand %vm5112_vm11, %vm6404_vm6 }
 0x1a9   : > { %2761 = vmatmul.mubr.msk.f32.gmra.mrb[88].mxu1 %vm5028_vm2, %v5012_v24  ;;  %v425_v24 = vmul.f32 %v4735_v47, %v367_v57  ;;  %vm6408_vm2 = vmmov %vm6356_vm4 }
 0x1aa   : > { %1775 = vmatmul.mubr.f32.gmra.mrb[24].mxu0 %v4771_v54  ;;  %2044 = vmatprep.mubr.f32.mxu1 %v5156_v33  ;;  %v369_v54 = vld [vmem:[%s4028_s10 + $0x170] sm:$0xff]  ;;  %vm6415_vm5 = vmmov %vm6408_vm2 }
 0x1ab   : > { %1779 = vmatprep.mubr.f32.mxu0 %v6395_v52  ;;  %3094 = vmatpush1.bf16.msra.mxu0 %v6396_v9  ;;  %v427_v57 = vmul.f32 %v4735_v47, %v369_v54  ;;  %v370_v9 = vld [vmem:[%s4028_s10 + $0x178] sm:$0xff]  ;;  %vm6420_vm7 = vmmov %vm6404_vm6  ;;  %vm6428_vm6 = vcmask 1045504  }
 0x1ac   : > { %3095 = vmatprep.subr.bf16.mxu0 %v6283_v39  ;;  %vm693_vm13 = vmand %vm5383_vm12, %vm6420_vm7 }
 0x1ad   : > { %2762 = vmatmul.mubr.msk.f32.gmra.mrb[90].mxu1 %vm5003_vm10, %v5054_v30  ;;  %v5348_v30 = vsel %vm5112_vm11, %v5179_v4, 0.0  ;;  %v5376_v51 = vadd.f32 %v4732_v61, %v427_v57  ;;  %v6407_v57 = vld [vmem:[#allocation76_spill] sm:$0xff] }
 0x1ae   : > { %1780 = vmatmul.mubr.f32.gmra.mrb[26].mxu0 %v4825_v20  ;;  %2049 = vmatprep.mubr.f32.mxu1 %v5177_v12  ;;  %v481_v20 = vadd.f32 %v4732_v61, %v425_v24  ;;  %v5361_v24 = vsel %vm6401_vm8, %v999_v8, %v1000_v21  ;;  %v1002_v54 = vrot.slane %v5348_v30, 1  ;;  %v428_v8 = vmul.f32 %v4735_v47, %v370_v9 }
 0x1af   : > { %1784 = vmatprep.mubr.f32.mxu0 %v6398_v43  ;;  %3097 = vmatpush1.bf16.msra.mxu0 %v6399_v35  ;;  %v6402_v35 = vld [vmem:[#allocation64_spill] sm:$0xff]  ;;  %v533_v45 = vmax.f32 %v5376_v51, 0.0 }
 0x1b0   : > { %3098 = vmatprep.subr.bf16.mxu0 %v6283_v39  ;;  %v5392_v9 = vsel %vm6408_vm2, %v1000_v21, %v1002_v54  ;;  %v484_v21 = vadd.f32 %v4732_v61, %v428_v8 }
 0x1b1   : > { %2763 = vmatmul.mubr.msk.f32.gmra.mrb[92].mxu1 %vm5003_vm10, %v5082_v16  ;;  %v531_v16 = vmax.f32 %v481_v20, 0.0  ;;  %v371_v20 = vld [vmem:[%s4028_s10 + $0x180] sm:$0xff]  ;;  %v5426_v29 = vsel %vm5383_vm12, %v533_v45, 0.0 }
 0x1b2   : > { %1785 = vmatmul.mubr.f32.gmra.mrb[28].mxu0 %v4846_v11  ;;  %2054 = vmatprep.mubr.f32.mxu1 %v5194_v38  ;;  %v5369_v11 = vsel %vm5112_vm11, %v5196_v37, 0.0  ;;  %v429_v25 = vmul.f32 %v4735_v47, %v371_v20 }
 0x1b3   : > { %1789 = vmatprep.mubr.f32.mxu0 %v6400_v27  ;;  %3100 = vmatpush1.bf16.msra.mxu0 %v6402_v35  ;;  %v532_v35 = vmax.f32 %v482_v28, 0.0  ;;  %v372_v28 = vld [vmem:[%s4028_s10 + $0x188] sm:$0x3]  ;;  %s5897_s10 = scalar_lea.sflag [#allocation4], %s308_s12 }
 0x1b4   : > { %3101 = vmatprep.subr.bf16.mxu0 %v6283_v39  ;;  %v1004_v39 = vrot.slane %v5369_v11, 1  ;;  %v430_v20 = vmul.f32 %v4735_v47, %v372_v28 }
 0x1b5   : > { %2764 = vmatmul.mubr.msk.f32.gmra.mrb[94].mxu1 %vm5003_vm10, %v5094_v48  ;;  %v5396_v48 = vsel %vm688_vm3, %v531_v16, 0.0  ;;  %vm6411_vm10 = vcmp.ge.s32.totalorder %v6410_v58, 1  ;;  %v6414_v58 = vld [vmem:[#allocation78_spill] sm:$0xff]  ;;  %vm6429_vm3 = vmmov %vm6428_vm6 }
 0x1b6   : > { %1790 = vmatmul.mubr.f32.gmra.mrb[30].mxu0 %v4877_v44  ;;  %2059 = vmatprep.mubr.f32.mxu1 %v5361_v24  ;;  %vm5403_vm4 = vmand %vm5383_vm12, %vm6411_vm10  ;;  %v5417_v16 = vsel %vm6415_vm5, %v1002_v54, %v1004_v39  ;;  %v1006_v51 = vrot.slane %v5396_v48, 1  ;;  %v6416_v54 = vld [vmem:[#allocation81_spill] sm:$0xff] }
 0x1b7   : > { %1794 = vmatprep.mubr.f32.mxu0 %v6407_v57  ;;  %3103 = vmatpush1.bf16.msra.mxu0 %v6409_v22  ;;  %v5422_v8 = vsel %vm5403_vm4, %v532_v35, 0.0  ;;  %v6425_v44 = vld [vmem:[#allocation89_spill] sm:$0xff] }
 0x1b8   : > { %v1030_v40 = vrot.slane %v5422_v8, 1 }
 0x1b9   : > { %2765 = vmatmul.mubr.msk.f32.gmra.mrb[96].mxu1 %vm5135_vm1, %v5127_v7  ;;  %v534_v7 = vmax.f32 %v484_v21, 0.0  ;;  %vm6417_vm1 = vmmov %vm6408_vm2  ;;  %v1031_v21 = vrot.slane %v5426_v29, 1 }
 0x1ba   : > { %1795 = vmatmul.mubr.f32.gmra.mrb[32].mxu0 %v4899_v31  ;;  %2064 = vmatprep.mubr.f32.mxu1 %v5392_v9  ;;  %v485_v31 = vadd.f32 %v4732_v61, %v429_v25  ;;  %v5437_v22 = vsel %vm6417_vm1, %v1004_v39, %v1006_v51  ;;  %vm6419_vm9 = vmmov %vm6417_vm1 }
 0x1bb   : > { %1799 = vmatprep.mubr.f32.mxu0 %v6414_v58  ;;  %v5443_v47 = vsel %vm5383_vm12, %v534_v7, 0.0  ;;  %v1032_v39 = vsel %vm6419_vm9, %v1030_v40, %v1031_v21  ;;  %vm6422_vm14 = vmmov %vm6417_vm1 }
 0x1bc   : > { %v535_v25 = vmax.f32 %v485_v31, 0.0  ;;  %v1033_v28 = vrot.slane %v5443_v47, 1  ;;  %vm6426_vm8 = vmmov %vm6417_vm1 }
 0x1bd   : > { %2766 = vmatmul.mubr.msk.f32.gmra.mrb[98].mxu1 %vm5112_vm11, %v5161_v49  ;;  %v486_v49 = vadd.f32 %v4732_v61, %v430_v20  ;;  %v6421_v61 = vld [vmem:[#allocation85_spill] sm:$0xff]  ;;  %vm6431_vm2 = vmmov %vm6429_vm3 }
 0x1be   : > { %1800 = vmatmul.mubr.f32.gmra.mrb[34].mxu0 %v4940_v42  ;;  %2069 = vmatprep.mubr.f32.mxu1 %v5417_v16  ;;  %v6418_v42 = vld [vmem:[#allocation84_spill] sm:$0xff]  ;;  %v5456_v51 = vsel %vm5383_vm12, %v535_v25, 0.0  ;;  %vm6450_vm5 = vmmov %vm6431_vm2 }
 0x1bf   : > { %1804 = vmatprep.mubr.f32.mxu0 %v6416_v54  ;;  %v536_v31 = vmax.f32 %v486_v49, 0.0  ;;  %v6427_v49 = vld [vmem:[#allocation90_spill] sm:$0xff] }
 0x1c1   : > { %2767 = vmatmul.mubr.msk.f32.gmra.mrb[100].mxu1 %vm5112_vm11, %v5179_v4  ;;  %v1034_v4 = vsel %vm6422_vm14, %v1031_v21, %v1033_v28  ;;  %v5469_v40 = vsel %vm693_vm13, %v536_v31, 0.0  ;;  %v6438_v31 = vld [vmem:[#allocation36_spill] sm:$0xff] }
 0x1c2   : > { %1805 = vmatmul.mubr.f32.gmra.mrb[36].mxu0 %v6364_v60  ;;  %2074 = vmatprep.mubr.f32.mxu1 %v5437_v22  ;;  %v1035_v60 = vrot.slane %v5456_v51, 1 }
 0x1c3   : > { %1809 = vmatprep.mubr.f32.mxu0 %v6418_v42 }
 0x1c5   : > { %2768 = vmatmul.mubr.msk.f32.gmra.mrb[102].mxu1 %vm5112_vm11, %v5196_v37  ;;  %vm6424_vm11 = vmmov %vm6417_vm1 }
 0x1c6   : > { %1810 = vmatmul.mubr.f32.gmra.mrb[38].mxu0 %v6369_v41  ;;  %2079 = vmatprep.mubr.f32.mxu1 %v1032_v39  ;;  %v1036_v37 = vsel %vm6424_vm11, %v1033_v28, %v1035_v60  ;;  %v1037_v41 = vrot.slane %v5469_v40, 1  ;;  %vm6452_vm1 = vmmov %vm6431_vm2 }
 0x1c7   : > { %1814 = vmatprep.mubr.f32.mxu0 %v6421_v61 }
 0x1c9   : > { %2769 = vmatmul.mubr.msk.f32.gmra.mrb[104].mxu1 %vm5403_vm4, %v532_v35  ;;  %vm6448_vm4 = vmmov %vm6431_vm2 }
 0x1ca   : > { %1815 = vmatmul.mubr.f32.gmra.mrb[40].mxu0 %v6374_v56  ;;  %2084 = vmatprep.mubr.f32.mxu1 %v1034_v4  ;;  %v1038_v56 = vsel %vm6426_vm8, %v1035_v60, %v1037_v41  ;;  %v6440_v60 = vld [vmem:[#allocation39_spill] sm:$0xff] }
 0x1cb   : > { %1819 = vmatprep.mubr.f32.mxu0 %v6423_v50 }
 0x1cc   : > { %v5477_v17 = vpop.f32.mrb[0].mxu1 }
 0x1cd   : > { %2770 = vmatmul.mubr.msk.f32.gmra.mrb[106].mxu1 %vm5383_vm12, %v533_v45  ;;  %v1268_v20 = vpop.f32.mrb[1].mxu1 }
 0x1ce   : > { %1820 = vmatmul.mubr.f32.gmra.mrb[42].mxu0 %v6380_v10  ;;  %2089 = vmatprep.mubr.f32.mxu1 %v1036_v37  ;;  %v6443_v37 = vld [vmem:[#allocation57_spill] sm:$0xff]  ;;  %v1048_v20 = vrot.slane %v5456_v51, 2 }
 0x1cf   : > { %1824 = vmatprep.mubr.f32.mxu0 %v6425_v44 }
 0x1d0   : > { %v5484_v35 = vpop.f32.mrb[2].mxu1 }
 0x1d1   : > { %2771 = vmatmul.mubr.msk.f32.gmra.mrb[108].mxu1 %vm5383_vm12, %v534_v7  ;;  %v1273_v21 = vpop.f32.mrb[3].mxu1 }
 0x1d2   : > { %1825 = vmatmul.mubr.f32.gmra.mrb[44].mxu0 %v6385_v15  ;;  %2094 = vmatprep.mubr.f32.mxu1 %v1038_v56  ;;  %v6446_v56 = vld [vmem:[#allocation38_spill] sm:$0xff] }
 0x1d3   : > { %1829 = vmatprep.mubr.f32.mxu0 %v6427_v49  ;;  %vm6447_vm10 = vnez %v6446_v56 }
 0x1d4   : > { %v5490_v45 = vpop.f32.mrb[4].mxu1 }
 0x1d5   : > { %2772 = vmatmul.mubr.msk.f32.gmra.mrb[110].mxu1 %vm5383_vm12, %v535_v25  ;;  %v1278_v10 = vpop.f32.mrb[5].mxu1  ;;  %vm6430_vm12 = vmmov %vm6429_vm3 }
 0x1d6   : > { %1830 = vmatmul.mubr.f32.gmra.mrb[46].mxu0 %v5101_v5  ;;  %2864 = vmatprep.mubr.f32.mxu1 %v4496_v55  ;;  %v1012_v55 = vrot.slane %v5323_v1, 2 }
 0x1d7   : > { %1834 = vmatprep.mubr.f32.mxu0 %v5153_v14 }
 0x1d8   : > { %v5497_v39 = vpop.f32.mrb[6].mxu1 }
 0x1d9   : > { %2865 = vmatmul.mubr.f32.vlgmr.msra.gmra.mrb[112].mxu1 %v6360_v32  ;;  %v1283_v15 = vpop.f32.mrb[7].mxu1  ;;  %v1013_v32 = vrot.slane %v5328_v19, 2 }
 0x1da   : > { %1835 = vmatmul.mubr.f32.gmra.mrb[48].mxu0 %v5119_v62  ;;  %2867 = vmatprep.mubr.f32.mxu1 %v6365_v59 }
 0x1db   : > { %1839 = vmatprep.mubr.f32.mxu0 %v5171_v0 }
 0x1dc   : > { %v5503_v34 = vpop.f32.mrb[8].mxu1 }
 0x1dd   : > { %2868 = vmatmul.mubr.f32.gmra.mrb[114].mxu1 %v6370_v63  ;;  %v1288_v5 = vpop.f32.mrb[9].mxu1  ;;  %v1015_v63 = vrot.slane %v5348_v30, 2 }
 0x1de   : > { %1840 = vmatmul.mubr.f32.gmra.mrb[50].mxu0 %v5156_v33  ;;  %2870 = vmatprep.mubr.f32.mxu1 %v6375_v26  ;;  %v1014_v33 = vsel %vm6428_vm6, %v1012_v55, %v1013_v32  ;;  %v6451_v5 = vld [vmem:[#allocation47_spill] sm:$0xff] }
 0x1df   : > { %1844 = vmatprep.mubr.f32.mxu0 %v5191_v53 }
 0x1e0   : > { %v5511_v62 = vpop.f32.mrb[10].mxu1 }
 0x1e1   : > { %2871 = vmatmul.mubr.f32.gmra.mrb[116].mxu1 %v6381_v2  ;;  %v1293_v59 = vpop.f32.mrb[11].mxu1  ;;  %v1017_v2 = vrot.slane %v5369_v11, 2 }
 0x1e2   : > { %1845 = vmatmul.mubr.f32.gmra.mrb[52].mxu0 %v5177_v12  ;;  %2873 = vmatprep.mubr.f32.mxu1 %v6386_v46  ;;  %v1016_v12 = vsel %vm6429_vm3, %v1013_v32, %v1015_v63  ;;  %v6453_v32 = vld [vmem:[#allocation63_spill] sm:$0xff] }
 0x1e3   : > { %1849 = vmatprep.mubr.f32.mxu0 %v5207_v3 }
 0x1e4   : > { %v5519_v26 = vpop.f32.mrb[12].mxu1 }
 0x1e5   : > { %2874 = vmatmul.mubr.f32.gmra.mrb[118].mxu1 %v6390_v36  ;;  %v1298_v1 = vpop.f32.mrb[13].mxu1  ;;  %v1018_v36 = vsel %vm6430_vm12, %v1015_v63, %v1017_v2 }
 0x1e6   : > { %1850 = vmatmul.mubr.f32.gmra.mrb[54].mxu0 %v5194_v38  ;;  %2876 = vmatprep.mubr.f32.mxu1 %v6393_v13  ;;  %v1019_v38 = vrot.slane %v5396_v48, 2  ;;  %v6432_v48 = vld [vmem:[#allocation30_spill] sm:$0xff] }
 0x1e7   : > { %1854 = vmatprep.mubr.f32.mxu0 %v1014_v33 }
 0x1e8   : > { %v5526_v46 = vpop.f32.mrb[14].mxu1 }
 0x1e9   : > { %2877 = vmatmul.mubr.f32.gmra.mrb[120].mxu1 %v6395_v52  ;;  %v1303_v19 = vpop.f32.mrb[15].mxu1  ;;  %v1020_v52 = vsel %vm6431_vm2, %v1017_v2, %v1019_v38 }
 0x1ea   : > { %1855 = vmatmul.mubr.f32.gmra.mrb[56].mxu0 %v5361_v24  ;;  %2879 = vmatprep.mubr.f32.mxu1 %v6398_v43 }
 0x1eb   : > { %1859 = vmatprep.mubr.f32.mxu0 %v1016_v12 }
 0x1ec   : > { %v5533_v13 = vpop.f32.mrb[16].mxu1 }
 0x1ed   : > { %2880 = vmatmul.mubr.f32.gmra.mrb[122].mxu1 %v6400_v27  ;;  %v1308_v30 = vpop.f32.mrb[17].mxu1 }
 0x1ee   : > { %1860 = vmatmul.mubr.f32.gmra.mrb[58].mxu0 %v5392_v9  ;;  %2882 = vmatprep.mubr.f32.mxu1 %v6407_v57 }
 0x1ef   : > { %1864 = vmatprep.mubr.f32.mxu0 %v1018_v36 }
 0x1f0   : > { %v5539_v24 = vpop.f32.mrb[18].mxu1 }
 0x1f1   : > { %2883 = vmatmul.mubr.f32.gmra.mrb[124].mxu1 %v6414_v58  ;;  %v1313_v43 = vpop.f32.mrb[19].mxu1 }
 0x1f2   : > { %1865 = vmatmul.mubr.f32.gmra.mrb[60].mxu0 %v5417_v16  ;;  %2885 = vmatprep.mubr.f32.mxu1 %v6416_v54  ;;  %v6434_v54 = vld [vmem:[#allocation32_spill] sm:$0xff] }
 0x1f3   : > { %1869 = vmatprep.mubr.f32.mxu0 %v1020_v52 }
 0x1f4   : > { %v5544_v11 = vpop.f32.mrb[20].mxu1 }
 0x1f5   : > { %2886 = vmatmul.mubr.f32.gmra.mrb[126].mxu1 %v6418_v42  ;;  %v1318_v27 = vpop.f32.mrb[21].mxu1  ;;  %v6436_v42 = vld [vmem:[#allocation34_spill] sm:$0xff] }
 0x1f6   : > { %1870 = vmatmul.mubr.f32.gmra.mrb[62].mxu0 %v5437_v22  ;;  %2888 = vmatprep.mubr.f32.mxu1 %v6421_v61  ;;  %v1044_v61 = vrot.slane %v5426_v29, 2 }
 0x1f7   : > { %1939 = vmatprep.mubr.f32.mxu0 %v4446_v23 }
 0x1f8   : > { %v5550_v57 = vpop.f32.mrb[22].mxu1 }
 0x1f9   : > { %2889 = vmatmul.mubr.f32.gmra.mrb[128].mxu1 %v6423_v50  ;;  %v1323_v9 = vpop.f32.mrb[23].mxu1  ;;  %v6441_v50 = vld [vmem:[#allocation40_spill] sm:$0xff] }
 0x1fa   : > { %2741 = vmatmul.mubr.msk.f32.vlgmr.msra.gmra.mrb[0].mxu0 %vm4312_vm0, %v6432_v48  ;;  %2891 = vmatprep.mubr.f32.mxu1 %v6425_v44  ;;  %vm6442_vm0 = vnez %v6441_v50  ;;  %v6445_v44 = vld [vmem:[#allocation43_spill] sm:$0xff] }
 0x1fb   : > { %1944 = vmatprep.mubr.f32.mxu0 %v6363_v6  ;;  %v6437_v6 = vld [vmem:[#allocation51_spill] sm:$0xff] }
 0x1fc   : > { %v5558_v16 = vpop.f32.mrb[24].mxu1 }
 0x1fd   : > { %2892 = vmatmul.mubr.f32.gmra.mrb[130].mxu1 %v6427_v49  ;;  %v1328_v7 = vpop.f32.mrb[25].mxu1  ;;  %v1050_v49 = vrot.slane %v5469_v40, 2 }
 0x1fe   : > { %2742 = vmatmul.mubr.msk.f32.gmra.mrb[2].mxu0 %vm4284_vm15, %v6434_v54  ;;  %2894 = vmatprep.mubr.f32.mxu1 %v5153_v14 }
 0x1ff   : > { %1949 = vmatprep.mubr.f32.mxu0 %v6368_v18  ;;  %v1043_v18 = vrot.slane %v5422_v8, 2  ;;  %v1051_v55 = vsel %vm6452_vm1, %v1048_v20, %v1050_v49 }
 0x200   : > { %v5566_v22 = vpop.f32.mrb[26].mxu1 }
 0x201   : > { %2895 = vmatmul.mubr.f32.gmra.mrb[132].mxu1 %v5171_v0  ;;  %v1333_v25 = vpop.f32.mrb[27].mxu1  ;;  %v6439_v0 = vld [vmem:[#allocation53_spill] sm:$0xff] }
 0x202   : > { %2743 = vmatmul.mubr.msk.f32.gmra.mrb[4].mxu0 %vm4284_vm15, %v6436_v42  ;;  %2897 = vmatprep.mubr.f32.mxu1 %v5191_v53 }
 0x203   : > { %1954 = vmatprep.mubr.f32.mxu0 %v6437_v6 }
 0x204   : > { %v5574_v28 = vpop.f32.mrb[28].mxu1 }
 0x205   : > { %2898 = vmatmul.mubr.f32.gmra.mrb[134].mxu1 %v5207_v3  ;;  %v1338_v14 = vpop.f32.mrb[29].mxu1  ;;  %v1046_v3 = vrot.slane %v5443_v47, 2  ;;  %v6449_v47 = vld [vmem:[#allocation60_spill] sm:$0xff] }
 0x206   : > { %2744 = vmatmul.mubr.msk.f32.gmra.mrb[6].mxu0 %vm4284_vm15, %v6438_v31  ;;  %2900 = vmatprep.mubr.f32.mxu1 %v1014_v33  ;;  %vm6444_vm15 = vmmov %vm6431_vm2  ;;  %v6454_v33 = vld [vmem:[#allocation50_spill] sm:$0xff] }
 0x207   : > { %1959 = vmatprep.mubr.f32.mxu0 %v6439_v0  ;;  %v1045_v41 = vsel %vm6444_vm15, %v1043_v18, %v1044_v61  ;;  %v1047_v21 = vsel %vm6448_vm4, %v1044_v61, %v1046_v3  ;;  %v1049_v10 = vsel %vm6450_vm5, %v1046_v3, %v1048_v20 }
 0x208   : > { %v5583_v4 = vpop.f32.mrb[30].mxu1 }
 0x209   : > { %2901 = vmatmul.mubr.f32.gmra.mrb[136].mxu1 %v1016_v12  ;;  %v1343_v53 = vpop.f32.mrb[31].mxu1 }
 0x20a   : > { %2745 = vmatmul.mubr.msk.f32.gmra.mrb[8].mxu0 %vm6442_vm0, %v6440_v60  ;;  %2903 = vmatprep.mubr.f32.mxu1 %v1018_v36 }
 0x20b   : > { %1964 = vmatprep.mubr.f32.mxu0 %v6443_v37 }
 0x20c   : > { %v5592_v8 = vpop.f32.mrb[32].mxu1 }
 0x20d   : > { %2904 = vmatmul.mubr.f32.gmra.mrb[138].mxu1 %v1020_v52  ;;  %v1348_v29 = vpop.f32.mrb[33].mxu1 }
 0x20e   : > { %2746 = vmatmul.mubr.msk.f32.gmra.mrb[10].mxu0 %vm6447_vm10, %v6445_v44  ;;  %2906 = vmatprep.mubr.f32.mxu1 %v1045_v41 }
 0x20f   : > { %1969 = vmatprep.mubr.f32.mxu0 %v6449_v47 }
 0x210   : > { %v5601_v15 = vpop.f32.mrb[34].mxu1 }
 0x211   : > { %2907 = vmatmul.mubr.f32.gmra.mrb[140].mxu1 %v1047_v21  ;;  %v1353_v51 = vpop.f32.mrb[35].mxu1 }
 0x212   : > { %2747 = vmatmul.mubr.msk.f32.gmra.mrb[12].mxu0 %vm6447_vm10, %v6451_v5  ;;  %2909 = vmatprep.mubr.f32.mxu1 %v1049_v10 }
 0x213   : > { %1974 = vmatprep.mubr.f32.mxu0 %v6453_v32 }
 0x214   : > { %v5608_v59 = vpop.f32.mrb[36].mxu1 }
 0x215   : > { %2910 = vmatmul.mubr.f32.gmra.mrb[142].mxu1 %v1051_v55  ;;  %v1358_v40 = vpop.f32.mrb[37].mxu1 }
 0x216   : > { %2748 = vmatmul.mubr.msk.f32.gmra.mrb[14].mxu0 %vm6447_vm10, %v6454_v33 }
 0x218   : > { %v5613_v63 = vpop.f32.mrb[38].mxu1 }
 0x219   : > { %v1363_v1 = vpop.f32.mrb[39].mxu1 }
 0x21c   : > { %v5615_v12 = vpop.f32.mrb[40].mxu1 }
 0x21d   : > { %v1368_v2 = vpop.f32.mrb[41].mxu1 }
 0x220   : > { %v5617_v19 = vpop.f32.mrb[42].mxu1 }
 0x221   : > { %v1373_v36 = vpop.f32.mrb[43].mxu1 }
 0x224   : > { %v5619_v38 = vpop.f32.mrb[44].mxu1 }
 0x225   : > { %v1378_v30 = vpop.f32.mrb[45].mxu1 }
 0x228   : > { %v5621_v52 = vpop.f32.mrb[46].mxu1 }
 0x229   : > { %v1383_v43 = vpop.f32.mrb[47].mxu1 }
 0x22c   : > { %v5623_v27 = vpop.f32.mrb[48].mxu1 }
 0x22d   : > { %v1388_v9 = vpop.f32.mrb[49].mxu1 }
 0x230   : > { %v5625_v48 = vpop.f32.mrb[50].mxu1 }
 0x231   : > { %v1393_v58 = vpop.f32.mrb[51].mxu1 }
 0x234   : > { %v5627_v7 = vpop.f32.mrb[52].mxu1 }
 0x235   : > { %v1398_v54 = vpop.f32.mrb[53].mxu1 }
 0x238   : > { %v5629_v23 = vpop.f32.mrb[54].mxu1 }
 0x239   : > { %v1403_v25 = vpop.f32.mrb[55].mxu1 }
 0x23c   : > { %v5631_v42 = vpop.f32.mrb[56].mxu1 }
 0x23d   : > { %v1408_v6 = vpop.f32.mrb[57].mxu1 }
 0x240   : > { %v5633_v14 = vpop.f32.mrb[58].mxu1 }
 0x241   : > { %v1413_v31 = vpop.f32.mrb[59].mxu1 }
 0x244   : > { %v5635_v0 = vpop.f32.mrb[60].mxu1 }
 0x245   : > { %v1418_v18 = vpop.f32.mrb[61].mxu1 }
 0x248   : > { %v5637_v61 = vpop.f32.mrb[62].mxu1 }
 0x249   : > { %v1423_v53 = vpop.f32.mrb[63].mxu1 }
 0x24c   : > { %v1981_v60 = vpop.f32.mrb[64].mxu1 }
 0x24d   : > { %v1983_v50 = vpop.f32.mrb[65].mxu1 }
 0x250   : > { %v1986_v3 = vpop.f32.mrb[66].mxu1 }
 0x251   : > { %v1988_v37 = vpop.f32.mrb[67].mxu1 }
 0x254   : > { %v1991_v41 = vpop.f32.mrb[68].mxu1 }
 0x255   : > { %v1993_v20 = vpop.f32.mrb[69].mxu1 }
 0x258   : > { %v1996_v29 = vpop.f32.mrb[70].mxu1 }
 0x259   : > { %v1998_v44 = vpop.f32.mrb[71].mxu1 }
 0x25c   : > { %v2001_v56 = vpop.f32.mrb[72].mxu1 }
 0x25d   : > { %v2003_v21 = vpop.f32.mrb[73].mxu1 }
 0x260   : > { %v2006_v49 = vpop.f32.mrb[74].mxu1 }
 0x261   : > { %v2008_v47 = vpop.f32.mrb[75].mxu1 }
 0x264   : > { %v2011_v10 = vpop.f32.mrb[76].mxu1 }
 0x265   : > { %v2013_v51 = vpop.f32.mrb[77].mxu1 }
 0x268   : > { %v2016_v5 = vpop.f32.mrb[78].mxu1 }
 0x269   : > { %v2018_v55 = vpop.f32.mrb[79].mxu1 }
 0x26c   : > { %v2021_v32 = vpop.f32.mrb[80].mxu1 }
 0x26d   : > { %v1756_v40 = vpop.f32.mrb[16].mxu0  ;;  %v2023_v33 = vpop.f32.mrb[81].mxu1 }
 0x26e   : > { %v3176_v1 = vadd.f32 %v1756_v40, %v5533_v13  ;;  %v1758_v2 = vpop.f32.mrb[17].mxu0 }
 0x270   : > { %v5640_v36 = vadd.f32 %v3176_v1, %v1981_v60  ;;  %v2026_v30 = vpop.f32.mrb[82].mxu1 }
 0x271   : > { %v1761_v43 = vpop.f32.mrb[18].mxu0  ;;  %v2028_v9 = vpop.f32.mrb[83].mxu1 }
 0x272   : > { %v3178_v58 = vadd.f32 %v1761_v43, %v5539_v24  ;;  %v1763_v54 = vpop.f32.mrb[19].mxu0 }
 0x274   : > { %v5643_v25 = vadd.f32 %v3178_v58, %v1986_v3  ;;  %v2031_v6 = vpop.f32.mrb[84].mxu1 }
 0x275   : > { %v1766_v31 = vpop.f32.mrb[20].mxu0  ;;  %v2033_v18 = vpop.f32.mrb[85].mxu1 }
 0x276   : > { %v3180_v53 = vadd.f32 %v1766_v31, %v5544_v11  ;;  %v1768_v50 = vpop.f32.mrb[21].mxu0 }
 0x278   : > { %v5646_v37 = vadd.f32 %v3180_v53, %v1991_v41  ;;  %v2036_v13 = vpop.f32.mrb[86].mxu1 }
 0x279   : > { %v1771_v20 = vpop.f32.mrb[22].mxu0  ;;  %v2038_v60 = vpop.f32.mrb[87].mxu1 }
 0x27a   : > { %v3182_v44 = vadd.f32 %v1771_v20, %v5550_v57  ;;  %v1773_v21 = vpop.f32.mrb[23].mxu0 }
 0x27c   : > { %v5649_v47 = vadd.f32 %v3182_v44, %v1996_v29  ;;  %v2041_v24 = vpop.f32.mrb[88].mxu1 }
 0x27d   : > { %v1776_v51 = vpop.f32.mrb[24].mxu0  ;;  %v2043_v3 = vpop.f32.mrb[89].mxu1 }
 0x27e   : > { %v3184_v55 = vadd.f32 %v1776_v51, %v5558_v16  ;;  %v1778_v40 = vpop.f32.mrb[25].mxu0 }
 0x280   : > { %v5652_v33 = vadd.f32 %v3184_v55, %v2001_v56  ;;  %v2046_v11 = vpop.f32.mrb[90].mxu1 }
 0x281   : > { %v1781_v1 = vpop.f32.mrb[26].mxu0  ;;  %v2048_v41 = vpop.f32.mrb[91].mxu1 }
 0x282   : > { %v3186_v2 = vadd.f32 %v1781_v1, %v5566_v22  ;;  %v1783_v43 = vpop.f32.mrb[27].mxu0 }
 0x284   : > { %v5655_v9 = vadd.f32 %v3186_v2, %v2006_v49  ;;  %v2051_v57 = vpop.f32.mrb[92].mxu1 }
 0x285   : > { %v1786_v58 = vpop.f32.mrb[28].mxu0  ;;  %v2053_v29 = vpop.f32.mrb[93].mxu1 }
 0x286   : > { %v3188_v54 = vadd.f32 %v1786_v58, %v5574_v28  ;;  %v1788_v31 = vpop.f32.mrb[29].mxu0 }
 0x288   : > { %v5658_v18 = vadd.f32 %v3188_v54, %v2011_v10  ;;  %v2056_v16 = vpop.f32.mrb[94].mxu1 }
 0x289   : > { %v1791_v53 = vpop.f32.mrb[30].mxu0  ;;  %v2058_v56 = vpop.f32.mrb[95].mxu1 }
 0x28a   : > { %v3190_v50 = vadd.f32 %v1791_v53, %v5583_v4  ;;  %v1793_v20 = vpop.f32.mrb[31].mxu0 }
 0x28c   : > { %v5661_v60 = vadd.f32 %v3190_v50, %v2016_v5  ;;  %v2061_v22 = vpop.f32.mrb[96].mxu1 }
 0x28d   : > { %v1796_v44 = vpop.f32.mrb[32].mxu0  ;;  %v2063_v49 = vpop.f32.mrb[97].mxu1 }
 0x28e   : > { %v3192_v21 = vadd.f32 %v1796_v44, %v5592_v8  ;;  %v1798_v51 = vpop.f32.mrb[33].mxu0 }
 0x290   : > { %v5664_v3 = vadd.f32 %v3192_v21, %v2021_v32  ;;  %v2066_v28 = vpop.f32.mrb[98].mxu1 }
 0x291   : > { %v1801_v55 = vpop.f32.mrb[34].mxu0  ;;  %v2068_v10 = vpop.f32.mrb[99].mxu1 }
 0x292   : > { %v3194_v40 = vadd.f32 %v1801_v55, %v5601_v15  ;;  %v1803_v1 = vpop.f32.mrb[35].mxu0 }
 0x294   : > { %v5667_v41 = vadd.f32 %v3194_v40, %v2026_v30  ;;  %v2071_v4 = vpop.f32.mrb[100].mxu1 }
 0x295   : > { %v1806_v2 = vpop.f32.mrb[36].mxu0  ;;  %v2073_v5 = vpop.f32.mrb[101].mxu1 }
 0x296   : > { %v3196_v43 = vadd.f32 %v1806_v2, %v5608_v59  ;;  %v1808_v58 = vpop.f32.mrb[37].mxu0 }
 0x298   : > { %v5670_v29 = vadd.f32 %v3196_v43, %v2031_v6  ;;  %v2076_v8 = vpop.f32.mrb[102].mxu1 }
 0x299   : > { %v1811_v54 = vpop.f32.mrb[38].mxu0  ;;  %v2078_v32 = vpop.f32.mrb[103].mxu1 }
 0x29a   : > { %v3198_v31 = vadd.f32 %v1811_v54, %v5613_v63  ;;  %v1813_v53 = vpop.f32.mrb[39].mxu0 }
 0x29c   : > { %v5673_v56 = vadd.f32 %v3198_v31, %v2036_v13  ;;  %v2081_v15 = vpop.f32.mrb[104].mxu1 }
 0x29d   : > { %v1816_v50 = vpop.f32.mrb[40].mxu0  ;;  %v2083_v30 = vpop.f32.mrb[105].mxu1 }
 0x29e   : > { %v3200_v20 = vadd.f32 %v1816_v50, %v5615_v12  ;;  %v1818_v44 = vpop.f32.mrb[41].mxu0 }
 0x2a0   : > { %v5676_v49 = vadd.f32 %v3200_v20, %v2041_v24  ;;  %v5678_v59 = vpop.f32.mrb[106].mxu1 }
 0x2a1   : > { %v1821_v6 = vpop.f32.mrb[42].mxu0  ;;  %v2088_v21 = vpop.f32.mrb[107].mxu1 }
 0x2a2   : > { %v3202_v51 = vadd.f32 %v1821_v6, %v5617_v19  ;;  %v1823_v55 = vpop.f32.mrb[43].mxu0 }
 0x2a4   : > { %v5681_v10 = vpop.f32.mrb[108].mxu1  ;;  %v5683_v63 = vadd.f32 %v3202_v51, %v2046_v11 }
 0x2a5   : > { %v1826_v13 = vpop.f32.mrb[44].mxu0  ;;  %v2093_v40 = vpop.f32.mrb[109].mxu1 }
 0x2a6   : > { %v3204_v1 = vadd.f32 %v1826_v13, %v5619_v38  ;;  %v1828_v2 = vpop.f32.mrb[45].mxu0 }
 0x2a8   : > { %v5686_v12 = vpop.f32.mrb[110].mxu1  ;;  %v5688_v24 = vadd.f32 %v3204_v1, %v2051_v57 }
 0x2a9   : > { %v1831_v5 = vpop.f32.mrb[46].mxu0  ;;  %v2098_v43 = vpop.f32.mrb[111].mxu1 }
 0x2aa   : > { %v3206_v58 = vadd.f32 %v1831_v5, %v5621_v52  ;;  %v1833_v54 = vpop.f32.mrb[47].mxu0 }
 0x2ac   : > { %v5691_v19 = vpop.f32.mrb[112].mxu1  ;;  %v5693_v32 = vadd.f32 %v3206_v58, %v2056_v16 }
 0x2ad   : > { %v1836_v11 = vpop.f32.mrb[48].mxu0  ;;  %v5695_v31 = vpop.f32.mrb[113].mxu1 }
 0x2ae   : > { %v3208_v38 = vadd.f32 %v1836_v11, %v5623_v27  ;;  %v1838_v53 = vpop.f32.mrb[49].mxu0 }
 0x2b0   : > { %v5698_v50 = vpop.f32.mrb[114].mxu1  ;;  %v5700_v57 = vadd.f32 %v3208_v38, %v2061_v22 }
 0x2b1   : > { %v1841_v30 = vpop.f32.mrb[50].mxu0  ;;  %v5702_v20 = vpop.f32.mrb[115].mxu1 }
 0x2b2   : > { %v3210_v52 = vadd.f32 %v1841_v30, %v5625_v48  ;;  %v1843_v44 = vpop.f32.mrb[51].mxu0 }
 0x2b4   : > { %v5705_v16 = vpop.f32.mrb[116].mxu1  ;;  %v5707_v6 = vadd.f32 %v3210_v52, %v2066_v28 }
 0x2b5   : > { %v1846_v21 = vpop.f32.mrb[52].mxu0  ;;  %v5709_v51 = vpop.f32.mrb[117].mxu1 }
 0x2b6   : > { %v3212_v27 = vadd.f32 %v1846_v21, %v5627_v7  ;;  %v1848_v55 = vpop.f32.mrb[53].mxu0 }
 0x2b8   : > { %v5713_v22 = vpop.f32.mrb[118].mxu1  ;;  %v5715_v13 = vadd.f32 %v3212_v27, %v2071_v4 }
 0x2b9   : > { %v1851_v40 = vpop.f32.mrb[54].mxu0  ;;  %v5717_v1 = vpop.f32.mrb[119].mxu1 }
 0x2ba   : > { %v3214_v48 = vadd.f32 %v1851_v40, %v5629_v23  ;;  %v1853_v28 = vpop.f32.mrb[55].mxu0 }
 0x2bc   : > { %v2878_v2 = vpop.f32.mrb[120].mxu1  ;;  %v5722_v5 = vadd.f32 %v3214_v48, %v2076_v8 }
 0x2bd   : > { %v1856_v43 = vpop.f32.mrb[56].mxu0  ;;  %v5725_v7 = vadd.f32 %v5643_v25, %v2878_v2  ;;  %v2206_v58 = vpop.f32.mrb[121].mxu1 }
 0x2be   : > { %v3216_v54 = vadd.f32 %v1856_v43, %v5631_v42  ;;  %v1858_v4 = vpop.f32.mrb[57].mxu0  ;;  %v5729_v11 = vadd.f32 %v5640_v36, %v2206_v58 }
 0x2bf   : > { %2334 = vst [vmem:[%s5731_s24 + $0x48] sm:$0xff] %v5725_v7 }
 0x2c0   : > { %2333 = vst [vmem:[%s5731_s24 + $0x40] sm:$0xff] %v5729_v11  ;;  %v2881_v23 = vpop.f32.mrb[122].mxu1  ;;  %v5737_v25 = vadd.f32 %v3216_v54, %v2081_v15 }
 0x2c1   : > { %v1861_v8 = vpop.f32.mrb[58].mxu0  ;;  %v5740_v42 = vadd.f32 %v5649_v47, %v2881_v23  ;;  %v2216_v36 = vpop.f32.mrb[123].mxu1 }
 0x2c2   : > { %v3218_v38 = vadd.f32 %v1861_v8, %v5633_v14  ;;  %v1863_v53 = vpop.f32.mrb[59].mxu0  ;;  %v5744_v30 = vadd.f32 %v5646_v37, %v2216_v36 }
 0x2c3   : > { %2336 = vst [vmem:[%s5731_s24 + $0x58] sm:$0xff] %v5740_v42 }
 0x2c4   : > { %2335 = vst [vmem:[%s5731_s24 + $0x50] sm:$0xff] %v5744_v30  ;;  %v2884_v52 = vpop.f32.mrb[124].mxu1  ;;  %v5751_v15 = vadd.f32 %v3218_v38, %v5678_v59 }
 0x2c5   : > { %v1866_v44 = vpop.f32.mrb[60].mxu0  ;;  %v5754_v47 = vadd.f32 %v5655_v9, %v2884_v52  ;;  %v2226_v21 = vpop.f32.mrb[125].mxu1 }
 0x2c6   : > { %v3220_v14 = vadd.f32 %v1866_v44, %v5635_v0  ;;  %v1868_v27 = vpop.f32.mrb[61].mxu0  ;;  %v5758_v37 = vadd.f32 %v5652_v33, %v2226_v21 }
 0x2c7   : > { %2338 = vst [vmem:[%s5731_s24 + $0x68] sm:$0xff] %v5754_v47 }
 0x2c8   : > { %2337 = vst [vmem:[%s5731_s24 + $0x60] sm:$0xff] %v5758_v37  ;;  %v2887_v55 = vpop.f32.mrb[126].mxu1  ;;  %v5765_v59 = vadd.f32 %v3220_v14, %v5681_v10 }
 0x2c9   : > { %v1871_v40 = vpop.f32.mrb[62].mxu0  ;;  %v5768_v9 = vadd.f32 %v5661_v60, %v2887_v55  ;;  %v2236_v48 = vpop.f32.mrb[127].mxu1 }
 0x2ca   : > { %v3222_v0 = vadd.f32 %v1871_v40, %v5637_v61  ;;  %v1873_v28 = vpop.f32.mrb[63].mxu0  ;;  %v5772_v33 = vadd.f32 %v5658_v18, %v2236_v48 }
 0x2cb   : > { %2340 = vst [vmem:[%s5731_s24 + $0x78] sm:$0xff] %v5768_v9 }
 0x2cc   : > { %2339 = vst [vmem:[%s5731_s24 + $0x70] sm:$0xff] %v5772_v33  ;;  %v2890_v10 = vpop.f32.mrb[128].mxu1  ;;  %v5779_v2 = vadd.f32 %v3222_v0, %v5686_v12 }
 0x2cd   : > { %v1941_v43 = vpop.f32.mrb[0].mxu0  ;;  %v5782_v60 = vadd.f32 %v5667_v41, %v2890_v10  ;;  %v2246_v58 = vpop.f32.mrb[129].mxu1 }
 0x2ce   : > { %v3168_v61 = vadd.f32 %v1941_v43, %v5477_v17  ;;  %v1943_v18 = vpop.f32.mrb[1].mxu0  ;;  %v5786_v54 = vadd.f32 %v5664_v3, %v2246_v58 }
 0x2cf   : > { %2342 = vst [vmem:[%s5731_s24 + $0x88] sm:$0xff] %v5782_v60 }
 0x2d0   : > { %v2167_v4 = vadd.f32 %v3168_v61, %v5695_v31  ;;  %2341 = vst [vmem:[%s5731_s24 + $0x80] sm:$0xff] %v5786_v54  ;;  %v2893_v12 = vpop.f32.mrb[130].mxu1 }
 0x2d1   : > { %v1946_v23 = vpop.f32.mrb[2].mxu0  ;;  %v5794_v41 = vadd.f32 %v5673_v56, %v2893_v12  ;;  %v2256_v8 = vpop.f32.mrb[131].mxu1 }
 0x2d2   : > { %2325 = vst [vmem:[%s5731_s24] sm:$0xff] %v2167_v4  ;;  %v3169_v17 = vadd.f32 %v1946_v23, %v5484_v35  ;;  %v1948_v36 = vpop.f32.mrb[3].mxu0  ;;  %v5799_v3 = vadd.f32 %v5670_v29, %v2256_v8  ;;  %v2394_v53 = vmul.f32 %v2167_v4, %v2167_v4 }
 0x2d3   : > { %2344 = vst [vmem:[%s5731_s24 + $0x98] sm:$0xff] %v5794_v41 }
 0x2d4   : > { %v2172_v31 = vadd.f32 %v3169_v17, %v5691_v19  ;;  %2343 = vst [vmem:[%s5731_s24 + $0x90] sm:$0xff] %v5799_v3  ;;  %v2896_v38 = vpop.f32.mrb[132].mxu1 }
 0x2d5   : > { %v1951_v56 = vpop.f32.mrb[4].mxu0  ;;  %v5807_v52 = vadd.f32 %v5683_v63, %v2896_v38  ;;  %v2266_v35 = vpop.f32.mrb[133].mxu1 }
 0x2d6   : > { %2326 = vst [vmem:[%s5731_s24 + $0x8] sm:$0xff] %v2172_v31  ;;  %v2357_v44 = vadd.f32 %v2172_v31, %v2167_v4  ;;  %v2395_v21 = vmul.f32 %v2172_v31, %v2172_v31  ;;  %v3170_v29 = vadd.f32 %v1951_v56, %v5490_v45  ;;  %v1953_v14 = vpop.f32.mrb[5].mxu0  ;;  %v5812_v19 = vadd.f32 %v5676_v49, %v2266_v35 }
 0x2d7   : > { %2346 = vst [vmem:[%s5731_s24 + $0xa8] sm:$0xff] %v5807_v52 }
 0x2d8   : > { %v2426_v27 = vadd.f32 %v2395_v21, %v2394_v53  ;;  %v2177_v55 = vadd.f32 %v3170_v29, %v5702_v20  ;;  %2345 = vst [vmem:[%s5731_s24 + $0xa0] sm:$0xff] %v5812_v19  ;;  %v2899_v63 = vpop.f32.mrb[134].mxu1 }
 0x2d9   : > { %v1956_v40 = vpop.f32.mrb[6].mxu0  ;;  %v5820_v48 = vadd.f32 %v5693_v32, %v2899_v63  ;;  %v2276_v45 = vpop.f32.mrb[135].mxu1 }
 0x2da   : > { %2327 = vst [vmem:[%s5731_s24 + $0x10] sm:$0xff] %v2177_v55  ;;  %v2358_v0 = vadd.f32 %v2357_v44, %v2177_v55  ;;  %v2396_v28 = vmul.f32 %v2177_v55, %v2177_v55  ;;  %v3171_v49 = vadd.f32 %v1956_v40, %v5497_v39  ;;  %v1958_v10 = vpop.f32.mrb[7].mxu0  ;;  %v5825_v43 = vadd.f32 %v5688_v24, %v2276_v45 }
 0x2db   : > { %2348 = vst [vmem:[%s5731_s24 + $0xb8] sm:$0xff] %v5820_v48 }
 0x2dc   : > { %v2427_v20 = vadd.f32 %v2426_v27, %v2396_v28  ;;  %v2182_v58 = vadd.f32 %v3171_v49, %v5698_v50  ;;  %2347 = vst [vmem:[%s5731_s24 + $0xb0] sm:$0xff] %v5825_v43  ;;  %v2902_v32 = vpop.f32.mrb[136].mxu1 }
 0x2dd   : > { %v1961_v61 = vpop.f32.mrb[8].mxu0  ;;  %v5833_v18 = vadd.f32 %v5707_v6, %v2902_v32  ;;  %v2286_v39 = vpop.f32.mrb[137].mxu1 }
 0x2de   : > { %2328 = vst [vmem:[%s5731_s24 + $0x18] sm:$0xff] %v2182_v58  ;;  %v2359_v4 = vadd.f32 %v2358_v0, %v2182_v58  ;;  %v2397_v12 = vmul.f32 %v2182_v58, %v2182_v58  ;;  %v3172_v24 = vadd.f32 %v1961_v61, %v5503_v34  ;;  %v1963_v23 = vpop.f32.mrb[9].mxu0  ;;  %v5838_v8 = vadd.f32 %v5700_v57, %v2286_v39 }
 0x2df   : > { %2350 = vst [vmem:[%s5731_s24 + $0xc8] sm:$0xff] %v5833_v18 }
 0x2e0   : > { %v2428_v50 = vadd.f32 %v2427_v20, %v2397_v12  ;;  %v2187_v6 = vadd.f32 %v3172_v24, %v5709_v51  ;;  %2349 = vst [vmem:[%s5731_s24 + $0xc0] sm:$0xff] %v5838_v8  ;;  %v2905_v17 = vpop.f32.mrb[138].mxu1 }
 0x2e1   : > { %v1966_v36 = vpop.f32.mrb[10].mxu0  ;;  %v5846_v31 = vadd.f32 %v5722_v5, %v2905_v17  ;;  %v2296_v34 = vpop.f32.mrb[139].mxu1 }
 0x2e2   : > { %2329 = vst [vmem:[%s5731_s24 + $0x20] sm:$0xff] %v2187_v6  ;;  %v2360_v57 = vadd.f32 %v2359_v4, %v2187_v6  ;;  %v2398_v38 = vmul.f32 %v2187_v6, %v2187_v6  ;;  %v3173_v53 = vadd.f32 %v1966_v36, %v5511_v62  ;;  %v1968_v56 = vpop.f32.mrb[11].mxu0  ;;  %v5851_v35 = vadd.f32 %v5715_v13, %v2296_v34 }
 0x2e3   : > { %2352 = vst [vmem:[%s5731_s24 + $0xd8] sm:$0xff] %v5846_v31 }
 0x2e4   : > { %v2429_v51 = vadd.f32 %v2428_v50, %v2398_v38  ;;  %v2192_v5 = vadd.f32 %v3173_v53, %v5705_v16  ;;  %2351 = vst [vmem:[%s5731_s24 + $0xd0] sm:$0xff] %v5851_v35  ;;  %v2908_v44 = vpop.f32.mrb[140].mxu1 }
 0x2e5   : > { %v1971_v21 = vpop.f32.mrb[12].mxu0  ;;  %v5861_v62 = vadd.f32 %v5751_v15, %v2908_v44  ;;  %v2306_v29 = vpop.f32.mrb[141].mxu1 }
 0x2e6   : > { %2330 = vst [vmem:[%s5731_s24 + $0x28] sm:$0xff] %v2192_v5  ;;  %v2361_v13 = vadd.f32 %v2360_v57, %v2192_v5  ;;  %v2399_v14 = vmul.f32 %v2192_v5, %v2192_v5  ;;  %v3174_v27 = vadd.f32 %v1971_v21, %v5519_v26  ;;  %v1973_v55 = vpop.f32.mrb[13].mxu0  ;;  %v5866_v63 = vadd.f32 %v5737_v25, %v2306_v29 }
 0x2e7   : > { %2354 = vst [vmem:[%s5731_s24 + $0xe8] sm:$0xff] %v5861_v62 }
 0x2e8   : > { %v2430_v16 = vadd.f32 %v2429_v51, %v2399_v14  ;;  %v2197_v40 = vadd.f32 %v3174_v27, %v5717_v1  ;;  %2353 = vst [vmem:[%s5731_s24 + $0xe0] sm:$0xff] %v5866_v63  ;;  %v2911_v15 = vpop.f32.mrb[142].mxu1 }
 0x2e9   : > { %v1976_v45 = vpop.f32.mrb[14].mxu0  ;;  %v5875_v26 = vadd.f32 %v5779_v2, %v2911_v15  ;;  %v2316_v0 = vpop.f32.mrb[143].mxu1 }
 0x2ea   : > { %2331 = vst [vmem:[%s5731_s24 + $0x30] sm:$0xff] %v2197_v40  ;;  %v2362_v25 = vadd.f32 %v2361_v13, %v2197_v40  ;;  %v2400_v28 = vmul.f32 %v2197_v40, %v2197_v40  ;;  %v3175_v49 = vadd.f32 %v1976_v45, %v5526_v46  ;;  %v1978_v1 = vpop.f32.mrb[15].mxu0  ;;  %v5880_v10 = vadd.f32 %v5765_v59, %v2316_v0 }
 0x2eb   : > { %2356 = vst [vmem:[%s5731_s24 + $0xf8] sm:$0xff] %v5875_v26 }
 0x2ec   : > { %v2431_v2 = vadd.f32 %v2430_v16, %v2400_v28  ;;  %v2202_v20 = vadd.f32 %v3175_v49, %v5713_v22  ;;  %2355 = vst [vmem:[%s5731_s24 + $0xf0] sm:$0xff] %v5880_v10 }
 0x2ee   : > { %2332 = vst [vmem:[%s5731_s24 + $0x38] sm:$0xff] %v2202_v20  ;;  %v2363_v46 = vadd.f32 %v2362_v25, %v2202_v20  ;;  %v2401_v59 = vmul.f32 %v2202_v20, %v2202_v20 }
 0x2ef   : > { %3579 = shalt.err (!%p3576_p1)
}
 0x2f0   : > { %s3580_s8 = scalar_lea.hbm %s5892_s3, 4096  ;;  %s3584_s21 = scalar_lea.hbm %s6458_s2, 32768 }
 0x2f1   : > { %p3581_p3 = scmp.ne.s32.totalorder %s5892_s3, %s3580_s8  ;;  %p3585_p5 = scmp.lt.u32.totalorder %s5892_s3, %s6458_s2 }
 0x2f2   : > { %p3586_p7 = scmp.lt.u32.totalorder %s3584_s21, %s3580_s8  ;;  %p3588_p11 = scmp.lt.u32.totalorder %s3580_s8, %s5892_s3 }
 0x2f3   : > { %p3582_p4 = pnand %p3581_p3, %p6459_p6 }
 0x2f4   : > { %p3587_p2 = por %p3586_p7, %p3585_p5 }
 0x2f5   : > { %p3583_p9 = pneg %p3582_p4 }
 0x2f6   : > { %p3589_p12 = por %p3588_p11, %p3587_p2 }
 0x2f8   : > { %p3590_p0 = pnand %p3589_p12, %p3583_p9 }
 0x2fa   : > { %3593 = shalt.err (!%p3590_p0)
}
 0x2fb   : > { %s3738_s4 = smov 128   ;;  %s3739_s6 = smov 8   ;;  %v2402_v22 = vmul.f32 %v5729_v11, %v5729_v11  ;;  %v2364_v58 = vadd.f32 %v2363_v46, %v5729_v11  ;;  %v2432_v32 = vadd.f32 %v2431_v2, %v2401_v59  ;;  %v2403_v61 = vmul.f32 %v5725_v7, %v5725_v7 }
 0x2fc   : > { %3321 = dma.vmem_to_hbm [thread:$0]  (%p6459_p6), %s5884_s14, 4096, %s5892_s3, %s5897_s10, %s3738_s4, %s3738_s4, %s3739_s6   ;;  %v2404_v12 = vmul.f32 %v5744_v30, %v5744_v30  ;;  %v2405_v50 = vmul.f32 %v5740_v42, %v5740_v42  ;;  %v2406_v11 = vmul.f32 %v5758_v37, %v5758_v37  ;;  %vm2463_vm9 = vcmask 1040384  }
 0x2fd   : > { %v2365_v39 = vadd.f32 %v2364_v58, %v5725_v7  ;;  %v2433_v4 = vadd.f32 %v2432_v32, %v2402_v22  ;;  %v2407_v7 = vmul.f32 %v5754_v47, %v5754_v47  ;;  %s2673_s14 = sshll.u32 %s4024_s18, 1  ;;  %s2779_s5 = sshll.u32 %s6456_s19, 2 }
 0x2fe   : > { %s2499_s3 = sadd.s32 %s6234_s1, %s2779_s5  ;;  %s317_s29 = scalar_lea.vmem [#allocation11], %s2673_s14 }
 0x2ff   : > { %v2366_v24 = vadd.f32 %v2365_v39, %v5744_v30  ;;  %v2434_v23 = vadd.f32 %v2433_v4, %v2403_v61  ;;  %v2408_v30 = vmul.f32 %v5772_v33, %v5772_v33  ;;  %s2780_s10 = sshll.u32 %s2499_s3, 5  ;;  %s2506_s30 = sshll.u32 %s317_s29, 4  ;;  %s6001_s30 = int_to_ptr.vmem [resolvable:$true] %s2506_s30 }
 0x300   : > { %s6460_s12 = sld [smem:[#allocation95_spill]]  ;;  %s2472_s1 = scalar_lea.sflag [#allocation12], %s4024_s18 }
 0x301   : > { %v2367_v6 = vadd.f32 %v2366_v24, %v5740_v42  ;;  %v2435_v17 = vadd.f32 %v2434_v23, %v2404_v12  ;;  %v2409_v42 = vmul.f32 %v5768_v9, %v5768_v9  ;;  %s3594_s19 = scalar_lea.vmem %s6001_s30, 32  ;;  %s3740_s21 = smov [#allocation11]  }
 0x302   : > { %p3595_p6 = scmp.ne.s32.totalorder %s6001_s30, %s3594_s19  ;;  %s3598_s17 = sshll.u32 %s3740_s21, 4  ;;  %s3599_s17 = int_to_ptr.vmem [resolvable:$false] %s3598_s17 }
 0x303   : > { %v2368_v36 = vadd.f32 %v2367_v6, %v5758_v37  ;;  %v2436_v34 = vadd.f32 %v2435_v17, %v2405_v50  ;;  %v2410_v37 = vmul.f32 %v5786_v54, %v5786_v54  ;;  %v2425_v50 = vmul.f32 %v5875_v26, %v5875_v26  ;;  %s3600_s7 = scalar_lea.vmem %s3599_s17, 64  ;;  %p3601_p1 = scmp.lt.s32.totalorder %s6001_s30, %s3599_s17 }
 0x304   : > { %p3596_p8 = pnand %p3595_p6, %p3961_p10  ;;  %p3602_p3 = scmp.lt.s32.totalorder %s3600_s7, %s3594_s19 }
 0x305   : > { %v2369_v57 = vadd.f32 %v2368_v36, %v5754_v47  ;;  %v2437_v38 = vadd.f32 %v2436_v34, %v2406_v11  ;;  %v2411_v47 = vmul.f32 %v5782_v60, %v5782_v60 }
 0x306   : > { %s5999_s24 = scalar_lea.hbm %s6460_s12, %s2780_s10  ;;  %p3597_p13 = pneg %p3596_p8 }
 0x307   : > { %v2370_v53 = vadd.f32 %v2369_v57, %v5772_v33  ;;  %v2438_v56 = vadd.f32 %v2437_v38, %v2407_v7  ;;  %v2412_v33 = vmul.f32 %v5799_v3, %v5799_v3  ;;  %p3603_p4 = por %p3602_p3, %p3601_p1 }
 0x309   : > { %v2371_v51 = vadd.f32 %v2370_v53, %v5768_v9  ;;  %v2439_v5 = vadd.f32 %v2438_v56, %v2408_v30  ;;  %v2413_v9 = vmul.f32 %v5794_v41, %v5794_v41  ;;  %p3604_p9 = pnand %p3603_p4, %p3597_p13 }
 0x30b   : > { %v2372_v44 = vadd.f32 %v2371_v51, %v5786_v54  ;;  %v2440_v21 = vadd.f32 %v2439_v5, %v2409_v42  ;;  %v2414_v54 = vmul.f32 %v5812_v19, %v5812_v19 }
 0x30d   : > { %v2373_v29 = vadd.f32 %v2372_v44, %v5782_v60  ;;  %v2441_v13 = vadd.f32 %v2440_v21, %v2410_v37  ;;  %v2415_v60 = vmul.f32 %v5807_v52, %v5807_v52 }
 0x30f   : > { %v2442_v14 = vadd.f32 %v2441_v13, %v2411_v47  ;;  %v2374_v27 = vadd.f32 %v2373_v29, %v5799_v3  ;;  %v2416_v3 = vmul.f32 %v5825_v43, %v5825_v43 }
 0x311   : > { %v2375_v55 = vadd.f32 %v2374_v27, %v5794_v41  ;;  %v2443_v16 = vadd.f32 %v2442_v14, %v2412_v33  ;;  %v2417_v41 = vmul.f32 %v5820_v48, %v5820_v48 }
 0x313   : > { %v2376_v40 = vadd.f32 %v2375_v55, %v5812_v19  ;;  %v2444_v15 = vadd.f32 %v2443_v16, %v2413_v9  ;;  %v2418_v19 = vmul.f32 %v5838_v8, %v5838_v8 }
 0x315   : > { %v2377_v45 = vadd.f32 %v2376_v40, %v5807_v52  ;;  %v2445_v0 = vadd.f32 %v2444_v15, %v2414_v54  ;;  %v2419_v52 = vmul.f32 %v5833_v18, %v5833_v18 }
 0x317   : > { %v2378_v25 = vadd.f32 %v2377_v45, %v5825_v43  ;;  %v2446_v28 = vadd.f32 %v2445_v0, %v2415_v60  ;;  %v2420_v43 = vmul.f32 %v5851_v35, %v5851_v35 }
 0x319   : > { %v2379_v49 = vadd.f32 %v2378_v25, %v5820_v48  ;;  %v2447_v1 = vadd.f32 %v2446_v28, %v2416_v3  ;;  %v2421_v48 = vmul.f32 %v5846_v31, %v5846_v31 }
 0x31b   : > { %v2380_v2 = vadd.f32 %v2379_v49, %v5838_v8  ;;  %v2448_v20 = vadd.f32 %v2447_v1, %v2417_v41  ;;  %v2422_v8 = vmul.f32 %v5866_v63, %v5866_v63 }
 0x31d   : > { %v2381_v46 = vadd.f32 %v2380_v2, %v5833_v18  ;;  %v2449_v59 = vadd.f32 %v2448_v20, %v2418_v19  ;;  %v2423_v18 = vmul.f32 %v5861_v62, %v5861_v62 }
 0x31f   : > { %v2382_v22 = vadd.f32 %v2381_v46, %v5851_v35  ;;  %v2450_v58 = vadd.f32 %v2449_v59, %v2419_v52 }
 0x321   : > { %v2383_v32 = vadd.f32 %v2382_v22, %v5846_v31  ;;  %v2451_v61 = vadd.f32 %v2450_v58, %v2420_v43  ;;  %v2424_v31 = vmul.f32 %v5880_v10, %v5880_v10 }
 0x323   : > { %v2384_v39 = vadd.f32 %v2383_v32, %v5866_v63  ;;  %v2452_v4 = vadd.f32 %v2451_v61, %v2421_v48 }
 0x325   : > { %v2385_v35 = vadd.f32 %v2384_v39, %v5861_v62  ;;  %v2453_v12 = vadd.f32 %v2452_v4, %v2422_v8 }
 0x327   : > { %v2386_v24 = vadd.f32 %v2385_v35, %v5880_v10  ;;  %v2454_v23 = vadd.f32 %v2453_v12, %v2423_v18 }
 0x329   : > { %v2387_v63 = vadd.f32 %v2386_v24, %v5875_v26  ;;  %v2455_v6 = vadd.f32 %v2454_v23, %v2424_v31 }
 0x32b   : > { %v2388_v17 = vrot.slane %v2387_v63, 4  ;;  %v2456_v11 = vadd.f32 %v2455_v6, %v2425_v50 }
 0x32d   : > { %v2389_v36 = vadd.f32 %v2388_v17, %v2387_v63  ;;  %v2457_v34 = vrot.slane %v2456_v11, 4 }
 0x32f   : > { %v2390_v7 = vrot.slane %v2389_v36, 2  ;;  %v2458_v62 = vadd.f32 %v2457_v34, %v2456_v11 }
 0x331   : > { %v2391_v57 = vadd.f32 %v2390_v7, %v2389_v36  ;;  %v2459_v38 = vrot.slane %v2458_v62, 2 }
 0x333   : > { %v2392_v10 = vrot.slane %v2391_v57, 1  ;;  %v2460_v30 = vadd.f32 %v2459_v38, %v2458_v62 }
 0x335   : > { %v2461_v53 = vrot.slane %v2460_v30, 1  ;;  %v2393_v26 = vadd.f32 %v2392_v10, %v2391_v57 }
 0x337   : > { %v2462_v56 = vadd.f32 %v2461_v53, %v2460_v30 }
 0x339   : > { %v2464_v42 = vsel %vm2463_vm9, %v2393_v26, %v2462_v56 }
 0x33a   : > { %2465 = vst [vmem:[%s317_s29] sm:$0x3] %v2464_v42 }
 0x33b   : > { %3607 = shalt.err (!%p3604_p9)
}
 0x33c   : > { %s3608_s18 = scalar_lea.hbm %s5999_s24, 32  ;;  %s3612_s14 = scalar_lea.hbm %s6460_s12, 256 }
 0x33d   : > { %p3609_p5 = scmp.ne.s32.totalorder %s5999_s24, %s3608_s18  ;;  %p3613_p11 = scmp.lt.u32.totalorder %s5999_s24, %s6460_s12 }
 0x33e   : > { %p3614_p12 = scmp.lt.u32.totalorder %s3612_s14, %s3608_s18  ;;  %p3616_p6 = scmp.lt.u32.totalorder %s3608_s18, %s5999_s24 }
 0x33f   : > { %p3610_p7 = pnand %p3609_p5, %p3961_p10 }
 0x340   : > { %p3615_p0 = por %p3614_p12, %p3613_p11 }
 0x341   : > { %p3611_p2 = pneg %p3610_p7 }
 0x342   : > { %p3617_p8 = por %p3616_p6, %p3615_p0 }
 0x344   : > { %p3618_p13 = pnand %p3617_p8, %p3611_p2 }
 0x346   : > { %3621 = shalt.err (!%p3618_p13)
}
 0x347   : > { %3322 = dma.vmem_to_hbm [thread:$0]  (%p3961_p10), %s6001_s30, 32, %s5999_s24, %s2472_s1  }
 0x348 PF: > { %s6461_s10 = sld [smem:[#allocation18_spill]]  ;;  %s6462_s29 = sld [smem:[#allocation24_spill]] }
 0x349   : > { %p3353_p1 = scmp.ge.s32.totalorder %s3728_s28, 2 }
 0x34e   : > { %s2518_s16 = sand.u32 1, %s6461_s10   ;;  %p6463_p3 = scmp.ne.s32.totalorder %s6462_s29, 0 }
 0x34f   : > { %s2519_s8 = scalar_lea.sflag [#allocation4], %s2518_s16 }
 0x350   : > { %p3340_p4 = pnand %p3353_p1, %p6463_p3 }
 0x352   : > { %3679 = dma.done.wait (!%p3340_p4), %s2519_s8, 4096  }
 0x353   : > { %3681 = vsyncadd (!%p3340_p4), %s2519_s8, 4294963200  ;;  %s6464_s19 = sld [smem:[#allocation20_spill]]  ;;  %s6465_s21 = sld [smem:[#allocation25_spill]] }
 0x359   : > { %s2527_s17 = sand.u32 1, %s6464_s19   ;;  %p6466_p9 = scmp.ne.s32.totalorder %s6465_s21, 0 }
 0x35a   : > { %s2528_s11 = scalar_lea.sflag [#allocation12], %s2527_s17 }
 0x35b   : > { %p3343_p5 = pnand %p3353_p1, %p6466_p9 }
 0x35d   : > { %3683 = dma.done.wait (!%p3343_p5), %s2528_s11, 32  }
 0x35e   : > { %3685 = vsyncadd (!%p3343_p5), %s2528_s11, 4294967264  ;;  %s27_s28 = sadd.s32 1, %s3728_s28   ;;  %s6467_s18 = sld [smem:[#allocation19_spill]] }
 0x35f   : > { %p24_p10 = scmp.ge.s32.totalorder %s27_s28, 10   ;;  %s6468_s19 = smov %s3696_s20 }
 0x360   : > { %s6469_s20 = smov %s3971_s25  ;;  %s6470_s21 = smov %s3704_s22 }
 0x361   : > { %s6471_s22 = smov %s3708_s23  ;;  %s6472_s23 = smov %s3974_s9 }
 0x362   : > { %s6473_s24 = smov %s3720_s26  ;;  %s6474_s25 = smov %s3724_s27 }
 0x363   : > { %s6475_s26 = smov %s6478_s13  ;;  %s6476_s27 = smov %s6482_s15 }
 0x364   :  { %26 = sbr.rel (!%p24_p10) target bundleno = 19 (0x13), region = 110 }
 0x36b   :  { %2533 = vsyncpa [#allocation3], 1 }
 0x36c   :  { %2535 = vsyncpa [#allocation3 + $0x1], 1 }
 0x36d   :  { %2536 = vsyncpa [#allocation6], 1 }
 0x36e   :  { %2537 = vsyncpa [#allocation9], 1 }
 0x36f   :  { %2538 = vsyncpa [#allocation4], 1 }
 0x370   :  { %2540 = vsyncpa [#allocation4 + $0x1], 1 }
 0x371   :  { %2541 = vsyncpa [#allocation12], 1 }
 0x372   :  { %2543 = vsyncpa [#allocation12 + $0x1], 1 }

// kernel: basic_block.5
= control target key start
LH: loop header
LB: loop body
LE: loop exit
PB: predicated region body
PF: predicated region fallthrough
CT: control target
= control target key end

     0   :  { %s1612_s0 = inlined_call_operand.hbm [shape: f32[2,32,32,128], index: 0, kind: input, shape index: {}]   ;;  %s1613_s1 = inlined_call_operand.hbm [shape: f32[2,32,32,128], index: 1, kind: input, shape index: {}]   ;;  %s1614_s2 = inlined_call_operand.hbm [shape: f32[1,128], index: 2, kind: input, shape index: {}]   ;;  %s1615_s3 = inlined_call_operand.hbm [shape: f32[1,128], index: 3, kind: input, shape index: {}]   ;;  %s1616_s4 = inlined_call_operand.hbm [shape: f32[2,32,32,128], index: 4, kind: output, shape index: {}]  }
   0x1   :  { %1627 = sst [smem:[#allocation20_spill]] %s1612_s0 }
   0x2   :  { %1628 = sst [smem:[#allocation21_spill]] %s1614_s2 }
   0x3   :  { %1629 = sst [smem:[#allocation22_spill]] %s1615_s3 }
   0x4   :  { %9 = vsyncpa [#allocation3], 0 }
   0x5   :  { %11 = vsyncpa [#allocation3 + $0x1], 0 }
   0x6   :  { %12 = vsyncpa [#allocation6], 0 }
   0x7   :  { %14 = vsyncpa [#allocation6 + $0x1], 0 }
   0x8   :  { %15 = vsyncpa [#allocation9], 0 }
   0x9   :  { %16 = vsyncpa [#allocation4], 0 }
   0xa   :  { %18 = vsyncpa [#allocation4 + $0x1], 0  ;;  %s1102_s15 = smov 0   ;;  %s1104_s16 = smov 0  }
   0xb   :  { %s1106_s17 = smov 0   ;;  %s1108_s18 = smov 0  }
   0xc   :  { %s1110_s19 = smov 0   ;;  %s1112_s20 = smov 0  }
   0xd   :  { %s1114_s21 = smov 0   ;;  %s1116_s22 = smov 0  }
   0xe LB: > { %1630 = sst [smem:[#allocation16_spill]] %s1058_s20  ;;  %s1143_s23 = sadd.s32 4294967295, %s1066_s22   ;;  %s1066_s22 = sphi %s1116_s22, %s24_s22   ;;  %s1062_s21 = sphi %s1114_s21, %s1663_s21   ;;  %s1058_s20 = sphi %s1112_s20, %s1657_s20   ;;  %s1054_s19 = sphi %s1110_s19, %s1662_s19   ;;  %s1050_s18 = sphi %s1108_s18, %s1656_s18   ;;  %s1046_s17 = sphi %s1106_s17, %s1661_s17   ;;  %s1042_s16 = sphi %s1104_s16, %s1660_s16   ;;  %s1038_s15 = sphi %s1102_s15, %s1659_s15  }
   0xf   : > { %s699_s24 = sadd.s32 4294967294, %s1066_s22   ;;  %p52_p0 = scmp.ne.s32.totalorder %s1046_s17, %s1042_s16 }
  0x10   : > { %p53_p1 = scmp.eq.s32.totalorder %s1066_s22, 0  ;;  %p58_p2 = scmp.ne.s32.totalorder %s1042_s16, %s1038_s15 }
  0x11   : > { %p1617_p3 = scmp.eq.s32.totalorder %s1143_s23, 0  ;;  %p154_p4 = scmp.eq.s32.totalorder %s1143_s23, 7 }
  0x12   : > { %p1154_p5 = por %p53_p1, %p52_p0  ;;  %p160_p6 = scmp.eq.s32.totalorder %s699_s24, 7 }
  0x13   : > { %p1160_p7 = por %p1617_p3, %p58_p2  ;;  %p1164_p8 = por %p154_p4, %p52_p0 }
  0x14   : > { %p1168_p9 = por %p160_p6, %p58_p2  ;;  %p700_p10 = scmp.ge.s32.totalorder %s1066_s22, 1 }
  0x15   : > { %s1632_s27 = scalar_select %p1160_p7, 1, 0 }
  0x16   : > { %s1633_s28 = scalar_select %p1164_p8, 1, 0 }
  0x17   : > { %s1634_s29 = scalar_select %p1168_p9, 1, 0 }
  0x18   : > { %p167_p11 = scmp.lt.s32.totalorder %s1066_s22, 9  ;;  %s1068_s5 = smov [#allocation7]  }
  0x19   : > { %1635 = sst [smem:[#allocation17_spill]] %s1634_s29  ;;  %s180_s6 = sshll.u32 %s1068_s5, 4  ;;  %s181_s6 = int_to_ptr.vmem [resolvable:$true] %s180_s6 }
  0x1a   : > { %p1174_p12 = pnand %p700_p10, %p167_p11  ;;  %p766_p13 = scmp.lt.s32.totalorder %s1066_s22, 8 }
  0x1b   : > { %s1069_s8 = smov [#allocation8]   ;;  %s1639_s2 = sld [smem:[#allocation21_spill]] }
  0x1c   : > { %s1636_s30 = scalar_select %p1174_p12, 1, 0 }
  0x1d   : > { %p746_p0 = pneg %p1174_p12  ;;  %p1183_p1 = pnand %p766_p13, %p1154_p5 }
  0x1e   : > { %s191_s9 = sshll.u32 %s1069_s8, 4  ;;  %s1193_s9 = int_to_ptr.vmem [resolvable:$true] %s191_s9 }
  0x1f   : > { %s1637_s7 = scalar_select %p1183_p1, 1, 0 }
  0x20   : > { %p1189_p2 = pnand %p746_p0, %p1617_p3 }
  0x21   : > { %s840_s13 = scalar_lea.hbm %s1639_s2, 16 }
  0x22   : > { %p841_p4 = scmp.ne.s32.totalorder %s1639_s2, %s840_s13  ;;  %p842_p5 = pneg %p1189_p2 }
  0x23   : > { %p847_p11 = scmp.lt.u32.totalorder %s840_s13, %s1639_s2 }
  0x24   : > { %p843_p6 = pnand %p842_p5, %p841_p4 }
  0x26   : > { %p844_p10 = pneg %p843_p6 }
  0x28   : > { %p849_p13 = pnand %p847_p11, %p844_p10 }
  0x2a   : > { %852 = shalt.err (!%p849_p13)
}
  0x2b   : > { %s853_s8 = scalar_lea.vmem %s181_s6, 16  ;;  %s860_s11 = scalar_lea.vmem %s181_s6, 32 }
  0x2c   : > { %p854_p0 = scmp.ne.s32.totalorder %s181_s6, %s853_s8  ;;  %p861_p8 = scmp.lt.s32.totalorder %s181_s6, %s181_s6 }
  0x2d   : > { %p862_p7 = scmp.lt.s32.totalorder %s860_s11, %s853_s8 }
  0x2e   : > { %p856_p3 = pnand %p854_p0, %p842_p5 }
  0x2f   : > { %p863_p12 = por %p862_p7, %p861_p8 }
  0x30   : > { %p857_p9 = pneg %p856_p3 }
  0x32   : > { %p864_p1 = pnand %p863_p12, %p857_p9 }
  0x34   : > { %867 = shalt.err (!%p864_p1)
}
  0x35   : > { %749 = dma.hbm_to_vmem [thread:$0]  (!%p1189_p2), %s1639_s2, 16, %s181_s6, [#allocation6]  }
  0x36   : > { %s1640_s3 = sld [smem:[#allocation22_spill]] }
  0x3c   : > { %s868_s26 = scalar_lea.hbm %s1640_s3, 16 }
  0x3d   : > { %p869_p3 = scmp.ne.s32.totalorder %s1640_s3, %s868_s26  ;;  %p875_p9 = scmp.lt.u32.totalorder %s868_s26, %s1640_s3 }
  0x3f   : > { %p871_p7 = pnand %p869_p3, %p842_p5 }
  0x41   : > { %p872_p8 = pneg %p871_p7 }
  0x43   : > { %p877_p12 = pnand %p875_p9, %p872_p8 }
  0x45   : > { %880 = shalt.err (!%p877_p12)
}
  0x46   : > { %s881_s6 = scalar_lea.vmem %s1193_s9, 16  ;;  %s888_s25 = scalar_lea.vmem %s1193_s9, 32 }
  0x47   : > { %p882_p1 = scmp.ne.s32.totalorder %s1193_s9, %s881_s6  ;;  %p889_p10 = scmp.lt.s32.totalorder %s1193_s9, %s1193_s9 }
  0x48   : > { %p890_p11 = scmp.lt.s32.totalorder %s888_s25, %s881_s6 }
  0x49   : > { %p884_p4 = pnand %p882_p1, %p842_p5 }
  0x4a   : > { %p891_p13 = por %p890_p11, %p889_p10 }
  0x4b   : > { %p885_p6 = pneg %p884_p4 }
  0x4d   : > { %p892_p0 = pnand %p891_p13, %p885_p6 }
  0x4f   : > { %895 = shalt.err (!%p892_p0)
}
  0x50   : > { %752 = dma.hbm_to_vmem [thread:$0]  (!%p1189_p2), %s1640_s3, 16, %s1193_s9, [#allocation9]  }
  0x51   : > { %s33_s13 = sadd.s32 1, %s1058_s20  ;;  %s36_s24 = sadd.s32 1, %s1062_s21 }
  0x52   : > { %p34_p5 = scmp.ge.s32.totalorder %s33_s13, 4  ;;  %s202_s26 = sand.u32 1, %s1046_s17  }
  0x53   : > { %s1246_s5 = sshll.u32 %s202_s26, 8  ;;  %s729_s8 = sshll.u32 %s1058_s20, 5 }
  0x54   : > { %s1665_s13 = smov (%p34_p5, %s33_s13), 0  ;;  %s1667_s24 = smov (!%p34_p5, %s36_s24), %s1062_s21 }
  0x55   : > { %1641 = sst [smem:[#allocation18_spill]] %s1665_s13  ;;  %s41_s10 = ssub.s32 %s1058_s20, %s1665_s13 }
  0x56   : > { %p38_p3 = scmp.ge.s32.totalorder %s1667_s24, 2  ;;  %s707_s11 = sshll.u32 %s1062_s21, 7 }
  0x57   : > { %s206_s9 = scalar_lea.vmem [#allocation2], %s1246_s5  ;;  %s1258_s25 = sadd.s32 %s729_s8, %s707_s11 }
  0x58   : > { %s216_s6 = sshll.u32 %s206_s9, 4  ;;  %s1669_s24 = smov (%p38_p3, %s1667_s24), 0  ;;  %s1260_s6 = int_to_ptr.vmem [resolvable:$true] %s216_s6 }
  0x59   : > { %1642 = sst [smem:[#allocation19_spill]] %s1669_s24  ;;  %s40_s12 = ssub.s32 %s1062_s21, %s1669_s24 }
  0x5a   : > { %s1625_s14 = sshll.u32 %s1258_s25, 7  ;;  %s42_s2 = sor.u32 %s41_s10, %s40_s12 }
  0x5b   : > { %s1643_s0 = sld [smem:[#allocation20_spill]]  ;;  %p43_p2 = scmp.eq.s32.totalorder %s42_s2, 0 }
  0x5c   : > { %s1644_s8 = sadd.s32 1, %s1046_s17  ;;  %s1277_s9 = scalar_lea.sflag [#allocation3], %s202_s26 }
  0x5d   : > { %s1275_s11 = scalar_select %p43_p2, %s1046_s17, %s1644_s8  }
  0x5e   : > { %p1645_p8 = scmp.ne.s32.totalorder %s1637_s7, 0 }
  0x60   : > { %p898_p9 = pneg %p1645_p8 }
  0x61   : > { %s1270_s20 = scalar_lea.hbm %s1643_s0, %s1625_s14  ;;  %s901_s10 = scalar_lea.hbm %s1643_s0, 32768 }
  0x62   : > { %s896_s29 = scalar_lea.hbm %s1270_s20, 4096  ;;  %p902_p4 = scmp.lt.u32.totalorder %s1270_s20, %s1643_s0 }
  0x63   : > { %p897_p7 = scmp.ne.s32.totalorder %s1270_s20, %s896_s29  ;;  %p903_p6 = scmp.lt.u32.totalorder %s901_s10, %s896_s29 }
  0x64   : > { %p905_p11 = scmp.lt.u32.totalorder %s896_s29, %s1270_s20 }
  0x65   : > { %p899_p12 = pnand %p898_p9, %p897_p7  ;;  %p904_p10 = por %p903_p6, %p902_p4 }
  0x67   : > { %p900_p1 = pneg %p899_p12  ;;  %p906_p13 = por %p905_p11, %p904_p10 }
  0x69   : > { %p907_p0 = pnand %p906_p13, %p900_p1 }
  0x6b   : > { %910 = shalt.err (!%p907_p0)
}
  0x6c   : > { %s911_s2 = scalar_lea.vmem %s1260_s6, 4096  ;;  %s1070_s26 = smov [#allocation2]  }
  0x6d   : > { %p912_p5 = scmp.ne.s32.totalorder %s1260_s6, %s911_s2  ;;  %s916_s8 = sshll.u32 %s1070_s26, 4  ;;  %s917_s8 = int_to_ptr.vmem [resolvable:$false] %s916_s8 }
  0x6e   : > { %s918_s14 = scalar_lea.vmem %s917_s8, 8192  ;;  %p919_p7 = scmp.lt.s32.totalorder %s1260_s6, %s917_s8 }
  0x6f   : > { %p914_p3 = pnand %p912_p5, %p898_p9  ;;  %p920_p12 = scmp.lt.s32.totalorder %s918_s14, %s911_s2 }
  0x71   : > { %p915_p2 = pneg %p914_p3  ;;  %p921_p4 = por %p920_p12, %p919_p7 }
  0x73   : > { %p922_p6 = pnand %p921_p4, %p915_p2 }
  0x75   : > { %925 = shalt.err (!%p922_p6)
}
  0x76   : > { %s1071_s29 = smov 128   ;;  %s1072_s3 = smov 8  }
  0x77   : > { %756 = dma.hbm_to_vmem [thread:$0]  (!%p1645_p8), %s1270_s20, 4096, %s1260_s6, %s1277_s9, %s1071_s29, %s1071_s29, %s1072_s3  }
  0x78   : > { %s1646_s13 = sshll.u32 %s1258_s25, 7  ;;  %s230_s26 = scalar_lea.vmem [#allocation5], %s1246_s5 }
  0x79   : > { %s1313_s2 = scalar_lea.hbm %s1613_s1, %s1646_s13  ;;  %s240_s8 = sshll.u32 %s230_s26, 4  ;;  %s1316_s8 = int_to_ptr.vmem [resolvable:$true] %s240_s8 }
  0x7a   : > { %s226_s14 = sand.u32 1, %s1066_s22   ;;  %s926_s24 = scalar_lea.hbm %s1313_s2, 4096 }
  0x7b   : > { %s1319_s0 = scalar_lea.sflag [#allocation6], %s226_s14  ;;  %p927_p1 = scmp.ne.s32.totalorder %s1313_s2, %s926_s24 }
  0x7c   : > { %s931_s25 = scalar_lea.hbm %s1613_s1, 32768  ;;  %p932_p13 = scmp.lt.u32.totalorder %s1313_s2, %s1613_s1 }
  0x7d   : > { %p929_p10 = pnand %p927_p1, %p898_p9  ;;  %p933_p0 = scmp.lt.u32.totalorder %s931_s25, %s926_s24 }
  0x7e   : > { %p935_p3 = scmp.lt.u32.totalorder %s926_s24, %s1313_s2 }
  0x7f   : > { %p930_p11 = pneg %p929_p10  ;;  %p934_p5 = por %p933_p0, %p932_p13 }
  0x81   : > { %p936_p2 = por %p935_p3, %p934_p5 }
  0x83   : > { %p937_p7 = pnand %p936_p2, %p930_p11 }
  0x85   : > { %940 = shalt.err (!%p937_p7)
}
  0x86   : > { %s941_s5 = scalar_lea.vmem %s1316_s8, 4096  ;;  %s1073_s10 = smov [#allocation5]  }
  0x87   : > { %p942_p12 = scmp.ne.s32.totalorder %s1316_s8, %s941_s5  ;;  %s946_s12 = sshll.u32 %s1073_s10, 4  ;;  %s947_s12 = int_to_ptr.vmem [resolvable:$false] %s946_s12 }
  0x88   : > { %s948_s26 = scalar_lea.vmem %s947_s12, 8192  ;;  %p949_p1 = scmp.lt.s32.totalorder %s1316_s8, %s947_s12 }
  0x89   : > { %p944_p4 = pnand %p942_p12, %p898_p9  ;;  %p950_p10 = scmp.lt.s32.totalorder %s948_s26, %s941_s5 }
  0x8b   : > { %p945_p6 = pneg %p944_p4  ;;  %p951_p13 = por %p950_p10, %p949_p1 }
  0x8d   : > { %p952_p0 = pnand %p951_p13, %p945_p6 }
  0x8f   : > { %955 = shalt.err (!%p952_p0)
}
  0x90   : > { %759 = dma.hbm_to_vmem [thread:$0]  (!%p1645_p8), %s1313_s2, 4096, %s1316_s8, %s1319_s0, %s1071_s29, %s1071_s29, %s1072_s3  }
  0x91   : > { %p1647_p9 = scmp.ne.s32.totalorder %s1636_s30, 0 }
  0x92   : > { %s1351_s24 = sand.u32 (!%p1647_p9), 1, %s1042_s16   ;;  %p1648_p11 = scmp.ne.s32.totalorder (!%p1647_p9), %s1632_s27, 0 }
  0x93   : > { %252 = sbr.rel (%p1647_p9) target bundleno = 219 (0xdb), region = 36  ;;  %s1354_s14 = sshll.u32 (!%p1647_p9), %s1351_s24, 8 }
  0x94   : > { %s255_s7 = scalar_lea.sflag (!%p1647_p9), [#allocation3], %s1351_s24  ;;  %s1358_s20 = scalar_lea.vmem (!%p1647_p9), [#allocation2], %s1354_s14 }
  0x9a   : > { %1017 = dma.done.wait (%p1648_p11), %s255_s7, 4096  }
  0x9b   : > { %1019 = vsyncadd (%p1648_p11), %s255_s7, 4294963200  ;;  %s263_s0 = sand.u32 1, %s1143_s23   ;;  %s1366_s29 = scalar_lea.vmem [#allocation5], %s1354_s14 }
  0x9c   : > { %s264_s30 = scalar_lea.sflag [#allocation6], %s263_s0 }
  0x9d   : > { %1021 = dma.done.wait (%p1648_p11), %s264_s30, 4096  }
  0x9e   : > { %1023 = vsyncadd (%p1648_p11), %s264_s30, 4294963200  ;;  %p1649_p8 = scmp.eq.s32.totalorder %s1143_s23, 0 }
  0xa0   : > { %1025 = dma.done.wait (%p1649_p8), [#allocation6], 16   ;;  %p1650_p5 = pmov %p1649_p8 }
  0xa2   : > { %1027 = vsyncadd (%p1650_p5), [#allocation6], 4294967280  ;;  %p1651_p3 = pmov %p1650_p5 }
  0xa4   : > { %1029 = dma.done.wait (%p1651_p3), [#allocation9], 16   ;;  %p1652_p2 = pmov %p1651_p3 }
  0xa5   : > { %v1380_v0 = vld [vmem:[#allocation7] ss:$0 sm:$0xff]  ;;  %v1382_v1 = vld [vmem:[#allocation8] ss:$0 sm:$0xff]  ;;  %v311_v4 = vld [vmem:[%s1358_s20 + $0x8] sm:$0xff]  ;;  %s1421_s23 = scalar_lea.vmem [#allocation10], %s1354_s14 }
  0xa6   : > { %1031 = vsyncadd (%p1652_p2), [#allocation9], 4294967280  ;;  %v310_v2 = vld [vmem:[%s1358_s20] sm:$0xff]  ;;  %v349_v6 = vmul.f32 %v1380_v0, %v311_v4  ;;  %v312_v7 = vld [vmem:[%s1358_s20 + $0x10] sm:$0xff]  ;;  %s731_s27 = sshll.u32 %s1050_s18, 5  ;;  %s725_s3 = sshll.u32 %s1054_s19, 7 }
  0xa7   : > { %v348_v3 = vmul.f32 %v1380_v0, %v310_v2  ;;  %v418_v5 = vld [vmem:[%s1366_s29] sm:$0xff]  ;;  %v313_v8 = vld [vmem:[%s1358_s20 + $0x18] sm:$0xff]  ;;  %v419_v10 = vld [vmem:[%s1366_s29 + $0x8] sm:$0xff]  ;;  %v350_v11 = vmul.f32 %v1380_v0, %v312_v7  ;;  %s1530_s18 = sadd.s32 %s731_s27, %s725_s3  ;;  %s563_s2 = sshll.u32 %s1421_s23, 4  ;;  %s1554_s2 = int_to_ptr.vmem [resolvable:$true] %s563_s2 }
  0xa8   : > { %v420_v12 = vld [vmem:[%s1366_s29 + $0x10] sm:$0xff]  ;;  %v351_v13 = vmul.f32 %v1380_v0, %v313_v8  ;;  %v314_v14 = vld [vmem:[%s1358_s20 + $0x20] sm:$0xff]  ;;  %v387_v15 = vadd.f32 %v1382_v1, %v349_v6  ;;  %v421_v16 = vld [vmem:[%s1366_s29 + $0x18] sm:$0xff]  ;;  %s726_s19 = sshll.u32 %s1530_s18, 7  ;;  %s547_s9 = scalar_lea.sflag [#allocation4], %s1351_s24 }
  0xa9   : > { %v386_v9 = vadd.f32 %v1382_v1, %v348_v3  ;;  %v352_v17 = vmul.f32 %v1380_v0, %v314_v14  ;;  %v315_v18 = vld [vmem:[%s1358_s20 + $0x28] sm:$0xff]  ;;  %v316_v19 = vld [vmem:[%s1358_s20 + $0x30] sm:$0xff]  ;;  %v388_v21 = vadd.f32 %v1382_v1, %v350_v11  ;;  %v422_v23 = vld [vmem:[%s1366_s29 + $0x20] sm:$0xff]  ;;  %s1552_s25 = scalar_lea.hbm %s1616_s4, %s726_s19  ;;  %s956_s13 = scalar_lea.vmem %s1554_s2, 4096 }
  0xaa   : > { %v389_v22 = vadd.f32 %v1382_v1, %v351_v13  ;;  %v353_v24 = vmul.f32 %v1380_v0, %v315_v18  ;;  %v317_v25 = vld [vmem:[%s1358_s20 + $0x38] sm:$0xff]  ;;  %v451_v26 = vadd.f32 %v419_v10, %v387_v15  ;;  %v423_v28 = vld [vmem:[%s1366_s29 + $0x28] sm:$0xff]  ;;  %v354_v29 = vmul.f32 %v1380_v0, %v316_v19  ;;  %v318_v31 = vld [vmem:[%s1358_s20 + $0x40] sm:$0xff]  ;;  %p957_p7 = scmp.ne.s32.totalorder %s1554_s2, %s956_s13  ;;  %p1653_p12 = scmp.ne.s32.totalorder %s1633_s28, 0 }
  0xab   : > { %v450_v20 = vadd.f32 %v418_v5, %v386_v9  ;;  %v390_v27 = vadd.f32 %v1382_v1, %v352_v17  ;;  %v355_v30 = vmul.f32 %v1380_v0, %v317_v25  ;;  %v452_v33 = vadd.f32 %v420_v12, %v388_v21  ;;  %v424_v36 = vld [vmem:[%s1366_s29 + $0x30] sm:$0xff]  ;;  %v425_v37 = vld [vmem:[%s1366_s29 + $0x38] sm:$0xff]  ;;  %v319_v38 = vld [vmem:[%s1358_s20 + $0x48] sm:$0xff]  ;;  %s1074_s5 = smov [#allocation10]  }
  0xac   : > { %v453_v34 = vadd.f32 %v421_v16, %v389_v22  ;;  %v391_v35 = vadd.f32 %v1382_v1, %v353_v24  ;;  %v483_v39 = vmax.f32 %v451_v26, 0.0  ;;  %v392_v41 = vadd.f32 %v1382_v1, %v354_v29  ;;  %v320_v43 = vld [vmem:[%s1358_s20 + $0x50] sm:$0xff]  ;;  %v321_v44 = vld [vmem:[%s1358_s20 + $0x58] sm:$0xff]  ;;  %v322_v49 = vld [vmem:[%s1358_s20 + $0x60] sm:$0xff]  ;;  %p958_p4 = pnand %p957_p7, %p1653_p12  ;;  %s960_s10 = sshll.u32 %s1074_s5, 4  ;;  %s961_s10 = int_to_ptr.vmem [resolvable:$false] %s960_s10 }
  0xad   : > { %v482_v32 = vmax.f32 %v450_v20, 0.0  ;;  %v454_v40 = vadd.f32 %v422_v23, %v390_v27  ;;  %v393_v42 = vadd.f32 %v1382_v1, %v355_v30  ;;  %v484_v45 = vmax.f32 %v452_v33, 0.0  ;;  %v426_v53 = vld [vmem:[%s1366_s29 + $0x40] sm:$0xff]  ;;  %v323_v55 = vld [vmem:[%s1358_s20 + $0x68] sm:$0xff]  ;;  %v324_v61 = vld [vmem:[%s1358_s20 + $0x70] sm:$0xff]  ;;  %s962_s12 = scalar_lea.vmem %s961_s10, 8192  ;;  %p963_p1 = scmp.lt.s32.totalorder %s1554_s2, %s961_s10 }
  0xae   : > { %v485_v46 = vmax.f32 %v453_v34, 0.0  ;;  %v455_v47 = vadd.f32 %v423_v28, %v391_v35  ;;  %v356_v48 = vmul.f32 %v1380_v0, %v318_v31  ;;  %515 = vst [vmem:[%s1421_s23 + $0x8] sm:$0xff] %v483_v39  ;;  %v456_v51 = vadd.f32 %v424_v36, %v392_v41  ;;  %v427_v58 = vld [vmem:[%s1366_s29 + $0x48] sm:$0xff]  ;;  %v325_v62 = vld [vmem:[%s1358_s20 + $0x78] sm:$0xff]  ;;  %v428_v4 = vld [vmem:[%s1366_s29 + $0x50] sm:$0xff]  ;;  %p959_p6 = pneg %p958_p4  ;;  %p964_p10 = scmp.lt.s32.totalorder %s962_s12, %s956_s13 }
  0xaf   : > { %514 = vst [vmem:[%s1421_s23] sm:$0xff] %v482_v32  ;;  %v486_v50 = vmax.f32 %v454_v40, 0.0  ;;  %v457_v52 = vadd.f32 %v425_v37, %v393_v42  ;;  %v357_v54 = vmul.f32 %v1380_v0, %v319_v38  ;;  %516 = vst [vmem:[%s1421_s23 + $0x10] sm:$0xff] %v484_v45  ;;  %v358_v59 = vmul.f32 %v1380_v0, %v320_v43  ;;  %v429_v5 = vld [vmem:[%s1366_s29 + $0x58] sm:$0xff]  ;;  %v430_v10 = vld [vmem:[%s1366_s29 + $0x60] sm:$0xff] }
  0xb0   : > { %517 = vst [vmem:[%s1421_s23 + $0x18] sm:$0xff] %v485_v46  ;;  %v487_v56 = vmax.f32 %v455_v47, 0.0  ;;  %v394_v57 = vadd.f32 %v1382_v1, %v356_v48  ;;  %v359_v60 = vmul.f32 %v1380_v0, %v321_v44  ;;  %v488_v63 = vmax.f32 %v456_v51, 0.0  ;;  %v431_v14 = vld [vmem:[%s1366_s29 + $0x68] sm:$0xff]  ;;  %v326_v17 = vld [vmem:[%s1358_s20 + $0x80] sm:$0xff]  ;;  %v432_v22 = vld [vmem:[%s1366_s29 + $0x70] sm:$0xff]  ;;  %p965_p13 = por %p964_p10, %p963_p1 }
  0xb1   : > { %518 = vst [vmem:[%s1421_s23 + $0x20] sm:$0xff] %v486_v50  ;;  %v489_v2 = vmax.f32 %v457_v52, 0.0  ;;  %v395_v3 = vadd.f32 %v1382_v1, %v357_v54  ;;  %v360_v6 = vmul.f32 %v1380_v0, %v322_v49  ;;  %v396_v8 = vadd.f32 %v1382_v1, %v358_v59  ;;  %v433_v23 = vld [vmem:[%s1366_s29 + $0x78] sm:$0xff]  ;;  %v327_v24 = vld [vmem:[%s1358_s20 + $0x88] sm:$0xff]  ;;  %v328_v29 = vld [vmem:[%s1358_s20 + $0x90] sm:$0xff] }
  0xb2   : > { %519 = vst [vmem:[%s1421_s23 + $0x28] sm:$0xff] %v487_v56  ;;  %v458_v7 = vadd.f32 %v426_v53, %v394_v57  ;;  %v397_v9 = vadd.f32 %v1382_v1, %v359_v60  ;;  %v361_v11 = vmul.f32 %v1380_v0, %v323_v55  ;;  %520 = vst [vmem:[%s1421_s23 + $0x30] sm:$0xff] %v488_v63  ;;  %v329_v30 = vld [vmem:[%s1358_s20 + $0x98] sm:$0xff]  ;;  %v330_v35 = vld [vmem:[%s1358_s20 + $0xa0] sm:$0xff]  ;;  %p966_p0 = pnand %p965_p13, %p959_p6 }
  0xb3   : > { %521 = vst [vmem:[%s1421_s23 + $0x38] sm:$0xff] %v489_v2  ;;  %v459_v12 = vadd.f32 %v427_v58, %v395_v3  ;;  %v398_v13 = vadd.f32 %v1382_v1, %v360_v6  ;;  %v362_v15 = vmul.f32 %v1380_v0, %v324_v61  ;;  %v363_v16 = vmul.f32 %v1380_v0, %v325_v62  ;;  %v434_v39 = vld [vmem:[%s1366_s29 + $0x80] sm:$0xff]  ;;  %v331_v41 = vld [vmem:[%s1358_s20 + $0xa8] sm:$0xff]  ;;  %v332_v47 = vld [vmem:[%s1358_s20 + $0xb0] sm:$0xff] }
  0xb4   : > { %v490_v18 = vmax.f32 %v458_v7, 0.0  ;;  %v460_v19 = vadd.f32 %v428_v4, %v396_v8  ;;  %v461_v20 = vadd.f32 %v429_v5, %v397_v9  ;;  %v399_v21 = vadd.f32 %v1382_v1, %v361_v11  ;;  %v435_v44 = vld [vmem:[%s1366_s29 + $0x88] sm:$0xff]  ;;  %v333_v48 = vld [vmem:[%s1358_s20 + $0xb8] sm:$0xff]  ;;  %v436_v52 = vld [vmem:[%s1366_s29 + $0x90] sm:$0xff] }
  0xb5   : > { %v491_v25 = vmax.f32 %v459_v12, 0.0  ;;  %v462_v26 = vadd.f32 %v430_v10, %v398_v13  ;;  %v400_v27 = vadd.f32 %v1382_v1, %v362_v15  ;;  %v401_v28 = vadd.f32 %v1382_v1, %v363_v16  ;;  %v437_v53 = vld [vmem:[%s1366_s29 + $0x98] sm:$0xff]  ;;  %v438_v58 = vld [vmem:[%s1366_s29 + $0xa0] sm:$0xff]  ;;  %v439_v62 = vld [vmem:[%s1366_s29 + $0xa8] sm:$0xff] }
  0xb6   : > { %522 = vst [vmem:[%s1421_s23 + $0x40] sm:$0xff] %v490_v18  ;;  %v492_v31 = vmax.f32 %v460_v19, 0.0  ;;  %v493_v32 = vmax.f32 %v461_v20, 0.0  ;;  %v463_v33 = vadd.f32 %v431_v14, %v399_v21  ;;  %v364_v34 = vmul.f32 %v1380_v0, %v326_v17  ;;  %v334_v3 = vld [vmem:[%s1358_s20 + $0xc0] sm:$0xff]  ;;  %v440_v8 = vld [vmem:[%s1366_s29 + $0xb0] sm:$0xff]  ;;  %v441_v9 = vld [vmem:[%s1366_s29 + $0xb8] sm:$0xff] }
  0xb7   : > { %523 = vst [vmem:[%s1421_s23 + $0x48] sm:$0xff] %v491_v25  ;;  %v494_v36 = vmax.f32 %v462_v26, 0.0  ;;  %v464_v37 = vadd.f32 %v432_v22, %v400_v27  ;;  %v465_v38 = vadd.f32 %v433_v23, %v401_v28  ;;  %v365_v40 = vmul.f32 %v1380_v0, %v327_v24  ;;  %v335_v10 = vld [vmem:[%s1358_s20 + $0xc8] sm:$0xff]  ;;  %v336_v15 = vld [vmem:[%s1358_s20 + $0xd0] sm:$0xff]  ;;  %v337_v16 = vld [vmem:[%s1358_s20 + $0xd8] sm:$0xff] }
  0xb8   : > { %524 = vst [vmem:[%s1421_s23 + $0x50] sm:$0xff] %v492_v31  ;;  %525 = vst [vmem:[%s1421_s23 + $0x58] sm:$0xff] %v493_v32  ;;  %v495_v42 = vmax.f32 %v463_v33, 0.0  ;;  %v402_v43 = vadd.f32 %v1382_v1, %v364_v34  ;;  %v366_v45 = vmul.f32 %v1380_v0, %v328_v29  ;;  %v367_v46 = vmul.f32 %v1380_v0, %v329_v30  ;;  %v338_v21 = vld [vmem:[%s1358_s20 + $0xe0] sm:$0xff]  ;;  %v339_v27 = vld [vmem:[%s1358_s20 + $0xe8] sm:$0xff] }
  0xb9   : > { %526 = vst [vmem:[%s1421_s23 + $0x60] sm:$0xff] %v494_v36  ;;  %v496_v49 = vmax.f32 %v464_v37, 0.0  ;;  %v497_v50 = vmax.f32 %v465_v38, 0.0  ;;  %v403_v51 = vadd.f32 %v1382_v1, %v365_v40  ;;  %v368_v54 = vmul.f32 %v1380_v0, %v330_v35  ;;  %v442_v25 = vld [vmem:[%s1366_s29 + $0xc0] sm:$0xff]  ;;  %v443_v30 = vld [vmem:[%s1366_s29 + $0xc8] sm:$0xff]  ;;  %v340_v33 = vld [vmem:[%s1358_s20 + $0xf0] sm:$0xff] }
  0xba   : > { %527 = vst [vmem:[%s1421_s23 + $0x68] sm:$0xff] %v495_v42  ;;  %v466_v55 = vadd.f32 %v434_v39, %v402_v43  ;;  %v404_v56 = vadd.f32 %v1382_v1, %v366_v45  ;;  %v405_v57 = vadd.f32 %v1382_v1, %v367_v46  ;;  %v369_v59 = vmul.f32 %v1380_v0, %v331_v41  ;;  %v341_v34 = vld [vmem:[%s1358_s20 + $0xf8] sm:$0xff]  ;;  %v444_v38 = vld [vmem:[%s1366_s29 + $0xd0] sm:$0xff] }
  0xbb   : > { %528 = vst [vmem:[%s1421_s23 + $0x70] sm:$0xff] %v496_v49  ;;  %529 = vst [vmem:[%s1421_s23 + $0x78] sm:$0xff] %v497_v50  ;;  %v467_v60 = vadd.f32 %v435_v44, %v403_v51  ;;  %v406_v61 = vadd.f32 %v1382_v1, %v368_v54  ;;  %v370_v63 = vmul.f32 %v1380_v0, %v332_v47  ;;  %v445_v39 = vld [vmem:[%s1366_s29 + $0xd8] sm:$0xff]  ;;  %v446_v44 = vld [vmem:[%s1366_s29 + $0xe0] sm:$0xff] }
  0xbc   : > { %v371_v2 = vmul.f32 %v1380_v0, %v333_v48  ;;  %v498_v4 = vmax.f32 %v466_v55, 0.0  ;;  %v468_v5 = vadd.f32 %v436_v52, %v404_v56  ;;  %v469_v6 = vadd.f32 %v437_v53, %v405_v57  ;;  %v447_v48 = vld [vmem:[%s1366_s29 + $0xe8] sm:$0xff]  ;;  %v448_v55 = vld [vmem:[%s1366_s29 + $0xf0] sm:$0xff]  ;;  %v449_v56 = vld [vmem:[%s1366_s29 + $0xf8] sm:$0xff] }
  0xbd   : > { %v407_v7 = vadd.f32 %v1382_v1, %v369_v59  ;;  %v499_v11 = vmax.f32 %v467_v60, 0.0  ;;  %v470_v12 = vadd.f32 %v438_v58, %v406_v61  ;;  %v408_v13 = vadd.f32 %v1382_v1, %v370_v63 }
  0xbe   : > { %v409_v14 = vadd.f32 %v1382_v1, %v371_v2  ;;  %530 = vst [vmem:[%s1421_s23 + $0x80] sm:$0xff] %v498_v4  ;;  %v500_v17 = vmax.f32 %v468_v5, 0.0  ;;  %v501_v18 = vmax.f32 %v469_v6, 0.0  ;;  %v372_v20 = vmul.f32 %v1380_v0, %v334_v3 }
  0xbf   : > { %v471_v19 = vadd.f32 %v439_v62, %v407_v7  ;;  %531 = vst [vmem:[%s1421_s23 + $0x88] sm:$0xff] %v499_v11  ;;  %v502_v22 = vmax.f32 %v470_v12, 0.0  ;;  %v472_v23 = vadd.f32 %v440_v8, %v408_v13  ;;  %v373_v26 = vmul.f32 %v1380_v0, %v335_v10 }
  0xc0   : > { %v473_v24 = vadd.f32 %v441_v9, %v409_v14  ;;  %532 = vst [vmem:[%s1421_s23 + $0x90] sm:$0xff] %v500_v17  ;;  %533 = vst [vmem:[%s1421_s23 + $0x98] sm:$0xff] %v501_v18  ;;  %v410_v29 = vadd.f32 %v1382_v1, %v372_v20  ;;  %v374_v31 = vmul.f32 %v1380_v0, %v336_v15 }
  0xc1   : > { %v503_v28 = vmax.f32 %v471_v19, 0.0  ;;  %v375_v32 = vmul.f32 %v1380_v0, %v337_v16  ;;  %534 = vst [vmem:[%s1421_s23 + $0xa0] sm:$0xff] %v502_v22  ;;  %v504_v35 = vmax.f32 %v472_v23, 0.0  ;;  %v411_v37 = vadd.f32 %v1382_v1, %v373_v26 }
  0xc2   : > { %v505_v36 = vmax.f32 %v473_v24, 0.0  ;;  %v376_v40 = vmul.f32 %v1380_v0, %v338_v21  ;;  %v474_v41 = vadd.f32 %v442_v25, %v410_v29  ;;  %v412_v42 = vadd.f32 %v1382_v1, %v374_v31 }
  0xc3   : > { %535 = vst [vmem:[%s1421_s23 + $0xa8] sm:$0xff] %v503_v28  ;;  %v413_v43 = vadd.f32 %v1382_v1, %v375_v32  ;;  %v377_v45 = vmul.f32 %v1380_v0, %v339_v27  ;;  %536 = vst [vmem:[%s1421_s23 + $0xb0] sm:$0xff] %v504_v35  ;;  %v475_v46 = vadd.f32 %v443_v30, %v411_v37 }
  0xc4   : > { %537 = vst [vmem:[%s1421_s23 + $0xb8] sm:$0xff] %v505_v36  ;;  %v414_v47 = vadd.f32 %v1382_v1, %v376_v40  ;;  %v378_v49 = vmul.f32 %v1380_v0, %v340_v33  ;;  %v379_v50 = vmul.f32 %v1380_v0, %v341_v34  ;;  %v506_v51 = vmax.f32 %v474_v41, 0.0 }
  0xc5   : > { %v476_v52 = vadd.f32 %v444_v38, %v412_v42  ;;  %v477_v53 = vadd.f32 %v445_v39, %v413_v43  ;;  %v415_v54 = vadd.f32 %v1382_v1, %v377_v45  ;;  %v507_v57 = vmax.f32 %v475_v46, 0.0 }
  0xc6   : > { %v478_v58 = vadd.f32 %v446_v44, %v414_v47  ;;  %v416_v59 = vadd.f32 %v1382_v1, %v378_v49  ;;  %v417_v60 = vadd.f32 %v1382_v1, %v379_v50  ;;  %538 = vst [vmem:[%s1421_s23 + $0xc0] sm:$0xff] %v506_v51 }
  0xc7   : > { %v508_v0 = vmax.f32 %v476_v52, 0.0  ;;  %v509_v61 = vmax.f32 %v477_v53, 0.0  ;;  %v479_v62 = vadd.f32 %v447_v48, %v415_v54  ;;  %539 = vst [vmem:[%s1421_s23 + $0xc8] sm:$0xff] %v507_v57 }
  0xc8   : > { %v510_v63 = vmax.f32 %v478_v58, 0.0  ;;  %v480_v2 = vadd.f32 %v448_v55, %v416_v59  ;;  %v481_v3 = vadd.f32 %v449_v56, %v417_v60 }
  0xc9   : > { %540 = vst [vmem:[%s1421_s23 + $0xd0] sm:$0xff] %v508_v0  ;;  %541 = vst [vmem:[%s1421_s23 + $0xd8] sm:$0xff] %v509_v61  ;;  %v511_v4 = vmax.f32 %v479_v62, 0.0 }
  0xca   : > { %542 = vst [vmem:[%s1421_s23 + $0xe0] sm:$0xff] %v510_v63  ;;  %v512_v1 = vmax.f32 %v480_v2, 0.0  ;;  %v513_v5 = vmax.f32 %v481_v3, 0.0 }
  0xcb   : > { %543 = vst [vmem:[%s1421_s23 + $0xe8] sm:$0xff] %v511_v4 }
  0xcc   : > { %544 = vst [vmem:[%s1421_s23 + $0xf0] sm:$0xff] %v512_v1  ;;  %545 = vst [vmem:[%s1421_s23 + $0xf8] sm:$0xff] %v513_v5 }
  0xcd   : > { %969 = shalt.err (!%p966_p0)
}
  0xce   : > { %s970_s26 = scalar_lea.hbm %s1552_s25, 4096  ;;  %s974_s20 = scalar_lea.hbm %s1616_s4, 32768 }
  0xcf   : > { %p971_p9 = scmp.ne.s32.totalorder %s1552_s25, %s970_s26  ;;  %p975_p5 = scmp.lt.u32.totalorder %s1552_s25, %s1616_s4 }
  0xd0   : > { %p976_p3 = scmp.lt.u32.totalorder %s974_s20, %s970_s26  ;;  %p978_p7 = scmp.lt.u32.totalorder %s970_s26, %s1552_s25 }
  0xd1   : > { %p972_p11 = pnand %p971_p9, %p1653_p12 }
  0xd2   : > { %p977_p2 = por %p976_p3, %p975_p5 }
  0xd3   : > { %p973_p8 = pneg %p972_p11 }
  0xd4   : > { %p979_p4 = por %p978_p7, %p977_p2 }
  0xd6   : > { %p980_p6 = pnand %p979_p4, %p973_p8 }
  0xd8   : > { %983 = shalt.err (!%p980_p6)
}
  0xd9   : > { %s1075_s29 = smov 128   ;;  %s1076_s23 = smov 8  }
  0xda   : > { %744 = dma.vmem_to_hbm [thread:$0]  (%p1653_p12), %s1554_s2, 4096, %s1552_s25, %s547_s9, %s1075_s29, %s1075_s29, %s1076_s23  }
  0xdb PF: > { %s1654_s27 = sld [smem:[#allocation17_spill]]  ;;  %p769_p1 = scmp.ge.s32.totalorder %s1066_s22, 2 }
  0xdc   : > { %s578_s3 = sand.u32 1, %s1038_s15  }
  0xdd   : > { %s579_s18 = scalar_lea.sflag [#allocation4], %s578_s3 }
  0xe1   : > { %p1655_p10 = scmp.ne.s32.totalorder %s1654_s27, 0 }
  0xe3   : > { %p761_p13 = pnand %p769_p1, %p1655_p10 }
  0xe5   : > { %1033 = dma.done.wait (!%p761_p13), %s579_s18, 4096  }
  0xe6   : > { %1035 = vsyncadd (!%p761_p13), %s579_s18, 4294963200  ;;  %s24_s22 = sadd.s32 1, %s1066_s22   ;;  %s1656_s18 = sld [smem:[#allocation16_spill]] }
  0xe7   : > { %p21_p0 = scmp.ge.s32.totalorder %s24_s22, 10   ;;  %s1657_s20 = sld [smem:[#allocation18_spill]] }
  0xe8   : > { %s1658_s28 = sld [smem:[#allocation19_spill]]  ;;  %s1659_s15 = smov %s1042_s16 }
  0xe9   : > { %s1660_s16 = smov %s1046_s17  ;;  %s1661_s17 = smov %s1275_s11 }
  0xea   : > { %s1662_s19 = smov %s1062_s21  ;;  %23 = sbr.rel (!%p21_p0) target bundleno = 14 (0xe), region = 102 }
  0xee   : > { %s1663_s21 = smov %s1658_s28 }
  0xf1   :  { %584 = vsyncpa [#allocation3], 1 }
  0xf2   :  { %586 = vsyncpa [#allocation3 + $0x1], 1 }
  0xf3   :  { %587 = vsyncpa [#allocation6], 1 }
  0xf4   :  { %589 = vsyncpa [#allocation6 + $0x1], 1 }
  0xf5   :  { %590 = vsyncpa [#allocation9], 1 }
  0xf6   :  { %591 = vsyncpa [#allocation4], 1 }
  0xf7   :  { %593 = vsyncpa [#allocation4 + $0x1], 1 }

</bundles_post_ra>
